<compile_context>
chip_gen: v7x
topology: tpu7x:2x2x1
jax: 0.10.0
libtpu: 0.0.40
codegen_flags: <defaults>
</compile_context>

<pallas_src>
import functools
import numpy as np
import jax
import jax.numpy as jnp
from jax.experimental import pallas as pl
from jax.experimental.pallas import tpu as pltpu

VPAD = 16   # joints padded 14 -> 16 for sublane alignment


# ---------------------------------------------------------------------------
# Pallas kernels
# ---------------------------------------------------------------------------

def _gcn_matmul_kernel(xa_ref, w_ref, o_ref):
    # Single-block matmul: pre-aggregated input (M, K*cin+Vp) @ folded weight.
    # Bias (per-joint, from conv bias + BN1) rides on the one-hot columns, so
    # the epilogue is just ReLU.
    y = jnp.dot(xa_ref[...], w_ref[...], preferred_element_type=jnp.float32)
    o_ref[...] = jnp.maximum(y, 0.0).astype(o_ref.dtype)


def pallas_gcn_matmul(xa, w, out_dtype=jnp.bfloat16):
    M, Kd = xa.shape
    Co = w.shape[1]
    return pl.pallas_call(
        _gcn_matmul_kernel,
        out_shape=jax.ShapeDtypeStruct((M, Co), out_dtype),
    )(xa, w)


def _tconv_kernel(*refs, V, S, Tout, res_mode):
    # Temporal conv (9,1), pad (4,0), stride (S,1) with bias + folded BN2,
    # optional fused residual (identity add or 1x1-conv tap) and final ReLU.
    #   S == 1: z_ref block (1, Tp*V, C)       -> taps are contiguous row slices
    #   S == 2: z_ref block (1, Tq, S*V, C)    -> taps are aligned (Tout, V, C)
    #                                             windows, reshaped to 2-D.
    if res_mode == 'conv':
        z_ref, w_ref, b_ref, xr_ref, rw_ref, rb_ref, o_ref = refs
    elif res_mode == 'iden':
        z_ref, w_ref, b_ref, xr_ref, o_ref = refs
    else:
        z_ref, w_ref, b_ref, o_ref = refs

    ToutV = Tout * V
    Ci = w_ref.shape[1]
    Co = w_ref.shape[2]
    acc = jnp.zeros((ToutV, Co), jnp.float32)
    for tau in range(9):                        # static unroll over temporal taps
        if S == 1:
            xt = z_ref[0, tau * V: tau * V + ToutV, :]
        else:
            q0, r = tau // S, tau % S
            xt = z_ref[0, q0:q0 + Tout, r * V:(r + 1) * V, :].reshape(ToutV, Ci)
        acc = acc + jnp.dot(xt, w_ref[tau], preferred_element_type=jnp.float32)

    y = acc + b_ref[...]
    if res_mode == 'iden':
        y = y + xr_ref[0].astype(jnp.float32)
    elif res_mode == 'conv':
        y = (y
             + jnp.dot(xr_ref[0], rw_ref[...], preferred_element_type=jnp.float32)
             + rb_ref[...])
    o_ref[0] = jnp.maximum(y, 0.0).astype(o_ref.dtype)


def pallas_temporal_conv(z, w9, b, *, stride, res_iden=None, res_conv=None,
                         out_dtype=jnp.bfloat16):
    """z: (N, T, V, C) channels-last (V already padded to 16).
    Returns (N, Tout, V, Cout).  Fuses bias + BN2 + residual + final ReLU."""
    N, T, V, C = z.shape
    Co = w9.shape[2]
    S = stride
    Tp = T + 8
    assert Tp % S == 0
    Tout = (T - 1) // S + 1
    zp = jnp.pad(z, ((0, 0), (4, 4), (0, 0), (0, 0)))

    if S == 1:
        zz = zp.reshape(N, Tp * V, C)                       # pure reshape
        z_spec = pl.BlockSpec((1, Tp * V, C), lambda n: (n, 0, 0))
    else:
        Tq = Tp // S
        zz = zp.reshape(N, Tq, S * V, C)                    # pure reshape, no copy
        z_spec = pl.BlockSpec((1, Tq, S * V, C), lambda n: (n, 0, 0, 0))

    args = [zz, w9, b]
    in_specs = [z_spec,
                pl.BlockSpec((9, C, Co), lambda n: (0, 0, 0)),
                pl.BlockSpec((1, Co), lambda n: (0, 0))]

    if res_conv is not None:
        xres, rw, rb = res_conv                             # (N, Tout*V, cin), (cin, Co), (1, Co)
        cin = rw.shape[0]
        res_mode = 'conv'
        args += [xres, rw, rb]
        in_specs += [pl.BlockSpec((1, Tout * V, cin), lambda n: (n, 0, 0)),
                     pl.BlockSpec((cin, Co), lambda n: (0, 0)),
                     pl.BlockSpec((1, Co), lambda n: (0, 0))]
    elif res_iden is not None:
        res_mode = 'iden'
        args.append(res_iden)                               # (N, Tout*V, Co)
        in_specs.append(pl.BlockSpec((1, Tout * V, Co), lambda n: (n, 0, 0)))
    else:
        res_mode = 'zero'

    out = pl.pallas_call(
        functools.partial(_tconv_kernel, V=V, S=S, Tout=Tout, res_mode=res_mode),
        out_shape=jax.ShapeDtypeStruct((N, Tout * V, Co), out_dtype),
        grid=(N,),
        in_specs=in_specs,
        out_specs=pl.BlockSpec((1, Tout * V, Co), lambda n: (n, 0, 0)),
        compiler_params=pltpu.CompilerParams(
            dimension_semantics=("parallel",)),
    )(*args)
    return out.reshape(N, Tout, V, Co)


def _pool_fc_kernel(x_ref, w_ref, b_ref, o_ref):
    pooled = jnp.mean(x_ref[...].astype(jnp.float32), axis=1)          # (N, C)
    o_ref[...] = jnp.sum(pooled * w_ref[...], axis=1, keepdims=True) + b_ref[...]


def pallas_pool_fc(x_ntv_c, fc_w, fc_b):
    """Global average pool over (T, V) fused with the final 1x1 conv -> (N,)."""
    N = x_ntv_c.shape[0]
    out = pl.pallas_call(
        _pool_fc_kernel,
        out_shape=jax.ShapeDtypeStruct((N, 1), jnp.float32),
    )(x_ntv_c, fc_w.astype(jnp.float32), fc_b.astype(jnp.float32))
    return out.reshape(N)


# ---------------------------------------------------------------------------
# Graph construction (exact port of the numpy code in the PyTorch module)
# ---------------------------------------------------------------------------

def build_dual_coco_A(max_hop=2, dilation=1):
    num_node = 14
    center = 0
    self_link = [(i, i) for i in range(num_node)]
    neighbor_link = [(4, 5), (0, 2), (0, 3), (0, 4), (0, 5), (0, 6), (0, 8),
                     (2, 4), (2, 6), (3, 5), (3, 8), (4, 6), (5, 8), (6, 7),
                     (8, 9), (1, 2), (1, 3), (1, 10), (1, 12), (2, 10),
                     (3, 12), (10, 11), (12, 13), (7, 9), (11, 13)]
    edge = self_link + neighbor_link

    Aadj = np.zeros((num_node, num_node))
    for i, j in edge:
        Aadj[j, i] = 1
        Aadj[i, j] = 1
    hop_dis = np.zeros((num_node, num_node)) + np.inf
    transfer_mat = [np.linalg.matrix_power(Aadj, d) for d in range(max_hop + 1)]
    arrive_mat = np.stack(transfer_mat) > 0
    for d in range(max_hop, -1, -1):
        hop_dis[arrive_mat[d]] = d

    valid_hop = range(0, max_hop + 1, dilation)
    adjacency = np.zeros((num_node, num_node))
    for hop in valid_hop:
        adjacency[hop_dis == hop] = 1
    Dl = np.sum(adjacency, 0)
    Dn = np.zeros((num_node, num_node))
    for i in range(num_node):
        if Dl[i] > 0:
            Dn[i, i] = Dl[i] ** (-1)
    norm_adj = np.dot(adjacency, Dn)

    A = []
    for hop in valid_hop:
        a_root = np.zeros((num_node, num_node))
        a_close = np.zeros((num_node, num_node))
        a_further = np.zeros((num_node, num_node))
        for i in range(num_node):
            for j in range(num_node):
                if hop_dis[j, i] == hop:
                    if hop_dis[j, center] == hop_dis[i, center]:
                        a_root[j, i] = norm_adj[j, i]
                    elif hop_dis[j, center] > hop_dis[i, center]:
                        a_close[j, i] = norm_adj[j, i]
                    else:
                        a_further[j, i] = norm_adj[j, i]
        if hop == 0:
            A.append(a_root)
        else:
            A.append(a_root + a_close)
            A.append(a_further)
    return np.stack(A).astype(np.float32)


# ---------------------------------------------------------------------------
# Parameters (deterministic synthetic init) and inference-time folding
# ---------------------------------------------------------------------------

BLOCK_CFG = [
    dict(cin=4,   cout=64,  stride=1, residual='zero'),
    dict(cin=64,  cout=128, stride=2, residual='conv'),
    dict(cin=128, cout=256, stride=2, residual='conv'),
    dict(cin=256, cout=256, stride=1, residual='iden'),
]


class KeyGen:
    def __init__(self, key):
        self.key = key

    def __call__(self):
        self.key, sub = jax.random.split(self.key)
        return sub


def bn_scale_shift(p, eps=1e-5):
    scale = p['gamma'] / jnp.sqrt(p['var'] + eps)
    shift = p['beta'] - p['mean'] * scale
    return scale, shift


def make_params(key, K, V, in_channels=4):
    kg = KeyGen(key)

    def nrm(shape, scale=0.05):
        return scale * jax.random.normal(kg(), shape, dtype=jnp.float32)

    def bn(c):
        return dict(
            gamma=1.0 + 0.1 * jax.random.normal(kg(), (c,), dtype=jnp.float32),
            beta=0.1 * jax.random.normal(kg(), (c,), dtype=jnp.float32),
            mean=jnp.zeros((c,), jnp.float32),
            var=jnp.ones((c,), jnp.float32))

    params = dict(data_bn=bn(in_channels * V),
                  blocks=[],
                  fcn_w=nrm((1, 256)),       # Conv2d(256, 1, 1) weight
                  fcn_b=nrm((1, 1)))
    for cfg in BLOCK_CFG:
        cin, cout = cfg['cin'], cfg['cout']
        blk = dict(
            # gcn 1x1 conv: torch weight (K*cout, cin, 1, 1) stored as (K, cout, cin)
            gcn_w=nrm((K, cout, cin)),
            gcn_b=nrm((K, cout)),
            tcn_bn1=bn(cout),
            # temporal conv (9,1): torch weight (cout, cout, 9, 1) stored as (9, cin, cout)
            tcn_w=nrm((9, cout, cout)),
            tcn_b=nrm((cout,)),
            tcn_bn2=bn(cout),
            edge_importance=jnp.ones((K, V, V), jnp.float32))
        if cfg['residual'] == 'conv':
            blk['res_w'] = nrm((cin, cout))      # 1x1 conv weight as (cin, cout)
            blk['res_b'] = nrm((cout,))
            blk['res_bn'] = bn(cout)
        params['blocks'].append(blk)
    return params


def fold_params(params, A):
    """Fold edge importance and all inference-mode BatchNorms into the conv
    weights; build the factored (pre-aggregation) gcn weight with the per-joint
    bias appended as one-hot rows; pre-cast matmul operands to bf16."""
    K, V, _ = A.shape
    s, t = bn_scale_shift(params['data_bn'])
    fp = dict(data_bn=(s.astype(jnp.float32), t.astype(jnp.float32)),
              fcn_w=params['fcn_w'].astype(jnp.float32),
              fcn_b=params['fcn_b'].astype(jnp.float32),
              blocks=[])
    for p, cfg in zip(params['blocks'], BLOCK_CFG):
        cin, cout = cfg['cin'], cfg['cout']
        A_eff = A * p['edge_importance']                          # (K, V, V)
        A_pad = jnp.pad(A_eff, ((0, 0), (0, VPAD - V), (0, VPAD - V)))

        # gcn conv + BN1 (scale): weight rows ordered (k, ci), columns c.
        s1, t1 = bn_scale_shift(p['tcn_bn1'])
        W = jnp.transpose(p['gcn_w'], (0, 2, 1)) * s1[None, None, :]   # (K, cin, cout)
        W = W.reshape(K * cin, cout)
        # Per-joint bias:  sum_k (sum_v A_eff[k,v,w]) * b[k,c] * s1[c] + t1[c]
        colsum = A_eff.sum(axis=1)                                # (K, V)
        btab = jnp.einsum('kw,kc->wc', colsum, p['gcn_b']) * s1[None, :] + t1[None, :]
        btab = jnp.pad(btab, ((0, VPAD - V), (0, 0)))             # pad joints -> 0
        W_aug = jnp.concatenate([W, btab], axis=0)                # (K*cin + 16, cout)

        # temporal conv with BN2 folded
        s2, t2 = bn_scale_shift(p['tcn_bn2'])
        w9 = p['tcn_w'] * s2[None, None, :]
        b9 = p['tcn_b'] * s2 + t2

        blk = dict(A_pad=A_pad.astype(jnp.float32),
                   W_aug=W_aug.astype(jnp.bfloat16),
                   tcn_w9=w9.astype(jnp.bfloat16),
                   tcn_b=b9.reshape(1, cout).astype(jnp.float32))
        if cfg['residual'] == 'conv':
            sr, tr = bn_scale_shift(p['res_bn'])
            blk['res_w'] = (p['res_w'] * sr[None, :]).astype(jnp.bfloat16)
            blk['res_b'] = (p['res_b'] * sr + tr).reshape(1, cout).astype(jnp.float32)
        fp['blocks'].append(blk)
    return fp


# ---------------------------------------------------------------------------
# Forward pass
# ---------------------------------------------------------------------------

def gcn_preagg(x, A_pad):
    """Graph pre-aggregation (in XLA, tiny): xa[n,t,w,(k,ci)] = sum_v A[k,v,w] x[n,t,v,ci]
    plus Vp one-hot columns that carry the per-joint gcn bias through the matmul."""
    N, T, Vp, cin = x.shape
    xa = jnp.einsum('kvw,ntvc->ntwkc', A_pad, x.astype(jnp.float32))
    xa = xa.reshape(N * T * Vp, -1)
    onehot = jnp.tile(jnp.eye(Vp, dtype=jnp.float32), (N * T, 1))
    return jnp.concatenate([xa, onehot], axis=1).astype(jnp.bfloat16)


def st_gcn_forward(x_nctv, fp):
    """x_nctv: (N, C, T, V) float32 -> (N,) float32 (inference forward)."""
    N, C, T, V = x_nctv.shape

    # data_bn: reproduces the reference's raw x.view(N, V*C, T) -> BatchNorm1d
    # -> x.view(N, C, T, V).  Done in plain jnp (XLA fuses it); no Pallas launch.
    s, t = fp['data_bn']
    xb = x_nctv.reshape(N, V * C, T)
    xb = xb * s[None, :, None] + t[None, :, None]
    x = xb.reshape(N, C, T, V).transpose(0, 2, 3, 1)             # (N, T, V, C)
    x = jnp.pad(x, ((0, 0), (0, 0), (0, VPAD - V), (0, 0)))      # pad joints 14->16

    for blk, cfg in zip(fp['blocks'], BLOCK_CFG):
        cin, cout, S = cfg['cin'], cfg['cout'], cfg['stride']
        Nb, Tb = x.shape[0], x.shape[1]
        Tout = (Tb - 1) // S + 1

        # --- gcn: pre-aggregate (XLA) + fused matmul/bias/BN1/ReLU (Pallas) ---
        xa = gcn_preagg(x, blk['A_pad'])                         # (Nb*Tb*16, K*cin+16)
        z = pallas_gcn_matmul(xa, blk['W_aug'])                  # bf16
        z = z.reshape(Nb, Tb, VPAD, cout)

        # --- temporal conv (9,1) + BN2 + residual + ReLU (one kernel) ---
        if cfg['residual'] == 'conv':
            xres = x[:, ::S].reshape(Nb, Tout * VPAD, cin).astype(jnp.bfloat16)
            x = pallas_temporal_conv(z, blk['tcn_w9'], blk['tcn_b'], stride=S,
                                     res_conv=(xres, blk['res_w'], blk['res_b']))
        elif cfg['residual'] == 'iden':
            xres = x.reshape(Nb, Tb * VPAD, cout).astype(jnp.bfloat16)
            x = pallas_temporal_conv(z, blk['tcn_w9'], blk['tcn_b'], stride=S,
                                     res_iden=xres)
        else:
            x = pallas_temporal_conv(z, blk['tcn_w9'], blk['tcn_b'], stride=S)

    # global average pool over (T, real V) + fcn (1x1 conv 256->1) + view(N)
    Nb, Tb, Vb, Cb = x.shape
    xr = x[:, :, :V, :].reshape(Nb, Tb * V, Cb)                  # drop pad joints
    return pallas_pool_fc(xr, fp['fcn_w'], fp['fcn_b'])


# ---------------------------------------------------------------------------

if __name__ == "__main__":
    key = jax.random.PRNGKey(0)
    A = jnp.asarray(build_dual_coco_A(max_hop=2, dilation=1))   # (5, 14, 14)
    K, V = A.shape[0], A.shape[1]

    kp, kx = jax.random.split(key)
    params = make_params(kp, K, V, in_channels=4)
    fparams = fold_params(params, A)           # one-time weight folding

    N, C, T = 2, 4, 16
    x = jax.random.normal(kx, (N, C, T, V), dtype=jnp.float32)

    fwd = jax.jit(st_gcn_forward)
    out = jax.block_until_ready(fwd(x, fparams))
    assert out.shape == (N,)
    assert bool(jnp.all(jnp.isfinite(out)))
    print("KERNEL_OK")
</pallas_src>

<mosaic_0001>
module attributes {stable_mosaic.version = 11 : i64} {
  func.func @_gcn_matmul_kernel(%arg0: memref<512x36xbf16, #tpu.memory_space<vmem>>, %arg1: memref<36x64xbf16, #tpu.memory_space<vmem>>, %arg2: memref<512x64xbf16, #tpu.memory_space<vmem>>) attributes {dimension_semantics = [], scalar_prefetch = 0 : i64, scratch_operands = 0 : i64, tpu.core_type = #tpu.core_type<tc>} {
    %c0 = arith.constant 0 : index
    %c0_0 = arith.constant 0 : index
    %0 = vector.load %arg0[%c0, %c0_0] : memref<512x36xbf16, #tpu.memory_space<vmem>>, vector<512x36xbf16>
    %c0_1 = arith.constant 0 : index
    %c0_2 = arith.constant 0 : index
    %1 = vector.load %arg1[%c0_1, %c0_2] : memref<36x64xbf16, #tpu.memory_space<vmem>>, vector<36x64xbf16>
    %cst = arith.constant dense<0.000000e+00> : vector<512x64xf32>
    %2 = tpu.matmul %0, %1, %cst {dimension_numbers = #tpu.dot_dimension_numbers<[1], [0], [0], [1], [0, 0, 1, 1], [], []>} : vector<512x36xbf16>, vector<36x64xbf16>, vector<512x64xf32> -> vector<512x64xf32>
    %cst_3 = arith.constant 0.000000e+00 : f32
    %3 = vector.broadcast %cst_3 : f32 to vector<512x64xf32>
    %4 = arith.maximumf %2, %3 : vector<512x64xf32>
    %5 = arith.truncf %4 : vector<512x64xf32> to vector<512x64xbf16>
    %c0_4 = arith.constant 0 : index
    %c0_5 = arith.constant 0 : index
    %6 = vector.load %arg2[%c0_4, %c0_5] : memref<512x64xbf16, #tpu.memory_space<vmem>>, vector<512x64xbf16>
    tpu.vector_store %arg2[%c0_4, %c0_5], %5 {strides = array<i32>} : memref<512x64xbf16, #tpu.memory_space<vmem>>, vector<512x64xbf16>,
    return
  }
}

module attributes {stable_mosaic.version = 11 : i64} {
  func.func @_tconv_kernel(%arg0: i32, %arg1: memref<1x384x64xbf16, #tpu.memory_space<vmem>>, %arg2: memref<9x64x64xbf16, #tpu.memory_space<vmem>>, %arg3: memref<1x64xf32, #tpu.memory_space<vmem>>, %arg4: memref<1x256x64xbf16, #tpu.memory_space<vmem>>) attributes {dimension_semantics = [#tpu.dimension_semantics<parallel>], iteration_bounds = array<i64: 2>, scalar_prefetch = 0 : i64, scratch_operands = 0 : i64, tpu.core_type = #tpu.core_type<tc>, window_params = [{transform_indices = @transform_0, window_bounds = array<i64: 1, 384, 64>}, {pipeline_mode = #tpu.pipeline_mode<synchronous>, transform_indices = @transform_1, window_bounds = array<i64: 9, 64, 64>}, {pipeline_mode = #tpu.pipeline_mode<synchronous>, transform_indices = @transform_2, window_bounds = array<i64: 1, 64>}, {transform_indices = @transform_3, window_bounds = array<i64: 1, 256, 64>}]} {
    %cst = arith.constant 0.000000e+00 : f32
    %0 = vector.broadcast %cst : f32 to vector<256x64xf32>
    %c0 = arith.constant 0 : index
    %c0_0 = arith.constant 0 : index
    %c0_1 = arith.constant 0 : index
    %1 = vector.load %arg1[%c0, %c0_0, %c0_1] : memref<1x384x64xbf16, #tpu.memory_space<vmem>>, vector<1x256x64xbf16>
    %2 = vector.shape_cast %1 : vector<1x256x64xbf16> to vector<256x64xbf16>
    %c0_2 = arith.constant 0 : index
    %c0_3 = arith.constant 0 : index
    %c0_4 = arith.constant 0 : index
    %3 = vector.load %arg2[%c0_2, %c0_3, %c0_4] : memref<9x64x64xbf16, #tpu.memory_space<vmem>>, vector<1x64x64xbf16>
    %4 = vector.shape_cast %3 : vector<1x64x64xbf16> to vector<64x64xbf16>
    %cst_5 = arith.constant dense<0.000000e+00> : vector<256x64xf32>
    %5 = tpu.matmul %2, %4, %cst_5 {dimension_numbers = #tpu.dot_dimension_numbers<[1], [0], [0], [1], [0, 0, 1, 1], [], []>} : vector<256x64xbf16>, vector<64x64xbf16>, vector<256x64xf32> -> vector<256x64xf32>
    %6 = arith.addf %0, %5 : vector<256x64xf32>
    %c0_6 = arith.constant 0 : index
    %c16 = arith.constant 16 : index
    %c0_7 = arith.constant 0 : index
    %7 = vector.load %arg1[%c0_6, %c16, %c0_7] : memref<1x384x64xbf16, #tpu.memory_space<vmem>>, vector<1x256x64xbf16>
    %8 = vector.shape_cast %7 : vector<1x256x64xbf16> to vector<256x64xbf16>
    %c1 = arith.constant 1 : index
    %c0_8 = arith.constant 0 : index
    %c0_9 = arith.constant 0 : index
    %9 = vector.load %arg2[%c1, %c0_8, %c0_9] : memref<9x64x64xbf16, #tpu.memory_space<vmem>>, vector<1x64x64xbf16>
    %10 = vector.shape_cast %9 : vector<1x64x64xbf16> to vector<64x64xbf16>
    %cst_10 = arith.constant dense<0.000000e+00> : vector<256x64xf32>
    %11 = tpu.matmul %8, %10, %cst_10 {dimension_numbers = #tpu.dot_dimension_numbers<[1], [0], [0], [1], [0, 0, 1, 1], [], []>} : vector<256x64xbf16>, vector<64x64xbf16>, vector<256x64xf32> -> vector<256x64xf32>
    %12 = arith.addf %6, %11 : vector<256x64xf32>
    %c0_11 = arith.constant 0 : index
    %c32 = arith.constant 32 : index
    %c0_12 = arith.constant 0 : index
    %13 = vector.load %arg1[%c0_11, %c32, %c0_12] : memref<1x384x64xbf16, #tpu.memory_space<vmem>>, vector<1x256x64xbf16>
    %14 = vector.shape_cast %13 : vector<1x256x64xbf16> to vector<256x64xbf16>
    %c2 = arith.constant 2 : index
    %c0_13 = arith.constant 0 : index
    %c0_14 = arith.constant 0 : index
    %15 = vector.load %arg2[%c2, %c0_13, %c0_14] : memref<9x64x64xbf16, #tpu.memory_space<vmem>>, vector<1x64x64xbf16>
    %16 = vector.shape_cast %15 : vector<1x64x64xbf16> to vector<64x64xbf16>
    %cst_15 = arith.constant dense<0.000000e+00> : vector<256x64xf32>
    %17 = tpu.matmul %14, %16, %cst_15 {dimension_numbers = #tpu.dot_dimension_numbers<[1], [0], [0], [1], [0, 0, 1, 1], [], []>} : vector<256x64xbf16>, vector<64x64xbf16>, vector<256x64xf32> -> vector<256x64xf32>
    %18 = arith.addf %12, %17 : vector<256x64xf32>
    %c0_16 = arith.constant 0 : index
    %c48 = arith.constant 48 : index
    %c0_17 = arith.constant 0 : index
    %19 = vector.load %arg1[%c0_16, %c48, %c0_17] : memref<1x384x64xbf16, #tpu.memory_space<vmem>>, vector<1x256x64xbf16>
    %20 = vector.shape_cast %19 : vector<1x256x64xbf16> to vector<256x64xbf16>
    %c3 = arith.constant 3 : index
    %c0_18 = arith.constant 0 : index
    %c0_19 = arith.constant 0 : index
    %21 = vector.load %arg2[%c3, %c0_18, %c0_19] : memref<9x64x64xbf16, #tpu.memory_space<vmem>>, vector<1x64x64xbf16>
    %22 = vector.shape_cast %21 : vector<1x64x64xbf16> to vector<64x64xbf16>
    %cst_20 = arith.constant dense<0.000000e+00> : vector<256x64xf32>
    %23 = tpu.matmul %20, %22, %cst_20 {dimension_numbers = #tpu.dot_dimension_numbers<[1], [0], [0], [1], [0, 0, 1, 1], [], []>} : vector<256x64xbf16>, vector<64x64xbf16>, vector<256x64xf32> -> vector<256x64xf32>
    %24 = arith.addf %18, %23 : vector<256x64xf32>
    %c0_21 = arith.constant 0 : index
    %c64 = arith.constant 64 : index
    %c0_22 = arith.constant 0 : index
    %25 = vector.load %arg1[%c0_21, %c64, %c0_22] : memref<1x384x64xbf16, #tpu.memory_space<vmem>>, vector<1x256x64xbf16>
    %26 = vector.shape_cast %25 : vector<1x256x64xbf16> to vector<256x64xbf16>
    %c4 = arith.constant 4 : index
    %c0_23 = arith.constant 0 : index
    %c0_24 = arith.constant 0 : index
    %27 = vector.load %arg2[%c4, %c0_23, %c0_24] : memref<9x64x64xbf16, #tpu.memory_space<vmem>>, vector<1x64x64xbf16>
    %28 = vector.shape_cast %27 : vector<1x64x64xbf16> to vector<64x64xbf16>
    %cst_25 = arith.constant dense<0.000000e+00> : vector<256x64xf32>
    %29 = tpu.matmul %26, %28, %cst_25 {dimension_numbers = #tpu.dot_dimension_numbers<[1], [0], [0], [1], [0, 0, 1, 1], [], []>} : vector<256x64xbf16>, vector<64x64xbf16>, vector<256x64xf32> -> vector<256x64xf32>
    %30 = arith.addf %24, %29 : vector<256x64xf32>
    %c0_26 = arith.constant 0 : index
    %c80 = arith.constant 80 : index
    %c0_27 = arith.constant 0 : index
    %31 = vector.load %arg1[%c0_26, %c80, %c0_27] : memref<1x384x64xbf16, #tpu.memory_space<vmem>>, vector<1x256x64xbf16>
    %32 = vector.shape_cast %31 : vector<1x256x64xbf16> to vector<256x64xbf16>
    %c5 = arith.constant 5 : index
    %c0_28 = arith.constant 0 : index
    %c0_29 = arith.constant 0 : index
    %33 = vector.load %arg2[%c5, %c0_28, %c0_29] : memref<9x64x64xbf16, #tpu.memory_space<vmem>>, vector<1x64x64xbf16>
    %34 = vector.shape_cast %33 : vector<1x64x64xbf16> to vector<64x64xbf16>
    %cst_30 = arith.constant dense<0.000000e+00> : vector<256x64xf32>
    %35 = tpu.matmul %32, %34, %cst_30 {dimension_numbers = #tpu.dot_dimension_numbers<[1], [0], [0], [1], [0, 0, 1, 1], [], []>} : vector<256x64xbf16>, vector<64x64xbf16>, vector<256x64xf32> -> vector<256x64xf32>
    %36 = arith.addf %30, %35 : vector<256x64xf32>
    %c0_31 = arith.constant 0 : index
    %c96 = arith.constant 96 : index
    %c0_32 = arith.constant 0 : index
    %37 = vector.load %arg1[%c0_31, %c96, %c0_32] : memref<1x384x64xbf16, #tpu.memory_space<vmem>>, vector<1x256x64xbf16>
    %38 = vector.shape_cast %37 : vector<1x256x64xbf16> to vector<256x64xbf16>
    %c6 = arith.constant 6 : index
    %c0_33 = arith.constant 0 : index
    %c0_34 = arith.constant 0 : index
    %39 = vector.load %arg2[%c6, %c0_33, %c0_34] : memref<9x64x64xbf16, #tpu.memory_space<vmem>>, vector<1x64x64xbf16>
    %40 = vector.shape_cast %39 : vector<1x64x64xbf16> to vector<64x64xbf16>
    %cst_35 = arith.constant dense<0.000000e+00> : vector<256x64xf32>
    %41 = tpu.matmul %38, %40, %cst_35 {dimension_numbers = #tpu.dot_dimension_numbers<[1], [0], [0], [1], [0, 0, 1, 1], [], []>} : vector<256x64xbf16>, vector<64x64xbf16>, vector<256x64xf32> -> vector<256x64xf32>
    %42 = arith.addf %36, %41 : vector<256x64xf32>
    %c0_36 = arith.constant 0 : index
    %c112 = arith.constant 112 : index
    %c0_37 = arith.constant 0 : index
    %43 = vector.load %arg1[%c0_36, %c112, %c0_37] : memref<1x384x64xbf16, #tpu.memory_space<vmem>>, vector<1x256x64xbf16>
    %44 = vector.shape_cast %43 : vector<1x256x64xbf16> to vector<256x64xbf16>
    %c7 = arith.constant 7 : index
    %c0_38 = arith.constant 0 : index
    %c0_39 = arith.constant 0 : index
    %45 = vector.load %arg2[%c7, %c0_38, %c0_39] : memref<9x64x64xbf16, #tpu.memory_space<vmem>>, vector<1x64x64xbf16>
    %46 = vector.shape_cast %45 : vector<1x64x64xbf16> to vector<64x64xbf16>
    %cst_40 = arith.constant dense<0.000000e+00> : vector<256x64xf32>
    %47 = tpu.matmul %44, %46, %cst_40 {dimension_numbers = #tpu.dot_dimension_numbers<[1], [0], [0], [1], [0, 0, 1, 1], [], []>} : vector<256x64xbf16>, vector<64x64xbf16>, vector<256x64xf32> -> vector<256x64xf32>
    %48 = arith.addf %42, %47 : vector<256x64xf32>
    %c0_41 = arith.constant 0 : index
    %c128 = arith.constant 128 : index
    %c0_42 = arith.constant 0 : index
    %49 = vector.load %arg1[%c0_41, %c128, %c0_42] : memref<1x384x64xbf16, #tpu.memory_space<vmem>>, vector<1x256x64xbf16>
    %50 = vector.shape_cast %49 : vector<1x256x64xbf16> to vector<256x64xbf16>
    %c8 = arith.constant 8 : index
    %c0_43 = arith.constant 0 : index
    %c0_44 = arith.constant 0 : index
    %51 = vector.load %arg2[%c8, %c0_43, %c0_44] : memref<9x64x64xbf16, #tpu.memory_space<vmem>>, vector<1x64x64xbf16>
    %52 = vector.shape_cast %51 : vector<1x64x64xbf16> to vector<64x64xbf16>
    %cst_45 = arith.constant dense<0.000000e+00> : vector<256x64xf32>
    %53 = tpu.matmul %50, %52, %cst_45 {dimension_numbers = #tpu.dot_dimension_numbers<[1], [0], [0], [1], [0, 0, 1, 1], [], []>} : vector<256x64xbf16>, vector<64x64xbf16>, vector<256x64xf32> -> vector<256x64xf32>
    %54 = arith.addf %48, %53 : vector<256x64xf32>
    %c0_46 = arith.constant 0 : index
    %c0_47 = arith.constant 0 : index
    %55 = vector.load %arg3[%c0_46, %c0_47] : memref<1x64xf32, #tpu.memory_space<vmem>>, vector<1x64xf32>
    %56 = vector.broadcast %55 : vector<1x64xf32> to vector<256x64xf32>
    %57 = arith.addf %54, %56 : vector<256x64xf32>
    %cst_48 = arith.constant 0.000000e+00 : f32
    %58 = vector.broadcast %cst_48 : f32 to vector<256x64xf32>
    %59 = arith.maximumf %57, %58 : vector<256x64xf32>
    %60 = arith.truncf %59 : vector<256x64xf32> to vector<256x64xbf16>
    %c0_49 = arith.constant 0 : index
    %c0_50 = arith.constant 0 : index
    %c0_51 = arith.constant 0 : index
    %61 = vector.load %arg4[%c0_49, %c0_50, %c0_51] : memref<1x256x64xbf16, #tpu.memory_space<vmem>>, vector<1x256x64xbf16>
    %62 = vector.shape_cast %61 : vector<1x256x64xbf16> to vector<256x64xbf16>
    %63 = vector.shape_cast %60 : vector<256x64xbf16> to vector<1x256x64xbf16>
    tpu.vector_store %arg4[%c0_49, %c0_50, %c0_51], %63 {strides = array<i32>} : memref<1x256x64xbf16, #tpu.memory_space<vmem>>, vector<1x256x64xbf16>,
    return
  }
  func.func @transform_0(%arg0: i32) -> (i32, i32, i32) {
    %c0_i32 = arith.constant 0 : i32
    %c0_i32_0 = arith.constant 0 : i32
    %c0_i32_1 = arith.constant 0 : i32
    return %arg0, %c0_i32, %c0_i32_0 : i32, i32, i32
  }
  func.func @transform_1(%arg0: i32) -> (i32, i32, i32) {
    %c0_i32 = arith.constant 0 : i32
    %c0_i32_0 = arith.constant 0 : i32
    %c0_i32_1 = arith.constant 0 : i32
    %c0_i32_2 = arith.constant 0 : i32
    return %c0_i32, %c0_i32_0, %c0_i32_1 : i32, i32, i32
  }
  func.func @transform_2(%arg0: i32) -> (i32, i32) {
    %c0_i32 = arith.constant 0 : i32
    %c0_i32_0 = arith.constant 0 : i32
    %c0_i32_1 = arith.constant 0 : i32
    return %c0_i32, %c0_i32_0 : i32, i32
  }
  func.func @transform_3(%arg0: i32) -> (i32, i32, i32) {
    %c0_i32 = arith.constant 0 : i32
    %c0_i32_0 = arith.constant 0 : i32
    %c0_i32_1 = arith.constant 0 : i32
    return %arg0, %c0_i32, %c0_i32_0 : i32, i32, i32
  }
}

module attributes {stable_mosaic.version = 11 : i64} {
  func.func @_gcn_matmul_kernel(%arg0: memref<512x336xbf16, #tpu.memory_space<vmem>>, %arg1: memref<336x128xbf16, #tpu.memory_space<vmem>>, %arg2: memref<512x128xbf16, #tpu.memory_space<vmem>>) attributes {dimension_semantics = [], scalar_prefetch = 0 : i64, scratch_operands = 0 : i64, tpu.core_type = #tpu.core_type<tc>} {
    %c0 = arith.constant 0 : index
    %c0_0 = arith.constant 0 : index
    %0 = vector.load %arg0[%c0, %c0_0] : memref<512x336xbf16, #tpu.memory_space<vmem>>, vector<512x336xbf16>
    %c0_1 = arith.constant 0 : index
    %c0_2 = arith.constant 0 : index
    %1 = vector.load %arg1[%c0_1, %c0_2] : memref<336x128xbf16, #tpu.memory_space<vmem>>, vector<336x128xbf16>
    %cst = arith.constant dense<0.000000e+00> : vector<512x128xf32>
    %2 = tpu.matmul %0, %1, %cst {dimension_numbers = #tpu.dot_dimension_numbers<[1], [0], [0], [1], [0, 0, 1, 1], [], []>} : vector<512x336xbf16>, vector<336x128xbf16>, vector<512x128xf32> -> vector<512x128xf32>
    %cst_3 = arith.constant 0.000000e+00 : f32
    %3 = vector.broadcast %cst_3 : f32 to vector<512x128xf32>
    %4 = arith.maximumf %2, %3 : vector<512x128xf32>
    %5 = arith.truncf %4 : vector<512x128xf32> to vector<512x128xbf16>
    %c0_4 = arith.constant 0 : index
    %c0_5 = arith.constant 0 : index
    %6 = vector.load %arg2[%c0_4, %c0_5] : memref<512x128xbf16, #tpu.memory_space<vmem>>, vector<512x128xbf16>
    tpu.vector_store %arg2[%c0_4, %c0_5], %5 {strides = array<i32>} : memref<512x128xbf16, #tpu.memory_space<vmem>>, vector<512x128xbf16>,
    return
  }
}

module attributes {stable_mosaic.version = 11 : i64} {
  func.func @_tconv_kernel(%arg0: i32, %arg1: memref<1x12x32x128xbf16, #tpu.memory_space<vmem>>, %arg2: memref<9x128x128xbf16, #tpu.memory_space<vmem>>, %arg3: memref<1x128xf32, #tpu.memory_space<vmem>>, %arg4: memref<1x128x64xbf16, #tpu.memory_space<vmem>>, %arg5: memref<64x128xbf16, #tpu.memory_space<vmem>>, %arg6: memref<1x128xf32, #tpu.memory_space<vmem>>, %arg7: memref<1x128x128xbf16, #tpu.memory_space<vmem>>) attributes {dimension_semantics = [#tpu.dimension_semantics<parallel>], iteration_bounds = array<i64: 2>, scalar_prefetch = 0 : i64, scratch_operands = 0 : i64, tpu.core_type = #tpu.core_type<tc>, window_params = [{transform_indices = @transform_0, window_bounds = array<i64: 1, 12, 32, 128>}, {pipeline_mode = #tpu.pipeline_mode<synchronous>, transform_indices = @transform_1, window_bounds = array<i64: 9, 128, 128>}, {pipeline_mode = #tpu.pipeline_mode<synchronous>, transform_indices = @transform_2, window_bounds = array<i64: 1, 128>}, {transform_indices = @transform_3, window_bounds = array<i64: 1, 128, 64>}, {pipeline_mode = #tpu.pipeline_mode<synchronous>, transform_indices = @transform_4, window_bounds = array<i64: 64, 128>}, {pipeline_mode = #tpu.pipeline_mode<synchronous>, transform_indices = @transform_5, window_bounds = array<i64: 1, 128>}, {transform_indices = @transform_6, window_bounds = array<i64: 1, 128, 128>}]} {
    %cst = arith.constant 0.000000e+00 : f32
    %0 = vector.broadcast %cst : f32 to vector<128x128xf32>
    %c0 = arith.constant 0 : index
    %c0_0 = arith.constant 0 : index
    %c0_1 = arith.constant 0 : index
    %c0_2 = arith.constant 0 : index
    %1 = vector.load %arg1[%c0, %c0_0, %c0_1, %c0_2] : memref<1x12x32x128xbf16, #tpu.memory_space<vmem>>, vector<1x8x16x128xbf16>
    %2 = vector.shape_cast %1 : vector<1x8x16x128xbf16> to vector<8x16x128xbf16>
    %3 = vector.shape_cast %2 : vector<8x16x128xbf16> to vector<128x128xbf16>
    %c0_3 = arith.constant 0 : index
    %c0_4 = arith.constant 0 : index
    %c0_5 = arith.constant 0 : index
    %4 = vector.load %arg2[%c0_3, %c0_4, %c0_5] : memref<9x128x128xbf16, #tpu.memory_space<vmem>>, vector<1x128x128xbf16>
    %5 = vector.shape_cast %4 : vector<1x128x128xbf16> to vector<128x128xbf16>
    %cst_6 = arith.constant dense<0.000000e+00> : vector<128x128xf32>
    %6 = tpu.matmul %3, %5, %cst_6 {dimension_numbers = #tpu.dot_dimension_numbers<[1], [0], [0], [1], [0, 0, 1, 1], [], []>} : vector<128x128xbf16>, vector<128x128xbf16>, vector<128x128xf32> -> vector<128x128xf32>
    %7 = arith.addf %0, %6 : vector<128x128xf32>
    %c0_7 = arith.constant 0 : index
    %c0_8 = arith.constant 0 : index
    %c16 = arith.constant 16 : index
    %c0_9 = arith.constant 0 : index
    %8 = vector.load %arg1[%c0_7, %c0_8, %c16, %c0_9] : memref<1x12x32x128xbf16, #tpu.memory_space<vmem>>, vector<1x8x16x128xbf16>
    %9 = vector.shape_cast %8 : vector<1x8x16x128xbf16> to vector<8x16x128xbf16>
    %10 = vector.shape_cast %9 : vector<8x16x128xbf16> to vector<128x128xbf16>
    %c1 = arith.constant 1 : index
    %c0_10 = arith.constant 0 : index
    %c0_11 = arith.constant 0 : index
    %11 = vector.load %arg2[%c1, %c0_10, %c0_11] : memref<9x128x128xbf16, #tpu.memory_space<vmem>>, vector<1x128x128xbf16>
    %12 = vector.shape_cast %11 : vector<1x128x128xbf16> to vector<128x128xbf16>
    %cst_12 = arith.constant dense<0.000000e+00> : vector<128x128xf32>
    %13 = tpu.matmul %10, %12, %cst_12 {dimension_numbers = #tpu.dot_dimension_numbers<[1], [0], [0], [1], [0, 0, 1, 1], [], []>} : vector<128x128xbf16>, vector<128x128xbf16>, vector<128x128xf32> -> vector<128x128xf32>
    %14 = arith.addf %7, %13 : vector<128x128xf32>
    %c0_13 = arith.constant 0 : index
    %c1_14 = arith.constant 1 : index
    %c0_15 = arith.constant 0 : index
    %c0_16 = arith.constant 0 : index
    %15 = vector.load %arg1[%c0_13, %c1_14, %c0_15, %c0_16] : memref<1x12x32x128xbf16, #tpu.memory_space<vmem>>, vector<1x8x16x128xbf16>
    %16 = vector.shape_cast %15 : vector<1x8x16x128xbf16> to vector<8x16x128xbf16>
    %17 = vector.shape_cast %16 : vector<8x16x128xbf16> to vector<128x128xbf16>
    %c2 = arith.constant 2 : index
    %c0_17 = arith.constant 0 : index
    %c0_18 = arith.constant 0 : index
    %18 = vector.load %arg2[%c2, %c0_17, %c0_18] : memref<9x128x128xbf16, #tpu.memory_space<vmem>>, vector<1x128x128xbf16>
    %19 = vector.shape_cast %18 : vector<1x128x128xbf16> to vector<128x128xbf16>
    %cst_19 = arith.constant dense<0.000000e+00> : vector<128x128xf32>
    %20 = tpu.matmul %17, %19, %cst_19 {dimension_numbers = #tpu.dot_dimension_numbers<[1], [0], [0], [1], [0, 0, 1, 1], [], []>} : vector<128x128xbf16>, vector<128x128xbf16>, vector<128x128xf32> -> vector<128x128xf32>
    %21 = arith.addf %14, %20 : vector<128x128xf32>
    %c0_20 = arith.constant 0 : index
    %c1_21 = arith.constant 1 : index
    %c16_22 = arith.constant 16 : index
    %c0_23 = arith.constant 0 : index
    %22 = vector.load %arg1[%c0_20, %c1_21, %c16_22, %c0_23] : memref<1x12x32x128xbf16, #tpu.memory_space<vmem>>, vector<1x8x16x128xbf16>
    %23 = vector.shape_cast %22 : vector<1x8x16x128xbf16> to vector<8x16x128xbf16>
    %24 = vector.shape_cast %23 : vector<8x16x128xbf16> to vector<128x128xbf16>
    %c3 = arith.constant 3 : index
    %c0_24 = arith.constant 0 : index
    %c0_25 = arith.constant 0 : index
    %25 = vector.load %arg2[%c3, %c0_24, %c0_25] : memref<9x128x128xbf16, #tpu.memory_space<vmem>>, vector<1x128x128xbf16>
    %26 = vector.shape_cast %25 : vector<1x128x128xbf16> to vector<128x128xbf16>
    %cst_26 = arith.constant dense<0.000000e+00> : vector<128x128xf32>
    %27 = tpu.matmul %24, %26, %cst_26 {dimension_numbers = #tpu.dot_dimension_numbers<[1], [0], [0], [1], [0, 0, 1, 1], [], []>} : vector<128x128xbf16>, vector<128x128xbf16>, vector<128x128xf32> -> vector<128x128xf32>
    %28 = arith.addf %21, %27 : vector<128x128xf32>
    %c0_27 = arith.constant 0 : index
    %c2_28 = arith.constant 2 : index
    %c0_29 = arith.constant 0 : index
    %c0_30 = arith.constant 0 : index
    %29 = vector.load %arg1[%c0_27, %c2_28, %c0_29, %c0_30] : memref<1x12x32x128xbf16, #tpu.memory_space<vmem>>, vector<1x8x16x128xbf16>
    %30 = vector.shape_cast %29 : vector<1x8x16x128xbf16> to vector<8x16x128xbf16>
    %31 = vector.shape_cast %30 : vector<8x16x128xbf16> to vector<128x128xbf16>
    %c4 = arith.constant 4 : index
    %c0_31 = arith.constant 0 : index
    %c0_32 = arith.constant 0 : index
    %32 = vector.load %arg2[%c4, %c0_31, %c0_32] : memref<9x128x128xbf16, #tpu.memory_space<vmem>>, vector<1x128x128xbf16>
    %33 = vector.shape_cast %32 : vector<1x128x128xbf16> to vector<128x128xbf16>
    %cst_33 = arith.constant dense<0.000000e+00> : vector<128x128xf32>
    %34 = tpu.matmul %31, %33, %cst_33 {dimension_numbers = #tpu.dot_dimension_numbers<[1], [0], [0], [1], [0, 0, 1, 1], [], []>} : vector<128x128xbf16>, vector<128x128xbf16>, vector<128x128xf32> -> vector<128x128xf32>
    %35 = arith.addf %28, %34 : vector<128x128xf32>
    %c0_34 = arith.constant 0 : index
    %c2_35 = arith.constant 2 : index
    %c16_36 = arith.constant 16 : index
    %c0_37 = arith.constant 0 : index
    %36 = vector.load %arg1[%c0_34, %c2_35, %c16_36, %c0_37] : memref<1x12x32x128xbf16, #tpu.memory_space<vmem>>, vector<1x8x16x128xbf16>
    %37 = vector.shape_cast %36 : vector<1x8x16x128xbf16> to vector<8x16x128xbf16>
    %38 = vector.shape_cast %37 : vector<8x16x128xbf16> to vector<128x128xbf16>
    %c5 = arith.constant 5 : index
    %c0_38 = arith.constant 0 : index
    %c0_39 = arith.constant 0 : index
    %39 = vector.load %arg2[%c5, %c0_38, %c0_39] : memref<9x128x128xbf16, #tpu.memory_space<vmem>>, vector<1x128x128xbf16>
    %40 = vector.shape_cast %39 : vector<1x128x128xbf16> to vector<128x128xbf16>
    %cst_40 = arith.constant dense<0.000000e+00> : vector<128x128xf32>
    %41 = tpu.matmul %38, %40, %cst_40 {dimension_numbers = #tpu.dot_dimension_numbers<[1], [0], [0], [1], [0, 0, 1, 1], [], []>} : vector<128x128xbf16>, vector<128x128xbf16>, vector<128x128xf32> -> vector<128x128xf32>
    %42 = arith.addf %35, %41 : vector<128x128xf32>
    %c0_41 = arith.constant 0 : index
    %c3_42 = arith.constant 3 : index
    %c0_43 = arith.constant 0 : index
    %c0_44 = arith.constant 0 : index
    %43 = vector.load %arg1[%c0_41, %c3_42, %c0_43, %c0_44] : memref<1x12x32x128xbf16, #tpu.memory_space<vmem>>, vector<1x8x16x128xbf16>
    %44 = vector.shape_cast %43 : vector<1x8x16x128xbf16> to vector<8x16x128xbf16>
    %45 = vector.shape_cast %44 : vector<8x16x128xbf16> to vector<128x128xbf16>
    %c6 = arith.constant 6 : index
    %c0_45 = arith.constant 0 : index
    %c0_46 = arith.constant 0 : index
    %46 = vector.load %arg2[%c6, %c0_45, %c0_46] : memref<9x128x128xbf16, #tpu.memory_space<vmem>>, vector<1x128x128xbf16>
    %47 = vector.shape_cast %46 : vector<1x128x128xbf16> to vector<128x128xbf16>
    %cst_47 = arith.constant dense<0.000000e+00> : vector<128x128xf32>
    %48 = tpu.matmul %45, %47, %cst_47 {dimension_numbers = #tpu.dot_dimension_numbers<[1], [0], [0], [1], [0, 0, 1, 1], [], []>} : vector<128x128xbf16>, vector<128x128xbf16>, vector<128x128xf32> -> vector<128x128xf32>
    %49 = arith.addf %42, %48 : vector<128x128xf32>
    %c0_48 = arith.constant 0 : index
    %c3_49 = arith.constant 3 : index
    %c16_50 = arith.constant 16 : index
    %c0_51 = arith.constant 0 : index
    %50 = vector.load %arg1[%c0_48, %c3_49, %c16_50, %c0_51] : memref<1x12x32x128xbf16, #tpu.memory_space<vmem>>, vector<1x8x16x128xbf16>
    %51 = vector.shape_cast %50 : vector<1x8x16x128xbf16> to vector<8x16x128xbf16>
    %52 = vector.shape_cast %51 : vector<8x16x128xbf16> to vector<128x128xbf16>
    %c7 = arith.constant 7 : index
    %c0_52 = arith.constant 0 : index
    %c0_53 = arith.constant 0 : index
    %53 = vector.load %arg2[%c7, %c0_52, %c0_53] : memref<9x128x128xbf16, #tpu.memory_space<vmem>>, vector<1x128x128xbf16>
    %54 = vector.shape_cast %53 : vector<1x128x128xbf16> to vector<128x128xbf16>
    %cst_54 = arith.constant dense<0.000000e+00> : vector<128x128xf32>
    %55 = tpu.matmul %52, %54, %cst_54 {dimension_numbers = #tpu.dot_dimension_numbers<[1], [0], [0], [1], [0, 0, 1, 1], [], []>} : vector<128x128xbf16>, vector<128x128xbf16>, vector<128x128xf32> -> vector<128x128xf32>
    %56 = arith.addf %49, %55 : vector<128x128xf32>
    %c0_55 = arith.constant 0 : index
    %c4_56 = arith.constant 4 : index
    %c0_57 = arith.constant 0 : index
    %c0_58 = arith.constant 0 : index
    %57 = vector.load %arg1[%c0_55, %c4_56, %c0_57, %c0_58] : memref<1x12x32x128xbf16, #tpu.memory_space<vmem>>, vector<1x8x16x128xbf16>
    %58 = vector.shape_cast %57 : vector<1x8x16x128xbf16> to vector<8x16x128xbf16>
    %59 = vector.shape_cast %58 : vector<8x16x128xbf16> to vector<128x128xbf16>
    %c8 = arith.constant 8 : index
    %c0_59 = arith.constant 0 : index
    %c0_60 = arith.constant 0 : index
    %60 = vector.load %arg2[%c8, %c0_59, %c0_60] : memref<9x128x128xbf16, #tpu.memory_space<vmem>>, vector<1x128x128xbf16>
    %61 = vector.shape_cast %60 : vector<1x128x128xbf16> to vector<128x128xbf16>
    %cst_61 = arith.constant dense<0.000000e+00> : vector<128x128xf32>
    %62 = tpu.matmul %59, %61, %cst_61 {dimension_numbers = #tpu.dot_dimension_numbers<[1], [0], [0], [1], [0, 0, 1, 1], [], []>} : vector<128x128xbf16>, vector<128x128xbf16>, vector<128x128xf32> -> vector<128x128xf32>
    %63 = arith.addf %56, %62 : vector<128x128xf32>
    %c0_62 = arith.constant 0 : index
    %c0_63 = arith.constant 0 : index
    %64 = vector.load %arg3[%c0_62, %c0_63] : memref<1x128xf32, #tpu.memory_space<vmem>>, vector<1x128xf32>
    %65 = vector.broadcast %64 : vector<1x128xf32> to vector<128x128xf32>
    %66 = arith.addf %63, %65 : vector<128x128xf32>
    %c0_64 = arith.constant 0 : index
    %c0_65 = arith.constant 0 : index
    %c0_66 = arith.constant 0 : index
    %67 = vector.load %arg4[%c0_64, %c0_65, %c0_66] : memref<1x128x64xbf16, #tpu.memory_space<vmem>>, vector<1x128x64xbf16>
    %68 = vector.shape_cast %67 : vector<1x128x64xbf16> to vector<128x64xbf16>
    %c0_67 = arith.constant 0 : index
    %c0_68 = arith.constant 0 : index
    %69 = vector.load %arg5[%c0_67, %c0_68] : memref<64x128xbf16, #tpu.memory_space<vmem>>, vector<64x128xbf16>
    %cst_69 = arith.constant dense<0.000000e+00> : vector<128x128xf32>
    %70 = tpu.matmul %68, %69, %cst_69 {dimension_numbers = #tpu.dot_dimension_numbers<[1], [0], [0], [1], [0, 0, 1, 1], [], []>} : vector<128x64xbf16>, vector<64x128xbf16>, vector<128x128xf32> -> vector<128x128xf32>
    %71 = arith.addf %66, %70 : vector<128x128xf32>
    %c0_70 = arith.constant 0 : index
    %c0_71 = arith.constant 0 : index
    %72 = vector.load %arg6[%c0_70, %c0_71] : memref<1x128xf32, #tpu.memory_space<vmem>>, vector<1x128xf32>
    %73 = vector.broadcast %72 : vector<1x128xf32> to vector<128x128xf32>
    %74 = arith.addf %71, %73 : vector<128x128xf32>
    %cst_72 = arith.constant 0.000000e+00 : f32
    %75 = vector.broadcast %cst_72 : f32 to vector<128x128xf32>
    %76 = arith.maximumf %74, %75 : vector<128x128xf32>
    %77 = arith.truncf %76 : vector<128x128xf32> to vector<128x128xbf16>
    %c0_73 = arith.constant 0 : index
    %c0_74 = arith.constant 0 : index
    %c0_75 = arith.constant 0 : index
    %78 = vector.load %arg7[%c0_73, %c0_74, %c0_75] : memref<1x128x128xbf16, #tpu.memory_space<vmem>>, vector<1x128x128xbf16>
    %79 = vector.shape_cast %78 : vector<1x128x128xbf16> to vector<128x128xbf16>
    %80 = vector.shape_cast %77 : vector<128x128xbf16> to vector<1x128x128xbf16>
    tpu.vector_store %arg7[%c0_73, %c0_74, %c0_75], %80 {strides = array<i32>} : memref<1x128x128xbf16, #tpu.memory_space<vmem>>, vector<1x128x128xbf16>,
    return
  }
  func.func @transform_0(%arg0: i32) -> (i32, i32, i32, i32) {
    %c0_i32 = arith.constant 0 : i32
    %c0_i32_0 = arith.constant 0 : i32
    %c0_i32_1 = arith.constant 0 : i32
    %c0_i32_2 = arith.constant 0 : i32
    return %arg0, %c0_i32, %c0_i32_0, %c0_i32_1 : i32, i32, i32, i32
  }
  func.func @transform_1(%arg0: i32) -> (i32, i32, i32) {
    %c0_i32 = arith.constant 0 : i32
    %c0_i32_0 = arith.constant 0 : i32
    %c0_i32_1 = arith.constant 0 : i32
    %c0_i32_2 = arith.constant 0 : i32
    return %c0_i32, %c0_i32_0, %c0_i32_1 : i32, i32, i32
  }
  func.func @transform_2(%arg0: i32) -> (i32, i32) {
    %c0_i32 = arith.constant 0 : i32
    %c0_i32_0 = arith.constant 0 : i32
    %c0_i32_1 = arith.constant 0 : i32
    return %c0_i32, %c0_i32_0 : i32, i32
  }
  func.func @transform_3(%arg0: i32) -> (i32, i32, i32) {
    %c0_i32 = arith.constant 0 : i32
    %c0_i32_0 = arith.constant 0 : i32
    %c0_i32_1 = arith.constant 0 : i32
    return %arg0, %c0_i32, %c0_i32_0 : i32, i32, i32
  }
  func.func @transform_4(%arg0: i32) -> (i32, i32) {
    %c0_i32 = arith.constant 0 : i32
    %c0_i32_0 = arith.constant 0 : i32
    %c0_i32_1 = arith.constant 0 : i32
    return %c0_i32, %c0_i32_0 : i32, i32
  }
  func.func @transform_5(%arg0: i32) -> (i32, i32) {
    %c0_i32 = arith.constant 0 : i32
    %c0_i32_0 = arith.constant 0 : i32
    %c0_i32_1 = arith.constant 0 : i32
    return %c0_i32, %c0_i32_0 : i32, i32
  }
  func.func @transform_6(%arg0: i32) -> (i32, i32, i32) {
    %c0_i32 = arith.constant 0 : i32
    %c0_i32_0 = arith.constant 0 : i32
    %c0_i32_1 = arith.constant 0 : i32
    return %arg0, %c0_i32, %c0_i32_0 : i32, i32, i32
  }
}

module attributes {stable_mosaic.version = 11 : i64} {
  func.func @_gcn_matmul_kernel(%arg0: memref<256x656xbf16, #tpu.memory_space<vmem>>, %arg1: memref<656x256xbf16, #tpu.memory_space<vmem>>, %arg2: memref<256x256xbf16, #tpu.memory_space<vmem>>) attributes {dimension_semantics = [], scalar_prefetch = 0 : i64, scratch_operands = 0 : i64, tpu.core_type = #tpu.core_type<tc>} {
    %c0 = arith.constant 0 : index
    %c0_0 = arith.constant 0 : index
    %0 = vector.load %arg0[%c0, %c0_0] : memref<256x656xbf16, #tpu.memory_space<vmem>>, vector<256x656xbf16>
    %c0_1 = arith.constant 0 : index
    %c0_2 = arith.constant 0 : index
    %1 = vector.load %arg1[%c0_1, %c0_2] : memref<656x256xbf16, #tpu.memory_space<vmem>>, vector<656x256xbf16>
    %cst = arith.constant dense<0.000000e+00> : vector<256x256xf32>
    %2 = tpu.matmul %0, %1, %cst {dimension_numbers = #tpu.dot_dimension_numbers<[1], [0], [0], [1], [0, 0, 1, 1], [], []>} : vector<256x656xbf16>, vector<656x256xbf16>, vector<256x256xf32> -> vector<256x256xf32>
    %cst_3 = arith.constant 0.000000e+00 : f32
    %3 = vector.broadcast %cst_3 : f32 to vector<256x256xf32>
    %4 = arith.maximumf %2, %3 : vector<256x256xf32>
    %5 = arith.truncf %4 : vector<256x256xf32> to vector<256x256xbf16>
    %c0_4 = arith.constant 0 : index
    %c0_5 = arith.constant 0 : index
    %6 = vector.load %arg2[%c0_4, %c0_5] : memref<256x256xbf16, #tpu.memory_space<vmem>>, vector<256x256xbf16>
    tpu.vector_store %arg2[%c0_4, %c0_5], %5 {strides = array<i32>} : memref<256x256xbf16, #tpu.memory_space<vmem>>, vector<256x256xbf16>,
    return
  }
}

module attributes {stable_mosaic.version = 11 : i64} {
  func.func @_tconv_kernel(%arg0: i32, %arg1: memref<1x8x32x256xbf16, #tpu.memory_space<vmem>>, %arg2: memref<9x256x256xbf16, #tpu.memory_space<vmem>>, %arg3: memref<1x256xf32, #tpu.memory_space<vmem>>, %arg4: memref<1x64x128xbf16, #tpu.memory_space<vmem>>, %arg5: memref<128x256xbf16, #tpu.memory_space<vmem>>, %arg6: memref<1x256xf32, #tpu.memory_space<vmem>>, %arg7: memref<1x64x256xbf16, #tpu.memory_space<vmem>>) attributes {dimension_semantics = [#tpu.dimension_semantics<parallel>], iteration_bounds = array<i64: 2>, scalar_prefetch = 0 : i64, scratch_operands = 0 : i64, tpu.core_type = #tpu.core_type<tc>, window_params = [{transform_indices = @transform_0, window_bounds = array<i64: 1, 8, 32, 256>}, {pipeline_mode = #tpu.pipeline_mode<synchronous>, transform_indices = @transform_1, window_bounds = array<i64: 9, 256, 256>}, {pipeline_mode = #tpu.pipeline_mode<synchronous>, transform_indices = @transform_2, window_bounds = array<i64: 1, 256>}, {transform_indices = @transform_3, window_bounds = array<i64: 1, 64, 128>}, {pipeline_mode = #tpu.pipeline_mode<synchronous>, transform_indices = @transform_4, window_bounds = array<i64: 128, 256>}, {pipeline_mode = #tpu.pipeline_mode<synchronous>, transform_indices = @transform_5, window_bounds = array<i64: 1, 256>}, {transform_indices = @transform_6, window_bounds = array<i64: 1, 64, 256>}]} {
    %cst = arith.constant 0.000000e+00 : f32
    %0 = vector.broadcast %cst : f32 to vector<64x256xf32>
    %c0 = arith.constant 0 : index
    %c0_0 = arith.constant 0 : index
    %c0_1 = arith.constant 0 : index
    %c0_2 = arith.constant 0 : index
    %1 = vector.load %arg1[%c0, %c0_0, %c0_1, %c0_2] : memref<1x8x32x256xbf16, #tpu.memory_space<vmem>>, vector<1x4x16x256xbf16>
    %2 = vector.shape_cast %1 : vector<1x4x16x256xbf16> to vector<4x16x256xbf16>
    %3 = vector.shape_cast %2 : vector<4x16x256xbf16> to vector<64x256xbf16>
    %c0_3 = arith.constant 0 : index
    %c0_4 = arith.constant 0 : index
    %c0_5 = arith.constant 0 : index
    %4 = vector.load %arg2[%c0_3, %c0_4, %c0_5] : memref<9x256x256xbf16, #tpu.memory_space<vmem>>, vector<1x256x256xbf16>
    %5 = vector.shape_cast %4 : vector<1x256x256xbf16> to vector<256x256xbf16>
    %cst_6 = arith.constant dense<0.000000e+00> : vector<64x256xf32>
    %6 = tpu.matmul %3, %5, %cst_6 {dimension_numbers = #tpu.dot_dimension_numbers<[1], [0], [0], [1], [0, 0, 1, 1], [], []>} : vector<64x256xbf16>, vector<256x256xbf16>, vector<64x256xf32> -> vector<64x256xf32>
    %7 = arith.addf %0, %6 : vector<64x256xf32>
    %c0_7 = arith.constant 0 : index
    %c0_8 = arith.constant 0 : index
    %c16 = arith.constant 16 : index
    %c0_9 = arith.constant 0 : index
    %8 = vector.load %arg1[%c0_7, %c0_8, %c16, %c0_9] : memref<1x8x32x256xbf16, #tpu.memory_space<vmem>>, vector<1x4x16x256xbf16>
    %9 = vector.shape_cast %8 : vector<1x4x16x256xbf16> to vector<4x16x256xbf16>
    %10 = vector.shape_cast %9 : vector<4x16x256xbf16> to vector<64x256xbf16>
    %c1 = arith.constant 1 : index
    %c0_10 = arith.constant 0 : index
    %c0_11 = arith.constant 0 : index
    %11 = vector.load %arg2[%c1, %c0_10, %c0_11] : memref<9x256x256xbf16, #tpu.memory_space<vmem>>, vector<1x256x256xbf16>
    %12 = vector.shape_cast %11 : vector<1x256x256xbf16> to vector<256x256xbf16>
    %cst_12 = arith.constant dense<0.000000e+00> : vector<64x256xf32>
    %13 = tpu.matmul %10, %12, %cst_12 {dimension_numbers = #tpu.dot_dimension_numbers<[1], [0], [0], [1], [0, 0, 1, 1], [], []>} : vector<64x256xbf16>, vector<256x256xbf16>, vector<64x256xf32> -> vector<64x256xf32>
    %14 = arith.addf %7, %13 : vector<64x256xf32>
    %c0_13 = arith.constant 0 : index
    %c1_14 = arith.constant 1 : index
    %c0_15 = arith.constant 0 : index
    %c0_16 = arith.constant 0 : index
    %15 = vector.load %arg1[%c0_13, %c1_14, %c0_15, %c0_16] : memref<1x8x32x256xbf16, #tpu.memory_space<vmem>>, vector<1x4x16x256xbf16>
    %16 = vector.shape_cast %15 : vector<1x4x16x256xbf16> to vector<4x16x256xbf16>
    %17 = vector.shape_cast %16 : vector<4x16x256xbf16> to vector<64x256xbf16>
    %c2 = arith.constant 2 : index
    %c0_17 = arith.constant 0 : index
    %c0_18 = arith.constant 0 : index
    %18 = vector.load %arg2[%c2, %c0_17, %c0_18] : memref<9x256x256xbf16, #tpu.memory_space<vmem>>, vector<1x256x256xbf16>
    %19 = vector.shape_cast %18 : vector<1x256x256xbf16> to vector<256x256xbf16>
    %cst_19 = arith.constant dense<0.000000e+00> : vector<64x256xf32>
    %20 = tpu.matmul %17, %19, %cst_19 {dimension_numbers = #tpu.dot_dimension_numbers<[1], [0], [0], [1], [0, 0, 1, 1], [], []>} : vector<64x256xbf16>, vector<256x256xbf16>, vector<64x256xf32> -> vector<64x256xf32>
    %21 = arith.addf %14, %20 : vector<64x256xf32>
    %c0_20 = arith.constant 0 : index
    %c1_21 = arith.constant 1 : index
    %c16_22 = arith.constant 16 : index
    %c0_23 = arith.constant 0 : index
    %22 = vector.load %arg1[%c0_20, %c1_21, %c16_22, %c0_23] : memref<1x8x32x256xbf16, #tpu.memory_space<vmem>>, vector<1x4x16x256xbf16>
    %23 = vector.shape_cast %22 : vector<1x4x16x256xbf16> to vector<4x16x256xbf16>
    %24 = vector.shape_cast %23 : vector<4x16x256xbf16> to vector<64x256xbf16>
    %c3 = arith.constant 3 : index
    %c0_24 = arith.constant 0 : index
    %c0_25 = arith.constant 0 : index
    %25 = vector.load %arg2[%c3, %c0_24, %c0_25] : memref<9x256x256xbf16, #tpu.memory_space<vmem>>, vector<1x256x256xbf16>
    %26 = vector.shape_cast %25 : vector<1x256x256xbf16> to vector<256x256xbf16>
    %cst_26 = arith.constant dense<0.000000e+00> : vector<64x256xf32>
    %27 = tpu.matmul %24, %26, %cst_26 {dimension_numbers = #tpu.dot_dimension_numbers<[1], [0], [0], [1], [0, 0, 1, 1], [], []>} : vector<64x256xbf16>, vector<256x256xbf16>, vector<64x256xf32> -> vector<64x256xf32>
    %28 = arith.addf %21, %27 : vector<64x256xf32>
    %c0_27 = arith.constant 0 : index
    %c2_28 = arith.constant 2 : index
    %c0_29 = arith.constant 0 : index
    %c0_30 = arith.constant 0 : index
    %29 = vector.load %arg1[%c0_27, %c2_28, %c0_29, %c0_30] : memref<1x8x32x256xbf16, #tpu.memory_space<vmem>>, vector<1x4x16x256xbf16>
    %30 = vector.shape_cast %29 : vector<1x4x16x256xbf16> to vector<4x16x256xbf16>
    %31 = vector.shape_cast %30 : vector<4x16x256xbf16> to vector<64x256xbf16>
    %c4 = arith.constant 4 : index
    %c0_31 = arith.constant 0 : index
    %c0_32 = arith.constant 0 : index
    %32 = vector.load %arg2[%c4, %c0_31, %c0_32] : memref<9x256x256xbf16, #tpu.memory_space<vmem>>, vector<1x256x256xbf16>
    %33 = vector.shape_cast %32 : vector<1x256x256xbf16> to vector<256x256xbf16>
    %cst_33 = arith.constant dense<0.000000e+00> : vector<64x256xf32>
    %34 = tpu.matmul %31, %33, %cst_33 {dimension_numbers = #tpu.dot_dimension_numbers<[1], [0], [0], [1], [0, 0, 1, 1], [], []>} : vector<64x256xbf16>, vector<256x256xbf16>, vector<64x256xf32> -> vector<64x256xf32>
    %35 = arith.addf %28, %34 : vector<64x256xf32>
    %c0_34 = arith.constant 0 : index
    %c2_35 = arith.constant 2 : index
    %c16_36 = arith.constant 16 : index
    %c0_37 = arith.constant 0 : index
    %36 = vector.load %arg1[%c0_34, %c2_35, %c16_36, %c0_37] : memref<1x8x32x256xbf16, #tpu.memory_space<vmem>>, vector<1x4x16x256xbf16>
    %37 = vector.shape_cast %36 : vector<1x4x16x256xbf16> to vector<4x16x256xbf16>
    %38 = vector.shape_cast %37 : vector<4x16x256xbf16> to vector<64x256xbf16>
    %c5 = arith.constant 5 : index
    %c0_38 = arith.constant 0 : index
    %c0_39 = arith.constant 0 : index
    %39 = vector.load %arg2[%c5, %c0_38, %c0_39] : memref<9x256x256xbf16, #tpu.memory_space<vmem>>, vector<1x256x256xbf16>
    %40 = vector.shape_cast %39 : vector<1x256x256xbf16> to vector<256x256xbf16>
    %cst_40 = arith.constant dense<0.000000e+00> : vector<64x256xf32>
    %41 = tpu.matmul %38, %40, %cst_40 {dimension_numbers = #tpu.dot_dimension_numbers<[1], [0], [0], [1], [0, 0, 1, 1], [], []>} : vector<64x256xbf16>, vector<256x256xbf16>, vector<64x256xf32> -> vector<64x256xf32>
    %42 = arith.addf %35, %41 : vector<64x256xf32>
    %c0_41 = arith.constant 0 : index
    %c3_42 = arith.constant 3 : index
    %c0_43 = arith.constant 0 : index
    %c0_44 = arith.constant 0 : index
    %43 = vector.load %arg1[%c0_41, %c3_42, %c0_43, %c0_44] : memref<1x8x32x256xbf16, #tpu.memory_space<vmem>>, vector<1x4x16x256xbf16>
    %44 = vector.shape_cast %43 : vector<1x4x16x256xbf16> to vector<4x16x256xbf16>
    %45 = vector.shape_cast %44 : vector<4x16x256xbf16> to vector<64x256xbf16>
    %c6 = arith.constant 6 : index
    %c0_45 = arith.constant 0 : index
    %c0_46 = arith.constant 0 : index
    %46 = vector.load %arg2[%c6, %c0_45, %c0_46] : memref<9x256x256xbf16, #tpu.memory_space<vmem>>, vector<1x256x256xbf16>
    %47 = vector.shape_cast %46 : vector<1x256x256xbf16> to vector<256x256xbf16>
    %cst_47 = arith.constant dense<0.000000e+00> : vector<64x256xf32>
    %48 = tpu.matmul %45, %47, %cst_47 {dimension_numbers = #tpu.dot_dimension_numbers<[1], [0], [0], [1], [0, 0, 1, 1], [], []>} : vector<64x256xbf16>, vector<256x256xbf16>, vector<64x256xf32> -> vector<64x256xf32>
    %49 = arith.addf %42, %48 : vector<64x256xf32>
    %c0_48 = arith.constant 0 : index
    %c3_49 = arith.constant 3 : index
    %c16_50 = arith.constant 16 : index
    %c0_51 = arith.constant 0 : index
    %50 = vector.load %arg1[%c0_48, %c3_49, %c16_50, %c0_51] : memref<1x8x32x256xbf16, #tpu.memory_space<vmem>>, vector<1x4x16x256xbf16>
    %51 = vector.shape_cast %50 : vector<1x4x16x256xbf16> to vector<4x16x256xbf16>
    %52 = vector.shape_cast %51 : vector<4x16x256xbf16> to vector<64x256xbf16>
    %c7 = arith.constant 7 : index
    %c0_52 = arith.constant 0 : index
    %c0_53 = arith.constant 0 : index
    %53 = vector.load %arg2[%c7, %c0_52, %c0_53] : memref<9x256x256xbf16, #tpu.memory_space<vmem>>, vector<1x256x256xbf16>
    %54 = vector.shape_cast %53 : vector<1x256x256xbf16> to vector<256x256xbf16>
    %cst_54 = arith.constant dense<0.000000e+00> : vector<64x256xf32>
    %55 = tpu.matmul %52, %54, %cst_54 {dimension_numbers = #tpu.dot_dimension_numbers<[1], [0], [0], [1], [0, 0, 1, 1], [], []>} : vector<64x256xbf16>, vector<256x256xbf16>, vector<64x256xf32> -> vector<64x256xf32>
    %56 = arith.addf %49, %55 : vector<64x256xf32>
    %c0_55 = arith.constant 0 : index
    %c4_56 = arith.constant 4 : index
    %c0_57 = arith.constant 0 : index
    %c0_58 = arith.constant 0 : index
    %57 = vector.load %arg1[%c0_55, %c4_56, %c0_57, %c0_58] : memref<1x8x32x256xbf16, #tpu.memory_space<vmem>>, vector<1x4x16x256xbf16>
    %58 = vector.shape_cast %57 : vector<1x4x16x256xbf16> to vector<4x16x256xbf16>
    %59 = vector.shape_cast %58 : vector<4x16x256xbf16> to vector<64x256xbf16>
    %c8 = arith.constant 8 : index
    %c0_59 = arith.constant 0 : index
    %c0_60 = arith.constant 0 : index
    %60 = vector.load %arg2[%c8, %c0_59, %c0_60] : memref<9x256x256xbf16, #tpu.memory_space<vmem>>, vector<1x256x256xbf16>
    %61 = vector.shape_cast %60 : vector<1x256x256xbf16> to vector<256x256xbf16>
    %cst_61 = arith.constant dense<0.000000e+00> : vector<64x256xf32>
    %62 = tpu.matmul %59, %61, %cst_61 {dimension_numbers = #tpu.dot_dimension_numbers<[1], [0], [0], [1], [0, 0, 1, 1], [], []>} : vector<64x256xbf16>, vector<256x256xbf16>, vector<64x256xf32> -> vector<64x256xf32>
    %63 = arith.addf %56, %62 : vector<64x256xf32>
    %c0_62 = arith.constant 0 : index
    %c0_63 = arith.constant 0 : index
    %64 = vector.load %arg3[%c0_62, %c0_63] : memref<1x256xf32, #tpu.memory_space<vmem>>, vector<1x256xf32>
    %65 = vector.broadcast %64 : vector<1x256xf32> to vector<64x256xf32>
    %66 = arith.addf %63, %65 : vector<64x256xf32>
    %c0_64 = arith.constant 0 : index
    %c0_65 = arith.constant 0 : index
    %c0_66 = arith.constant 0 : index
    %67 = vector.load %arg4[%c0_64, %c0_65, %c0_66] : memref<1x64x128xbf16, #tpu.memory_space<vmem>>, vector<1x64x128xbf16>
    %68 = vector.shape_cast %67 : vector<1x64x128xbf16> to vector<64x128xbf16>
    %c0_67 = arith.constant 0 : index
    %c0_68 = arith.constant 0 : index
    %69 = vector.load %arg5[%c0_67, %c0_68] : memref<128x256xbf16, #tpu.memory_space<vmem>>, vector<128x256xbf16>
    %cst_69 = arith.constant dense<0.000000e+00> : vector<64x256xf32>
    %70 = tpu.matmul %68, %69, %cst_69 {dimension_numbers = #tpu.dot_dimension_numbers<[1], [0], [0], [1], [0, 0, 1, 1], [], []>} : vector<64x128xbf16>, vector<128x256xbf16>, vector<64x256xf32> -> vector<64x256xf32>
    %71 = arith.addf %66, %70 : vector<64x256xf32>
    %c0_70 = arith.constant 0 : index
    %c0_71 = arith.constant 0 : index
    %72 = vector.load %arg6[%c0_70, %c0_71] : memref<1x256xf32, #tpu.memory_space<vmem>>, vector<1x256xf32>
    %73 = vector.broadcast %72 : vector<1x256xf32> to vector<64x256xf32>
    %74 = arith.addf %71, %73 : vector<64x256xf32>
    %cst_72 = arith.constant 0.000000e+00 : f32
    %75 = vector.broadcast %cst_72 : f32 to vector<64x256xf32>
    %76 = arith.maximumf %74, %75 : vector<64x256xf32>
    %77 = arith.truncf %76 : vector<64x256xf32> to vector<64x256xbf16>
    %c0_73 = arith.constant 0 : index
    %c0_74 = arith.constant 0 : index
    %c0_75 = arith.constant 0 : index
    %78 = vector.load %arg7[%c0_73, %c0_74, %c0_75] : memref<1x64x256xbf16, #tpu.memory_space<vmem>>, vector<1x64x256xbf16>
    %79 = vector.shape_cast %78 : vector<1x64x256xbf16> to vector<64x256xbf16>
    %80 = vector.shape_cast %77 : vector<64x256xbf16> to vector<1x64x256xbf16>
    tpu.vector_store %arg7[%c0_73, %c0_74, %c0_75], %80 {strides = array<i32>} : memref<1x64x256xbf16, #tpu.memory_space<vmem>>, vector<1x64x256xbf16>,
    return
  }
  func.func @transform_0(%arg0: i32) -> (i32, i32, i32, i32) {
    %c0_i32 = arith.constant 0 : i32
    %c0_i32_0 = arith.constant 0 : i32
    %c0_i32_1 = arith.constant 0 : i32
    %c0_i32_2 = arith.constant 0 : i32
    return %arg0, %c0_i32, %c0_i32_0, %c0_i32_1 : i32, i32, i32, i32
  }
  func.func @transform_1(%arg0: i32) -> (i32, i32, i32) {
    %c0_i32 = arith.constant 0 : i32
    %c0_i32_0 = arith.constant 0 : i32
    %c0_i32_1 = arith.constant 0 : i32
    %c0_i32_2 = arith.constant 0 : i32
    return %c0_i32, %c0_i32_0, %c0_i32_1 : i32, i32, i32
  }
  func.func @transform_2(%arg0: i32) -> (i32, i32) {
    %c0_i32 = arith.constant 0 : i32
    %c0_i32_0 = arith.constant 0 : i32
    %c0_i32_1 = arith.constant 0 : i32
    return %c0_i32, %c0_i32_0 : i32, i32
  }
  func.func @transform_3(%arg0: i32) -> (i32, i32, i32) {
    %c0_i32 = arith.constant 0 : i32
    %c0_i32_0 = arith.constant 0 : i32
    %c0_i32_1 = arith.constant 0 : i32
    return %arg0, %c0_i32, %c0_i32_0 : i32, i32, i32
  }
  func.func @transform_4(%arg0: i32) -> (i32, i32) {
    %c0_i32 = arith.constant 0 : i32
    %c0_i32_0 = arith.constant 0 : i32
    %c0_i32_1 = arith.constant 0 : i32
    return %c0_i32, %c0_i32_0 : i32, i32
  }
  func.func @transform_5(%arg0: i32) -> (i32, i32) {
    %c0_i32 = arith.constant 0 : i32
    %c0_i32_0 = arith.constant 0 : i32
    %c0_i32_1 = arith.constant 0 : i32
    return %c0_i32, %c0_i32_0 : i32, i32
  }
  func.func @transform_6(%arg0: i32) -> (i32, i32, i32) {
    %c0_i32 = arith.constant 0 : i32
    %c0_i32_0 = arith.constant 0 : i32
    %c0_i32_1 = arith.constant 0 : i32
    return %arg0, %c0_i32, %c0_i32_0 : i32, i32, i32
  }
}

module attributes {stable_mosaic.version = 11 : i64} {
  func.func @_gcn_matmul_kernel(%arg0: memref<128x1296xbf16, #tpu.memory_space<vmem>>, %arg1: memref<1296x256xbf16, #tpu.memory_space<vmem>>, %arg2: memref<128x256xbf16, #tpu.memory_space<vmem>>) attributes {dimension_semantics = [], scalar_prefetch = 0 : i64, scratch_operands = 0 : i64, tpu.core_type = #tpu.core_type<tc>} {
    %c0 = arith.constant 0 : index
    %c0_0 = arith.constant 0 : index
    %0 = vector.load %arg0[%c0, %c0_0] : memref<128x1296xbf16, #tpu.memory_space<vmem>>, vector<128x1296xbf16>
    %c0_1 = arith.constant 0 : index
    %c0_2 = arith.constant 0 : index
    %1 = vector.load %arg1[%c0_1, %c0_2] : memref<1296x256xbf16, #tpu.memory_space<vmem>>, vector<1296x256xbf16>
    %cst = arith.constant dense<0.000000e+00> : vector<128x256xf32>
    %2 = tpu.matmul %0, %1, %cst {dimension_numbers = #tpu.dot_dimension_numbers<[1], [0], [0], [1], [0, 0, 1, 1], [], []>} : vector<128x1296xbf16>, vector<1296x256xbf16>, vector<128x256xf32> -> vector<128x256xf32>
    %cst_3 = arith.constant 0.000000e+00 : f32
    %3 = vector.broadcast %cst_3 : f32 to vector<128x256xf32>
    %4 = arith.maximumf %2, %3 : vector<128x256xf32>
    %5 = arith.truncf %4 : vector<128x256xf32> to vector<128x256xbf16>
    %c0_4 = arith.constant 0 : index
    %c0_5 = arith.constant 0 : index
    %6 = vector.load %arg2[%c0_4, %c0_5] : memref<128x256xbf16, #tpu.memory_space<vmem>>, vector<128x256xbf16>
    tpu.vector_store %arg2[%c0_4, %c0_5], %5 {strides = array<i32>} : memref<128x256xbf16, #tpu.memory_space<vmem>>, vector<128x256xbf16>,
    return
  }
}

module attributes {stable_mosaic.version = 11 : i64} {
  func.func @_tconv_kernel(%arg0: i32, %arg1: memref<1x192x256xbf16, #tpu.memory_space<vmem>>, %arg2: memref<9x256x256xbf16, #tpu.memory_space<vmem>>, %arg3: memref<1x256xf32, #tpu.memory_space<vmem>>, %arg4: memref<1x64x256xbf16, #tpu.memory_space<vmem>>, %arg5: memref<1x64x256xbf16, #tpu.memory_space<vmem>>) attributes {dimension_semantics = [#tpu.dimension_semantics<parallel>], iteration_bounds = array<i64: 2>, scalar_prefetch = 0 : i64, scratch_operands = 0 : i64, tpu.core_type = #tpu.core_type<tc>, window_params = [{transform_indices = @transform_0, window_bounds = array<i64: 1, 192, 256>}, {pipeline_mode = #tpu.pipeline_mode<synchronous>, transform_indices = @transform_1, window_bounds = array<i64: 9, 256, 256>}, {pipeline_mode = #tpu.pipeline_mode<synchronous>, transform_indices = @transform_2, window_bounds = array<i64: 1, 256>}, {transform_indices = @transform_3, window_bounds = array<i64: 1, 64, 256>}, {transform_indices = @transform_4, window_bounds = array<i64: 1, 64, 256>}]} {
    %cst = arith.constant 0.000000e+00 : f32
    %0 = vector.broadcast %cst : f32 to vector<64x256xf32>
    %c0 = arith.constant 0 : index
    %c0_0 = arith.constant 0 : index
    %c0_1 = arith.constant 0 : index
    %1 = vector.load %arg1[%c0, %c0_0, %c0_1] : memref<1x192x256xbf16, #tpu.memory_space<vmem>>, vector<1x64x256xbf16>
    %2 = vector.shape_cast %1 : vector<1x64x256xbf16> to vector<64x256xbf16>
    %c0_2 = arith.constant 0 : index
    %c0_3 = arith.constant 0 : index
    %c0_4 = arith.constant 0 : index
    %3 = vector.load %arg2[%c0_2, %c0_3, %c0_4] : memref<9x256x256xbf16, #tpu.memory_space<vmem>>, vector<1x256x256xbf16>
    %4 = vector.shape_cast %3 : vector<1x256x256xbf16> to vector<256x256xbf16>
    %cst_5 = arith.constant dense<0.000000e+00> : vector<64x256xf32>
    %5 = tpu.matmul %2, %4, %cst_5 {dimension_numbers = #tpu.dot_dimension_numbers<[1], [0], [0], [1], [0, 0, 1, 1], [], []>} : vector<64x256xbf16>, vector<256x256xbf16>, vector<64x256xf32> -> vector<64x256xf32>
    %6 = arith.addf %0, %5 : vector<64x256xf32>
    %c0_6 = arith.constant 0 : index
    %c16 = arith.constant 16 : index
    %c0_7 = arith.constant 0 : index
    %7 = vector.load %arg1[%c0_6, %c16, %c0_7] : memref<1x192x256xbf16, #tpu.memory_space<vmem>>, vector<1x64x256xbf16>
    %8 = vector.shape_cast %7 : vector<1x64x256xbf16> to vector<64x256xbf16>
    %c1 = arith.constant 1 : index
    %c0_8 = arith.constant 0 : index
    %c0_9 = arith.constant 0 : index
    %9 = vector.load %arg2[%c1, %c0_8, %c0_9] : memref<9x256x256xbf16, #tpu.memory_space<vmem>>, vector<1x256x256xbf16>
    %10 = vector.shape_cast %9 : vector<1x256x256xbf16> to vector<256x256xbf16>
    %cst_10 = arith.constant dense<0.000000e+00> : vector<64x256xf32>
    %11 = tpu.matmul %8, %10, %cst_10 {dimension_numbers = #tpu.dot_dimension_numbers<[1], [0], [0], [1], [0, 0, 1, 1], [], []>} : vector<64x256xbf16>, vector<256x256xbf16>, vector<64x256xf32> -> vector<64x256xf32>
    %12 = arith.addf %6, %11 : vector<64x256xf32>
    %c0_11 = arith.constant 0 : index
    %c32 = arith.constant 32 : index
    %c0_12 = arith.constant 0 : index
    %13 = vector.load %arg1[%c0_11, %c32, %c0_12] : memref<1x192x256xbf16, #tpu.memory_space<vmem>>, vector<1x64x256xbf16>
    %14 = vector.shape_cast %13 : vector<1x64x256xbf16> to vector<64x256xbf16>
    %c2 = arith.constant 2 : index
    %c0_13 = arith.constant 0 : index
    %c0_14 = arith.constant 0 : index
    %15 = vector.load %arg2[%c2, %c0_13, %c0_14] : memref<9x256x256xbf16, #tpu.memory_space<vmem>>, vector<1x256x256xbf16>
    %16 = vector.shape_cast %15 : vector<1x256x256xbf16> to vector<256x256xbf16>
    %cst_15 = arith.constant dense<0.000000e+00> : vector<64x256xf32>
    %17 = tpu.matmul %14, %16, %cst_15 {dimension_numbers = #tpu.dot_dimension_numbers<[1], [0], [0], [1], [0, 0, 1, 1], [], []>} : vector<64x256xbf16>, vector<256x256xbf16>, vector<64x256xf32> -> vector<64x256xf32>
    %18 = arith.addf %12, %17 : vector<64x256xf32>
    %c0_16 = arith.constant 0 : index
    %c48 = arith.constant 48 : index
    %c0_17 = arith.constant 0 : index
    %19 = vector.load %arg1[%c0_16, %c48, %c0_17] : memref<1x192x256xbf16, #tpu.memory_space<vmem>>, vector<1x64x256xbf16>
    %20 = vector.shape_cast %19 : vector<1x64x256xbf16> to vector<64x256xbf16>
    %c3 = arith.constant 3 : index
    %c0_18 = arith.constant 0 : index
    %c0_19 = arith.constant 0 : index
    %21 = vector.load %arg2[%c3, %c0_18, %c0_19] : memref<9x256x256xbf16, #tpu.memory_space<vmem>>, vector<1x256x256xbf16>
    %22 = vector.shape_cast %21 : vector<1x256x256xbf16> to vector<256x256xbf16>
    %cst_20 = arith.constant dense<0.000000e+00> : vector<64x256xf32>
    %23 = tpu.matmul %20, %22, %cst_20 {dimension_numbers = #tpu.dot_dimension_numbers<[1], [0], [0], [1], [0, 0, 1, 1], [], []>} : vector<64x256xbf16>, vector<256x256xbf16>, vector<64x256xf32> -> vector<64x256xf32>
    %24 = arith.addf %18, %23 : vector<64x256xf32>
    %c0_21 = arith.constant 0 : index
    %c64 = arith.constant 64 : index
    %c0_22 = arith.constant 0 : index
    %25 = vector.load %arg1[%c0_21, %c64, %c0_22] : memref<1x192x256xbf16, #tpu.memory_space<vmem>>, vector<1x64x256xbf16>
    %26 = vector.shape_cast %25 : vector<1x64x256xbf16> to vector<64x256xbf16>
    %c4 = arith.constant 4 : index
    %c0_23 = arith.constant 0 : index
    %c0_24 = arith.constant 0 : index
    %27 = vector.load %arg2[%c4, %c0_23, %c0_24] : memref<9x256x256xbf16, #tpu.memory_space<vmem>>, vector<1x256x256xbf16>
    %28 = vector.shape_cast %27 : vector<1x256x256xbf16> to vector<256x256xbf16>
    %cst_25 = arith.constant dense<0.000000e+00> : vector<64x256xf32>
    %29 = tpu.matmul %26, %28, %cst_25 {dimension_numbers = #tpu.dot_dimension_numbers<[1], [0], [0], [1], [0, 0, 1, 1], [], []>} : vector<64x256xbf16>, vector<256x256xbf16>, vector<64x256xf32> -> vector<64x256xf32>
    %30 = arith.addf %24, %29 : vector<64x256xf32>
    %c0_26 = arith.constant 0 : index
    %c80 = arith.constant 80 : index
    %c0_27 = arith.constant 0 : index
    %31 = vector.load %arg1[%c0_26, %c80, %c0_27] : memref<1x192x256xbf16, #tpu.memory_space<vmem>>, vector<1x64x256xbf16>
    %32 = vector.shape_cast %31 : vector<1x64x256xbf16> to vector<64x256xbf16>
    %c5 = arith.constant 5 : index
    %c0_28 = arith.constant 0 : index
    %c0_29 = arith.constant 0 : index
    %33 = vector.load %arg2[%c5, %c0_28, %c0_29] : memref<9x256x256xbf16, #tpu.memory_space<vmem>>, vector<1x256x256xbf16>
    %34 = vector.shape_cast %33 : vector<1x256x256xbf16> to vector<256x256xbf16>
    %cst_30 = arith.constant dense<0.000000e+00> : vector<64x256xf32>
    %35 = tpu.matmul %32, %34, %cst_30 {dimension_numbers = #tpu.dot_dimension_numbers<[1], [0], [0], [1], [0, 0, 1, 1], [], []>} : vector<64x256xbf16>, vector<256x256xbf16>, vector<64x256xf32> -> vector<64x256xf32>
    %36 = arith.addf %30, %35 : vector<64x256xf32>
    %c0_31 = arith.constant 0 : index
    %c96 = arith.constant 96 : index
    %c0_32 = arith.constant 0 : index
    %37 = vector.load %arg1[%c0_31, %c96, %c0_32] : memref<1x192x256xbf16, #tpu.memory_space<vmem>>, vector<1x64x256xbf16>
    %38 = vector.shape_cast %37 : vector<1x64x256xbf16> to vector<64x256xbf16>
    %c6 = arith.constant 6 : index
    %c0_33 = arith.constant 0 : index
    %c0_34 = arith.constant 0 : index
    %39 = vector.load %arg2[%c6, %c0_33, %c0_34] : memref<9x256x256xbf16, #tpu.memory_space<vmem>>, vector<1x256x256xbf16>
    %40 = vector.shape_cast %39 : vector<1x256x256xbf16> to vector<256x256xbf16>
    %cst_35 = arith.constant dense<0.000000e+00> : vector<64x256xf32>
    %41 = tpu.matmul %38, %40, %cst_35 {dimension_numbers = #tpu.dot_dimension_numbers<[1], [0], [0], [1], [0, 0, 1, 1], [], []>} : vector<64x256xbf16>, vector<256x256xbf16>, vector<64x256xf32> -> vector<64x256xf32>
    %42 = arith.addf %36, %41 : vector<64x256xf32>
    %c0_36 = arith.constant 0 : index
    %c112 = arith.constant 112 : index
    %c0_37 = arith.constant 0 : index
    %43 = vector.load %arg1[%c0_36, %c112, %c0_37] : memref<1x192x256xbf16, #tpu.memory_space<vmem>>, vector<1x64x256xbf16>
    %44 = vector.shape_cast %43 : vector<1x64x256xbf16> to vector<64x256xbf16>
    %c7 = arith.constant 7 : index
    %c0_38 = arith.constant 0 : index
    %c0_39 = arith.constant 0 : index
    %45 = vector.load %arg2[%c7, %c0_38, %c0_39] : memref<9x256x256xbf16, #tpu.memory_space<vmem>>, vector<1x256x256xbf16>
    %46 = vector.shape_cast %45 : vector<1x256x256xbf16> to vector<256x256xbf16>
    %cst_40 = arith.constant dense<0.000000e+00> : vector<64x256xf32>
    %47 = tpu.matmul %44, %46, %cst_40 {dimension_numbers = #tpu.dot_dimension_numbers<[1], [0], [0], [1], [0, 0, 1, 1], [], []>} : vector<64x256xbf16>, vector<256x256xbf16>, vector<64x256xf32> -> vector<64x256xf32>
    %48 = arith.addf %42, %47 : vector<64x256xf32>
    %c0_41 = arith.constant 0 : index
    %c128 = arith.constant 128 : index
    %c0_42 = arith.constant 0 : index
    %49 = vector.load %arg1[%c0_41, %c128, %c0_42] : memref<1x192x256xbf16, #tpu.memory_space<vmem>>, vector<1x64x256xbf16>
    %50 = vector.shape_cast %49 : vector<1x64x256xbf16> to vector<64x256xbf16>
    %c8 = arith.constant 8 : index
    %c0_43 = arith.constant 0 : index
    %c0_44 = arith.constant 0 : index
    %51 = vector.load %arg2[%c8, %c0_43, %c0_44] : memref<9x256x256xbf16, #tpu.memory_space<vmem>>, vector<1x256x256xbf16>
    %52 = vector.shape_cast %51 : vector<1x256x256xbf16> to vector<256x256xbf16>
    %cst_45 = arith.constant dense<0.000000e+00> : vector<64x256xf32>
    %53 = tpu.matmul %50, %52, %cst_45 {dimension_numbers = #tpu.dot_dimension_numbers<[1], [0], [0], [1], [0, 0, 1, 1], [], []>} : vector<64x256xbf16>, vector<256x256xbf16>, vector<64x256xf32> -> vector<64x256xf32>
    %54 = arith.addf %48, %53 : vector<64x256xf32>
    %c0_46 = arith.constant 0 : index
    %c0_47 = arith.constant 0 : index
    %55 = vector.load %arg3[%c0_46, %c0_47] : memref<1x256xf32, #tpu.memory_space<vmem>>, vector<1x256xf32>
    %56 = vector.broadcast %55 : vector<1x256xf32> to vector<64x256xf32>
    %57 = arith.addf %54, %56 : vector<64x256xf32>
    %c0_48 = arith.constant 0 : index
    %c0_49 = arith.constant 0 : index
    %c0_50 = arith.constant 0 : index
    %58 = vector.load %arg4[%c0_48, %c0_49, %c0_50] : memref<1x64x256xbf16, #tpu.memory_space<vmem>>, vector<1x64x256xbf16>
    %59 = vector.shape_cast %58 : vector<1x64x256xbf16> to vector<64x256xbf16>
    %60 = arith.extf %59 : vector<64x256xbf16> to vector<64x256xf32>
    %61 = arith.addf %57, %60 : vector<64x256xf32>
    %cst_51 = arith.constant 0.000000e+00 : f32
    %62 = vector.broadcast %cst_51 : f32 to vector<64x256xf32>
    %63 = arith.maximumf %61, %62 : vector<64x256xf32>
    %64 = arith.truncf %63 : vector<64x256xf32> to vector<64x256xbf16>
    %c0_52 = arith.constant 0 : index
    %c0_53 = arith.constant 0 : index
    %c0_54 = arith.constant 0 : index
    %65 = vector.load %arg5[%c0_52, %c0_53, %c0_54] : memref<1x64x256xbf16, #tpu.memory_space<vmem>>, vector<1x64x256xbf16>
    %66 = vector.shape_cast %65 : vector<1x64x256xbf16> to vector<64x256xbf16>
    %67 = vector.shape_cast %64 : vector<64x256xbf16> to vector<1x64x256xbf16>
    tpu.vector_store %arg5[%c0_52, %c0_53, %c0_54], %67 {strides = array<i32>} : memref<1x64x256xbf16, #tpu.memory_space<vmem>>, vector<1x64x256xbf16>,
    return
  }
  func.func @transform_0(%arg0: i32) -> (i32, i32, i32) {
    %c0_i32 = arith.constant 0 : i32
    %c0_i32_0 = arith.constant 0 : i32
    %c0_i32_1 = arith.constant 0 : i32
    return %arg0, %c0_i32, %c0_i32_0 : i32, i32, i32
  }
  func.func @transform_1(%arg0: i32) -> (i32, i32, i32) {
    %c0_i32 = arith.constant 0 : i32
    %c0_i32_0 = arith.constant 0 : i32
    %c0_i32_1 = arith.constant 0 : i32
    %c0_i32_2 = arith.constant 0 : i32
    return %c0_i32, %c0_i32_0, %c0_i32_1 : i32, i32, i32
  }
  func.func @transform_2(%arg0: i32) -> (i32, i32) {
    %c0_i32 = arith.constant 0 : i32
    %c0_i32_0 = arith.constant 0 : i32
    %c0_i32_1 = arith.constant 0 : i32
    return %c0_i32, %c0_i32_0 : i32, i32
  }
  func.func @transform_3(%arg0: i32) -> (i32, i32, i32) {
    %c0_i32 = arith.constant 0 : i32
    %c0_i32_0 = arith.constant 0 : i32
    %c0_i32_1 = arith.constant 0 : i32
    return %arg0, %c0_i32, %c0_i32_0 : i32, i32, i32
  }
  func.func @transform_4(%arg0: i32) -> (i32, i32, i32) {
    %c0_i32 = arith.constant 0 : i32
    %c0_i32_0 = arith.constant 0 : i32
    %c0_i32_1 = arith.constant 0 : i32
    return %arg0, %c0_i32, %c0_i32_0 : i32, i32, i32
  }
}

module attributes {stable_mosaic.version = 11 : i64} {
  func.func @_pool_fc_kernel(%arg0: memref<2x56x256xbf16, #tpu.memory_space<vmem>>, %arg1: memref<1x256xf32, #tpu.memory_space<vmem>>, %arg2: memref<1x1xf32, #tpu.memory_space<vmem>>, %arg3: memref<2x1xf32, #tpu.memory_space<vmem>>) attributes {dimension_semantics = [], scalar_prefetch = 0 : i64, scratch_operands = 0 : i64, tpu.core_type = #tpu.core_type<tc>} {
    %c0 = arith.constant 0 : index
    %c0_0 = arith.constant 0 : index
    %c0_1 = arith.constant 0 : index
    %0 = vector.load %arg0[%c0, %c0_0, %c0_1] : memref<2x56x256xbf16, #tpu.memory_space<vmem>>, vector<2x56x256xbf16>
    %1 = arith.extf %0 : vector<2x56x256xbf16> to vector<2x56x256xf32>
    %cst = arith.constant dense<0.000000e+00> : vector<2x256xf32>
    %2 = vector.multi_reduction <add>, %1, %cst [1] : vector<2x56x256xf32> to vector<2x256xf32>
    %cst_2 = arith.constant 5.600000e+01 : f32
    %3 = vector.broadcast %cst_2 : f32 to vector<2x256xf32>
    %4 = arith.divf %2, %3 : vector<2x256xf32>
    %c0_3 = arith.constant 0 : index
    %c0_4 = arith.constant 0 : index
    %5 = vector.load %arg1[%c0_3, %c0_4] : memref<1x256xf32, #tpu.memory_space<vmem>>, vector<1x256xf32>
    %6 = vector.broadcast %5 : vector<1x256xf32> to vector<2x256xf32>
    %7 = arith.mulf %4, %6 : vector<2x256xf32>
    %cst_5 = arith.constant dense<0.000000e+00> : vector<2xf32>
    %8 = vector.multi_reduction <add>, %7, %cst_5 [1] : vector<2x256xf32> to vector<2xf32>
    %9 = vector.shape_cast %8 : vector<2xf32> to vector<2x1xf32>
    %c0_6 = arith.constant 0 : index
    %c0_7 = arith.constant 0 : index
    %10 = vector.load %arg2[%c0_6, %c0_7] : memref<1x1xf32, #tpu.memory_space<vmem>>, vector<1x1xf32>
    %11 = vector.broadcast %10 : vector<1x1xf32> to vector<2x1xf32>
    %12 = arith.addf %9, %11 : vector<2x1xf32>
    %c0_8 = arith.constant 0 : index
    %c0_9 = arith.constant 0 : index
    %13 = vector.load %arg3[%c0_8, %c0_9] : memref<2x1xf32, #tpu.memory_space<vmem>>, vector<2x1xf32>
    tpu.vector_store %arg3[%c0_8, %c0_9], %12 {strides = array<i32>} : memref<2x1xf32, #tpu.memory_space<vmem>>, vector<2x1xf32>,
    return
  }
}

</mosaic_0001>

<bundles_post_ra>
// kernel: st_gcn_forward.9
= control target key start
LH: loop header
LB: loop body
LE: loop exit
PB: predicated region body
PF: predicated region fallthrough
CT: control target
= control target key end

     0   :  { %vm256_vm0 = vcmask 293888   ;;  %vm353_vm1 = vcmask 1041408   ;;  %vm966_vm2 = vcmask 519168   ;;  %s1786_s1 = inlined_call_operand.vmem [shape: bf16[36,64], index: 1, kind: input, shape index: {}]   ;;  %s1787_s0 = inlined_call_operand.vmem [shape: bf16[512,36], index: 0, kind: input, shape index: {}]   ;;  %s1788_s2 = inlined_call_operand.vmem [shape: bf16[512,64], index: 2, kind: output, shape index: {}]  }
   0x1   :  { %v1343_v0 = vld [vmem:[%s1786_s1] sm:$0xff]   ;;  %v1344_v1 = vld [vmem:[%s1786_s1 + $0x8] sm:$0xff]   ;;  %v1345_v2 = vld [vmem:[%s1786_s1 + $0x10] ss:$0 sps:$4 sm:$0x33]  }
   0x2   :  { %1265 = vmatprep.subr.bf16.mxu0 %v1343_v0  ;;  %1335 = vmatprep.subr.bf16.mxu1 %v1343_v0  ;;  %v1346_v3 = vld [vmem:[%s1787_s0] sm:$0xff]   ;;  %v355_v5 = vsel %vm353_vm1, %v1345_v2, 0  ;;  %v1348_v6 = vld [vmem:[%s1787_s0 + $0x8] sm:$0xff]   ;;  %v1350_v8 = vld [vmem:[%s1787_s0 + $0x10] sm:$0xff]  }
   0x3   :  { %1266 = vmatpush3.bf16.msra.mxu0 %v1343_v0  ;;  %1338 = vmatpush3.bf16.msra.mxu1 %v1343_v0  ;;  %v1347_v4 = vld [vmem:[%s1787_s0 + $0x80] sm:$0xff]   ;;  %v1349_v7 = vld [vmem:[%s1787_s0 + $0x88] sm:$0xff]   ;;  %v1351_v9 = vld [vmem:[%s1787_s0 + $0x90] sm:$0xff]  }
   0x4   :  { %1267 = vmatprep.subr.bf16.mxu0 %v1344_v1  ;;  %1336 = vmatprep.subr.bf16.mxu1 %v1344_v1  ;;  %v1352_v10 = vld [vmem:[%s1787_s0 + $0x18] sm:$0xff]   ;;  %v1354_v12 = vld [vmem:[%s1787_s0 + $0x20] sm:$0xff]   ;;  %v1356_v14 = vld [vmem:[%s1787_s0 + $0x28] sm:$0xff]  }
   0x5   :  { %1271 = vmatprep.mubr.msk.bf16.mxu0 %vm256_vm0, %v1346_v3  ;;  %1303 = vmatprep.mubr.msk.bf16.mxu1 %vm256_vm0, %v1347_v4  ;;  %v1353_v11 = vld [vmem:[%s1787_s0 + $0x98] sm:$0xff]   ;;  %v1355_v13 = vld [vmem:[%s1787_s0 + $0xa0] sm:$0xff]   ;;  %v1357_v15 = vld [vmem:[%s1787_s0 + $0xa8] sm:$0xff]  }
   0x6   :  { %v1358_v16 = vld [vmem:[%s1787_s0 + $0x30] sm:$0xff]   ;;  %v1360_v18 = vld [vmem:[%s1787_s0 + $0x38] sm:$0xff]   ;;  %v1362_v20 = vld [vmem:[%s1787_s0 + $0x40] sm:$0xff]  }
   0x7   :  { %1268 = vmatpush3.bf16.msra.mxu0 %v1344_v1  ;;  %1339 = vmatpush3.bf16.msra.mxu1 %v1344_v1  ;;  %v1359_v17 = vld [vmem:[%s1787_s0 + $0xb0] sm:$0xff]   ;;  %v1361_v19 = vld [vmem:[%s1787_s0 + $0xb8] sm:$0xff]   ;;  %v1363_v21 = vld [vmem:[%s1787_s0 + $0xc0] sm:$0xff]  }
   0x8   :  { %1341 = vmatprep.subr.msk.bf16.mxu0 %vm353_vm1, %v1345_v2  ;;  %1342 = vmatprep.subr.msk.bf16.mxu1 %vm353_vm1, %v1345_v2  ;;  %v1364_v22 = vld [vmem:[%s1787_s0 + $0x48] sm:$0xff]   ;;  %v1366_v24 = vld [vmem:[%s1787_s0 + $0x50] sm:$0xff]   ;;  %v1368_v26 = vld [vmem:[%s1787_s0 + $0x58] sm:$0xff]  }
   0x9   :  { %v1365_v23 = vld [vmem:[%s1787_s0 + $0xc8] sm:$0xff]   ;;  %v1367_v25 = vld [vmem:[%s1787_s0 + $0xd0] sm:$0xff]   ;;  %v1369_v27 = vld [vmem:[%s1787_s0 + $0xd8] sm:$0xff]  }
   0xa   :  { %v1370_v28 = vld [vmem:[%s1787_s0 + $0x60] sm:$0xff]   ;;  %v1372_v30 = vld [vmem:[%s1787_s0 + $0x68] sm:$0xff]   ;;  %v1374_v32 = vld [vmem:[%s1787_s0 + $0x70] sm:$0xff]  }
   0xb   :  { %1270 = vmatpush3.bf16.msra.mxu0 %v355_v5  ;;  %1340 = vmatpush3.bf16.msra.mxu1 %v355_v5  ;;  %v1371_v29 = vld [vmem:[%s1787_s0 + $0xe0] sm:$0xff]   ;;  %v1373_v31 = vld [vmem:[%s1787_s0 + $0xe8] sm:$0xff]   ;;  %v1375_v33 = vld [vmem:[%s1787_s0 + $0xf0] sm:$0xff]  }
   0xc   :  { %v1376_v34 = vld [vmem:[%s1787_s0 + $0x78] sm:$0xff]  }
   0xd   :  { %v1377_v35 = vld [vmem:[%s1787_s0 + $0xf8] sm:$0xff]  }
   0xe   :  { %1272 = vmatmul.mubr.msk.bf16.vlgmr.msra.gmra.mrb[0].mxu0 %vm256_vm0, %v1348_v6  ;;  %1304 = vmatmul.mubr.msk.bf16.vlgmr.msra.gmra.mrb[0].mxu1 %vm256_vm0, %v1349_v7 }
   0xf   :  { %1275 = vmatprep.mubr.msk.bf16.mxu0 %vm256_vm0, %v1350_v8  ;;  %1307 = vmatprep.mubr.msk.bf16.mxu1 %vm256_vm0, %v1351_v9 }
  0x16   :  { %1276 = vmatmul.mubr.msk.bf16.gmra.mrb[4].mxu0 %vm256_vm0, %v1352_v10  ;;  %1308 = vmatmul.mubr.msk.bf16.gmra.mrb[4].mxu1 %vm256_vm0, %v1353_v11 }
  0x17   :  { %1279 = vmatprep.mubr.msk.bf16.mxu0 %vm256_vm0, %v1354_v12  ;;  %1311 = vmatprep.mubr.msk.bf16.mxu1 %vm256_vm0, %v1355_v13 }
  0x1e   :  { %1280 = vmatmul.mubr.msk.bf16.gmra.mrb[8].mxu0 %vm256_vm0, %v1356_v14  ;;  %1312 = vmatmul.mubr.msk.bf16.gmra.mrb[8].mxu1 %vm256_vm0, %v1357_v15 }
  0x1f   :  { %1283 = vmatprep.mubr.msk.bf16.mxu0 %vm256_vm0, %v1358_v16  ;;  %1315 = vmatprep.mubr.msk.bf16.mxu1 %vm256_vm0, %v1359_v17 }
  0x26   :  { %1284 = vmatmul.mubr.msk.bf16.gmra.mrb[12].mxu0 %vm256_vm0, %v1360_v18  ;;  %1316 = vmatmul.mubr.msk.bf16.gmra.mrb[12].mxu1 %vm256_vm0, %v1361_v19 }
  0x27   :  { %1287 = vmatprep.mubr.msk.bf16.mxu0 %vm256_vm0, %v1362_v20  ;;  %1319 = vmatprep.mubr.msk.bf16.mxu1 %vm256_vm0, %v1363_v21 }
  0x2e   :  { %1288 = vmatmul.mubr.msk.bf16.gmra.mrb[16].mxu0 %vm256_vm0, %v1364_v22  ;;  %1320 = vmatmul.mubr.msk.bf16.gmra.mrb[16].mxu1 %vm256_vm0, %v1365_v23 }
  0x2f   :  { %1291 = vmatprep.mubr.msk.bf16.mxu0 %vm256_vm0, %v1366_v24  ;;  %1323 = vmatprep.mubr.msk.bf16.mxu1 %vm256_vm0, %v1367_v25 }
  0x36   :  { %1292 = vmatmul.mubr.msk.bf16.gmra.mrb[20].mxu0 %vm256_vm0, %v1368_v26  ;;  %1324 = vmatmul.mubr.msk.bf16.gmra.mrb[20].mxu1 %vm256_vm0, %v1369_v27 }
  0x37   :  { %1295 = vmatprep.mubr.msk.bf16.mxu0 %vm256_vm0, %v1370_v28  ;;  %1327 = vmatprep.mubr.msk.bf16.mxu1 %vm256_vm0, %v1371_v29 }
  0x3e   :  { %1296 = vmatmul.mubr.msk.bf16.gmra.mrb[24].mxu0 %vm256_vm0, %v1372_v30  ;;  %1328 = vmatmul.mubr.msk.bf16.gmra.mrb[24].mxu1 %vm256_vm0, %v1373_v31 }
  0x3f   :  { %1299 = vmatprep.mubr.msk.bf16.mxu0 %vm256_vm0, %v1374_v32  ;;  %1331 = vmatprep.mubr.msk.bf16.mxu1 %vm256_vm0, %v1375_v33 }
  0x46   :  { %1300 = vmatmul.mubr.msk.bf16.gmra.mrb[28].mxu0 %vm256_vm0, %v1376_v34  ;;  %1332 = vmatmul.mubr.msk.bf16.gmra.mrb[28].mxu1 %vm256_vm0, %v1377_v35 }
  0xe1   :  { %v1273_v36 = vpop.f32.mrb[0].mxu0  ;;  %v1305_v37 = vpop.f32.mrb[0].mxu1 }
  0xe2   :  { %v648_v38 = vmax.f32 %v1273_v36, 0.0  ;;  %v680_v39 = vmax.f32 %v1305_v37, 0.0  ;;  %v391_v40 = vpop.f32.mrb[1].mxu0  ;;  %v519_v41 = vpop.f32.mrb[1].mxu1 }
  0xe3   :  { %v646_v42 = vmax.f32 %v391_v40, 0.0  ;;  %v678_v43 = vmax.f32 %v519_v41, 0.0  ;;  %v1274_v44 = vpop.f32.mrb[2].mxu0  ;;  %v1306_v45 = vpop.f32.mrb[2].mxu1 }
  0xe4   :  { %v1168_v46 = vpack.c.bf16 %v648_v38, %v648_v38  ;;  %v1200_v47 = vpack.c.bf16 %v680_v39, %v680_v39  ;;  %v649_v48 = vmax.f32 %v1274_v44, 0.0  ;;  %v681_v49 = vmax.f32 %v1306_v45, 0.0  ;;  %v394_v50 = vpop.f32.mrb[3].mxu0  ;;  %v522_v51 = vpop.f32.mrb[3].mxu1 }
  0xe5   :  { %v1166_v52 = vpack.c.bf16 %v646_v42, %v646_v42  ;;  %v1198_v53 = vpack.c.bf16 %v678_v43, %v678_v43  ;;  %v647_v54 = vmax.f32 %v394_v50, 0.0  ;;  %v679_v55 = vmax.f32 %v522_v51, 0.0 }
  0xe6   :  { %969 = vst.msk [vmem:[%s1788_s2 + $0x8] sm:$0xf] %vm966_vm2, %v1168_v46  ;;  %1001 = vst.msk [vmem:[%s1788_s2 + $0x88] sm:$0xf] %vm966_vm2, %v1200_v47  ;;  %v1169_v56 = vpack.c.bf16 %v649_v48, %v649_v48  ;;  %v1201_v57 = vpack.c.bf16 %v681_v49, %v681_v49 }
  0xe7   :  { %967 = vst.msk [vmem:[%s1788_s2] sm:$0xf] %vm966_vm2, %v1166_v52  ;;  %999 = vst.msk [vmem:[%s1788_s2 + $0x80] sm:$0xf] %vm966_vm2, %v1198_v53  ;;  %v1167_v58 = vpack.c.bf16 %v647_v54, %v647_v54  ;;  %v1199_v59 = vpack.c.bf16 %v679_v55, %v679_v55 }
  0xe8   :  { %970 = vst.msk [vmem:[%s1788_s2 + $0xc] sm:$0xf] %vm966_vm2, %v1169_v56  ;;  %1002 = vst.msk [vmem:[%s1788_s2 + $0x8c] sm:$0xf] %vm966_vm2, %v1201_v57 }
  0xe9   :  { %968 = vst.msk [vmem:[%s1788_s2 + $0x4] sm:$0xf] %vm966_vm2, %v1167_v58  ;;  %1000 = vst.msk [vmem:[%s1788_s2 + $0x84] sm:$0xf] %vm966_vm2, %v1199_v59  ;;  %v1277_v60 = vpop.f32.mrb[4].mxu0  ;;  %v1309_v61 = vpop.f32.mrb[4].mxu1 }
  0xea   :  { %v652_v62 = vmax.f32 %v1277_v60, 0.0  ;;  %v684_v63 = vmax.f32 %v1309_v61, 0.0  ;;  %v407_v0 = vpop.f32.mrb[5].mxu0  ;;  %v535_v1 = vpop.f32.mrb[5].mxu1 }
  0xeb   :  { %v650_v2 = vmax.f32 %v407_v0, 0.0  ;;  %v682_v3 = vmax.f32 %v535_v1, 0.0  ;;  %v1278_v4 = vpop.f32.mrb[6].mxu0  ;;  %v1310_v5 = vpop.f32.mrb[6].mxu1 }
  0xec   :  { %v1172_v6 = vpack.c.bf16 %v652_v62, %v652_v62  ;;  %v1204_v7 = vpack.c.bf16 %v684_v63, %v684_v63  ;;  %v653_v8 = vmax.f32 %v1278_v4, 0.0  ;;  %v685_v9 = vmax.f32 %v1310_v5, 0.0  ;;  %v410_v10 = vpop.f32.mrb[7].mxu0  ;;  %v538_v11 = vpop.f32.mrb[7].mxu1 }
  0xed   :  { %v1170_v12 = vpack.c.bf16 %v650_v2, %v650_v2  ;;  %v1202_v13 = vpack.c.bf16 %v682_v3, %v682_v3  ;;  %v651_v14 = vmax.f32 %v410_v10, 0.0  ;;  %v683_v15 = vmax.f32 %v538_v11, 0.0 }
  0xee   :  { %973 = vst.msk [vmem:[%s1788_s2 + $0x18] sm:$0xf] %vm966_vm2, %v1172_v6  ;;  %1005 = vst.msk [vmem:[%s1788_s2 + $0x98] sm:$0xf] %vm966_vm2, %v1204_v7  ;;  %v1173_v16 = vpack.c.bf16 %v653_v8, %v653_v8  ;;  %v1205_v17 = vpack.c.bf16 %v685_v9, %v685_v9 }
  0xef   :  { %971 = vst.msk [vmem:[%s1788_s2 + $0x10] sm:$0xf] %vm966_vm2, %v1170_v12  ;;  %1003 = vst.msk [vmem:[%s1788_s2 + $0x90] sm:$0xf] %vm966_vm2, %v1202_v13  ;;  %v1171_v18 = vpack.c.bf16 %v651_v14, %v651_v14  ;;  %v1203_v19 = vpack.c.bf16 %v683_v15, %v683_v15 }
  0xf0   :  { %974 = vst.msk [vmem:[%s1788_s2 + $0x1c] sm:$0xf] %vm966_vm2, %v1173_v16  ;;  %1006 = vst.msk [vmem:[%s1788_s2 + $0x9c] sm:$0xf] %vm966_vm2, %v1205_v17 }
  0xf1   :  { %972 = vst.msk [vmem:[%s1788_s2 + $0x14] sm:$0xf] %vm966_vm2, %v1171_v18  ;;  %1004 = vst.msk [vmem:[%s1788_s2 + $0x94] sm:$0xf] %vm966_vm2, %v1203_v19  ;;  %v1281_v20 = vpop.f32.mrb[8].mxu0  ;;  %v1313_v21 = vpop.f32.mrb[8].mxu1 }
  0xf2   :  { %v656_v22 = vmax.f32 %v1281_v20, 0.0  ;;  %v688_v23 = vmax.f32 %v1313_v21, 0.0  ;;  %v423_v24 = vpop.f32.mrb[9].mxu0  ;;  %v551_v25 = vpop.f32.mrb[9].mxu1 }
  0xf3   :  { %v654_v26 = vmax.f32 %v423_v24, 0.0  ;;  %v686_v27 = vmax.f32 %v551_v25, 0.0  ;;  %v1282_v28 = vpop.f32.mrb[10].mxu0  ;;  %v1314_v29 = vpop.f32.mrb[10].mxu1 }
  0xf4   :  { %v1176_v30 = vpack.c.bf16 %v656_v22, %v656_v22  ;;  %v1208_v31 = vpack.c.bf16 %v688_v23, %v688_v23  ;;  %v657_v32 = vmax.f32 %v1282_v28, 0.0  ;;  %v689_v33 = vmax.f32 %v1314_v29, 0.0  ;;  %v426_v34 = vpop.f32.mrb[11].mxu0  ;;  %v554_v35 = vpop.f32.mrb[11].mxu1 }
  0xf5   :  { %v1174_v36 = vpack.c.bf16 %v654_v26, %v654_v26  ;;  %v1206_v37 = vpack.c.bf16 %v686_v27, %v686_v27  ;;  %v655_v38 = vmax.f32 %v426_v34, 0.0  ;;  %v687_v39 = vmax.f32 %v554_v35, 0.0 }
  0xf6   :  { %977 = vst.msk [vmem:[%s1788_s2 + $0x28] sm:$0xf] %vm966_vm2, %v1176_v30  ;;  %1009 = vst.msk [vmem:[%s1788_s2 + $0xa8] sm:$0xf] %vm966_vm2, %v1208_v31  ;;  %v1177_v40 = vpack.c.bf16 %v657_v32, %v657_v32  ;;  %v1209_v41 = vpack.c.bf16 %v689_v33, %v689_v33 }
  0xf7   :  { %975 = vst.msk [vmem:[%s1788_s2 + $0x20] sm:$0xf] %vm966_vm2, %v1174_v36  ;;  %1007 = vst.msk [vmem:[%s1788_s2 + $0xa0] sm:$0xf] %vm966_vm2, %v1206_v37  ;;  %v1175_v42 = vpack.c.bf16 %v655_v38, %v655_v38  ;;  %v1207_v43 = vpack.c.bf16 %v687_v39, %v687_v39 }
  0xf8   :  { %978 = vst.msk [vmem:[%s1788_s2 + $0x2c] sm:$0xf] %vm966_vm2, %v1177_v40  ;;  %1010 = vst.msk [vmem:[%s1788_s2 + $0xac] sm:$0xf] %vm966_vm2, %v1209_v41 }
  0xf9   :  { %976 = vst.msk [vmem:[%s1788_s2 + $0x24] sm:$0xf] %vm966_vm2, %v1175_v42  ;;  %1008 = vst.msk [vmem:[%s1788_s2 + $0xa4] sm:$0xf] %vm966_vm2, %v1207_v43  ;;  %v1285_v44 = vpop.f32.mrb[12].mxu0  ;;  %v1317_v45 = vpop.f32.mrb[12].mxu1 }
  0xfa   :  { %v660_v46 = vmax.f32 %v1285_v44, 0.0  ;;  %v692_v47 = vmax.f32 %v1317_v45, 0.0  ;;  %v439_v48 = vpop.f32.mrb[13].mxu0  ;;  %v567_v49 = vpop.f32.mrb[13].mxu1 }
  0xfb   :  { %v658_v50 = vmax.f32 %v439_v48, 0.0  ;;  %v690_v51 = vmax.f32 %v567_v49, 0.0  ;;  %v1286_v52 = vpop.f32.mrb[14].mxu0  ;;  %v1318_v53 = vpop.f32.mrb[14].mxu1 }
  0xfc   :  { %v1180_v54 = vpack.c.bf16 %v660_v46, %v660_v46  ;;  %v1212_v55 = vpack.c.bf16 %v692_v47, %v692_v47  ;;  %v661_v56 = vmax.f32 %v1286_v52, 0.0  ;;  %v693_v57 = vmax.f32 %v1318_v53, 0.0  ;;  %v442_v58 = vpop.f32.mrb[15].mxu0  ;;  %v570_v59 = vpop.f32.mrb[15].mxu1 }
  0xfd   :  { %v1178_v60 = vpack.c.bf16 %v658_v50, %v658_v50  ;;  %v1210_v61 = vpack.c.bf16 %v690_v51, %v690_v51  ;;  %v659_v62 = vmax.f32 %v442_v58, 0.0  ;;  %v691_v63 = vmax.f32 %v570_v59, 0.0 }
  0xfe   :  { %981 = vst.msk [vmem:[%s1788_s2 + $0x38] sm:$0xf] %vm966_vm2, %v1180_v54  ;;  %1013 = vst.msk [vmem:[%s1788_s2 + $0xb8] sm:$0xf] %vm966_vm2, %v1212_v55  ;;  %v1181_v0 = vpack.c.bf16 %v661_v56, %v661_v56  ;;  %v1213_v1 = vpack.c.bf16 %v693_v57, %v693_v57 }
  0xff   :  { %979 = vst.msk [vmem:[%s1788_s2 + $0x30] sm:$0xf] %vm966_vm2, %v1178_v60  ;;  %1011 = vst.msk [vmem:[%s1788_s2 + $0xb0] sm:$0xf] %vm966_vm2, %v1210_v61  ;;  %v1179_v2 = vpack.c.bf16 %v659_v62, %v659_v62  ;;  %v1211_v3 = vpack.c.bf16 %v691_v63, %v691_v63 }
 0x100   :  { %982 = vst.msk [vmem:[%s1788_s2 + $0x3c] sm:$0xf] %vm966_vm2, %v1181_v0  ;;  %1014 = vst.msk [vmem:[%s1788_s2 + $0xbc] sm:$0xf] %vm966_vm2, %v1213_v1 }
 0x101   :  { %980 = vst.msk [vmem:[%s1788_s2 + $0x34] sm:$0xf] %vm966_vm2, %v1179_v2  ;;  %1012 = vst.msk [vmem:[%s1788_s2 + $0xb4] sm:$0xf] %vm966_vm2, %v1211_v3  ;;  %v1289_v4 = vpop.f32.mrb[16].mxu0  ;;  %v1321_v5 = vpop.f32.mrb[16].mxu1 }
 0x102   :  { %v664_v6 = vmax.f32 %v1289_v4, 0.0  ;;  %v696_v7 = vmax.f32 %v1321_v5, 0.0  ;;  %v455_v8 = vpop.f32.mrb[17].mxu0  ;;  %v583_v9 = vpop.f32.mrb[17].mxu1 }
 0x103   :  { %v662_v10 = vmax.f32 %v455_v8, 0.0  ;;  %v694_v11 = vmax.f32 %v583_v9, 0.0  ;;  %v1290_v12 = vpop.f32.mrb[18].mxu0  ;;  %v1322_v13 = vpop.f32.mrb[18].mxu1 }
 0x104   :  { %v1184_v14 = vpack.c.bf16 %v664_v6, %v664_v6  ;;  %v1216_v15 = vpack.c.bf16 %v696_v7, %v696_v7  ;;  %v665_v16 = vmax.f32 %v1290_v12, 0.0  ;;  %v697_v17 = vmax.f32 %v1322_v13, 0.0  ;;  %v458_v18 = vpop.f32.mrb[19].mxu0  ;;  %v586_v19 = vpop.f32.mrb[19].mxu1 }
 0x105   :  { %v1182_v20 = vpack.c.bf16 %v662_v10, %v662_v10  ;;  %v1214_v21 = vpack.c.bf16 %v694_v11, %v694_v11  ;;  %v663_v22 = vmax.f32 %v458_v18, 0.0  ;;  %v695_v23 = vmax.f32 %v586_v19, 0.0 }
 0x106   :  { %985 = vst.msk [vmem:[%s1788_s2 + $0x48] sm:$0xf] %vm966_vm2, %v1184_v14  ;;  %1017 = vst.msk [vmem:[%s1788_s2 + $0xc8] sm:$0xf] %vm966_vm2, %v1216_v15  ;;  %v1185_v24 = vpack.c.bf16 %v665_v16, %v665_v16  ;;  %v1217_v25 = vpack.c.bf16 %v697_v17, %v697_v17 }
 0x107   :  { %983 = vst.msk [vmem:[%s1788_s2 + $0x40] sm:$0xf] %vm966_vm2, %v1182_v20  ;;  %1015 = vst.msk [vmem:[%s1788_s2 + $0xc0] sm:$0xf] %vm966_vm2, %v1214_v21  ;;  %v1183_v26 = vpack.c.bf16 %v663_v22, %v663_v22  ;;  %v1215_v27 = vpack.c.bf16 %v695_v23, %v695_v23 }
 0x108   :  { %986 = vst.msk [vmem:[%s1788_s2 + $0x4c] sm:$0xf] %vm966_vm2, %v1185_v24  ;;  %1018 = vst.msk [vmem:[%s1788_s2 + $0xcc] sm:$0xf] %vm966_vm2, %v1217_v25 }
 0x109   :  { %984 = vst.msk [vmem:[%s1788_s2 + $0x44] sm:$0xf] %vm966_vm2, %v1183_v26  ;;  %1016 = vst.msk [vmem:[%s1788_s2 + $0xc4] sm:$0xf] %vm966_vm2, %v1215_v27  ;;  %v1293_v28 = vpop.f32.mrb[20].mxu0  ;;  %v1325_v29 = vpop.f32.mrb[20].mxu1 }
 0x10a   :  { %v668_v30 = vmax.f32 %v1293_v28, 0.0  ;;  %v700_v31 = vmax.f32 %v1325_v29, 0.0  ;;  %v471_v32 = vpop.f32.mrb[21].mxu0  ;;  %v599_v33 = vpop.f32.mrb[21].mxu1 }
 0x10b   :  { %v666_v34 = vmax.f32 %v471_v32, 0.0  ;;  %v698_v35 = vmax.f32 %v599_v33, 0.0  ;;  %v1294_v36 = vpop.f32.mrb[22].mxu0  ;;  %v1326_v37 = vpop.f32.mrb[22].mxu1 }
 0x10c   :  { %v1188_v38 = vpack.c.bf16 %v668_v30, %v668_v30  ;;  %v1220_v39 = vpack.c.bf16 %v700_v31, %v700_v31  ;;  %v669_v40 = vmax.f32 %v1294_v36, 0.0  ;;  %v701_v41 = vmax.f32 %v1326_v37, 0.0  ;;  %v474_v42 = vpop.f32.mrb[23].mxu0  ;;  %v602_v43 = vpop.f32.mrb[23].mxu1 }
 0x10d   :  { %v1186_v44 = vpack.c.bf16 %v666_v34, %v666_v34  ;;  %v1218_v45 = vpack.c.bf16 %v698_v35, %v698_v35  ;;  %v667_v46 = vmax.f32 %v474_v42, 0.0  ;;  %v699_v47 = vmax.f32 %v602_v43, 0.0 }
 0x10e   :  { %989 = vst.msk [vmem:[%s1788_s2 + $0x58] sm:$0xf] %vm966_vm2, %v1188_v38  ;;  %1021 = vst.msk [vmem:[%s1788_s2 + $0xd8] sm:$0xf] %vm966_vm2, %v1220_v39  ;;  %v1189_v48 = vpack.c.bf16 %v669_v40, %v669_v40  ;;  %v1221_v49 = vpack.c.bf16 %v701_v41, %v701_v41 }
 0x10f   :  { %987 = vst.msk [vmem:[%s1788_s2 + $0x50] sm:$0xf] %vm966_vm2, %v1186_v44  ;;  %1019 = vst.msk [vmem:[%s1788_s2 + $0xd0] sm:$0xf] %vm966_vm2, %v1218_v45  ;;  %v1187_v50 = vpack.c.bf16 %v667_v46, %v667_v46  ;;  %v1219_v51 = vpack.c.bf16 %v699_v47, %v699_v47 }
 0x110   :  { %990 = vst.msk [vmem:[%s1788_s2 + $0x5c] sm:$0xf] %vm966_vm2, %v1189_v48  ;;  %1022 = vst.msk [vmem:[%s1788_s2 + $0xdc] sm:$0xf] %vm966_vm2, %v1221_v49 }
 0x111   :  { %988 = vst.msk [vmem:[%s1788_s2 + $0x54] sm:$0xf] %vm966_vm2, %v1187_v50  ;;  %1020 = vst.msk [vmem:[%s1788_s2 + $0xd4] sm:$0xf] %vm966_vm2, %v1219_v51  ;;  %v1297_v52 = vpop.f32.mrb[24].mxu0  ;;  %v1329_v53 = vpop.f32.mrb[24].mxu1 }
 0x112   :  { %v672_v54 = vmax.f32 %v1297_v52, 0.0  ;;  %v704_v55 = vmax.f32 %v1329_v53, 0.0  ;;  %v487_v56 = vpop.f32.mrb[25].mxu0  ;;  %v615_v57 = vpop.f32.mrb[25].mxu1 }
 0x113   :  { %v670_v58 = vmax.f32 %v487_v56, 0.0  ;;  %v702_v59 = vmax.f32 %v615_v57, 0.0  ;;  %v1298_v60 = vpop.f32.mrb[26].mxu0  ;;  %v1330_v61 = vpop.f32.mrb[26].mxu1 }
 0x114   :  { %v1192_v62 = vpack.c.bf16 %v672_v54, %v672_v54  ;;  %v1224_v63 = vpack.c.bf16 %v704_v55, %v704_v55  ;;  %v673_v0 = vmax.f32 %v1298_v60, 0.0  ;;  %v705_v1 = vmax.f32 %v1330_v61, 0.0  ;;  %v490_v2 = vpop.f32.mrb[27].mxu0  ;;  %v618_v3 = vpop.f32.mrb[27].mxu1 }
 0x115   :  { %v1190_v4 = vpack.c.bf16 %v670_v58, %v670_v58  ;;  %v1222_v5 = vpack.c.bf16 %v702_v59, %v702_v59  ;;  %v671_v6 = vmax.f32 %v490_v2, 0.0  ;;  %v703_v7 = vmax.f32 %v618_v3, 0.0 }
 0x116   :  { %993 = vst.msk [vmem:[%s1788_s2 + $0x68] sm:$0xf] %vm966_vm2, %v1192_v62  ;;  %1025 = vst.msk [vmem:[%s1788_s2 + $0xe8] sm:$0xf] %vm966_vm2, %v1224_v63  ;;  %v1193_v8 = vpack.c.bf16 %v673_v0, %v673_v0  ;;  %v1225_v9 = vpack.c.bf16 %v705_v1, %v705_v1 }
 0x117   :  { %991 = vst.msk [vmem:[%s1788_s2 + $0x60] sm:$0xf] %vm966_vm2, %v1190_v4  ;;  %1023 = vst.msk [vmem:[%s1788_s2 + $0xe0] sm:$0xf] %vm966_vm2, %v1222_v5  ;;  %v1191_v10 = vpack.c.bf16 %v671_v6, %v671_v6  ;;  %v1223_v11 = vpack.c.bf16 %v703_v7, %v703_v7 }
 0x118   :  { %994 = vst.msk [vmem:[%s1788_s2 + $0x6c] sm:$0xf] %vm966_vm2, %v1193_v8  ;;  %1026 = vst.msk [vmem:[%s1788_s2 + $0xec] sm:$0xf] %vm966_vm2, %v1225_v9 }
 0x119   :  { %992 = vst.msk [vmem:[%s1788_s2 + $0x64] sm:$0xf] %vm966_vm2, %v1191_v10  ;;  %1024 = vst.msk [vmem:[%s1788_s2 + $0xe4] sm:$0xf] %vm966_vm2, %v1223_v11  ;;  %v1301_v12 = vpop.f32.mrb[28].mxu0  ;;  %v1333_v13 = vpop.f32.mrb[28].mxu1 }
 0x11a   :  { %v676_v14 = vmax.f32 %v1301_v12, 0.0  ;;  %v708_v15 = vmax.f32 %v1333_v13, 0.0  ;;  %v503_v16 = vpop.f32.mrb[29].mxu0  ;;  %v631_v17 = vpop.f32.mrb[29].mxu1 }
 0x11b   :  { %v674_v18 = vmax.f32 %v503_v16, 0.0  ;;  %v706_v19 = vmax.f32 %v631_v17, 0.0  ;;  %v1302_v20 = vpop.f32.mrb[30].mxu0  ;;  %v1334_v21 = vpop.f32.mrb[30].mxu1 }
 0x11c   :  { %v1196_v22 = vpack.c.bf16 %v676_v14, %v676_v14  ;;  %v1228_v23 = vpack.c.bf16 %v708_v15, %v708_v15  ;;  %v677_v24 = vmax.f32 %v1302_v20, 0.0  ;;  %v709_v25 = vmax.f32 %v1334_v21, 0.0  ;;  %v506_v26 = vpop.f32.mrb[31].mxu0  ;;  %v634_v27 = vpop.f32.mrb[31].mxu1 }
 0x11d   :  { %v1194_v28 = vpack.c.bf16 %v674_v18, %v674_v18  ;;  %v1226_v29 = vpack.c.bf16 %v706_v19, %v706_v19  ;;  %v675_v30 = vmax.f32 %v506_v26, 0.0  ;;  %v707_v31 = vmax.f32 %v634_v27, 0.0 }
 0x11e   :  { %997 = vst.msk [vmem:[%s1788_s2 + $0x78] sm:$0xf] %vm966_vm2, %v1196_v22  ;;  %1029 = vst.msk [vmem:[%s1788_s2 + $0xf8] sm:$0xf] %vm966_vm2, %v1228_v23  ;;  %v1197_v32 = vpack.c.bf16 %v677_v24, %v677_v24  ;;  %v1229_v33 = vpack.c.bf16 %v709_v25, %v709_v25 }
 0x11f   :  { %995 = vst.msk [vmem:[%s1788_s2 + $0x70] sm:$0xf] %vm966_vm2, %v1194_v28  ;;  %1027 = vst.msk [vmem:[%s1788_s2 + $0xf0] sm:$0xf] %vm966_vm2, %v1226_v29  ;;  %v1195_v34 = vpack.c.bf16 %v675_v30, %v675_v30  ;;  %v1227_v35 = vpack.c.bf16 %v707_v31, %v707_v31 }
 0x120   :  { %998 = vst.msk [vmem:[%s1788_s2 + $0x7c] sm:$0xf] %vm966_vm2, %v1197_v32  ;;  %1030 = vst.msk [vmem:[%s1788_s2 + $0xfc] sm:$0xf] %vm966_vm2, %v1229_v33 }
 0x121   :  { %996 = vst.msk [vmem:[%s1788_s2 + $0x74] sm:$0xf] %vm966_vm2, %v1195_v34  ;;  %1028 = vst.msk [vmem:[%s1788_s2 + $0xf4] sm:$0xf] %vm966_vm2, %v1227_v35 }

// kernel: st_gcn_forward.10
= control target key start
LH: loop header
LB: loop body
LE: loop exit
PB: predicated region body
PF: predicated region fallthrough
CT: control target
= control target key end

     0   :  { %s4985_s12 = smov 0   ;;  %s5548_s0 = inlined_call_operand.vmem [shape: bf16[2,384,64], index: 0, kind: input, shape index: {}]   ;;  %s5549_s1 = inlined_call_operand.vmem [shape: bf16[9,64,64], index: 1, kind: input, shape index: {}]   ;;  %s5550_s2 = inlined_call_operand.vmem [shape: f32[1,64], index: 2, kind: input, shape index: {}]   ;;  %s5551_s3 = inlined_call_operand.vmem [shape: bf16[2,256,64], index: 3, kind: output, shape index: {}]  }
   0x1 LB: > { %s3590_s13 = sadd.s32 4294967295, %s4963_s12   ;;  %p3594_p0 = scmp.ge.s32.totalorder %s4963_s12, 1  ;;  %s4963_s12 = sphi %s4985_s12, %s13_s12  }
   0x2   : > { %p137_p1 = scmp.lt.s32.totalorder %s4963_s12, 3 }
   0x4   : > { %p138_p2 = pnand %p3594_p0, %p137_p1 }
   0x5   : > { %v4788_v0 = vld [vmem:[%s5549_s1 + $0x20] sm:$0xff] (!%p138_p2)   ;;  %p161_p3 = scmp.lt.s32.totalorder (!%p138_p2), %s3590_s13, 1  ;;  %v4790_v2 = vld [vmem:[%s5549_s1 + $0x28] sm:$0xff] (!%p138_p2)   ;;  %v4792_v4 = vld [vmem:[%s5549_s1 + $0x30] sm:$0xff] (!%p138_p2)   ;;  %vm327_vm0 = vcmask (!%p138_p2), 523264  }
   0x6   : > { %141 = sbr.rel (%p138_p2) target bundleno = 527 (0x20f), region = 32  ;;  %v4789_v1 = vld [vmem:[%s5549_s1 + $0x80] sm:$0xff] (!%p138_p2)   ;;  %4155 = vmatprep.subr.bf16.mxu1 (!%p138_p2), %v4788_v0  ;;  %v4791_v3 = vld [vmem:[%s5549_s1 + $0x88] sm:$0xff] (!%p138_p2)   ;;  %v4793_v5 = vld [vmem:[%s5549_s1 + $0x90] sm:$0xff] (!%p138_p2)  }
   0x7   : > { %4315 = vmatprep.subr.bf16.mxu0 (!%p138_p2), %v4789_v1  ;;  %4156 = vmatpush3.bf16.msra.mxu1 (!%p138_p2), %v4788_v0  ;;  %v4794_v6 = vld [vmem:[%s5549_s1 + $0x38] sm:$0xff] (!%p138_p2)   ;;  %v4799_v10 = vld [vmem:[%s5549_s1] sm:$0xff] (!%p138_p2)   ;;  %v4806_v16 = vld [vmem:[%s5549_s1 + $0xa8] sm:$0xff] (!%p138_p2)  }
   0x8   : > { %4316 = vmatpush3.bf16.msra.mxu0 (!%p138_p2), %v4789_v1  ;;  %4157 = vmatprep.subr.bf16.mxu1 (!%p138_p2), %v4790_v2  ;;  %v4795_v7 = vld [vmem:[%s5549_s1 + $0x98] sm:$0xff] (!%p138_p2)   ;;  %v4801_v11 = vld [vmem:[%s5549_s1 + $0xa0] sm:$0xff] (!%p138_p2)   ;;  %v4810_v20 = vld [vmem:[%s5549_s1 + $0x8] sm:$0xff] (!%p138_p2)  }
   0x9   : > { %4317 = vmatprep.subr.bf16.mxu0 (!%p138_p2), %v4791_v3  ;;  %v4812_v22 = vld [vmem:[%s5549_s1 + $0xb0] sm:$0xff] (!%p138_p2)   ;;  %v4817_v24 = vld [vmem:[%s5549_s1 + $0xb8] sm:$0xff] (!%p138_p2)   ;;  %v4823_v29 = vld [vmem:[%s5549_s1 + $0xc0] sm:$0xff] (!%p138_p2)  }
   0xa   : > { %v4821_v28 = vld [vmem:[%s5549_s1 + $0x10] sm:$0xff] (!%p138_p2)   ;;  %v4831_v34 = vld [vmem:[%s5549_s1 + $0x18] sm:$0xff] (!%p138_p2)   ;;  %v4833_v39 = vld [vmem:[%s5549_s1 + $0xc8] sm:$0xff] (!%p138_p2)  }
   0xb   : > { %4158 = vmatpush3.bf16.msra.mxu1 (!%p138_p2), %v4790_v2  ;;  %v4840_v41 = vld [vmem:[%s5549_s1 + $0x40] sm:$0xff] (!%p138_p2)   ;;  %v4842_v43 = vld [vmem:[%s5549_s1 + $0xd0] sm:$0xff] (!%p138_p2)   ;;  %v4848_v46 = vld [vmem:[%s5549_s1 + $0xd8] sm:$0xff] (!%p138_p2)  }
   0xc   : > { %4318 = vmatpush3.bf16.msra.mxu0 (!%p138_p2), %v4791_v3  ;;  %4159 = vmatprep.subr.bf16.mxu1 (!%p138_p2), %v4792_v4  ;;  %v4854_v51 = vld [vmem:[%s5549_s1 + $0xe0] sm:$0xff] (!%p138_p2)   ;;  %v4846_v58 = vld [vmem:[%s5549_s1 + $0x48] sm:$0xff] (!%p138_p2)   ;;  %v4852_v59 = vld [vmem:[%s5549_s1 + $0x50] sm:$0xff] (!%p138_p2)  }
   0xd   : > { %s5553_s13 = smov (!%p161_p3, %s3590_s13), 1  ;;  %4319 = vmatprep.subr.bf16.mxu0 %v4793_v5  ;;  %v4858_v62 = vld [vmem:[%s5549_s1 + $0x58] sm:$0xff]   ;;  %v4866_v63 = vld [vmem:[%s5549_s1 + $0x60] sm:$0xff]  }
   0xe   : > { %s4779_s24 = smul.u32 192, %s5553_s13  ;;  %s3974_s26 = sshll.u32 %s5553_s13, 7 }
   0xf   : > { %4160 = vmatpush3.bf16.msra.mxu1 %v4792_v4  ;;  %s5479_s29 = scalar_lea.vmem %s5551_s3, %s3974_s26 }
  0x10   : > { %s5020_s4 = scalar_lea.vmem %s5548_s0, %s4779_s24  ;;  %4320 = vmatpush3.bf16.msra.mxu0 %v4793_v5  ;;  %4161 = vmatprep.subr.bf16.mxu1 %v4794_v6 }
  0x11   : > { %v5026_v8 = vld [vmem:[%s5020_s4 + $0x8] sm:$0xff]   ;;  %v4797_v9 = vld [vmem:[%s5020_s4 + $0x20] sm:$0xff]   ;;  %4321 = vmatprep.subr.bf16.mxu0 %v4795_v7  ;;  %v5039_v12 = vld [vmem:[%s5020_s4 + $0x10] sm:$0xff]  }
  0x12   : > { %4163 = vmatprep.mubr.msk.bf16.mxu1 %vm327_vm0, %v5026_v8  ;;  %4323 = vmatprep.mubr.msk.bf16.mxu0 %vm327_vm0, %v4797_v9  ;;  %v4800_v13 = vld [vmem:[%s5020_s4 + $0x28] sm:$0xff]   ;;  %v5043_v14 = vld [vmem:[%s5020_s4 + $0x18] sm:$0xff]   ;;  %v4803_v15 = vld [vmem:[%s5020_s4 + $0x30] sm:$0xff]  }
  0x13   : > { %4162 = vmatpush3.bf16.msra.mxu1 %v4794_v6  ;;  %v5055_v17 = vld [vmem:[%s5020_s4 + $0x20] sm:$0xff]   ;;  %v4805_v18 = vld [vmem:[%s5020_s4 + $0x38] sm:$0xff]   ;;  %v5060_v19 = vld [vmem:[%s5020_s4 + $0x28] sm:$0xff]  }
  0x14   : > { %4322 = vmatpush3.bf16.msra.mxu0 %v4795_v7  ;;  %4195 = vmatprep.subr.bf16.mxu1 %v4799_v10  ;;  %v4808_v21 = vld [vmem:[%s5020_s4 + $0x40] sm:$0xff]   ;;  %v5076_v23 = vld [vmem:[%s5020_s4 + $0x30] sm:$0xff]   ;;  %v4811_v25 = vld [vmem:[%s5020_s4 + $0x48] sm:$0xff]  }
  0x15   : > { %4355 = vmatprep.subr.bf16.mxu0 %v4801_v11  ;;  %v5083_v26 = vld [vmem:[%s5020_s4 + $0x38] sm:$0xff]   ;;  %v4814_v27 = vld [vmem:[%s5020_s4 + $0x50] sm:$0xff]   ;;  %v5099_v30 = vld [vmem:[%s5020_s4 + $0x40] sm:$0xff]  }
  0x16   : > { %4164 = vmatmul.mubr.msk.bf16.vlgmr.msra.gmra.mrb[0].mxu1 %vm327_vm0, %v5039_v12  ;;  %v4816_v31 = vld [vmem:[%s5020_s4 + $0x58] sm:$0xff]   ;;  %v5103_v32 = vld [vmem:[%s5020_s4 + $0x48] sm:$0xff]   ;;  %v5116_v35 = vld [vmem:[%s5020_s4 + $0x50] sm:$0xff]  }
  0x17   : > { %4324 = vmatmul.mubr.msk.bf16.vlgmr.msra.gmra.mrb[0].mxu0 %vm327_vm0, %v4800_v13  ;;  %4196 = vmatpush3.bf16.msra.mxu1 %v4799_v10  ;;  %v4819_v33 = vld [vmem:[%s5020_s4 + $0x28] sm:$0xff]   ;;  %v4822_v36 = vld [vmem:[%s5020_s4 + $0x30] sm:$0xff]   ;;  %v5120_v37 = vld [vmem:[%s5020_s4 + $0x58] sm:$0xff]  }
  0x18   : > { %4356 = vmatpush3.bf16.msra.mxu0 %v4801_v11  ;;  %4167 = vmatprep.mubr.msk.bf16.mxu1 %vm327_vm0, %v5043_v14  ;;  %v4825_v38 = vld [vmem:[%s5020_s4 + $0x38] sm:$0xff]   ;;  %v5133_v40 = vld [vmem:[%s5020_s4 + $0x60] sm:$0xff]   ;;  %v5143_v44 = vld [vmem:[%s5020_s4 + $0x68] sm:$0xff]  }
  0x19   : > { %4327 = vmatprep.mubr.msk.bf16.mxu0 %vm327_vm0, %v4803_v15  ;;  %4357 = vmatprep.subr.bf16.mxu0 %v4806_v16  ;;  %v4827_v42 = vld [vmem:[%s5020_s4 + $0x40] sm:$0xff]   ;;  %v4829_v45 = vld [vmem:[%s5020_s4 + $0x48] sm:$0xff]   ;;  %v5156_v47 = vld [vmem:[%s5020_s4 + $0x70] sm:$0xff]  }
  0x1a   : > { %4197 = vmatprep.subr.bf16.mxu1 %v4810_v20  ;;  %v4832_v48 = vld [vmem:[%s5020_s4 + $0x50] sm:$0xff]   ;;  %v5160_v49 = vld [vmem:[%s5020_s4 + $0x78] sm:$0xff]   ;;  %v4836_v52 = vld [vmem:[%s5020_s4 + $0x80] sm:$0xff]  }
  0x1b   : > { %4198 = vmatpush3.bf16.msra.mxu1 %v4810_v20  ;;  %v4835_v50 = vld [vmem:[%s5020_s4 + $0x58] sm:$0xff]   ;;  %v4837_v53 = vld [vmem:[%s5020_s4 + $0x60] sm:$0xff]   ;;  %v4839_v55 = vld [vmem:[%s5020_s4 + $0x68] sm:$0xff]  }
  0x1c   : > { %4358 = vmatpush3.bf16.msra.mxu0 %v4806_v16  ;;  %4199 = vmatprep.subr.bf16.mxu1 %v4821_v28  ;;  %v4838_v54 = vld [vmem:[%s5020_s4] sm:$0xff]   ;;  %v4841_v56 = vld [vmem:[%s5020_s4 + $0x70] sm:$0xff]   ;;  %v4843_v57 = vld [vmem:[%s5020_s4 + $0x78] sm:$0xff]  }
  0x1d   : > { %4359 = vmatprep.subr.bf16.mxu0 %v4812_v22  ;;  %v4844_v60 = vld [vmem:[%s5020_s4 + $0x80] sm:$0xff]   ;;  %v4845_v61 = vld [vmem:[%s5020_s4 + $0x88] sm:$0xff]   ;;  %v4847_v0 = vld [vmem:[%s5020_s4 + $0x90] sm:$0xff]  }
  0x1e   : > { %4168 = vmatmul.mubr.msk.bf16.gmra.mrb[4].mxu1 %vm327_vm0, %v5055_v17  ;;  %v4849_v1 = vld [vmem:[%s5020_s4 + $0x98] sm:$0xff]   ;;  %v4850_v2 = vld [vmem:[%s5020_s4 + $0xa0] sm:$0xff]   ;;  %v4851_v3 = vld [vmem:[%s5020_s4 + $0x30] sm:$0xff]  }
  0x1f   : > { %4328 = vmatmul.mubr.msk.bf16.gmra.mrb[4].mxu0 %vm327_vm0, %v4805_v18  ;;  %4171 = vmatprep.mubr.msk.bf16.mxu1 %vm327_vm0, %v5060_v19  ;;  %v4853_v4 = vld [vmem:[%s5020_s4 + $0x38] sm:$0xff]   ;;  %v4855_v5 = vld [vmem:[%s5020_s4 + $0x40] sm:$0xff]   ;;  %v4860_v6 = vld [vmem:[%s5549_s1 + $0xe8] sm:$0xff]  }
  0x20   : > { %4331 = vmatprep.mubr.msk.bf16.mxu0 %vm327_vm0, %v4808_v21  ;;  %4360 = vmatpush3.bf16.msra.mxu0 %v4812_v22  ;;  %v4868_v7 = vld [vmem:[%s5549_s1 + $0xf0] sm:$0xff]   ;;  %v4878_v10 = vld [vmem:[%s5549_s1 + $0xf8] sm:$0xff]   ;;  %v5252_v11 = vld [vmem:[%s5549_s1 + $0x100] sm:$0xff]  }
  0x21   : > { %4361 = vmatprep.subr.bf16.mxu0 %v4817_v24  ;;  %4200 = vmatpush3.bf16.msra.mxu1 %v4821_v28  ;;  %v4857_v9 = vld [vmem:[%s5020_s4 + $0x50] sm:$0xff]   ;;  %v4861_v13 = vld [vmem:[%s5020_s4 + $0x60] sm:$0xff]   ;;  %v4867_v18 = vld [vmem:[%s5020_s4 + $0x78] sm:$0xff]  }
  0x22   : > { %4201 = vmatprep.subr.bf16.mxu1 %v4831_v34  ;;  %v4863_v15 = vld [vmem:[%s5020_s4 + $0x10] sm:$0xff]   ;;  %v4870_v20 = vld [vmem:[%s5020_s4 + $0x80] sm:$0xff]   ;;  %v4876_v21 = vld [vmem:[%s5549_s1 + $0x68] sm:$0xff]  }
  0x23   : > { %v4864_v16 = vld [vmem:[%s5020_s4 + $0x70] sm:$0xff]   ;;  %v4875_v28 = vld [vmem:[%s5020_s4 + $0x38] sm:$0xff]  }
  0x24   : > { %4362 = vmatpush3.bf16.msra.mxu0 %v4817_v24  ;;  %v4886_v22 = vld [vmem:[%s5549_s1 + $0x70] sm:$0xff]   ;;  %v4872_v24 = vld [vmem:[%s5020_s4 + $0x88] sm:$0xff]  }
  0x25   : > { %4395 = vmatprep.subr.bf16.mxu0 %v4823_v29  ;;  %4202 = vmatpush3.bf16.msra.mxu1 %v4831_v34  ;;  %v4882_v34 = vld [vmem:[%s5020_s4 + $0xa8] sm:$0xff]  }
  0x26   : > { %4172 = vmatmul.mubr.msk.bf16.gmra.mrb[8].mxu1 %vm327_vm0, %v5076_v23  ;;  %4235 = vmatprep.subr.bf16.mxu1 %v4840_v41 }
  0x27   : > { %4332 = vmatmul.mubr.msk.bf16.gmra.mrb[8].mxu0 %vm327_vm0, %v4811_v25  ;;  %4175 = vmatprep.mubr.msk.bf16.mxu1 %vm327_vm0, %v5083_v26  ;;  %v4873_v25 = vld [vmem:[%s5020_s4 + $0x30] sm:$0xff]  }
  0x28   : > { %4335 = vmatprep.mubr.msk.bf16.mxu0 %vm327_vm0, %v4814_v27  ;;  %v4896_v27 = vld [vmem:[%s5549_s1 + $0x78] sm:$0xff]  }
  0x2e   : > { %4176 = vmatmul.mubr.msk.bf16.gmra.mrb[12].mxu1 %vm327_vm0, %v5099_v30 }
  0x2f   : > { %4336 = vmatmul.mubr.msk.bf16.gmra.mrb[12].mxu0 %vm327_vm0, %v4816_v31  ;;  %4179 = vmatprep.mubr.msk.bf16.mxu1 %vm327_vm0, %v5103_v32  ;;  %v4880_v31 = vld [vmem:[%s5020_s4 + $0xa0] sm:$0xff]  }
  0x30   : > { %4363 = vmatprep.mubr.msk.bf16.mxu0 %vm327_vm0, %v4819_v33  ;;  %v4881_v33 = vld [vmem:[%s5020_s4 + $0x48] sm:$0xff]  }
  0x36   : > { %4180 = vmatmul.mubr.msk.bf16.gmra.mrb[16].mxu1 %vm327_vm0, %v5116_v35 }
  0x37   : > { %4364 = vmatmul.mubr.msk.bf16.vlgmr.msra.gmra.mrb[0].mxu0 %vm327_vm0, %v4822_v36  ;;  %4183 = vmatprep.mubr.msk.bf16.mxu1 %vm327_vm0, %v5120_v37  ;;  %v4884_v36 = vld [vmem:[%s5020_s4 + $0x38] sm:$0xff]  }
  0x38   : > { %4396 = vmatpush3.bf16.msra.mxu0 %v4823_v29  ;;  %4367 = vmatprep.mubr.msk.bf16.mxu0 %vm327_vm0, %v4825_v38  ;;  %v4877_v29 = vld [vmem:[%s5020_s4 + $0x98] sm:$0xff]   ;;  %v4887_v38 = vld [vmem:[%s5020_s4 + $0x40] sm:$0xff]  }
  0x39   : > { %4397 = vmatprep.subr.bf16.mxu0 %v4833_v39 }
  0x3c   : > { %4398 = vmatpush3.bf16.msra.mxu0 %v4833_v39  ;;  %v4889_v39 = vld [vmem:[%s5020_s4 + $0x60] sm:$0xff]  }
  0x3d   : > { %4399 = vmatprep.subr.bf16.mxu0 %v4842_v43 }
  0x3e   : > { %4184 = vmatmul.mubr.msk.bf16.gmra.mrb[20].mxu1 %vm327_vm0, %v5133_v40 }
  0x3f   : > { %4368 = vmatmul.mubr.msk.bf16.gmra.mrb[4].mxu0 %vm327_vm0, %v4827_v42  ;;  %4187 = vmatprep.mubr.msk.bf16.mxu1 %vm327_vm0, %v5143_v44  ;;  %v4907_v42 = vld [vmem:[%s5549_s1 + $0x110] sm:$0xff]  }
  0x40   : > { %4371 = vmatprep.mubr.msk.bf16.mxu0 %vm327_vm0, %v4829_v45  ;;  %4400 = vmatpush3.bf16.msra.mxu0 %v4842_v43  ;;  %v4891_v43 = vld [vmem:[%s5020_s4 + $0x68] sm:$0xff]   ;;  %v4893_v45 = vld [vmem:[%s5020_s4 + $0x70] sm:$0xff]  }
  0x41   : > { %4401 = vmatprep.subr.bf16.mxu0 %v4848_v46 }
  0x44   : > { %4402 = vmatpush3.bf16.msra.mxu0 %v4848_v46  ;;  %v4894_v46 = vld [vmem:[%s5020_s4 + $0x58] sm:$0xff]  }
  0x45   : > { %4435 = vmatprep.subr.bf16.mxu0 %v4854_v51 }
  0x46   : > { %4188 = vmatmul.mubr.msk.bf16.gmra.mrb[24].mxu1 %vm327_vm0, %v5156_v47 }
  0x47   : > { %4372 = vmatmul.mubr.msk.bf16.gmra.mrb[8].mxu0 %vm327_vm0, %v4832_v48  ;;  %4191 = vmatprep.mubr.msk.bf16.mxu1 %vm327_vm0, %v5160_v49  ;;  %v4895_v48 = vld [vmem:[%s5020_s4 + $0x78] sm:$0xff]  }
  0x48   : > { %4375 = vmatprep.mubr.msk.bf16.mxu0 %vm327_vm0, %v4835_v50  ;;  %v4899_v50 = vld [vmem:[%s5020_s4 + $0x80] sm:$0xff]  }
  0x4e   : > { %4192 = vmatmul.mubr.msk.bf16.gmra.mrb[28].mxu1 %vm327_vm0, %v4836_v52  ;;  %v4901_v52 = vld [vmem:[%s5020_s4 + $0x88] sm:$0xff]  }
  0x4f   : > { %4376 = vmatmul.mubr.msk.bf16.gmra.mrb[12].mxu0 %vm327_vm0, %v4837_v53  ;;  %4203 = vmatprep.mubr.msk.bf16.mxu1 %vm327_vm0, %v4838_v54  ;;  %v4902_v53 = vld [vmem:[%s5020_s4 + $0x70] sm:$0xff]   ;;  %v4903_v54 = vld [vmem:[%s5020_s4 + $0x18] sm:$0xff]  }
  0x50   : > { %4379 = vmatprep.mubr.msk.bf16.mxu0 %vm327_vm0, %v4839_v55  ;;  %v4904_v55 = vld [vmem:[%s5020_s4 + $0x78] sm:$0xff]  }
  0x56   : > { %4204 = vmatmul.mubr.msk.bf16.vlgmr.msra.gmra.mrb[0].mxu1 %vm327_vm0, %v5026_v8  ;;  %v4856_v8 = vld [vmem:[%s5020_s4 + $0x48] sm:$0xff]  }
  0x57   : > { %4380 = vmatmul.mubr.msk.bf16.gmra.mrb[16].mxu0 %vm327_vm0, %v4841_v56  ;;  %4236 = vmatpush3.bf16.msra.mxu1 %v4840_v41  ;;  %v4898_v41 = vld [vmem:[%s5549_s1 + $0x108] sm:$0xff]   ;;  %v4905_v56 = vld [vmem:[%s5020_s4 + $0x20] sm:$0xff]  }
  0x58   : > { %4207 = vmatprep.mubr.msk.bf16.mxu1 %vm327_vm0, %v5039_v12  ;;  %4383 = vmatprep.mubr.msk.bf16.mxu0 %vm327_vm0, %v4843_v57  ;;  %v4859_v12 = vld [vmem:[%s5020_s4 + $0x58] sm:$0xff]   ;;  %v4906_v57 = vld [vmem:[%s5020_s4 + $0x80] sm:$0xff]  }
  0x59   : > { %4237 = vmatprep.subr.bf16.mxu1 %v4846_v58 }
  0x5b   : > { %4238 = vmatpush3.bf16.msra.mxu1 %v4846_v58  ;;  %v4908_v58 = vld [vmem:[%s5020_s4 + $0x28] sm:$0xff]  }
  0x5c   : > { %4239 = vmatprep.subr.bf16.mxu1 %v4852_v59 }
  0x5e   : > { %4208 = vmatmul.mubr.msk.bf16.gmra.mrb[4].mxu1 %vm327_vm0, %v5043_v14  ;;  %v4862_v14 = vld [vmem:[%s5020_s4 + $0x68] sm:$0xff]  }
  0x5f   : > { %4384 = vmatmul.mubr.msk.bf16.gmra.mrb[20].mxu0 %vm327_vm0, %v4844_v60  ;;  %4211 = vmatprep.mubr.msk.bf16.mxu1 %vm327_vm0, %v5055_v17  ;;  %v4865_v17 = vld [vmem:[%s5020_s4 + $0x18] sm:$0xff]   ;;  %v4954_v60 = vld [vmem:[%s5549_s1 + $0x88] sm:$0xff]  }
  0x60   : > { %4387 = vmatprep.mubr.msk.bf16.mxu0 %vm327_vm0, %v4845_v61  ;;  %4240 = vmatpush3.bf16.msra.mxu1 %v4852_v59  ;;  %v4909_v59 = vld [vmem:[%s5020_s4 + $0x88] sm:$0xff]   ;;  %v4910_v61 = vld [vmem:[%s5020_s4 + $0x30] sm:$0xff]  }
  0x61   : > { %4241 = vmatprep.subr.bf16.mxu1 %v4858_v62 }
  0x64   : > { %4242 = vmatpush3.bf16.msra.mxu1 %v4858_v62  ;;  %v4911_v62 = vld [vmem:[%s5020_s4 + $0x90] sm:$0xff]  }
  0x65   : > { %4275 = vmatprep.subr.bf16.mxu1 %v4866_v63 }
  0x66   : > { %4212 = vmatmul.mubr.msk.bf16.gmra.mrb[8].mxu1 %vm327_vm0, %v5060_v19  ;;  %v4869_v19 = vld [vmem:[%s5020_s4 + $0x20] sm:$0xff]  }
  0x67   : > { %4388 = vmatmul.mubr.msk.bf16.gmra.mrb[24].mxu0 %vm327_vm0, %v4847_v0  ;;  %4215 = vmatprep.mubr.msk.bf16.mxu1 %vm327_vm0, %v5076_v23  ;;  %v4871_v23 = vld [vmem:[%s5020_s4 + $0x28] sm:$0xff]   ;;  %v4913_v0 = vld [vmem:[%s5020_s4 + $0x98] sm:$0xff]  }
  0x68   : > { %4391 = vmatprep.mubr.msk.bf16.mxu0 %vm327_vm0, %v4849_v1  ;;  %v4955_v1 = vld [vmem:[%s5549_s1 + $0x90] sm:$0xff]  }
  0x6e   : > { %4216 = vmatmul.mubr.msk.bf16.gmra.mrb[12].mxu1 %vm327_vm0, %v5083_v26  ;;  %v4874_v26 = vld [vmem:[%s5020_s4 + $0x90] sm:$0xff]  }
  0x6f   : > { %4392 = vmatmul.mubr.msk.bf16.gmra.mrb[28].mxu0 %vm327_vm0, %v4850_v2  ;;  %4219 = vmatprep.mubr.msk.bf16.mxu1 %vm327_vm0, %v5099_v30  ;;  %v4879_v30 = vld [vmem:[%s5020_s4 + $0x40] sm:$0xff]   ;;  %v4956_v2 = vld [vmem:[%s5549_s1 + $0x98] sm:$0xff]  }
  0x70   : > { %4403 = vmatprep.mubr.msk.bf16.mxu0 %vm327_vm0, %v4851_v3  ;;  %v4914_v3 = vld [vmem:[%s5020_s4 + $0x40] sm:$0xff]  }
  0x76   : > { %4220 = vmatmul.mubr.msk.bf16.gmra.mrb[16].mxu1 %vm327_vm0, %v5103_v32  ;;  %v4953_v32 = vld [vmem:[%s5549_s1 + $0x80] sm:$0xff]  }
  0x77   : > { %4404 = vmatmul.mubr.msk.bf16.vlgmr.msra.gmra.mrb[0].mxu0 %vm327_vm0, %v4853_v4  ;;  %4223 = vmatprep.mubr.msk.bf16.mxu1 %vm327_vm0, %v5116_v35  ;;  %v4883_v35 = vld [vmem:[%s5020_s4 + $0x50] sm:$0xff]   ;;  %v4915_v4 = vld [vmem:[%s5020_s4 + $0xa0] sm:$0xff]  }
  0x78   : > { %4436 = vmatpush3.bf16.msra.mxu0 %v4854_v51  ;;  %4407 = vmatprep.mubr.msk.bf16.mxu0 %vm327_vm0, %v4855_v5  ;;  %v4900_v51 = vld [vmem:[%s5020_s4 + $0x68] sm:$0xff]  }
  0x79   : > { %4437 = vmatprep.subr.bf16.mxu0 %v4860_v6  ;;  %v4917_v5 = vld [vmem:[%s5020_s4 + $0x48] sm:$0xff]  }
  0x7c   : > { %4438 = vmatpush3.bf16.msra.mxu0 %v4860_v6  ;;  %v4918_v6 = vld [vmem:[%s5020_s4 + $0xa8] sm:$0xff]  }
  0x7d   : > { %4439 = vmatprep.subr.bf16.mxu0 %v4868_v7 }
  0x7e   : > { %4224 = vmatmul.mubr.msk.bf16.gmra.mrb[20].mxu1 %vm327_vm0, %v5120_v37  ;;  %v4885_v37 = vld [vmem:[%s5020_s4 + $0x58] sm:$0xff]  }
  0x7f   : > { %4408 = vmatmul.mubr.msk.bf16.gmra.mrb[4].mxu0 %vm327_vm0, %v4856_v8  ;;  %4227 = vmatprep.mubr.msk.bf16.mxu1 %vm327_vm0, %v5133_v40  ;;  %v4890_v40 = vld [vmem:[%s5020_s4 + $0x48] sm:$0xff]   ;;  %v4920_v8 = vld [vmem:[%s5020_s4 + $0xb0] sm:$0xff]  }
  0x80   : > { %4411 = vmatprep.mubr.msk.bf16.mxu0 %vm327_vm0, %v4857_v9  ;;  %4440 = vmatpush3.bf16.msra.mxu0 %v4868_v7  ;;  %v4919_v7 = vld [vmem:[%s5020_s4 + $0x50] sm:$0xff]   ;;  %v4921_v9 = vld [vmem:[%s5020_s4 + $0x58] sm:$0xff]  }
  0x81   : > { %4441 = vmatprep.subr.bf16.mxu0 %v4878_v10 }
  0x84   : > { %4442 = vmatpush3.bf16.msra.mxu0 %v4878_v10  ;;  %v4922_v10 = vld [vmem:[%s5020_s4 + $0x40] sm:$0xff]  }
  0x85   : > { %4475 = vmatprep.subr.bf16.mxu0 %v5252_v11 }
  0x86   : > { %4228 = vmatmul.mubr.msk.bf16.gmra.mrb[24].mxu1 %vm327_vm0, %v5143_v44  ;;  %v4892_v44 = vld [vmem:[%s5020_s4 + $0x50] sm:$0xff]  }
  0x87   : > { %4412 = vmatmul.mubr.msk.bf16.gmra.mrb[8].mxu0 %vm327_vm0, %v4859_v12  ;;  %4231 = vmatprep.mubr.msk.bf16.mxu1 %vm327_vm0, %v5156_v47  ;;  %v4916_v47 = vld [vmem:[%s5549_s1 + $0x118] sm:$0xff]   ;;  %v4924_v12 = vld [vmem:[%s5020_s4 + $0x48] sm:$0xff]  }
  0x88   : > { %4415 = vmatprep.mubr.msk.bf16.mxu0 %vm327_vm0, %v4861_v13  ;;  %v4925_v13 = vld [vmem:[%s5020_s4 + $0x68] sm:$0xff]  }
  0x8e   : > { %4232 = vmatmul.mubr.msk.bf16.gmra.mrb[28].mxu1 %vm327_vm0, %v5160_v49  ;;  %v4897_v49 = vld [vmem:[%s5020_s4 + $0x60] sm:$0xff]  }
  0x8f   : > { %4416 = vmatmul.mubr.msk.bf16.gmra.mrb[12].mxu0 %vm327_vm0, %v4862_v14  ;;  %4243 = vmatprep.mubr.msk.bf16.mxu1 %vm327_vm0, %v4863_v15  ;;  %v4926_v14 = vld [vmem:[%s5020_s4 + $0x50] sm:$0xff]  }
  0x90   : > { %4419 = vmatprep.mubr.msk.bf16.mxu0 %vm327_vm0, %v4864_v16  ;;  %v4927_v15 = vld [vmem:[%s5020_s4 + $0x70] sm:$0xff]   ;;  %v4928_v16 = vld [vmem:[%s5020_s4 + $0x58] sm:$0xff]  }
  0x96   : > { %4244 = vmatmul.mubr.msk.bf16.vlgmr.msra.gmra.mrb[0].mxu1 %vm327_vm0, %v4865_v17  ;;  %v4929_v17 = vld [vmem:[%s5020_s4 + $0x78] sm:$0xff]  }
  0x97   : > { %4420 = vmatmul.mubr.msk.bf16.gmra.mrb[16].mxu0 %vm327_vm0, %v4867_v18  ;;  %4276 = vmatpush3.bf16.msra.mxu1 %v4866_v63  ;;  %v4912_v63 = vld [vmem:[%s5020_s4 + $0x38] sm:$0xff]   ;;  %v4930_v18 = vld [vmem:[%s5020_s4 + $0x60] sm:$0xff]  }
  0x98   : > { %4247 = vmatprep.mubr.msk.bf16.mxu1 %vm327_vm0, %v4869_v19  ;;  %4423 = vmatprep.mubr.msk.bf16.mxu0 %vm327_vm0, %v4870_v20  ;;  %v4931_v19 = vld [vmem:[%s5020_s4 + $0x80] sm:$0xff]   ;;  %v4932_v20 = vld [vmem:[%s5020_s4 + $0x68] sm:$0xff]  }
  0x99   : > { %4277 = vmatprep.subr.bf16.mxu1 %v4876_v21 }
  0x9b   : > { %4278 = vmatpush3.bf16.msra.mxu1 %v4876_v21  ;;  %v4933_v21 = vld [vmem:[%s5020_s4 + $0x88] sm:$0xff]  }
  0x9c   : > { %4279 = vmatprep.subr.bf16.mxu1 %v4886_v22 }
  0x9e   : > { %4248 = vmatmul.mubr.msk.bf16.gmra.mrb[4].mxu1 %vm327_vm0, %v4871_v23  ;;  %v4935_v23 = vld [vmem:[%s5020_s4 + $0x90] sm:$0xff]  }
  0x9f   : > { %4424 = vmatmul.mubr.msk.bf16.gmra.mrb[20].mxu0 %vm327_vm0, %v4872_v24  ;;  %4251 = vmatprep.mubr.msk.bf16.mxu1 %vm327_vm0, %v4873_v25  ;;  %v4936_v24 = vld [vmem:[%s5020_s4 + $0x78] sm:$0xff]   ;;  %v4937_v25 = vld [vmem:[%s5020_s4 + $0x60] sm:$0xff]  }
  0xa0   : > { %4427 = vmatprep.mubr.msk.bf16.mxu0 %vm327_vm0, %v4874_v26  ;;  %4280 = vmatpush3.bf16.msra.mxu1 %v4886_v22  ;;  %v4934_v22 = vld [vmem:[%s5020_s4 + $0x70] sm:$0xff]   ;;  %v4938_v26 = vld [vmem:[%s5020_s4 + $0x80] sm:$0xff]  }
  0xa1   : > { %4281 = vmatprep.subr.bf16.mxu1 %v4896_v27 }
  0xa4   : > { %4282 = vmatpush3.bf16.msra.mxu1 %v4896_v27  ;;  %v4939_v27 = vld [vmem:[%s5020_s4 + $0x68] sm:$0xff]  }
  0xa5   : > { %4515 = vmatprep.subr.bf16.mxu1 %v4953_v32 }
  0xa6   : > { %4252 = vmatmul.mubr.msk.bf16.gmra.mrb[8].mxu1 %vm327_vm0, %v4875_v28  ;;  %v4940_v28 = vld [vmem:[%s5020_s4 + $0x88] sm:$0xff]  }
  0xa7   : > { %4428 = vmatmul.mubr.msk.bf16.gmra.mrb[24].mxu0 %vm327_vm0, %v4877_v29  ;;  %4255 = vmatprep.mubr.msk.bf16.mxu1 %vm327_vm0, %v4879_v30  ;;  %v4941_v29 = vld [vmem:[%s5020_s4 + $0x70] sm:$0xff]  }
  0xa8   : > { %4431 = vmatprep.mubr.msk.bf16.mxu0 %vm327_vm0, %v4880_v31  ;;  %v4942_v30 = vld [vmem:[%s5020_s4 + $0x90] sm:$0xff]   ;;  %v4943_v31 = vld [vmem:[%s5020_s4 + $0x78] sm:$0xff]  }
  0xae   : > { %4256 = vmatmul.mubr.msk.bf16.gmra.mrb[12].mxu1 %vm327_vm0, %v4881_v33  ;;  %v4945_v33 = vld [vmem:[%s5020_s4 + $0x80] sm:$0xff]  }
  0xaf   : > { %4432 = vmatmul.mubr.msk.bf16.gmra.mrb[28].mxu0 %vm327_vm0, %v4882_v34  ;;  %4259 = vmatprep.mubr.msk.bf16.mxu1 %vm327_vm0, %v4883_v35  ;;  %v4946_v34 = vld [vmem:[%s5020_s4 + $0xa0] sm:$0xff]   ;;  %v4947_v35 = vld [vmem:[%s5020_s4 + $0x88] sm:$0xff]  }
  0xb0   : > { %4443 = vmatprep.mubr.msk.bf16.mxu0 %vm327_vm0, %v4884_v36  ;;  %v4948_v36 = vld [vmem:[%s5020_s4 + $0xa8] sm:$0xff]  }
  0xb6   : > { %4260 = vmatmul.mubr.msk.bf16.gmra.mrb[16].mxu1 %vm327_vm0, %v4885_v37  ;;  %v4949_v37 = vld [vmem:[%s5020_s4 + $0x90] sm:$0xff]  }
  0xb7   : > { %4444 = vmatmul.mubr.msk.bf16.vlgmr.msra.gmra.mrb[0].mxu0 %vm327_vm0, %v4887_v38  ;;  %4263 = vmatprep.mubr.msk.bf16.mxu1 %vm327_vm0, %v4889_v39  ;;  %v4950_v38 = vld [vmem:[%s5020_s4 + $0xb0] sm:$0xff]   ;;  %v4951_v39 = vld [vmem:[%s5020_s4 + $0x98] sm:$0xff]  }
  0xb8   : > { %4476 = vmatpush3.bf16.msra.mxu0 %v5252_v11  ;;  %4447 = vmatprep.mubr.msk.bf16.mxu0 %vm327_vm0, %v4890_v40  ;;  %v4923_v11 = vld [vmem:[%s5020_s4 + $0x60] sm:$0xff]   ;;  %v4952_v40 = vld [vmem:[%s5020_s4 + $0xb8] sm:$0xff]  }
  0xb9   : > { %4477 = vmatprep.subr.bf16.mxu0 %v4898_v41 }
  0xbc   : > { %4478 = vmatpush3.bf16.msra.mxu0 %v4898_v41 }
  0xbd   : > { %4479 = vmatprep.subr.bf16.mxu0 %v4907_v42 }
  0xbe   : > { %4264 = vmatmul.mubr.msk.bf16.gmra.mrb[20].mxu1 %vm327_vm0, %v4891_v43 }
  0xbf   : > { %4448 = vmatmul.mubr.msk.bf16.gmra.mrb[4].mxu0 %vm327_vm0, %v4892_v44  ;;  %4267 = vmatprep.mubr.msk.bf16.mxu1 %vm327_vm0, %v4893_v45 }
  0xc0   : > { %4451 = vmatprep.mubr.msk.bf16.mxu0 %vm327_vm0, %v4894_v46  ;;  %4480 = vmatpush3.bf16.msra.mxu0 %v4907_v42 }
  0xc1   : > { %4481 = vmatprep.subr.bf16.mxu0 %v4916_v47 }
  0xc4   : > { %4482 = vmatpush3.bf16.msra.mxu0 %v4916_v47 }
  0xc6   : > { %4268 = vmatmul.mubr.msk.bf16.gmra.mrb[24].mxu1 %vm327_vm0, %v4895_v48 }
  0xc7   : > { %4452 = vmatmul.mubr.msk.bf16.gmra.mrb[8].mxu0 %vm327_vm0, %v4897_v49  ;;  %4271 = vmatprep.mubr.msk.bf16.mxu1 %vm327_vm0, %v4899_v50 }
  0xc8   : > { %4455 = vmatprep.mubr.msk.bf16.mxu0 %vm327_vm0, %v4900_v51 }
  0xce   : > { %4272 = vmatmul.mubr.msk.bf16.gmra.mrb[28].mxu1 %vm327_vm0, %v4901_v52 }
  0xcf   : > { %4456 = vmatmul.mubr.msk.bf16.gmra.mrb[12].mxu0 %vm327_vm0, %v4902_v53  ;;  %4283 = vmatprep.mubr.msk.bf16.mxu1 %vm327_vm0, %v4903_v54 }
  0xd0   : > { %4459 = vmatprep.mubr.msk.bf16.mxu0 %vm327_vm0, %v4904_v55 }
  0xd6   : > { %4284 = vmatmul.mubr.msk.bf16.vlgmr.msra.gmra.mrb[0].mxu1 %vm327_vm0, %v4905_v56 }
  0xd7   : > { %4460 = vmatmul.mubr.msk.bf16.gmra.mrb[16].mxu0 %vm327_vm0, %v4906_v57  ;;  %4519 = vmatpush3.bf16.msra.mxu1 %v4953_v32  ;;  %v4944_v32 = vld [vmem:[%s5020_s4 + $0x98] sm:$0xff]  }
  0xd8   : > { %4287 = vmatprep.mubr.msk.bf16.mxu1 %vm327_vm0, %v4908_v58  ;;  %4463 = vmatprep.mubr.msk.bf16.mxu0 %vm327_vm0, %v4909_v59  ;;  %v5469_v58 = vld [vmem:[%s5550_s2] ss:$0 sm:$0xff] }
  0xd9   : > { %4516 = vmatprep.subr.bf16.mxu1 %v4954_v60 }
  0xdb   : > { %4520 = vmatpush3.bf16.msra.mxu1 %v4954_v60 }
  0xdc   : > { %4517 = vmatprep.subr.bf16.mxu1 %v4955_v1 }
  0xde   : > { %4288 = vmatmul.mubr.msk.bf16.gmra.mrb[4].mxu1 %vm327_vm0, %v4910_v61 }
  0xdf   : > { %4464 = vmatmul.mubr.msk.bf16.gmra.mrb[20].mxu0 %vm327_vm0, %v4911_v62  ;;  %4291 = vmatprep.mubr.msk.bf16.mxu1 %vm327_vm0, %v4912_v63 }
  0xe0   : > { %4467 = vmatprep.mubr.msk.bf16.mxu0 %vm327_vm0, %v4913_v0  ;;  %4521 = vmatpush3.bf16.msra.mxu1 %v4955_v1 }
  0xe1   : > { %4518 = vmatprep.subr.bf16.mxu1 %v4956_v2 }
  0xe4   : > { %4522 = vmatpush3.bf16.msra.mxu1 %v4956_v2 }
  0xe6   : > { %4292 = vmatmul.mubr.msk.bf16.gmra.mrb[8].mxu1 %vm327_vm0, %v4914_v3 }
  0xe7   : > { %4468 = vmatmul.mubr.msk.bf16.gmra.mrb[24].mxu0 %vm327_vm0, %v4915_v4  ;;  %4295 = vmatprep.mubr.msk.bf16.mxu1 %vm327_vm0, %v4917_v5 }
  0xe8   : > { %4471 = vmatprep.mubr.msk.bf16.mxu0 %vm327_vm0, %v4918_v6 }
  0xee   : > { %4296 = vmatmul.mubr.msk.bf16.gmra.mrb[12].mxu1 %vm327_vm0, %v4919_v7 }
  0xef   : > { %4472 = vmatmul.mubr.msk.bf16.gmra.mrb[28].mxu0 %vm327_vm0, %v4920_v8  ;;  %4299 = vmatprep.mubr.msk.bf16.mxu1 %vm327_vm0, %v4921_v9 }
  0xf0   : > { %4483 = vmatprep.mubr.msk.bf16.mxu0 %vm327_vm0, %v4922_v10 }
  0xf6   : > { %4300 = vmatmul.mubr.msk.bf16.gmra.mrb[16].mxu1 %vm327_vm0, %v4923_v11 }
  0xf7   : > { %4484 = vmatmul.mubr.msk.bf16.vlgmr.msra.gmra.mrb[0].mxu0 %vm327_vm0, %v4924_v12  ;;  %4303 = vmatprep.mubr.msk.bf16.mxu1 %vm327_vm0, %v4925_v13 }
  0xf8   : > { %4487 = vmatprep.mubr.msk.bf16.mxu0 %vm327_vm0, %v4926_v14 }
  0xfe   : > { %4304 = vmatmul.mubr.msk.bf16.gmra.mrb[20].mxu1 %vm327_vm0, %v4927_v15 }
  0xff   : > { %4488 = vmatmul.mubr.msk.bf16.gmra.mrb[4].mxu0 %vm327_vm0, %v4928_v16  ;;  %4307 = vmatprep.mubr.msk.bf16.mxu1 %vm327_vm0, %v4929_v17 }
 0x100   : > { %4491 = vmatprep.mubr.msk.bf16.mxu0 %vm327_vm0, %v4930_v18 }
 0x106   : > { %4308 = vmatmul.mubr.msk.bf16.gmra.mrb[24].mxu1 %vm327_vm0, %v4931_v19 }
 0x107   : > { %4492 = vmatmul.mubr.msk.bf16.gmra.mrb[8].mxu0 %vm327_vm0, %v4932_v20  ;;  %4311 = vmatprep.mubr.msk.bf16.mxu1 %vm327_vm0, %v4933_v21 }
 0x108   : > { %4495 = vmatprep.mubr.msk.bf16.mxu0 %vm327_vm0, %v4934_v22 }
 0x10e   : > { %4312 = vmatmul.mubr.msk.bf16.gmra.mrb[28].mxu1 %vm327_vm0, %v4935_v23 }
 0x10f   : > { %4496 = vmatmul.mubr.msk.bf16.gmra.mrb[12].mxu0 %vm327_vm0, %v4936_v24  ;;  %4339 = vmatprep.mubr.msk.bf16.mxu1 %vm327_vm0, %v4937_v25 }
 0x110   : > { %4499 = vmatprep.mubr.msk.bf16.mxu0 %vm327_vm0, %v4938_v26 }
 0x116   : > { %4340 = vmatmul.mubr.msk.bf16.vlgmr.msra.gmra.mrb[16].mxu1 %vm327_vm0, %v4939_v27 }
 0x117   : > { %4500 = vmatmul.mubr.msk.bf16.gmra.mrb[16].mxu0 %vm327_vm0, %v4940_v28  ;;  %4343 = vmatprep.mubr.msk.bf16.mxu1 %vm327_vm0, %v4941_v29 }
 0x118   : > { %4503 = vmatprep.mubr.msk.bf16.mxu0 %vm327_vm0, %v4942_v30 }
 0x11e   : > { %4344 = vmatmul.mubr.msk.bf16.gmra.mrb[20].mxu1 %vm327_vm0, %v4943_v31 }
 0x11f   : > { %4504 = vmatmul.mubr.msk.bf16.gmra.mrb[20].mxu0 %vm327_vm0, %v4944_v32  ;;  %4347 = vmatprep.mubr.msk.bf16.mxu1 %vm327_vm0, %v4945_v33 }
 0x120   : > { %4507 = vmatprep.mubr.msk.bf16.mxu0 %vm327_vm0, %v4946_v34 }
 0x126   : > { %4348 = vmatmul.mubr.msk.bf16.gmra.mrb[24].mxu1 %vm327_vm0, %v4947_v35 }
 0x127   : > { %4508 = vmatmul.mubr.msk.bf16.gmra.mrb[24].mxu0 %vm327_vm0, %v4948_v36  ;;  %4351 = vmatprep.mubr.msk.bf16.mxu1 %vm327_vm0, %v4949_v37 }
 0x128   : > { %4511 = vmatprep.mubr.msk.bf16.mxu0 %vm327_vm0, %v4950_v38 }
 0x12e   : > { %4352 = vmatmul.mubr.msk.bf16.gmra.mrb[28].mxu1 %vm327_vm0, %v4951_v39 }
 0x12f   : > { %4512 = vmatmul.mubr.msk.bf16.gmra.mrb[28].mxu0 %vm327_vm0, %v4952_v40 }
 0x1a9   : > { %v4285_v41 = vpop.f32.mrb[0].mxu1 }
 0x1aa   : > { %v1343_v42 = vpop.f32.mrb[1].mxu1 }
 0x1ab   : > { %v4286_v43 = vpop.f32.mrb[2].mxu1 }
 0x1ac   : > { %v1346_v44 = vpop.f32.mrb[3].mxu1 }
 0x1b1   : > { %v4289_v45 = vpop.f32.mrb[4].mxu1 }
 0x1b2   : > { %v1359_v46 = vpop.f32.mrb[5].mxu1 }
 0x1b3   : > { %v4290_v47 = vpop.f32.mrb[6].mxu1 }
 0x1b4   : > { %v1362_v48 = vpop.f32.mrb[7].mxu1 }
 0x1b9   : > { %v4293_v49 = vpop.f32.mrb[8].mxu1 }
 0x1ba   : > { %v1375_v50 = vpop.f32.mrb[9].mxu1 }
 0x1bb   : > { %v4294_v51 = vpop.f32.mrb[10].mxu1 }
 0x1bc   : > { %v1378_v52 = vpop.f32.mrb[11].mxu1 }
 0x1c1   : > { %v5458_v53 = vpop.f32.mrb[12].mxu1 }
 0x1c2   : > { %v5460_v54 = vpop.f32.mrb[13].mxu1 }
 0x1c3   : > { %v5462_v55 = vpop.f32.mrb[14].mxu1 }
 0x1c4   : > { %v5464_v56 = vpop.f32.mrb[15].mxu1 }
 0x1ca   : > { %v4485_v57 = vpop.f32.mrb[0].mxu0 }
 0x1cb   : > { %v4523_v59 = vadd.f32 %v4485_v57, %v4285_v41  ;;  %v3273_v60 = vpop.f32.mrb[1].mxu0 }
 0x1cc   : > { %v4524_v61 = vadd.f32 %v3273_v60, %v1343_v42  ;;  %v4486_v62 = vpop.f32.mrb[2].mxu0 }
 0x1cd   : > { %v3441_v63 = vadd.f32 %v4523_v59, %v5469_v58  ;;  %v4525_v0 = vadd.f32 %v4486_v62, %v4286_v43  ;;  %v3276_v1 = vpop.f32.mrb[3].mxu0 }
 0x1ce   : > { %v3439_v2 = vadd.f32 %v4524_v61, %v5469_v58  ;;  %v4526_v3 = vadd.f32 %v3276_v1, %v1346_v44 }
 0x1cf   : > { %v3442_v4 = vadd.f32 %v4525_v0, %v5469_v58  ;;  %v3473_v6 = vmax.f32 %v3441_v63, 0.0 }
 0x1d0   : > { %v3440_v5 = vadd.f32 %v4526_v3, %v5469_v58  ;;  %v3471_v8 = vmax.f32 %v3439_v2, 0.0 }
 0x1d1   : > { %v3474_v7 = vmax.f32 %v3442_v4, 0.0 }
 0x1d2   : > { %v3472_v9 = vmax.f32 %v3440_v5, 0.0  ;;  %v4489_v10 = vpop.f32.mrb[4].mxu0 }
 0x1d3   : > { %v3504_v11 = vpack.c.bf16 %v3474_v7, %v3473_v6  ;;  %v4527_v12 = vadd.f32 %v4489_v10, %v4289_v45  ;;  %v3289_v13 = vpop.f32.mrb[5].mxu0 }
 0x1d4   : > { %v3503_v14 = vpack.c.bf16 %v3472_v9, %v3471_v8  ;;  %v4528_v15 = vadd.f32 %v3289_v13, %v1359_v46  ;;  %v4490_v16 = vpop.f32.mrb[6].mxu0 }
 0x1d5   : > { %3520 = vst.msk [vmem:[%s5479_s29 + $0x8] sm:$0xff] %vm327_vm0, %v3504_v11  ;;  %v3445_v17 = vadd.f32 %v4527_v12, %v5469_v58  ;;  %v4529_v18 = vadd.f32 %v4490_v16, %v4290_v47  ;;  %v3292_v19 = vpop.f32.mrb[7].mxu0 }
 0x1d6   : > { %3519 = vst.msk [vmem:[%s5479_s29] sm:$0xff] %vm327_vm0, %v3503_v14  ;;  %v3443_v20 = vadd.f32 %v4528_v15, %v5469_v58  ;;  %v4530_v21 = vadd.f32 %v3292_v19, %v1362_v48 }
 0x1d7   : > { %v3446_v22 = vadd.f32 %v4529_v18, %v5469_v58  ;;  %v3477_v24 = vmax.f32 %v3445_v17, 0.0 }
 0x1d8   : > { %v3444_v23 = vadd.f32 %v4530_v21, %v5469_v58  ;;  %v3475_v26 = vmax.f32 %v3443_v20, 0.0 }
 0x1d9   : > { %v3478_v25 = vmax.f32 %v3446_v22, 0.0 }
 0x1da   : > { %v3476_v27 = vmax.f32 %v3444_v23, 0.0  ;;  %v4493_v28 = vpop.f32.mrb[8].mxu0 }
 0x1db   : > { %v3506_v29 = vpack.c.bf16 %v3478_v25, %v3477_v24  ;;  %v4531_v30 = vadd.f32 %v4493_v28, %v4293_v49  ;;  %v3305_v31 = vpop.f32.mrb[9].mxu0 }
 0x1dc   : > { %v3505_v32 = vpack.c.bf16 %v3476_v27, %v3475_v26  ;;  %v4532_v33 = vadd.f32 %v3305_v31, %v1375_v50  ;;  %v4494_v34 = vpop.f32.mrb[10].mxu0 }
 0x1dd   : > { %3522 = vst.msk [vmem:[%s5479_s29 + $0x18] sm:$0xff] %vm327_vm0, %v3506_v29  ;;  %v3449_v35 = vadd.f32 %v4531_v30, %v5469_v58  ;;  %v4533_v36 = vadd.f32 %v4494_v34, %v4294_v51  ;;  %v3308_v37 = vpop.f32.mrb[11].mxu0 }
 0x1de   : > { %3521 = vst.msk [vmem:[%s5479_s29 + $0x10] sm:$0xff] %vm327_vm0, %v3505_v32  ;;  %v3447_v38 = vadd.f32 %v4532_v33, %v5469_v58  ;;  %v4534_v39 = vadd.f32 %v3308_v37, %v1378_v52 }
 0x1df   : > { %v3450_v40 = vadd.f32 %v4533_v36, %v5469_v58  ;;  %v3481_v42 = vmax.f32 %v3449_v35, 0.0 }
 0x1e0   : > { %v3448_v41 = vadd.f32 %v4534_v39, %v5469_v58  ;;  %v3479_v44 = vmax.f32 %v3447_v38, 0.0 }
 0x1e1   : > { %v3482_v43 = vmax.f32 %v3450_v40, 0.0 }
 0x1e2   : > { %v3480_v45 = vmax.f32 %v3448_v41, 0.0  ;;  %v4497_v46 = vpop.f32.mrb[12].mxu0 }
 0x1e3   : > { %v3508_v47 = vpack.c.bf16 %v3482_v43, %v3481_v42  ;;  %v4535_v48 = vadd.f32 %v4497_v46, %v5458_v53  ;;  %v3321_v49 = vpop.f32.mrb[13].mxu0 }
 0x1e4   : > { %v3507_v50 = vpack.c.bf16 %v3480_v45, %v3479_v44  ;;  %v4536_v51 = vadd.f32 %v3321_v49, %v5460_v54  ;;  %v4498_v57 = vpop.f32.mrb[14].mxu0 }
 0x1e5   : > { %3524 = vst.msk [vmem:[%s5479_s29 + $0x28] sm:$0xff] %vm327_vm0, %v3508_v47  ;;  %v3453_v52 = vadd.f32 %v4535_v48, %v5469_v58  ;;  %v4537_v59 = vadd.f32 %v4498_v57, %v5462_v55  ;;  %v3324_v60 = vpop.f32.mrb[15].mxu0 }
 0x1e6   : > { %3523 = vst.msk [vmem:[%s5479_s29 + $0x20] sm:$0xff] %vm327_vm0, %v3507_v50  ;;  %v3451_v61 = vadd.f32 %v4536_v51, %v5469_v58  ;;  %v4538_v62 = vadd.f32 %v3324_v60, %v5464_v56 }
 0x1e7   : > { %v3454_v53 = vadd.f32 %v4537_v59, %v5469_v58  ;;  %v3485_v54 = vmax.f32 %v3453_v52, 0.0 }
 0x1e8   : > { %v3452_v63 = vadd.f32 %v4538_v62, %v5469_v58  ;;  %v3483_v2 = vmax.f32 %v3451_v61, 0.0 }
 0x1e9   : > { %v3486_v0 = vmax.f32 %v3454_v53, 0.0  ;;  %v4341_v1 = vpop.f32.mrb[16].mxu1 }
 0x1ea   : > { %v3484_v3 = vmax.f32 %v3452_v63, 0.0  ;;  %v4501_v4 = vpop.f32.mrb[16].mxu0  ;;  %v1793_v55 = vpop.f32.mrb[17].mxu1 }
 0x1eb   : > { %v3510_v5 = vpack.c.bf16 %v3486_v0, %v3485_v54  ;;  %v4539_v6 = vadd.f32 %v4501_v4, %v4341_v1  ;;  %v3337_v7 = vpop.f32.mrb[17].mxu0  ;;  %v4342_v8 = vpop.f32.mrb[18].mxu1 }
 0x1ec   : > { %v3509_v9 = vpack.c.bf16 %v3484_v3, %v3483_v2  ;;  %v4540_v10 = vadd.f32 %v3337_v7, %v1793_v55  ;;  %v4502_v56 = vpop.f32.mrb[18].mxu0  ;;  %v1796_v11 = vpop.f32.mrb[19].mxu1 }
 0x1ed   : > { %3526 = vst.msk [vmem:[%s5479_s29 + $0x38] sm:$0xff] %vm327_vm0, %v3510_v5  ;;  %v3457_v12 = vadd.f32 %v4539_v6, %v5469_v58  ;;  %v4541_v13 = vadd.f32 %v4502_v56, %v4342_v8  ;;  %v3340_v14 = vpop.f32.mrb[19].mxu0 }
 0x1ee   : > { %3525 = vst.msk [vmem:[%s5479_s29 + $0x30] sm:$0xff] %vm327_vm0, %v3509_v9  ;;  %v3455_v15 = vadd.f32 %v4540_v10, %v5469_v58  ;;  %v4542_v16 = vadd.f32 %v3340_v14, %v1796_v11 }
 0x1ef   : > { %v3458_v17 = vadd.f32 %v4541_v13, %v5469_v58  ;;  %v3489_v19 = vmax.f32 %v3457_v12, 0.0 }
 0x1f0   : > { %v3456_v18 = vadd.f32 %v4542_v16, %v5469_v58  ;;  %v3487_v22 = vmax.f32 %v3455_v15, 0.0 }
 0x1f1   : > { %v3490_v20 = vmax.f32 %v3458_v17, 0.0  ;;  %v4345_v21 = vpop.f32.mrb[20].mxu1 }
 0x1f2   : > { %v3488_v23 = vmax.f32 %v3456_v18, 0.0  ;;  %v4505_v24 = vpop.f32.mrb[20].mxu0  ;;  %v1809_v25 = vpop.f32.mrb[21].mxu1 }
 0x1f3   : > { %v3512_v26 = vpack.c.bf16 %v3490_v20, %v3489_v19  ;;  %v4543_v27 = vadd.f32 %v4505_v24, %v4345_v21  ;;  %v3353_v28 = vpop.f32.mrb[21].mxu0  ;;  %v4346_v29 = vpop.f32.mrb[22].mxu1 }
 0x1f4   : > { %v3511_v30 = vpack.c.bf16 %v3488_v23, %v3487_v22  ;;  %v4544_v31 = vadd.f32 %v3353_v28, %v1809_v25  ;;  %v4506_v32 = vpop.f32.mrb[22].mxu0  ;;  %v1812_v33 = vpop.f32.mrb[23].mxu1 }
 0x1f5   : > { %3528 = vst.msk [vmem:[%s5479_s29 + $0x48] sm:$0xff] %vm327_vm0, %v3512_v26  ;;  %v3461_v34 = vadd.f32 %v4543_v27, %v5469_v58  ;;  %v4545_v35 = vadd.f32 %v4506_v32, %v4346_v29  ;;  %v3356_v36 = vpop.f32.mrb[23].mxu0 }
 0x1f6   : > { %3527 = vst.msk [vmem:[%s5479_s29 + $0x40] sm:$0xff] %vm327_vm0, %v3511_v30  ;;  %v3459_v37 = vadd.f32 %v4544_v31, %v5469_v58  ;;  %v4546_v38 = vadd.f32 %v3356_v36, %v1812_v33 }
 0x1f7   : > { %v3462_v39 = vadd.f32 %v4545_v35, %v5469_v58  ;;  %v3493_v41 = vmax.f32 %v3461_v34, 0.0 }
 0x1f8   : > { %v3460_v40 = vadd.f32 %v4546_v38, %v5469_v58  ;;  %v3491_v44 = vmax.f32 %v3459_v37, 0.0 }
 0x1f9   : > { %v3494_v42 = vmax.f32 %v3462_v39, 0.0  ;;  %v4349_v43 = vpop.f32.mrb[24].mxu1 }
 0x1fa   : > { %v3492_v45 = vmax.f32 %v3460_v40, 0.0  ;;  %v4509_v46 = vpop.f32.mrb[24].mxu0  ;;  %v1825_v47 = vpop.f32.mrb[25].mxu1 }
 0x1fb   : > { %v3514_v48 = vpack.c.bf16 %v3494_v42, %v3493_v41  ;;  %v4547_v49 = vadd.f32 %v4509_v46, %v4349_v43  ;;  %v3369_v50 = vpop.f32.mrb[25].mxu0  ;;  %v4350_v51 = vpop.f32.mrb[26].mxu1 }
 0x1fc   : > { %v3513_v57 = vpack.c.bf16 %v3492_v45, %v3491_v44  ;;  %v4548_v52 = vadd.f32 %v3369_v50, %v1825_v47  ;;  %v4510_v59 = vpop.f32.mrb[26].mxu0  ;;  %v1828_v60 = vpop.f32.mrb[27].mxu1 }
 0x1fd   : > { %3530 = vst.msk [vmem:[%s5479_s29 + $0x58] sm:$0xff] %vm327_vm0, %v3514_v48  ;;  %v3465_v61 = vadd.f32 %v4547_v49, %v5469_v58  ;;  %v4549_v62 = vadd.f32 %v4510_v59, %v4350_v51  ;;  %v3372_v53 = vpop.f32.mrb[27].mxu0 }
 0x1fe   : > { %3529 = vst.msk [vmem:[%s5479_s29 + $0x50] sm:$0xff] %vm327_vm0, %v3513_v57  ;;  %v3463_v63 = vadd.f32 %v4548_v52, %v5469_v58  ;;  %v4550_v54 = vadd.f32 %v3372_v53, %v1828_v60 }
 0x1ff   : > { %v3466_v0 = vadd.f32 %v4549_v62, %v5469_v58  ;;  %v3497_v2 = vmax.f32 %v3465_v61, 0.0 }
 0x200   : > { %v3464_v1 = vadd.f32 %v4550_v54, %v5469_v58  ;;  %v3495_v55 = vmax.f32 %v3463_v63, 0.0 }
 0x201   : > { %v3498_v3 = vmax.f32 %v3466_v0, 0.0  ;;  %v4353_v4 = vpop.f32.mrb[28].mxu1 }
 0x202   : > { %v3496_v5 = vmax.f32 %v3464_v1, 0.0  ;;  %v4513_v6 = vpop.f32.mrb[28].mxu0  ;;  %v1841_v7 = vpop.f32.mrb[29].mxu1 }
 0x203   : > { %v3516_v8 = vpack.c.bf16 %v3498_v3, %v3497_v2  ;;  %v4551_v9 = vadd.f32 %v4513_v6, %v4353_v4  ;;  %v3385_v10 = vpop.f32.mrb[29].mxu0  ;;  %v4354_v56 = vpop.f32.mrb[30].mxu1 }
 0x204   : > { %v3515_v11 = vpack.c.bf16 %v3496_v5, %v3495_v55  ;;  %v4552_v12 = vadd.f32 %v3385_v10, %v1841_v7  ;;  %v4514_v13 = vpop.f32.mrb[30].mxu0  ;;  %v1844_v14 = vpop.f32.mrb[31].mxu1 }
 0x205   : > { %3532 = vst.msk [vmem:[%s5479_s29 + $0x68] sm:$0xff] %vm327_vm0, %v3516_v8  ;;  %v3469_v15 = vadd.f32 %v4551_v9, %v5469_v58  ;;  %v4553_v16 = vadd.f32 %v4514_v13, %v4354_v56  ;;  %v3388_v17 = vpop.f32.mrb[31].mxu0 }
 0x206   : > { %3531 = vst.msk [vmem:[%s5479_s29 + $0x60] sm:$0xff] %vm327_vm0, %v3515_v11  ;;  %v3467_v18 = vadd.f32 %v4552_v12, %v5469_v58  ;;  %v4554_v19 = vadd.f32 %v3388_v17, %v1844_v14 }
 0x207   : > { %v3470_v20 = vadd.f32 %v4553_v16, %v5469_v58  ;;  %v3501_v22 = vmax.f32 %v3469_v15, 0.0 }
 0x208   : > { %v3468_v21 = vadd.f32 %v4554_v19, %v5469_v58  ;;  %v3499_v24 = vmax.f32 %v3467_v18, 0.0 }
 0x209   : > { %v3502_v23 = vmax.f32 %v3470_v20, 0.0 }
 0x20a   : > { %v3500_v25 = vmax.f32 %v3468_v21, 0.0 }
 0x20b   : > { %v3518_v26 = vpack.c.bf16 %v3502_v23, %v3501_v22 }
 0x20c   : > { %v3517_v27 = vpack.c.bf16 %v3500_v25, %v3499_v24 }
 0x20d   : > { %3534 = vst.msk [vmem:[%s5479_s29 + $0x78] sm:$0xff] %vm327_vm0, %v3518_v26 }
 0x20e   : > { %3533 = vst.msk [vmem:[%s5479_s29 + $0x70] sm:$0xff] %vm327_vm0, %v3517_v27 }
 0x20f PF: > { %s13_s12 = sadd.s32 1, %s4963_s12  }
 0x210   : > { %p10_p4 = scmp.ge.s32.totalorder %s13_s12, 4  }
 0x212   :  { %12 = sbr.rel (!%p10_p4) target bundleno = 1 (0x1), region = 70 }

// kernel: st_gcn_forward.11
= control target key start
LH: loop header
LB: loop body
LE: loop exit
PB: predicated region body
PF: predicated region fallthrough
CT: control target
= control target key end

     0   :  { %v2612_v0 = vmov 0   ;;  %vm788_vm0 = vcmask 654336   ;;  %s3253_s1 = inlined_call_operand.vmem [shape: bf16[336,128], index: 1, kind: input, shape index: {}]   ;;  %s3254_s0 = inlined_call_operand.vmem [shape: bf16[512,336], index: 0, kind: input, shape index: {}]   ;;  %s3255_s2 = inlined_call_operand.vmem [shape: bf16[512,128], index: 2, kind: output, shape index: {}]  }
   0x1   :  { %885 = vmatprep.subr.bf16.mxu0 %v2612_v0  ;;  %2430 = vmatprep.subr.bf16.mxu1 %v2612_v0  ;;  %v2463_v1 = vld [vmem:[%s3253_s1] sm:$0xff]   ;;  %v2464_v2 = vld [vmem:[%s3253_s1 + $0x8] sm:$0xff]   ;;  %v2465_v3 = vld [vmem:[%s3253_s1 + $0x10] sm:$0xff]  }
   0x2   :  { %886 = vmatpush1.bf16.msra.mxu0 %v2463_v1  ;;  %2446 = vmatpush1.bf16.msra.mxu1 %v2463_v1  ;;  %v2466_v4 = vld [vmem:[%s3253_s1 + $0x18] sm:$0xff]   ;;  %v2467_v5 = vld [vmem:[%s3253_s1 + $0x20] sm:$0xff]   ;;  %v2468_v7 = vld [vmem:[%s3253_s1 + $0x28] sm:$0xff]  }
   0x3   :  { %887 = vmatprep.subr.bf16.mxu0 %v2612_v0  ;;  %2431 = vmatprep.subr.bf16.mxu1 %v2612_v0  ;;  %v2481_v6 = vld [vmem:[%s3254_s0 + $0x4] ss:$12 sps:$4 sm:$0xff]   ;;  %v2470_v10 = vld [vmem:[%s3253_s1 + $0x38] sm:$0xff]   ;;  %v2472_v12 = vld [vmem:[%s3253_s1 + $0x48] sm:$0xff]  }
   0x4   :  { %v2484_v8 = vld [vmem:[%s3254_s0 + $0x244] ss:$12 sps:$4 sm:$0xff]   ;;  %917 = vmatprep.mubr.bf16.mxu0 %v2481_v6  ;;  %v2474_v14 = vld [vmem:[%s3253_s1 + $0x58] sm:$0xff]   ;;  %v2476_v16 = vld [vmem:[%s3253_s1 + $0x68] sm:$0xff]  }
   0x5   :  { %1109 = vmatprep.mubr.bf16.mxu1 %v2484_v8  ;;  %v2469_v9 = vld [vmem:[%s3253_s1 + $0x30] sm:$0xff]   ;;  %v2471_v11 = vld [vmem:[%s3253_s1 + $0x40] sm:$0xff]   ;;  %v2478_v18 = vld [vmem:[%s3253_s1 + $0x78] sm:$0xff]  }
   0x6   :  { %888 = vmatpush1.bf16.msra.mxu0 %v2464_v2  ;;  %2447 = vmatpush1.bf16.msra.mxu1 %v2464_v2  ;;  %v2473_v13 = vld [vmem:[%s3253_s1 + $0x50] sm:$0xff]   ;;  %v2475_v15 = vld [vmem:[%s3253_s1 + $0x60] sm:$0xff]   ;;  %v2486_v22 = vld [vmem:[%s3254_s0 + $0x1c] ss:$12 sps:$4 sm:$0xff]  }
   0x7   :  { %889 = vmatprep.subr.bf16.mxu0 %v2612_v0  ;;  %2432 = vmatprep.subr.bf16.mxu1 %v2612_v0  ;;  %v2477_v17 = vld [vmem:[%s3253_s1 + $0x70] sm:$0xff]   ;;  %v2479_v19 = vld [vmem:[%s3254_s0] ss:$12 sps:$4 sm:$0xff]   ;;  %v2488_v23 = vld [vmem:[%s3254_s0 + $0x25c] ss:$12 sps:$4 sm:$0xff]  }
   0x8   :  { %v2485_v20 = vld [vmem:[%s3253_s1 + $0x80] sm:$0xff]   ;;  %v2492_v24 = vld [vmem:[%s3253_s1 + $0x88] sm:$0xff]   ;;  %v2505_v26 = vld [vmem:[%s3253_s1 + $0x90] sm:$0xff]  }
   0x9   :  { %v2482_v21 = vld [vmem:[%s3254_s0 + $0x240] ss:$12 sps:$4 sm:$0xff]   ;;  %v2490_v25 = vld [vmem:[%s3254_s0 + $0x18] ss:$12 sps:$4 sm:$0xff]   ;;  %v2497_v31 = vld [vmem:[%s3254_s0 + $0x30] ss:$12 sps:$4 sm:$0xff]  }
   0xa   :  { %890 = vmatpush1.bf16.msra.mxu0 %v2465_v3  ;;  %2448 = vmatpush1.bf16.msra.mxu1 %v2465_v3  ;;  %v2491_v27 = vld [vmem:[%s3254_s0 + $0x258] ss:$12 sps:$4 sm:$0xff]   ;;  %v2493_v28 = vld [vmem:[%s3254_s0 + $0x34] ss:$12 sps:$4 sm:$0xff]   ;;  %v2498_v32 = vld [vmem:[%s3254_s0 + $0x270] ss:$12 sps:$4 sm:$0xff]  }
   0xb   :  { %891 = vmatprep.subr.bf16.mxu0 %v2612_v0  ;;  %2433 = vmatprep.subr.bf16.mxu1 %v2612_v0  ;;  %v2495_v29 = vld [vmem:[%s3254_s0 + $0x274] ss:$12 sps:$4 sm:$0xff]   ;;  %v2516_v30 = vld [vmem:[%s3253_s1 + $0x98] sm:$0xff]   ;;  %v2506_v38 = vld [vmem:[%s3254_s0 + $0x64] ss:$12 sps:$4 sm:$0xff]  }
   0xc   :  { %v2525_v33 = vld [vmem:[%s3253_s1 + $0xa0] sm:$0xff]   ;;  %v2499_v34 = vld [vmem:[%s3254_s0 + $0x4c] ss:$12 sps:$4 sm:$0xff]   ;;  %v2503_v36 = vld [vmem:[%s3254_s0 + $0x48] ss:$12 sps:$4 sm:$0xff]  }
   0xd   :  { %v2501_v35 = vld [vmem:[%s3254_s0 + $0x28c] ss:$12 sps:$4 sm:$0xff]   ;;  %v2504_v37 = vld [vmem:[%s3254_s0 + $0x288] ss:$12 sps:$4 sm:$0xff]   ;;  %v2508_v39 = vld [vmem:[%s3254_s0 + $0x2a4] ss:$12 sps:$4 sm:$0xff]  }
   0xe   :  { %892 = vmatpush1.bf16.msra.mxu0 %v2466_v4  ;;  %2449 = vmatpush1.bf16.msra.mxu1 %v2466_v4  ;;  %v2510_v40 = vld [vmem:[%s3254_s0 + $0x60] ss:$12 sps:$4 sm:$0xff]   ;;  %v2512_v42 = vld [vmem:[%s3254_s0 + $0x7c] ss:$12 sps:$4 sm:$0xff]   ;;  %v2517_v44 = vld [vmem:[%s3254_s0 + $0x78] ss:$12 sps:$4 sm:$0xff]  }
   0xf   :  { %893 = vmatprep.subr.bf16.mxu0 %v2612_v0  ;;  %2434 = vmatprep.subr.bf16.mxu1 %v2612_v0  ;;  %v2511_v41 = vld [vmem:[%s3254_s0 + $0x2a0] ss:$12 sps:$4 sm:$0xff]   ;;  %v2514_v43 = vld [vmem:[%s3254_s0 + $0x2bc] ss:$12 sps:$4 sm:$0xff]   ;;  %v2518_v45 = vld [vmem:[%s3254_s0 + $0x2b8] ss:$12 sps:$4 sm:$0xff]  }
  0x10   :  { %v2519_v46 = vld [vmem:[%s3254_s0 + $0x94] ss:$12 sps:$4 sm:$0xff]   ;;  %v2523_v48 = vld [vmem:[%s3254_s0 + $0x90] ss:$12 sps:$4 sm:$0xff]   ;;  %v2526_v50 = vld [vmem:[%s3254_s0 + $0xac] ss:$12 sps:$4 sm:$0xff]  }
  0x11   :  { %v2521_v47 = vld [vmem:[%s3254_s0 + $0x2d4] ss:$12 sps:$4 sm:$0xff]   ;;  %v2524_v49 = vld [vmem:[%s3254_s0 + $0x2d0] ss:$12 sps:$4 sm:$0xff]   ;;  %v2528_v51 = vld [vmem:[%s3254_s0 + $0x2ec] ss:$12 sps:$4 sm:$0xff]  }
  0x12   :  { %894 = vmatpush1.bf16.msra.mxu0 %v2467_v5  ;;  %2450 = vmatpush1.bf16.msra.mxu1 %v2467_v5  ;;  %v2530_v52 = vld [vmem:[%s3254_s0 + $0xa8] ss:$12 sps:$4 sm:$0xff]   ;;  %v2532_v54 = vld [vmem:[%s3254_s0 + $0xc4] ss:$12 sps:$4 sm:$0xff]   ;;  %v2535_v56 = vld [vmem:[%s3254_s0 + $0xc0] ss:$12 sps:$4 sm:$0xff]  }
  0x13   :  { %895 = vmatprep.subr.bf16.mxu0 %v2612_v0  ;;  %2435 = vmatprep.subr.bf16.mxu1 %v2612_v0  ;;  %v2531_v53 = vld [vmem:[%s3254_s0 + $0x2e8] ss:$12 sps:$4 sm:$0xff]   ;;  %v2536_v57 = vld [vmem:[%s3254_s0 + $0x20] ss:$12 sps:$4 sm:$0xff]   ;;  %v2539_v59 = vld [vmem:[%s3254_s0 + $0x38] ss:$12 sps:$4 sm:$0xff]  }
  0x14   :  { %v2534_v55 = vld [vmem:[%s3254_s0 + $0x8] ss:$12 sps:$4 sm:$0xff]   ;;  %v2540_v60 = vld [vmem:[%s3254_s0 + $0xd8] ss:$12 sps:$4 sm:$0xff]   ;;  %v2541_v61 = vld [vmem:[%s3254_s0 + $0x50] ss:$12 sps:$4 sm:$0xff]  }
  0x15   :  { %v2537_v58 = vld [vmem:[%s3254_s0 + $0xdc] ss:$12 sps:$4 sm:$0xff]   ;;  %v2542_v62 = vld [vmem:[%s3254_s0 + $0xf4] ss:$12 sps:$4 sm:$0xff]   ;;  %v2547_v2 = vld [vmem:[%s3254_s0 + $0x10c] ss:$12 sps:$4 sm:$0xff]  }
  0x16   :  { %896 = vmatpush1.bf16.msra.mxu0 %v2468_v7  ;;  %2451 = vmatpush1.bf16.msra.mxu1 %v2468_v7  ;;  %v2544_v63 = vld [vmem:[%s3254_s0 + $0x68] ss:$12 sps:$4 sm:$0xff]   ;;  %v2546_v1 = vld [vmem:[%s3254_s0 + $0x80] ss:$12 sps:$4 sm:$0xff]   ;;  %v2549_v3 = vld [vmem:[%s3254_s0 + $0x98] ss:$12 sps:$4 sm:$0xff]  }
  0x17   :  { %897 = vmatprep.subr.bf16.mxu0 %v2612_v0  ;;  %2436 = vmatprep.subr.bf16.mxu1 %v2612_v0  ;;  %v2550_v4 = vld [vmem:[%s3254_s0 + $0x108] ss:$12 sps:$4 sm:$0xff]   ;;  %v2551_v5 = vld [vmem:[%s3254_s0 + $0xb0] ss:$12 sps:$4 sm:$0xff]   ;;  %v2555_v8 = vld [vmem:[%s3254_s0 + $0x120] ss:$12 sps:$4 sm:$0xff]  }
  0x18   :  { %v2552_v6 = vld [vmem:[%s3254_s0 + $0x124] ss:$12 sps:$4 sm:$0xff]   ;;  %v2554_v7 = vld [vmem:[%s3254_s0 + $0xc8] ss:$12 sps:$4 sm:$0xff]  }
  0x1a   :  { %898 = vmatpush1.bf16.msra.mxu0 %v2469_v9  ;;  %2452 = vmatpush1.bf16.msra.mxu1 %v2469_v9  ;;  %v2556_v9 = vld [vmem:[%s3254_s0 + $0xe0] ss:$12 sps:$4 sm:$0xff]  }
  0x1b   :  { %899 = vmatprep.subr.bf16.mxu0 %v2612_v0  ;;  %2437 = vmatprep.subr.bf16.mxu1 %v2612_v0 }
  0x1e   :  { %900 = vmatpush1.bf16.msra.mxu0 %v2470_v10  ;;  %2453 = vmatpush1.bf16.msra.mxu1 %v2470_v10  ;;  %v2557_v10 = vld [vmem:[%s3254_s0 + $0x13c] ss:$12 sps:$4 sm:$0xff]  }
  0x1f   :  { %901 = vmatprep.subr.bf16.mxu0 %v2612_v0  ;;  %2438 = vmatprep.subr.bf16.mxu1 %v2612_v0 }
  0x22   :  { %902 = vmatpush1.bf16.msra.mxu0 %v2471_v11  ;;  %2454 = vmatpush1.bf16.msra.mxu1 %v2471_v11  ;;  %v2559_v11 = vld [vmem:[%s3254_s0 + $0xf8] ss:$12 sps:$4 sm:$0xff]  }
  0x23   :  { %903 = vmatprep.subr.bf16.mxu0 %v2612_v0  ;;  %2439 = vmatprep.subr.bf16.mxu1 %v2612_v0 }
  0x26   :  { %904 = vmatpush1.bf16.msra.mxu0 %v2472_v12  ;;  %2455 = vmatpush1.bf16.msra.mxu1 %v2472_v12  ;;  %v2560_v12 = vld [vmem:[%s3254_s0 + $0x138] ss:$12 sps:$4 sm:$0xff]  }
  0x27   :  { %905 = vmatprep.subr.bf16.mxu0 %v2612_v0  ;;  %2440 = vmatprep.subr.bf16.mxu1 %v2612_v0 }
  0x2a   :  { %906 = vmatpush1.bf16.msra.mxu0 %v2473_v13  ;;  %2456 = vmatpush1.bf16.msra.mxu1 %v2473_v13  ;;  %v2561_v13 = vld [vmem:[%s3254_s0 + $0x110] ss:$12 sps:$4 sm:$0xff]  }
  0x2b   :  { %907 = vmatprep.subr.bf16.mxu0 %v2612_v0  ;;  %2441 = vmatprep.subr.bf16.mxu1 %v2612_v0 }
  0x2e   :  { %908 = vmatpush1.bf16.msra.mxu0 %v2474_v14  ;;  %2457 = vmatpush1.bf16.msra.mxu1 %v2474_v14  ;;  %v2562_v14 = vld [vmem:[%s3254_s0 + $0x154] ss:$12 sps:$4 sm:$0xff]  }
  0x2f   :  { %909 = vmatprep.subr.bf16.mxu0 %v2612_v0  ;;  %2442 = vmatprep.subr.bf16.mxu1 %v2612_v0 }
  0x32   :  { %910 = vmatpush1.bf16.msra.mxu0 %v2475_v15  ;;  %2458 = vmatpush1.bf16.msra.mxu1 %v2475_v15  ;;  %v2564_v15 = vld [vmem:[%s3254_s0 + $0x128] ss:$12 sps:$4 sm:$0xff]  }
  0x33   :  { %911 = vmatprep.subr.bf16.mxu0 %v2612_v0  ;;  %2443 = vmatprep.subr.bf16.mxu1 %v2612_v0 }
  0x36   :  { %912 = vmatpush1.bf16.msra.mxu0 %v2476_v16  ;;  %2459 = vmatpush1.bf16.msra.mxu1 %v2476_v16  ;;  %v2565_v16 = vld [vmem:[%s3254_s0 + $0x150] ss:$12 sps:$4 sm:$0xff]  }
  0x37   :  { %913 = vmatprep.subr.bf16.mxu0 %v2612_v0  ;;  %2444 = vmatprep.subr.bf16.mxu1 %v2612_v0 }
  0x3a   :  { %914 = vmatpush1.bf16.msra.mxu0 %v2477_v17  ;;  %2460 = vmatpush1.bf16.msra.mxu1 %v2477_v17  ;;  %v2566_v17 = vld [vmem:[%s3254_s0 + $0x140] ss:$12 sps:$4 sm:$0xff]  }
  0x3b   :  { %915 = vmatprep.subr.bf16.mxu0 %v2612_v0  ;;  %2445 = vmatprep.subr.bf16.mxu1 %v2612_v0  ;;  %v2545_v0 = vld [vmem:[%s3254_s0 + $0xf0] ss:$12 sps:$4 sm:$0xff]  }
  0x3e   :  { %916 = vmatpush1.bf16.msra.mxu0 %v2478_v18  ;;  %2461 = vmatpush1.bf16.msra.mxu1 %v2478_v18  ;;  %v2567_v18 = vld [vmem:[%s3254_s0 + $0x16c] ss:$12 sps:$4 sm:$0xff]  }
  0x3f   :  { %2356 = vmatprep.subr.bf16.mxu1 %v2485_v20 }
  0x41   :  { %918 = vmatmul.mubr.bf16.vlgmr.msra.gmra.mrb[0].mxu0 %v2479_v19  ;;  %1110 = vmatmul.mubr.bf16.vlgmr.msra.gmra.mrb[0].mxu1 %v2482_v21  ;;  %v2569_v19 = vld [vmem:[%s3254_s0 + $0x158] ss:$12 sps:$4 sm:$0xff]   ;;  %v2571_v21 = vld [vmem:[%s3254_s0 + $0x170] ss:$12 sps:$4 sm:$0xff]  }
  0x42   :  { %2357 = vmatpush3.bf16.msra.mxu1 %v2485_v20  ;;  %925 = vmatprep.mubr.bf16.mxu0 %v2486_v22  ;;  %v2570_v20 = vld [vmem:[%s3254_s0 + $0x168] ss:$12 sps:$4 sm:$0xff]   ;;  %v2572_v22 = vld [vmem:[%s3254_s0 + $0x184] ss:$12 sps:$4 sm:$0xff]  }
  0x43   :  { %1117 = vmatprep.mubr.bf16.mxu1 %v2488_v23  ;;  %2358 = vmatprep.subr.bf16.mxu1 %v2492_v24  ;;  %v2574_v23 = vld [vmem:[%s3254_s0 + $0x188] ss:$12 sps:$4 sm:$0xff]  }
  0x46   :  { %2359 = vmatpush3.bf16.msra.mxu1 %v2492_v24  ;;  %v2575_v24 = vld [vmem:[%s3254_s0 + $0x180] ss:$12 sps:$4 sm:$0xff]  }
  0x47   :  { %2360 = vmatprep.subr.bf16.mxu1 %v2505_v26 }
  0x49   :  { %926 = vmatmul.mubr.bf16.gmra.mrb[4].mxu0 %v2490_v25  ;;  %1118 = vmatmul.mubr.bf16.gmra.mrb[4].mxu1 %v2491_v27  ;;  %v2576_v25 = vld [vmem:[%s3254_s0 + $0x1a0] ss:$12 sps:$4 sm:$0xff]   ;;  %v2579_v27 = vld [vmem:[%s3254_s0 + $0x1b8] ss:$12 sps:$4 sm:$0xff]  }
  0x4a   :  { %933 = vmatprep.mubr.bf16.mxu0 %v2493_v28  ;;  %1125 = vmatprep.mubr.bf16.mxu1 %v2495_v29  ;;  %v2580_v28 = vld [vmem:[%s3254_s0 + $0x198] ss:$12 sps:$4 sm:$0xff]   ;;  %v2581_v29 = vld [vmem:[%s3254_s0 + $0x1d0] ss:$12 sps:$4 sm:$0xff]  }
  0x4b   :  { %2361 = vmatpush3.bf16.msra.mxu1 %v2505_v26  ;;  %v2577_v26 = vld [vmem:[%s3254_s0 + $0x19c] ss:$12 sps:$4 sm:$0xff]  }
  0x4c   :  { %2362 = vmatprep.subr.bf16.mxu1 %v2516_v30 }
  0x4f   :  { %2363 = vmatpush3.bf16.msra.mxu1 %v2516_v30  ;;  %v2582_v30 = vld [vmem:[%s3254_s0 + $0x1b4] ss:$12 sps:$4 sm:$0xff]  }
  0x50   :  { %2364 = vmatprep.subr.bf16.mxu1 %v2525_v33 }
  0x51   :  { %934 = vmatmul.mubr.bf16.gmra.mrb[8].mxu0 %v2497_v31  ;;  %1126 = vmatmul.mubr.bf16.gmra.mrb[8].mxu1 %v2498_v32  ;;  %v2584_v31 = vld [vmem:[%s3254_s0 + $0x1e8] ss:$12 sps:$4 sm:$0xff]   ;;  %v2585_v32 = vld [vmem:[%s3254_s0 + $0x1b0] ss:$12 sps:$4 sm:$0xff]  }
  0x52   :  { %941 = vmatprep.mubr.bf16.mxu0 %v2499_v34  ;;  %1133 = vmatprep.mubr.bf16.mxu1 %v2501_v35  ;;  %v2587_v34 = vld [vmem:[%s3254_s0 + $0x1cc] ss:$12 sps:$4 sm:$0xff]  }
  0x53   :  { %2365 = vmatpush3.bf16.msra.mxu1 %v2525_v33  ;;  %v2586_v33 = vld [vmem:[%s3254_s0 + $0x200] ss:$12 sps:$4 sm:$0xff]   ;;  %v2589_v35 = vld [vmem:[%s3254_s0 + $0x218] ss:$12 sps:$4 sm:$0xff]  }
  0x59   :  { %942 = vmatmul.mubr.bf16.gmra.mrb[12].mxu0 %v2503_v36  ;;  %1134 = vmatmul.mubr.bf16.gmra.mrb[12].mxu1 %v2504_v37  ;;  %v2590_v36 = vld [vmem:[%s3254_s0 + $0x1c8] ss:$12 sps:$4 sm:$0xff]   ;;  %v2591_v37 = vld [vmem:[%s3254_s0 + $0x230] ss:$12 sps:$4 sm:$0xff]  }
  0x5a   :  { %949 = vmatprep.mubr.bf16.mxu0 %v2506_v38  ;;  %1141 = vmatprep.mubr.bf16.mxu1 %v2508_v39  ;;  %v2592_v38 = vld [vmem:[%s3254_s0 + $0x1e4] ss:$12 sps:$4 sm:$0xff]   ;;  %v2594_v39 = vld [vmem:[%s3254_s0 + $0x248] ss:$12 sps:$4 sm:$0xff]  }
  0x61   :  { %950 = vmatmul.mubr.bf16.gmra.mrb[16].mxu0 %v2510_v40  ;;  %1142 = vmatmul.mubr.bf16.gmra.mrb[16].mxu1 %v2511_v41  ;;  %v2595_v40 = vld [vmem:[%s3254_s0 + $0x1e0] ss:$12 sps:$4 sm:$0xff]  }
  0x62   :  { %957 = vmatprep.mubr.bf16.mxu0 %v2512_v42  ;;  %1149 = vmatprep.mubr.bf16.mxu1 %v2514_v43  ;;  %v2596_v41 = vld [vmem:[%s3254_s0 + $0x260] ss:$12 sps:$4 sm:$0xff]   ;;  %v2597_v42 = vld [vmem:[%s3254_s0 + $0x1fc] ss:$12 sps:$4 sm:$0xff]   ;;  %v2599_v43 = vld [vmem:[%s3254_s0 + $0x278] ss:$12 sps:$4 sm:$0xff]  }
  0x69   :  { %958 = vmatmul.mubr.bf16.gmra.mrb[20].mxu0 %v2517_v44  ;;  %1150 = vmatmul.mubr.bf16.gmra.mrb[20].mxu1 %v2518_v45  ;;  %v2600_v44 = vld [vmem:[%s3254_s0 + $0x1f8] ss:$12 sps:$4 sm:$0xff]   ;;  %v2601_v45 = vld [vmem:[%s3254_s0 + $0x290] ss:$12 sps:$4 sm:$0xff]  }
  0x6a   :  { %965 = vmatprep.mubr.bf16.mxu0 %v2519_v46  ;;  %1157 = vmatprep.mubr.bf16.mxu1 %v2521_v47  ;;  %v2602_v46 = vld [vmem:[%s3254_s0 + $0x214] ss:$12 sps:$4 sm:$0xff]  }
  0x6b   :  { %v2604_v47 = vld [vmem:[%s3254_s0 + $0x2a8] ss:$12 sps:$4 sm:$0xff]  }
  0x71   :  { %966 = vmatmul.mubr.bf16.gmra.mrb[24].mxu0 %v2523_v48  ;;  %1158 = vmatmul.mubr.bf16.gmra.mrb[24].mxu1 %v2524_v49  ;;  %v2605_v48 = vld [vmem:[%s3254_s0 + $0x210] ss:$12 sps:$4 sm:$0xff]   ;;  %v2606_v49 = vld [vmem:[%s3254_s0 + $0x2c0] ss:$12 sps:$4 sm:$0xff]  }
  0x72   :  { %973 = vmatprep.mubr.bf16.mxu0 %v2526_v50  ;;  %1165 = vmatprep.mubr.bf16.mxu1 %v2528_v51  ;;  %v2607_v50 = vld [vmem:[%s3254_s0 + $0x22c] ss:$12 sps:$4 sm:$0xff]  }
  0x73   :  { %v2609_v51 = vld [vmem:[%s3254_s0 + $0x2d8] ss:$12 sps:$4 sm:$0xff]  }
  0x79   :  { %974 = vmatmul.mubr.bf16.gmra.mrb[28].mxu0 %v2530_v52  ;;  %1166 = vmatmul.mubr.bf16.gmra.mrb[28].mxu1 %v2531_v53  ;;  %v2610_v52 = vld [vmem:[%s3254_s0 + $0x228] ss:$12 sps:$4 sm:$0xff]   ;;  %v2611_v53 = vld [vmem:[%s3254_s0 + $0x2f0] ss:$12 sps:$4 sm:$0xff]  }
  0x7a   :  { %981 = vmatprep.mubr.bf16.mxu0 %v2532_v54  ;;  %2366 = vmatprep.mubr.msk.bf16.mxu1 %vm788_vm0, %v2534_v55 }
  0x81   :  { %982 = vmatmul.mubr.bf16.gmra.mrb[32].mxu0 %v2535_v56  ;;  %2367 = vmatmul.mubr.msk.bf16.vlgmr.msra.gmra.mrb[32].mxu1 %vm788_vm0, %v2536_v57 }
  0x82   :  { %989 = vmatprep.mubr.bf16.mxu0 %v2537_v58  ;;  %2370 = vmatprep.mubr.msk.bf16.mxu1 %vm788_vm0, %v2539_v59 }
  0x89   :  { %990 = vmatmul.mubr.bf16.gmra.mrb[36].mxu0 %v2540_v60  ;;  %2371 = vmatmul.mubr.msk.bf16.gmra.mrb[36].mxu1 %vm788_vm0, %v2541_v61 }
  0x8a   :  { %997 = vmatprep.mubr.bf16.mxu0 %v2542_v62  ;;  %2374 = vmatprep.mubr.msk.bf16.mxu1 %vm788_vm0, %v2544_v63 }
  0x91   :  { %998 = vmatmul.mubr.bf16.gmra.mrb[40].mxu0 %v2545_v0  ;;  %2375 = vmatmul.mubr.msk.bf16.gmra.mrb[40].mxu1 %vm788_vm0, %v2546_v1 }
  0x92   :  { %1005 = vmatprep.mubr.bf16.mxu0 %v2547_v2  ;;  %2378 = vmatprep.mubr.msk.bf16.mxu1 %vm788_vm0, %v2549_v3 }
  0x99   :  { %1006 = vmatmul.mubr.bf16.gmra.mrb[44].mxu0 %v2550_v4  ;;  %2379 = vmatmul.mubr.msk.bf16.gmra.mrb[44].mxu1 %vm788_vm0, %v2551_v5 }
  0x9a   :  { %1013 = vmatprep.mubr.bf16.mxu0 %v2552_v6  ;;  %2382 = vmatprep.mubr.msk.bf16.mxu1 %vm788_vm0, %v2554_v7 }
  0xa1   :  { %1014 = vmatmul.mubr.bf16.gmra.mrb[48].mxu0 %v2555_v8  ;;  %2383 = vmatmul.mubr.msk.bf16.gmra.mrb[48].mxu1 %vm788_vm0, %v2556_v9 }
  0xa2   :  { %1021 = vmatprep.mubr.bf16.mxu0 %v2557_v10  ;;  %2386 = vmatprep.mubr.msk.bf16.mxu1 %vm788_vm0, %v2559_v11 }
  0xa9   :  { %1022 = vmatmul.mubr.bf16.gmra.mrb[52].mxu0 %v2560_v12  ;;  %2387 = vmatmul.mubr.msk.bf16.gmra.mrb[52].mxu1 %vm788_vm0, %v2561_v13 }
  0xaa   :  { %1029 = vmatprep.mubr.bf16.mxu0 %v2562_v14  ;;  %2390 = vmatprep.mubr.msk.bf16.mxu1 %vm788_vm0, %v2564_v15 }
  0xb1   :  { %1030 = vmatmul.mubr.bf16.gmra.mrb[56].mxu0 %v2565_v16  ;;  %2391 = vmatmul.mubr.msk.bf16.gmra.mrb[56].mxu1 %vm788_vm0, %v2566_v17 }
  0xb2   :  { %1037 = vmatprep.mubr.bf16.mxu0 %v2567_v18  ;;  %2394 = vmatprep.mubr.msk.bf16.mxu1 %vm788_vm0, %v2569_v19 }
  0xb9   :  { %1038 = vmatmul.mubr.bf16.gmra.mrb[60].mxu0 %v2570_v20  ;;  %2395 = vmatmul.mubr.msk.bf16.gmra.mrb[60].mxu1 %vm788_vm0, %v2571_v21 }
  0xba   :  { %1045 = vmatprep.mubr.bf16.mxu0 %v2572_v22  ;;  %2398 = vmatprep.mubr.msk.bf16.mxu1 %vm788_vm0, %v2574_v23 }
  0xc1   :  { %1046 = vmatmul.mubr.bf16.gmra.mrb[64].mxu0 %v2575_v24  ;;  %2399 = vmatmul.mubr.msk.bf16.gmra.mrb[64].mxu1 %vm788_vm0, %v2576_v25 }
  0xc2   :  { %1053 = vmatprep.mubr.bf16.mxu0 %v2577_v26  ;;  %2402 = vmatprep.mubr.msk.bf16.mxu1 %vm788_vm0, %v2579_v27 }
  0xc9   :  { %1054 = vmatmul.mubr.bf16.gmra.mrb[68].mxu0 %v2580_v28  ;;  %2403 = vmatmul.mubr.msk.bf16.gmra.mrb[68].mxu1 %vm788_vm0, %v2581_v29 }
  0xca   :  { %1061 = vmatprep.mubr.bf16.mxu0 %v2582_v30  ;;  %2406 = vmatprep.mubr.msk.bf16.mxu1 %vm788_vm0, %v2584_v31 }
  0xd1   :  { %1062 = vmatmul.mubr.bf16.gmra.mrb[72].mxu0 %v2585_v32  ;;  %2407 = vmatmul.mubr.msk.bf16.gmra.mrb[72].mxu1 %vm788_vm0, %v2586_v33 }
  0xd2   :  { %1069 = vmatprep.mubr.bf16.mxu0 %v2587_v34  ;;  %2410 = vmatprep.mubr.msk.bf16.mxu1 %vm788_vm0, %v2589_v35 }
  0xd9   :  { %1070 = vmatmul.mubr.bf16.gmra.mrb[76].mxu0 %v2590_v36  ;;  %2411 = vmatmul.mubr.msk.bf16.gmra.mrb[76].mxu1 %vm788_vm0, %v2591_v37 }
  0xda   :  { %1077 = vmatprep.mubr.bf16.mxu0 %v2592_v38  ;;  %2414 = vmatprep.mubr.msk.bf16.mxu1 %vm788_vm0, %v2594_v39 }
  0xe1   :  { %1078 = vmatmul.mubr.bf16.gmra.mrb[80].mxu0 %v2595_v40  ;;  %2415 = vmatmul.mubr.msk.bf16.gmra.mrb[80].mxu1 %vm788_vm0, %v2596_v41 }
  0xe2   :  { %1085 = vmatprep.mubr.bf16.mxu0 %v2597_v42  ;;  %2418 = vmatprep.mubr.msk.bf16.mxu1 %vm788_vm0, %v2599_v43 }
  0xe9   :  { %1086 = vmatmul.mubr.bf16.gmra.mrb[84].mxu0 %v2600_v44  ;;  %2419 = vmatmul.mubr.msk.bf16.gmra.mrb[84].mxu1 %vm788_vm0, %v2601_v45 }
  0xea   :  { %1093 = vmatprep.mubr.bf16.mxu0 %v2602_v46  ;;  %2422 = vmatprep.mubr.msk.bf16.mxu1 %vm788_vm0, %v2604_v47 }
  0xf1   :  { %1094 = vmatmul.mubr.bf16.gmra.mrb[88].mxu0 %v2605_v48  ;;  %2423 = vmatmul.mubr.msk.bf16.gmra.mrb[88].mxu1 %vm788_vm0, %v2606_v49 }
  0xf2   :  { %1101 = vmatprep.mubr.bf16.mxu0 %v2607_v50  ;;  %2426 = vmatprep.mubr.msk.bf16.mxu1 %vm788_vm0, %v2609_v51 }
  0xf9   :  { %1102 = vmatmul.mubr.bf16.gmra.mrb[92].mxu0 %v2610_v52  ;;  %2427 = vmatmul.mubr.msk.bf16.gmra.mrb[92].mxu1 %vm788_vm0, %v2611_v53 }
 0x114   :  { %v3043_v54 = vpop.f32.mrb[0].mxu0  ;;  %v3045_v55 = vpop.f32.mrb[0].mxu1 }
 0x115   :  { %v921_v56 = vpop.f32.mrb[1].mxu0  ;;  %v1113_v57 = vpop.f32.mrb[1].mxu1 }
 0x116   :  { %v3047_v58 = vpop.f32.mrb[2].mxu0  ;;  %v3049_v59 = vpop.f32.mrb[2].mxu1 }
 0x117   :  { %v924_v60 = vpop.f32.mrb[3].mxu0  ;;  %v1116_v61 = vpop.f32.mrb[3].mxu1 }
 0x11c   :  { %v927_v62 = vpop.f32.mrb[4].mxu0  ;;  %v3051_v63 = vpop.f32.mrb[4].mxu1 }
 0x11d   :  { %v929_v0 = vpop.f32.mrb[5].mxu0  ;;  %v1121_v1 = vpop.f32.mrb[5].mxu1 }
 0x11e   :  { %v930_v2 = vpop.f32.mrb[6].mxu0  ;;  %v3053_v3 = vpop.f32.mrb[6].mxu1 }
 0x11f   :  { %v932_v4 = vpop.f32.mrb[7].mxu0  ;;  %v1124_v5 = vpop.f32.mrb[7].mxu1 }
 0x124   :  { %v3055_v6 = vpop.f32.mrb[8].mxu0  ;;  %v3057_v7 = vpop.f32.mrb[8].mxu1 }
 0x125   :  { %v937_v8 = vpop.f32.mrb[9].mxu0  ;;  %v1129_v9 = vpop.f32.mrb[9].mxu1 }
 0x126   :  { %v3059_v10 = vpop.f32.mrb[10].mxu0  ;;  %v3061_v11 = vpop.f32.mrb[10].mxu1 }
 0x127   :  { %v940_v12 = vpop.f32.mrb[11].mxu0  ;;  %v1132_v13 = vpop.f32.mrb[11].mxu1 }
 0x12c   :  { %v943_v14 = vpop.f32.mrb[12].mxu0  ;;  %v3063_v15 = vpop.f32.mrb[12].mxu1 }
 0x12d   :  { %v945_v16 = vpop.f32.mrb[13].mxu0  ;;  %v1137_v17 = vpop.f32.mrb[13].mxu1 }
 0x12e   :  { %v3065_v18 = vpop.f32.mrb[14].mxu0  ;;  %v3067_v19 = vpop.f32.mrb[14].mxu1 }
 0x12f   :  { %v948_v20 = vpop.f32.mrb[15].mxu0  ;;  %v1140_v21 = vpop.f32.mrb[15].mxu1 }
 0x134   :  { %v3069_v22 = vpop.f32.mrb[16].mxu0  ;;  %v3071_v23 = vpop.f32.mrb[16].mxu1 }
 0x135   :  { %v953_v24 = vpop.f32.mrb[17].mxu0  ;;  %v1145_v25 = vpop.f32.mrb[17].mxu1 }
 0x136   :  { %v3073_v26 = vpop.f32.mrb[18].mxu0  ;;  %v3075_v27 = vpop.f32.mrb[18].mxu1 }
 0x137   :  { %v956_v28 = vpop.f32.mrb[19].mxu0  ;;  %v1148_v29 = vpop.f32.mrb[19].mxu1 }
 0x13c   :  { %v3077_v30 = vpop.f32.mrb[20].mxu0  ;;  %v3079_v31 = vpop.f32.mrb[20].mxu1 }
 0x13d   :  { %v961_v32 = vpop.f32.mrb[21].mxu0  ;;  %v1153_v33 = vpop.f32.mrb[21].mxu1 }
 0x13e   :  { %v3081_v34 = vpop.f32.mrb[22].mxu0  ;;  %v3083_v35 = vpop.f32.mrb[22].mxu1 }
 0x13f   :  { %v964_v36 = vpop.f32.mrb[23].mxu0  ;;  %v1156_v37 = vpop.f32.mrb[23].mxu1 }
 0x144   :  { %v3085_v38 = vpop.f32.mrb[24].mxu0  ;;  %v3087_v39 = vpop.f32.mrb[24].mxu1 }
 0x145   :  { %v969_v40 = vpop.f32.mrb[25].mxu0  ;;  %v1161_v41 = vpop.f32.mrb[25].mxu1 }
 0x146   :  { %v3089_v42 = vpop.f32.mrb[26].mxu0  ;;  %v3091_v43 = vpop.f32.mrb[26].mxu1 }
 0x147   :  { %v972_v44 = vpop.f32.mrb[27].mxu0  ;;  %v1164_v45 = vpop.f32.mrb[27].mxu1 }
 0x14c   :  { %v3093_v46 = vpop.f32.mrb[28].mxu0  ;;  %v3095_v47 = vpop.f32.mrb[28].mxu1 }
 0x14d   :  { %v977_v48 = vpop.f32.mrb[29].mxu0  ;;  %v1169_v49 = vpop.f32.mrb[29].mxu1 }
 0x14e   :  { %v3097_v50 = vpop.f32.mrb[30].mxu0  ;;  %v3099_v51 = vpop.f32.mrb[30].mxu1 }
 0x14f   :  { %v980_v52 = vpop.f32.mrb[31].mxu0  ;;  %v1172_v53 = vpop.f32.mrb[31].mxu1 }
 0x154   :  { %v3101_v56 = vpop.f32.mrb[32].mxu0  ;;  %v2368_v57 = vpop.f32.mrb[32].mxu1 }
 0x155   :  { %v1217_v60 = vadd.f32 %v2368_v57, %v927_v62  ;;  %v985_v61 = vpop.f32.mrb[33].mxu0  ;;  %v1208_v0 = vpop.f32.mrb[33].mxu1 }
 0x156   :  { %v1209_v1 = vadd.f32 %v1208_v0, %v3043_v54  ;;  %v3104_v4 = vpop.f32.mrb[34].mxu0  ;;  %v2369_v5 = vpop.f32.mrb[34].mxu1 }
 0x157   :  { %v1220_v8 = vadd.f32 %v2369_v5, %v930_v2  ;;  %v988_v9 = vpop.f32.mrb[35].mxu0  ;;  %v1211_v12 = vpop.f32.mrb[35].mxu1  ;;  %v1465_v16 = vmax.f32 %v1217_v60, 0.0 }
 0x158   :  { %v1212_v13 = vadd.f32 %v1211_v12, %v3047_v58  ;;  %v1463_v20 = vmax.f32 %v1209_v1, 0.0 }
 0x159   :  { %v1466_v17 = vmax.f32 %v1220_v8, 0.0 }
 0x15a   :  { %v1464_v21 = vmax.f32 %v1212_v13, 0.0 }
 0x15b   :  { %v2136_v24 = vpack.c.bf16 %v1466_v17, %v1465_v16 }
 0x15c   :  { %v2131_v25 = vpack.c.bf16 %v1464_v21, %v1463_v20  ;;  %v3107_v28 = vpop.f32.mrb[36].mxu0  ;;  %v2372_v62 = vpop.f32.mrb[36].mxu1 }
 0x15d   :  { %2288 = vst [vmem:[%s3255_s2 + $0x8] sm:$0xff] %v2136_v24   ;;  %v1233_v54 = vadd.f32 %v2372_v62, %v943_v14  ;;  %v993_v29 = vpop.f32.mrb[37].mxu0  ;;  %v1224_v2 = vpop.f32.mrb[37].mxu1 }
 0x15e   :  { %2132 = vst [vmem:[%s3255_s2] sm:$0xff] %v2131_v25   ;;  %v1225_v58 = vadd.f32 %v1224_v2, %v3055_v6  ;;  %v994_v32 = vpop.f32.mrb[38].mxu0  ;;  %v2373_v33 = vpop.f32.mrb[38].mxu1 }
 0x15f   :  { %v1236_v36 = vadd.f32 %v2373_v33, %v3065_v18  ;;  %v996_v37 = vpop.f32.mrb[39].mxu0  ;;  %v1227_v40 = vpop.f32.mrb[39].mxu1  ;;  %v1469_v44 = vmax.f32 %v1233_v54, 0.0 }
 0x160   :  { %v1228_v41 = vadd.f32 %v1227_v40, %v3059_v10  ;;  %v1467_v48 = vmax.f32 %v1225_v58, 0.0 }
 0x161   :  { %v1470_v45 = vmax.f32 %v1236_v36, 0.0 }
 0x162   :  { %v1468_v14 = vmax.f32 %v1228_v41, 0.0 }
 0x163   :  { %v2146_v49 = vpack.c.bf16 %v1470_v45, %v1469_v44 }
 0x164   :  { %v2141_v52 = vpack.c.bf16 %v1468_v14, %v1467_v48  ;;  %v3118_v53 = vpop.f32.mrb[40].mxu0  ;;  %v2376_v57 = vpop.f32.mrb[40].mxu1 }
 0x165   :  { %2290 = vst [vmem:[%s3255_s2 + $0x18] sm:$0xff] %v2146_v49   ;;  %v1249_v6 = vadd.f32 %v2376_v57, %v3077_v30  ;;  %v1001_v18 = vpop.f32.mrb[41].mxu0  ;;  %v1240_v60 = vpop.f32.mrb[41].mxu1 }
 0x166   :  { %2289 = vst [vmem:[%s3255_s2 + $0x10] sm:$0xff] %v2141_v52   ;;  %v1241_v10 = vadd.f32 %v1240_v60, %v3069_v22  ;;  %v3128_v61 = vpop.f32.mrb[42].mxu0  ;;  %v2377_v0 = vpop.f32.mrb[42].mxu1 }
 0x167   :  { %v1252_v1 = vadd.f32 %v2377_v0, %v3081_v34  ;;  %v1004_v5 = vpop.f32.mrb[43].mxu0  ;;  %v1243_v8 = vpop.f32.mrb[43].mxu1  ;;  %v1473_v12 = vmax.f32 %v1249_v6, 0.0 }
 0x168   :  { %v1244_v9 = vadd.f32 %v1243_v8, %v3073_v26  ;;  %v1471_v30 = vmax.f32 %v1241_v10, 0.0 }
 0x169   :  { %v1474_v13 = vmax.f32 %v1252_v1, 0.0 }
 0x16a   :  { %v1472_v16 = vmax.f32 %v1244_v9, 0.0 }
 0x16b   :  { %v2156_v17 = vpack.c.bf16 %v1474_v13, %v1473_v12 }
 0x16c   :  { %v2151_v20 = vpack.c.bf16 %v1472_v16, %v1471_v30  ;;  %v1007_v21 = vpop.f32.mrb[44].mxu0  ;;  %v2380_v24 = vpop.f32.mrb[44].mxu1 }
 0x16d   :  { %2292 = vst [vmem:[%s3255_s2 + $0x28] sm:$0xff] %v2156_v17   ;;  %v1265_v22 = vadd.f32 %v2380_v24, %v3093_v46  ;;  %v1009_v25 = vpop.f32.mrb[45].mxu0  ;;  %v1256_v34 = vpop.f32.mrb[45].mxu1 }
 0x16e   :  { %2291 = vst [vmem:[%s3255_s2 + $0x20] sm:$0xff] %v2151_v20   ;;  %v1257_v26 = vadd.f32 %v1256_v34, %v3085_v38  ;;  %v1010_v62 = vpop.f32.mrb[46].mxu0  ;;  %v2381_v54 = vpop.f32.mrb[46].mxu1 }
 0x16f   :  { %v1268_v29 = vadd.f32 %v2381_v54, %v3097_v50  ;;  %v1012_v2 = vpop.f32.mrb[47].mxu0  ;;  %v1259_v58 = vpop.f32.mrb[47].mxu1  ;;  %v1477_v36 = vmax.f32 %v1265_v22, 0.0 }
 0x170   :  { %v1260_v33 = vadd.f32 %v1259_v58, %v3089_v42  ;;  %v1475_v40 = vmax.f32 %v1257_v26, 0.0 }
 0x171   :  { %v1478_v37 = vmax.f32 %v1268_v29, 0.0 }
 0x172   :  { %v1476_v46 = vmax.f32 %v1260_v33, 0.0 }
 0x173   :  { %v2166_v41 = vpack.c.bf16 %v1478_v37, %v1477_v36 }
 0x174   :  { %v2161_v44 = vpack.c.bf16 %v1476_v46, %v1475_v40  ;;  %v1015_v45 = vpop.f32.mrb[48].mxu0  ;;  %v2384_v48 = vpop.f32.mrb[48].mxu1 }
 0x175   :  { %2294 = vst [vmem:[%s3255_s2 + $0x38] sm:$0xff] %v2166_v41   ;;  %v1281_v38 = vadd.f32 %v2384_v48, %v3107_v28  ;;  %v1017_v14 = vpop.f32.mrb[49].mxu0  ;;  %v1272_v50 = vpop.f32.mrb[49].mxu1 }
 0x176   :  { %2293 = vst [vmem:[%s3255_s2 + $0x30] sm:$0xff] %v2161_v44   ;;  %v1273_v42 = vadd.f32 %v1272_v50, %v3101_v56  ;;  %v1018_v49 = vpop.f32.mrb[50].mxu0  ;;  %v2385_v52 = vpop.f32.mrb[50].mxu1 }
 0x177   :  { %v1284_v57 = vadd.f32 %v2385_v52, %v994_v32  ;;  %v1020_v6 = vpop.f32.mrb[51].mxu0  ;;  %v1275_v18 = vpop.f32.mrb[51].mxu1  ;;  %v1481_v10 = vmax.f32 %v1281_v38, 0.0 }
 0x178   :  { %v1276_v60 = vadd.f32 %v1275_v18, %v3104_v4  ;;  %v1479_v1 = vmax.f32 %v1273_v42, 0.0 }
 0x179   :  { %v1482_v0 = vmax.f32 %v1284_v57, 0.0 }
 0x17a   :  { %v1480_v5 = vmax.f32 %v1276_v60, 0.0 }
 0x17b   :  { %v2176_v28 = vpack.c.bf16 %v1482_v0, %v1481_v10 }
 0x17c   :  { %v2171_v8 = vpack.c.bf16 %v1480_v5, %v1479_v1  ;;  %v1023_v9 = vpop.f32.mrb[52].mxu0  ;;  %v2388_v12 = vpop.f32.mrb[52].mxu1 }
 0x17d   :  { %2296 = vst [vmem:[%s3255_s2 + $0x48] sm:$0xff] %v2176_v28   ;;  %v1297_v56 = vadd.f32 %v2388_v12, %v1007_v21  ;;  %v1025_v13 = vpop.f32.mrb[53].mxu0  ;;  %v1288_v30 = vpop.f32.mrb[53].mxu1 }
 0x17e   :  { %2295 = vst [vmem:[%s3255_s2 + $0x40] sm:$0xff] %v2171_v8   ;;  %v1289_v4 = vadd.f32 %v1288_v30, %v3118_v53  ;;  %v1026_v32 = vpop.f32.mrb[54].mxu0  ;;  %v2389_v16 = vpop.f32.mrb[54].mxu1 }
 0x17f   :  { %v1300_v17 = vadd.f32 %v2389_v16, %v1010_v62  ;;  %v1028_v20 = vpop.f32.mrb[55].mxu0  ;;  %v1291_v24 = vpop.f32.mrb[55].mxu1  ;;  %v1485_v25 = vmax.f32 %v1297_v56, 0.0 }
 0x180   :  { %v1292_v22 = vadd.f32 %v1291_v24, %v3128_v61  ;;  %v1483_v26 = vmax.f32 %v1289_v4, 0.0 }
 0x181   :  { %v1486_v34 = vmax.f32 %v1300_v17, 0.0 }
 0x182   :  { %v1484_v54 = vmax.f32 %v1292_v22, 0.0 }
 0x183   :  { %v2186_v21 = vpack.c.bf16 %v1486_v34, %v1485_v25 }
 0x184   :  { %v2181_v29 = vpack.c.bf16 %v1484_v54, %v1483_v26  ;;  %v1031_v2 = vpop.f32.mrb[56].mxu0  ;;  %v2392_v58 = vpop.f32.mrb[56].mxu1 }
 0x185   :  { %2298 = vst [vmem:[%s3255_s2 + $0x58] sm:$0xff] %v2186_v21   ;;  %v1313_v53 = vadd.f32 %v2392_v58, %v1023_v9  ;;  %v1033_v33 = vpop.f32.mrb[57].mxu0  ;;  %v1304_v36 = vpop.f32.mrb[57].mxu1 }
 0x186   :  { %2297 = vst [vmem:[%s3255_s2 + $0x50] sm:$0xff] %v2181_v29   ;;  %v1305_v61 = vadd.f32 %v1304_v36, %v1015_v45  ;;  %v1034_v62 = vpop.f32.mrb[58].mxu0  ;;  %v2393_v37 = vpop.f32.mrb[58].mxu1 }
 0x187   :  { %v1316_v40 = vadd.f32 %v2393_v37, %v1026_v32  ;;  %v1036_v46 = vpop.f32.mrb[59].mxu0  ;;  %v1307_v41 = vpop.f32.mrb[59].mxu1  ;;  %v1489_v48 = vmax.f32 %v1313_v53, 0.0 }
 0x188   :  { %v1308_v44 = vadd.f32 %v1307_v41, %v1018_v49  ;;  %v1487_v14 = vmax.f32 %v1305_v61, 0.0 }
 0x189   :  { %v1490_v38 = vmax.f32 %v1316_v40, 0.0 }
 0x18a   :  { %v1488_v50 = vmax.f32 %v1308_v44, 0.0 }
 0x18b   :  { %v2196_v42 = vpack.c.bf16 %v1490_v38, %v1489_v48 }
 0x18c   :  { %v2191_v52 = vpack.c.bf16 %v1488_v50, %v1487_v14  ;;  %v1039_v57 = vpop.f32.mrb[60].mxu0  ;;  %v2396_v6 = vpop.f32.mrb[60].mxu1 }
 0x18d   :  { %2300 = vst [vmem:[%s3255_s2 + $0x68] sm:$0xff] %v2196_v42   ;;  %v1329_v18 = vadd.f32 %v2396_v6, %v1039_v57  ;;  %v1041_v45 = vpop.f32.mrb[61].mxu0  ;;  %v1320_v60 = vpop.f32.mrb[61].mxu1 }
 0x18e   :  { %2299 = vst [vmem:[%s3255_s2 + $0x60] sm:$0xff] %v2191_v52   ;;  %v1321_v49 = vadd.f32 %v1320_v60, %v1031_v2  ;;  %v1042_v10 = vpop.f32.mrb[62].mxu0  ;;  %v2397_v0 = vpop.f32.mrb[62].mxu1 }
 0x18f   :  { %v1332_v1 = vadd.f32 %v2397_v0, %v1042_v10  ;;  %v1044_v5 = vpop.f32.mrb[63].mxu0  ;;  %v1323_v28 = vpop.f32.mrb[63].mxu1  ;;  %v1493_v9 = vmax.f32 %v1329_v18, 0.0 }
 0x190   :  { %v1324_v8 = vadd.f32 %v1323_v28, %v1034_v62  ;;  %v1491_v56 = vmax.f32 %v1321_v49, 0.0 }
 0x191   :  { %v1494_v12 = vmax.f32 %v1332_v1, 0.0 }
 0x192   :  { %v1492_v13 = vmax.f32 %v1324_v8, 0.0 }
 0x193   :  { %v2206_v30 = vpack.c.bf16 %v1494_v12, %v1493_v9 }
 0x194   :  { %v2201_v4 = vpack.c.bf16 %v1492_v13, %v1491_v56  ;;  %v1047_v32 = vpop.f32.mrb[64].mxu0  ;;  %v2400_v16 = vpop.f32.mrb[64].mxu1 }
 0x195   :  { %2302 = vst [vmem:[%s3255_s2 + $0x78] sm:$0xff] %v2206_v30   ;;  %v1049_v17 = vpop.f32.mrb[65].mxu0  ;;  %v1336_v20 = vpop.f32.mrb[65].mxu1 }
 0x196   :  { %2301 = vst [vmem:[%s3255_s2 + $0x70] sm:$0xff] %v2201_v4   ;;  %v1337_v24 = vadd.f32 %v1336_v20, %v1047_v32  ;;  %v1050_v22 = vpop.f32.mrb[66].mxu0  ;;  %v2401_v25 = vpop.f32.mrb[66].mxu1 }
 0x197   :  { %v1052_v34 = vpop.f32.mrb[67].mxu0  ;;  %v1339_v26 = vpop.f32.mrb[67].mxu1 }
 0x198   :  { %v1340_v54 = vadd.f32 %v1339_v26, %v1050_v22  ;;  %v1495_v21 = vmax.f32 %v1337_v24, 0.0 }
 0x19a   :  { %v1496_v29 = vmax.f32 %v1340_v54, 0.0 }
 0x19c   :  { %v2211_v2 = vpack.c.bf16 %v1496_v29, %v1495_v21  ;;  %v1055_v58 = vpop.f32.mrb[68].mxu0  ;;  %v2404_v53 = vpop.f32.mrb[68].mxu1 }
 0x19d   :  { %v1345_v33 = vadd.f32 %v2400_v16, %v1055_v58  ;;  %v1057_v36 = vpop.f32.mrb[69].mxu0  ;;  %v1352_v61 = vpop.f32.mrb[69].mxu1 }
 0x19e   :  { %2303 = vst [vmem:[%s3255_s2 + $0x80] sm:$0xff] %v2211_v2   ;;  %v1058_v62 = vpop.f32.mrb[70].mxu0  ;;  %v2405_v37 = vpop.f32.mrb[70].mxu1 }
 0x19f   :  { %v1348_v40 = vadd.f32 %v2401_v25, %v1058_v62  ;;  %v1060_v46 = vpop.f32.mrb[71].mxu0  ;;  %v1355_v41 = vpop.f32.mrb[71].mxu1  ;;  %v1497_v44 = vmax.f32 %v1345_v33, 0.0 }
 0x1a1   :  { %v1498_v48 = vmax.f32 %v1348_v40, 0.0 }
 0x1a3   :  { %v2216_v38 = vpack.c.bf16 %v1498_v48, %v1497_v44 }
 0x1a4   :  { %v1063_v14 = vpop.f32.mrb[72].mxu0  ;;  %v2408_v50 = vpop.f32.mrb[72].mxu1 }
 0x1a5   :  { %2304 = vst [vmem:[%s3255_s2 + $0x88] sm:$0xff] %v2216_v38   ;;  %v1353_v42 = vadd.f32 %v1352_v61, %v1063_v14  ;;  %v1065_v52 = vpop.f32.mrb[73].mxu0  ;;  %v1368_v57 = vpop.f32.mrb[73].mxu1 }
 0x1a6   :  { %v1066_v6 = vpop.f32.mrb[74].mxu0  ;;  %v2409_v18 = vpop.f32.mrb[74].mxu1 }
 0x1a7   :  { %v1356_v45 = vadd.f32 %v1355_v41, %v1066_v6  ;;  %v1068_v60 = vpop.f32.mrb[75].mxu0  ;;  %v1371_v49 = vpop.f32.mrb[75].mxu1  ;;  %v1499_v10 = vmax.f32 %v1353_v42, 0.0 }
 0x1a9   :  { %v1500_v0 = vmax.f32 %v1356_v45, 0.0 }
 0x1ab   :  { %v2221_v1 = vpack.c.bf16 %v1500_v0, %v1499_v10 }
 0x1ac   :  { %v1071_v5 = vpop.f32.mrb[76].mxu0  ;;  %v3183_v28 = vpop.f32.mrb[76].mxu1 }
 0x1ad   :  { %2305 = vst [vmem:[%s3255_s2 + $0x90] sm:$0xff] %v2221_v1   ;;  %v1361_v8 = vadd.f32 %v2404_v53, %v1071_v5  ;;  %v1073_v9 = vpop.f32.mrb[77].mxu0  ;;  %v3188_v12 = vpop.f32.mrb[77].mxu1 }
 0x1ae   :  { %v1074_v56 = vpop.f32.mrb[78].mxu0  ;;  %v3190_v13 = vpop.f32.mrb[78].mxu1 }
 0x1af   :  { %v1364_v30 = vadd.f32 %v2405_v37, %v1074_v56  ;;  %v1076_v4 = vpop.f32.mrb[79].mxu0  ;;  %v3192_v32 = vpop.f32.mrb[79].mxu1  ;;  %v1501_v16 = vmax.f32 %v1361_v8, 0.0 }
 0x1b1   :  { %v1502_v17 = vmax.f32 %v1364_v30, 0.0 }
 0x1b3   :  { %v2226_v20 = vpack.c.bf16 %v1502_v17, %v1501_v16 }
 0x1b4   :  { %v1079_v24 = vpop.f32.mrb[80].mxu0  ;;  %v2416_v22 = vpop.f32.mrb[80].mxu1 }
 0x1b5   :  { %2306 = vst [vmem:[%s3255_s2 + $0x98] sm:$0xff] %v2226_v20   ;;  %v1369_v25 = vadd.f32 %v1368_v57, %v1079_v24  ;;  %v1409_v34 = vadd.f32 %v2416_v22, %v3051_v63  ;;  %v1081_v26 = vpop.f32.mrb[81].mxu0  ;;  %v1400_v54 = vpop.f32.mrb[81].mxu1 }
 0x1b6   :  { %v1401_v21 = vadd.f32 %v1400_v54, %v3045_v55  ;;  %v1082_v29 = vpop.f32.mrb[82].mxu0  ;;  %v2417_v2 = vpop.f32.mrb[82].mxu1 }
 0x1b7   :  { %v1372_v58 = vadd.f32 %v1371_v49, %v1082_v29  ;;  %v1412_v53 = vadd.f32 %v2417_v2, %v3053_v3  ;;  %v1084_v33 = vpop.f32.mrb[83].mxu0  ;;  %v1403_v36 = vpop.f32.mrb[83].mxu1  ;;  %v1503_v62 = vmax.f32 %v1369_v25, 0.0  ;;  %v1513_v37 = vmax.f32 %v1409_v34, 0.0 }
 0x1b8   :  { %v1404_v61 = vadd.f32 %v1403_v36, %v3049_v59  ;;  %v1511_v41 = vmax.f32 %v1401_v21, 0.0 }
 0x1b9   :  { %v1504_v40 = vmax.f32 %v1372_v58, 0.0  ;;  %v1514_v46 = vmax.f32 %v1412_v53, 0.0 }
 0x1ba   :  { %v1512_v44 = vmax.f32 %v1404_v61, 0.0 }
 0x1bb   :  { %v2231_v63 = vpack.c.bf16 %v1504_v40, %v1503_v62  ;;  %v2256_v48 = vpack.c.bf16 %v1514_v46, %v1513_v37 }
 0x1bc   :  { %v2251_v38 = vpack.c.bf16 %v1512_v44, %v1511_v41  ;;  %v1087_v14 = vpop.f32.mrb[84].mxu0  ;;  %v2420_v55 = vpop.f32.mrb[84].mxu1 }
 0x1bd   :  { %2307 = vst [vmem:[%s3255_s2 + $0xa0] sm:$0xff] %v2231_v63   ;;  %2312 = vst [vmem:[%s3255_s2 + $0xc8] sm:$0xff] %v2256_v48   ;;  %v1377_v59 = vadd.f32 %v2408_v50, %v1087_v14  ;;  %v1425_v3 = vadd.f32 %v2420_v55, %v3063_v15  ;;  %v1089_v42 = vpop.f32.mrb[85].mxu0  ;;  %v1416_v52 = vpop.f32.mrb[85].mxu1 }
 0x1be   :  { %2311 = vst [vmem:[%s3255_s2 + $0xc0] sm:$0xff] %v2251_v38   ;;  %v1417_v57 = vadd.f32 %v1416_v52, %v3057_v7  ;;  %v1090_v6 = vpop.f32.mrb[86].mxu0  ;;  %v2421_v45 = vpop.f32.mrb[86].mxu1 }
 0x1bf   :  { %v1380_v60 = vadd.f32 %v2409_v18, %v1090_v6  ;;  %v1428_v49 = vadd.f32 %v2421_v45, %v3067_v19  ;;  %v1092_v10 = vpop.f32.mrb[87].mxu0  ;;  %v1419_v0 = vpop.f32.mrb[87].mxu1  ;;  %v1505_v50 = vmax.f32 %v1377_v59, 0.0  ;;  %v1517_v5 = vmax.f32 %v1425_v3, 0.0 }
 0x1c0   :  { %v1420_v1 = vadd.f32 %v1419_v0, %v3061_v11  ;;  %v1515_v9 = vmax.f32 %v1417_v57, 0.0 }
 0x1c1   :  { %v1506_v15 = vmax.f32 %v1380_v60, 0.0  ;;  %v1518_v8 = vmax.f32 %v1428_v49, 0.0 }
 0x1c2   :  { %v1516_v56 = vmax.f32 %v1420_v1, 0.0 }
 0x1c3   :  { %v2236_v30 = vpack.c.bf16 %v1506_v15, %v1505_v50  ;;  %v2266_v4 = vpack.c.bf16 %v1518_v8, %v1517_v5 }
 0x1c4   :  { %v2261_v16 = vpack.c.bf16 %v1516_v56, %v1515_v9  ;;  %v1095_v17 = vpop.f32.mrb[88].mxu0  ;;  %v2424_v7 = vpop.f32.mrb[88].mxu1 }
 0x1c5   :  { %2308 = vst [vmem:[%s3255_s2 + $0xa8] sm:$0xff] %v2236_v30   ;;  %2314 = vst [vmem:[%s3255_s2 + $0xd8] sm:$0xff] %v2266_v4   ;;  %v1385_v11 = vadd.f32 %v3188_v12, %v1095_v17  ;;  %v1441_v19 = vadd.f32 %v2424_v7, %v3079_v31  ;;  %v1097_v18 = vpop.f32.mrb[89].mxu0  ;;  %v1432_v20 = vpop.f32.mrb[89].mxu1 }
 0x1c6   :  { %2313 = vst [vmem:[%s3255_s2 + $0xd0] sm:$0xff] %v2261_v16   ;;  %v1433_v24 = vadd.f32 %v1432_v20, %v3071_v23  ;;  %v1098_v22 = vpop.f32.mrb[90].mxu0  ;;  %v2425_v25 = vpop.f32.mrb[90].mxu1 }
 0x1c7   :  { %v1388_v34 = vadd.f32 %v3192_v32, %v1098_v22  ;;  %v1444_v26 = vadd.f32 %v2425_v25, %v3083_v35  ;;  %v1100_v54 = vpop.f32.mrb[91].mxu0  ;;  %v1435_v21 = vpop.f32.mrb[91].mxu1  ;;  %v1507_v29 = vmax.f32 %v1385_v11, 0.0  ;;  %v1521_v31 = vmax.f32 %v1441_v19, 0.0 }
 0x1c8   :  { %v1436_v12 = vadd.f32 %v1435_v21, %v3075_v27  ;;  %v1519_v53 = vmax.f32 %v1433_v24, 0.0 }
 0x1c9   :  { %v1508_v2 = vmax.f32 %v1388_v34, 0.0  ;;  %v1522_v58 = vmax.f32 %v1444_v26, 0.0 }
 0x1ca   :  { %v1520_v33 = vmax.f32 %v1436_v12, 0.0 }
 0x1cb   :  { %v2241_v36 = vpack.c.bf16 %v1508_v2, %v1507_v29  ;;  %v2276_v61 = vpack.c.bf16 %v1522_v58, %v1521_v31 }
 0x1cc   :  { %v2271_v62 = vpack.c.bf16 %v1520_v33, %v1519_v53  ;;  %v1103_v23 = vpop.f32.mrb[92].mxu0  ;;  %v2428_v37 = vpop.f32.mrb[92].mxu1 }
 0x1cd   :  { %2309 = vst [vmem:[%s3255_s2 + $0xb0] sm:$0xff] %v2241_v36   ;;  %2316 = vst [vmem:[%s3255_s2 + $0xe8] sm:$0xff] %v2276_v61   ;;  %v1393_v27 = vadd.f32 %v3183_v28, %v1103_v23  ;;  %v1457_v35 = vadd.f32 %v2428_v37, %v3095_v47  ;;  %v1105_v32 = vpop.f32.mrb[93].mxu0  ;;  %v1448_v40 = vpop.f32.mrb[93].mxu1 }
 0x1ce   :  { %2315 = vst [vmem:[%s3255_s2 + $0xe0] sm:$0xff] %v2271_v62   ;;  %v1449_v46 = vadd.f32 %v1448_v40, %v3087_v39  ;;  %v1106_v41 = vpop.f32.mrb[94].mxu0  ;;  %v2429_v44 = vpop.f32.mrb[94].mxu1 }
 0x1cf   :  { %v1396_v63 = vadd.f32 %v3190_v13, %v1106_v41  ;;  %v1460_v48 = vadd.f32 %v2429_v44, %v3099_v51  ;;  %v1108_v38 = vpop.f32.mrb[95].mxu0  ;;  %v1451_v14 = vpop.f32.mrb[95].mxu1  ;;  %v1509_v55 = vmax.f32 %v1393_v27, 0.0  ;;  %v1525_v47 = vmax.f32 %v1457_v35, 0.0 }
 0x1d0   :  { %v1452_v28 = vadd.f32 %v1451_v14, %v3091_v43  ;;  %v1523_v42 = vmax.f32 %v1449_v46, 0.0 }
 0x1d1   :  { %v1510_v59 = vmax.f32 %v1396_v63, 0.0  ;;  %v1526_v3 = vmax.f32 %v1460_v48, 0.0 }
 0x1d2   :  { %v1524_v52 = vmax.f32 %v1452_v28, 0.0 }
 0x1d3   :  { %v2246_v57 = vpack.c.bf16 %v1510_v59, %v1509_v55  ;;  %v2286_v6 = vpack.c.bf16 %v1526_v3, %v1525_v47 }
 0x1d4   :  { %v2281_v45 = vpack.c.bf16 %v1524_v52, %v1523_v42 }
 0x1d5   :  { %2310 = vst [vmem:[%s3255_s2 + $0xb8] sm:$0xff] %v2246_v57   ;;  %2318 = vst [vmem:[%s3255_s2 + $0xf8] sm:$0xff] %v2286_v6  }
 0x1d6   :  { %2317 = vst [vmem:[%s3255_s2 + $0xf0] sm:$0xff] %v2281_v45  }

// kernel: st_gcn_forward.12
= control target key start
LH: loop header
LB: loop body
LE: loop exit
PB: predicated region body
PF: predicated region fallthrough
CT: control target
= control target key end

     0   :  { %s4049_s21 = smov 0   ;;  %s4449_s0 = inlined_call_operand.vmem [shape: bf16[2,12,32,128], index: 0, kind: input, shape index: {}]   ;;  %s4450_s1 = inlined_call_operand.vmem [shape: bf16[9,128,128], index: 1, kind: input, shape index: {}]   ;;  %s4451_s2 = inlined_call_operand.vmem [shape: f32[1,128], index: 2, kind: input, shape index: {}]   ;;  %s4452_s3 = inlined_call_operand.vmem [shape: bf16[2,128,64], index: 3, kind: input, shape index: {}]   ;;  %s4453_s4 = inlined_call_operand.vmem [shape: bf16[64,128], index: 4, kind: input, shape index: {}]   ;;  %s4454_s5 = inlined_call_operand.vmem [shape: f32[1,128], index: 5, kind: input, shape index: {}]   ;;  %s4455_s6 = inlined_call_operand.vmem [shape: bf16[2,128,128], index: 6, kind: output, shape index: {}]  }
   0x1 LB: > { %s2793_s22 = sadd.s32 4294967295, %s4012_s21   ;;  %p2797_p0 = scmp.ge.s32.totalorder %s4012_s21, 1  ;;  %s4012_s21 = sphi %s4049_s21, %s16_s21  }
   0x2   : > { %p222_p1 = scmp.lt.s32.totalorder %s4012_s21, 3 }
   0x4   : > { %p223_p2 = pnand %p2797_p0, %p222_p1 }
   0x5   : > { %v3850_v0 = vld [vmem:[%s4450_s1 + $0x40] sm:$0xff] (!%p223_p2)   ;;  %p257_p3 = scmp.lt.s32.totalorder (!%p223_p2), %s2793_s22, 1  ;;  %v3852_v2 = vld [vmem:[%s4450_s1 + $0x48] sm:$0xff] (!%p223_p2)   ;;  %v3854_v4 = vld [vmem:[%s4450_s1 + $0x50] sm:$0xff] (!%p223_p2)   ;;  %vm2533_vm0 = vcmask (!%p223_p2), 523264  }
   0x6   : > { %226 = sbr.rel (%p223_p2) target bundleno = 416 (0x1a0), region = 44  ;;  %v3851_v1 = vld [vmem:[%s4450_s1 + $0x140] sm:$0xff] (!%p223_p2)   ;;  %3369 = vmatprep.subr.bf16.mxu1 (!%p223_p2), %v3850_v0  ;;  %v3853_v3 = vld [vmem:[%s4450_s1 + $0x148] sm:$0xff] (!%p223_p2)   ;;  %v3855_v5 = vld [vmem:[%s4450_s1 + $0x150] sm:$0xff] (!%p223_p2)  }
   0x7   : > { %3529 = vmatprep.subr.bf16.mxu0 (!%p223_p2), %v3851_v1  ;;  %3370 = vmatpush3.bf16.msra.mxu1 (!%p223_p2), %v3850_v0  ;;  %v3856_v6 = vld [vmem:[%s4450_s1 + $0x58] sm:$0xff] (!%p223_p2)   ;;  %v3858_v8 = vld [vmem:[%s4450_s1 + $0x60] sm:$0xff] (!%p223_p2)   ;;  %v3860_v10 = vld [vmem:[%s4450_s1 + $0x68] sm:$0xff] (!%p223_p2)  }
   0x8   : > { %3530 = vmatpush3.bf16.msra.mxu0 (!%p223_p2), %v3851_v1  ;;  %3371 = vmatprep.subr.bf16.mxu1 (!%p223_p2), %v3852_v2  ;;  %v3857_v7 = vld [vmem:[%s4450_s1 + $0x158] sm:$0xff] (!%p223_p2)   ;;  %v3859_v9 = vld [vmem:[%s4450_s1 + $0x160] sm:$0xff] (!%p223_p2)   ;;  %v3861_v11 = vld [vmem:[%s4450_s1 + $0x168] sm:$0xff] (!%p223_p2)  }
   0x9   : > { %3531 = vmatprep.subr.bf16.mxu0 (!%p223_p2), %v3853_v3  ;;  %v3862_v14 = vld [vmem:[%s4450_s1 + $0x70] sm:$0xff] (!%p223_p2)   ;;  %v3864_v16 = vld [vmem:[%s4450_s1 + $0x78] sm:$0xff] (!%p223_p2)   ;;  %v3869_v19 = vld [vmem:[%s4450_s1] sm:$0xff] (!%p223_p2)  }
   0xa   : > { %v3863_v15 = vld [vmem:[%s4450_s1 + $0x170] sm:$0xff] (!%p223_p2)   ;;  %v3865_v17 = vld [vmem:[%s4450_s1 + $0x178] sm:$0xff] (!%p223_p2)   ;;  %v3871_v20 = vld [vmem:[%s4450_s1 + $0x180] sm:$0xff] (!%p223_p2)  }
   0xb   : > { %3372 = vmatpush3.bf16.msra.mxu1 (!%p223_p2), %v3852_v2  ;;  %v3872_v22 = vld [vmem:[%s4450_s1 + $0x8] sm:$0xff] (!%p223_p2)   ;;  %v3877_v27 = vld [vmem:[%s4450_s1 + $0x10] sm:$0xff] (!%p223_p2)   ;;  %v3880_v30 = vld [vmem:[%s4450_s1 + $0x18] sm:$0xff] (!%p223_p2)  }
   0xc   : > { %3532 = vmatpush3.bf16.msra.mxu0 (!%p223_p2), %v3853_v3  ;;  %3373 = vmatprep.subr.bf16.mxu1 (!%p223_p2), %v3854_v4  ;;  %v3873_v23 = vld [vmem:[%s4450_s1 + $0x188] sm:$0xff] (!%p223_p2)   ;;  %v3879_v28 = vld [vmem:[%s4450_s1 + $0x190] sm:$0xff] (!%p223_p2)   ;;  %v3881_v31 = vld [vmem:[%s4450_s1 + $0x198] sm:$0xff] (!%p223_p2)  }
   0xd   : > { %s4457_s22 = smov (!%p257_p3, %s2793_s22), 1  ;;  %3533 = vmatprep.subr.bf16.mxu0 %v3855_v5  ;;  %v3885_v35 = vld [vmem:[%s4450_s1 + $0x20] sm:$0xff]   ;;  %v3888_v38 = vld [vmem:[%s4450_s1 + $0x28] sm:$0xff]   ;;  %v3893_v43 = vld [vmem:[%s4450_s1 + $0x30] sm:$0xff]  }
   0xe   : > { %s3841_s15 = smul.u32 192, %s4457_s22  ;;  %v3887_v36 = vld [vmem:[%s4450_s1 + $0x1a0] sm:$0xff]   ;;  %v3889_v39 = vld [vmem:[%s4450_s1 + $0x1a8] sm:$0xff]   ;;  %v3895_v44 = vld [vmem:[%s4450_s1 + $0x1b0] sm:$0xff]   ;;  %s3211_s18 = sshll.u32 %s4457_s22, 6 }
   0xf   : > { %3374 = vmatpush3.bf16.msra.mxu1 %v3854_v4  ;;  %v3896_v46 = vld [vmem:[%s4450_s1 + $0x38] sm:$0xff]   ;;  %v3901_v51 = vld [vmem:[%s4450_s1 + $0x80] sm:$0xff]   ;;  %v3904_v54 = vld [vmem:[%s4450_s1 + $0x88] sm:$0xff]   ;;  %s4348_s28 = scalar_lea.vmem %s4452_s3, %s3211_s18  ;;  %s4413_s16 = scalar_lea.vmem %s4455_s6, %s3211_s18 }
  0x10   : > { %3534 = vmatpush3.bf16.msra.mxu0 %v3855_v5  ;;  %3375 = vmatprep.subr.bf16.mxu1 %v3856_v6  ;;  %s4093_s24 = scalar_lea.vmem %s4449_s0, %s3841_s15  ;;  %v3897_v47 = vld [vmem:[%s4450_s1 + $0x1b8] sm:$0xff]   ;;  %v3903_v52 = vld [vmem:[%s4450_s1 + $0x1c0] sm:$0xff]   ;;  %v3905_v55 = vld [vmem:[%s4450_s1 + $0x1c8] sm:$0xff]  }
  0x11   : > { %3535 = vmatprep.subr.bf16.mxu0 %v3857_v7  ;;  %v3866_v12 = vld [vmem:[%s4093_s24 + $0x8] sm:$0xff]   ;;  %v3868_v18 = vld [vmem:[%s4093_s24 + $0x18] sm:$0xff]   ;;  %v3898_v48 = vld [vmem:[%s4093_s24] sm:$0xff]  }
  0x12   : > { %v3867_v13 = vld [vmem:[%s4093_s24 + $0x28] sm:$0xff]   ;;  %3385 = vmatprep.mubr.bf16.mxu1 %v3866_v12  ;;  %v3870_v21 = vld [vmem:[%s4093_s24 + $0x38] sm:$0xff]   ;;  %v3899_v49 = vld [vmem:[%s4093_s24 + $0x30] sm:$0xff]  }
  0x13   : > { %3376 = vmatpush3.bf16.msra.mxu1 %v3856_v6  ;;  %3545 = vmatprep.mubr.bf16.mxu0 %v3867_v13  ;;  %v3874_v24 = vld [vmem:[%s4093_s24 + $0x28] sm:$0xff]   ;;  %v3876_v26 = vld [vmem:[%s4093_s24 + $0x38] sm:$0xff]   ;;  %v3900_v50 = vld [vmem:[%s4093_s24 + $0x10] sm:$0xff]  }
  0x14   : > { %3536 = vmatpush3.bf16.msra.mxu0 %v3857_v7  ;;  %3377 = vmatprep.subr.bf16.mxu1 %v3858_v8  ;;  %v3875_v25 = vld [vmem:[%s4093_s24 + $0x48] sm:$0xff]   ;;  %v3878_v29 = vld [vmem:[%s4093_s24 + $0x58] sm:$0xff]   ;;  %v3902_v53 = vld [vmem:[%s4093_s24 + $0x40] sm:$0xff]  }
  0x15   : > { %3537 = vmatprep.subr.bf16.mxu0 %v3859_v9  ;;  %v3882_v32 = vld [vmem:[%s4093_s24 + $0x48] sm:$0xff]   ;;  %v3884_v34 = vld [vmem:[%s4093_s24 + $0x58] sm:$0xff]   ;;  %v3906_v56 = vld [vmem:[%s4093_s24 + $0x20] sm:$0xff]  }
  0x16   : > { %v3883_v33 = vld [vmem:[%s4093_s24 + $0x68] sm:$0xff]   ;;  %v3886_v37 = vld [vmem:[%s4093_s24 + $0x78] sm:$0xff]   ;;  %v3907_v57 = vld [vmem:[%s4093_s24 + $0x50] sm:$0xff]  }
  0x17   : > { %3378 = vmatpush3.bf16.msra.mxu1 %v3858_v8  ;;  %v3890_v40 = vld [vmem:[%s4093_s24 + $0x68] sm:$0xff]   ;;  %v3892_v42 = vld [vmem:[%s4093_s24 + $0x78] sm:$0xff]   ;;  %v3908_v58 = vld [vmem:[%s4093_s24 + $0x30] sm:$0xff]  }
  0x18   : > { %3538 = vmatpush3.bf16.msra.mxu0 %v3859_v9  ;;  %3379 = vmatprep.subr.bf16.mxu1 %v3860_v10  ;;  %v3891_v41 = vld [vmem:[%s4093_s24 + $0x88] sm:$0xff]   ;;  %v3894_v45 = vld [vmem:[%s4093_s24 + $0x98] sm:$0xff]   ;;  %v3909_v59 = vld [vmem:[%s4450_s1 + $0x90] sm:$0xff]  }
  0x19   : > { %3539 = vmatprep.subr.bf16.mxu0 %v3861_v11  ;;  %v3911_v60 = vld [vmem:[%s4450_s1 + $0x1d0] sm:$0xff]   ;;  %v3910_v61 = vld [vmem:[%s4093_s24 + $0x60] sm:$0xff]   ;;  %v3912_v62 = vld [vmem:[%s4450_s1 + $0x98] sm:$0xff]  }
  0x1a   : > { %v3913_v63 = vld [vmem:[%s4450_s1 + $0x1d8] sm:$0xff]   ;;  %v3914_v0 = vld [vmem:[%s4093_s24 + $0x40] sm:$0xff]   ;;  %v3915_v1 = vld [vmem:[%s4093_s24 + $0x70] sm:$0xff]  }
  0x1b   : > { %3380 = vmatpush3.bf16.msra.mxu1 %v3860_v10  ;;  %v3916_v2 = vld [vmem:[%s4093_s24 + $0x50] sm:$0xff]   ;;  %v3917_v3 = vld [vmem:[%s4450_s1 + $0xa0] sm:$0xff]   ;;  %v3920_v6 = vld [vmem:[%s4450_s1 + $0xa8] sm:$0xff]  }
  0x1c   : > { %3540 = vmatpush3.bf16.msra.mxu0 %v3861_v11  ;;  %3381 = vmatprep.subr.bf16.mxu1 %v3862_v14  ;;  %v3919_v4 = vld [vmem:[%s4450_s1 + $0x1e0] sm:$0xff]   ;;  %v3921_v7 = vld [vmem:[%s4450_s1 + $0x1e8] sm:$0xff]   ;;  %v3923_v9 = vld [vmem:[%s4093_s24 + $0x90] sm:$0xff]  }
  0x1d   : > { %3541 = vmatprep.subr.bf16.mxu0 %v3863_v15  ;;  %v3918_v5 = vld [vmem:[%s4093_s24 + $0x80] sm:$0xff]   ;;  %v3924_v10 = vld [vmem:[%s4093_s24 + $0x70] sm:$0xff]  }
  0x1e   : > { %v3922_v8 = vld [vmem:[%s4093_s24 + $0x60] sm:$0xff]   ;;  %v3925_v11 = vld [vmem:[%s4450_s1 + $0xb0] sm:$0xff]  }
  0x1f   : > { %3382 = vmatpush3.bf16.msra.mxu1 %v3862_v14  ;;  %v3927_v12 = vld [vmem:[%s4450_s1 + $0x1f0] sm:$0xff]   ;;  %v3926_v13 = vld [vmem:[%s4093_s24 + $0xa0] sm:$0xff]   ;;  %v3928_v14 = vld [vmem:[%s4450_s1 + $0xb8] sm:$0xff]  }
  0x20   : > { %3542 = vmatpush3.bf16.msra.mxu0 %v3863_v15  ;;  %3383 = vmatprep.subr.bf16.mxu1 %v3864_v16  ;;  %v3929_v15 = vld [vmem:[%s4450_s1 + $0x1f8] sm:$0xff]  }
  0x21   : > { %3543 = vmatprep.subr.bf16.mxu0 %v3865_v17 }
  0x23   : > { %3384 = vmatpush3.bf16.msra.mxu1 %v3864_v16  ;;  %v3930_v16 = vld [vmem:[%s4093_s24 + $0x10] sm:$0xff]  }
  0x24   : > { %3544 = vmatpush3.bf16.msra.mxu0 %v3865_v17  ;;  %3401 = vmatprep.subr.bf16.mxu1 %v3869_v19  ;;  %v3931_v17 = vld [vmem:[%s4093_s24 + $0x38] sm:$0xff]  }
  0x25   : > { %3561 = vmatprep.subr.bf16.mxu0 %v3871_v20 }
  0x26   : > { %3386 = vmatmul.mubr.bf16.vlgmr.msra.gmra.mrb[0].mxu1 %v3868_v18  ;;  %v3932_v18 = vld [vmem:[%s4093_s24 + $0x20] sm:$0xff]  }
  0x27   : > { %3546 = vmatmul.mubr.bf16.vlgmr.msra.gmra.mrb[0].mxu0 %v3870_v21  ;;  %3402 = vmatpush3.bf16.msra.mxu1 %v3869_v19  ;;  %v3933_v19 = vld [vmem:[%s4450_s1 + $0xc0] sm:$0xff]   ;;  %v3934_v21 = vld [vmem:[%s4093_s24 + $0x48] sm:$0xff]  }
  0x28   : > { %3562 = vmatpush3.bf16.msra.mxu0 %v3871_v20  ;;  %3403 = vmatprep.subr.bf16.mxu1 %v3872_v22  ;;  %v3935_v20 = vld [vmem:[%s4450_s1 + $0x200] sm:$0xff]  }
  0x29   : > { %3563 = vmatprep.subr.bf16.mxu0 %v3873_v23  ;;  %3389 = vmatprep.mubr.bf16.mxu1 %v3874_v24  ;;  %v3938_v24 = vld [vmem:[%s4093_s24 + $0x30] sm:$0xff]  }
  0x2a   : > { %3549 = vmatprep.mubr.bf16.mxu0 %v3875_v25  ;;  %v3939_v25 = vld [vmem:[%s4093_s24 + $0x58] sm:$0xff]  }
  0x2b   : > { %3404 = vmatpush3.bf16.msra.mxu1 %v3872_v22  ;;  %v3936_v22 = vld [vmem:[%s4450_s1 + $0xc8] sm:$0xff]  }
  0x2c   : > { %3564 = vmatpush3.bf16.msra.mxu0 %v3873_v23  ;;  %3405 = vmatprep.subr.bf16.mxu1 %v3877_v27  ;;  %v3937_v23 = vld [vmem:[%s4450_s1 + $0x208] sm:$0xff]  }
  0x2d   : > { %3565 = vmatprep.subr.bf16.mxu0 %v3879_v28 }
  0x2e   : > { %3390 = vmatmul.mubr.bf16.gmra.mrb[4].mxu1 %v3876_v26  ;;  %v3940_v26 = vld [vmem:[%s4093_s24 + $0x40] sm:$0xff]  }
  0x2f   : > { %3550 = vmatmul.mubr.bf16.gmra.mrb[4].mxu0 %v3878_v29  ;;  %3406 = vmatpush3.bf16.msra.mxu1 %v3877_v27  ;;  %v3941_v27 = vld [vmem:[%s4450_s1 + $0xd0] sm:$0xff]   ;;  %v3942_v29 = vld [vmem:[%s4093_s24 + $0x68] sm:$0xff]  }
  0x30   : > { %3566 = vmatpush3.bf16.msra.mxu0 %v3879_v28  ;;  %3407 = vmatprep.subr.bf16.mxu1 %v3880_v30  ;;  %v3943_v28 = vld [vmem:[%s4450_s1 + $0x210] sm:$0xff]  }
  0x31   : > { %3567 = vmatprep.subr.bf16.mxu0 %v3881_v31  ;;  %3393 = vmatprep.mubr.bf16.mxu1 %v3882_v32  ;;  %v3946_v32 = vld [vmem:[%s4093_s24 + $0x50] sm:$0xff]  }
  0x32   : > { %3553 = vmatprep.mubr.bf16.mxu0 %v3883_v33  ;;  %v3947_v33 = vld [vmem:[%s4093_s24 + $0x78] sm:$0xff]  }
  0x33   : > { %3408 = vmatpush3.bf16.msra.mxu1 %v3880_v30  ;;  %v3944_v30 = vld [vmem:[%s4450_s1 + $0xd8] sm:$0xff]  }
  0x34   : > { %3568 = vmatpush3.bf16.msra.mxu0 %v3881_v31  ;;  %3409 = vmatprep.subr.bf16.mxu1 %v3885_v35  ;;  %v3945_v31 = vld [vmem:[%s4450_s1 + $0x218] sm:$0xff]  }
  0x35   : > { %3569 = vmatprep.subr.bf16.mxu0 %v3887_v36 }
  0x36   : > { %3394 = vmatmul.mubr.bf16.gmra.mrb[8].mxu1 %v3884_v34  ;;  %v3948_v34 = vld [vmem:[%s4093_s24 + $0x60] sm:$0xff]  }
  0x37   : > { %3554 = vmatmul.mubr.bf16.gmra.mrb[8].mxu0 %v3886_v37  ;;  %3410 = vmatpush3.bf16.msra.mxu1 %v3885_v35  ;;  %v3949_v35 = vld [vmem:[%s4450_s1 + $0xe0] sm:$0xff]   ;;  %v3950_v37 = vld [vmem:[%s4093_s24 + $0x88] sm:$0xff]  }
  0x38   : > { %3570 = vmatpush3.bf16.msra.mxu0 %v3887_v36  ;;  %3411 = vmatprep.subr.bf16.mxu1 %v3888_v38  ;;  %v3951_v36 = vld [vmem:[%s4450_s1 + $0x220] sm:$0xff]  }
  0x39   : > { %3571 = vmatprep.subr.bf16.mxu0 %v3889_v39  ;;  %3397 = vmatprep.mubr.bf16.mxu1 %v3890_v40  ;;  %v3954_v40 = vld [vmem:[%s4093_s24 + $0x70] sm:$0xff]  }
  0x3a   : > { %3557 = vmatprep.mubr.bf16.mxu0 %v3891_v41  ;;  %v3955_v41 = vld [vmem:[%s4093_s24 + $0x98] sm:$0xff]  }
  0x3b   : > { %3412 = vmatpush3.bf16.msra.mxu1 %v3888_v38  ;;  %v3952_v38 = vld [vmem:[%s4450_s1 + $0xe8] sm:$0xff]  }
  0x3c   : > { %3572 = vmatpush3.bf16.msra.mxu0 %v3889_v39  ;;  %3413 = vmatprep.subr.bf16.mxu1 %v3893_v43  ;;  %v3953_v39 = vld [vmem:[%s4450_s1 + $0x228] sm:$0xff]  }
  0x3d   : > { %3573 = vmatprep.subr.bf16.mxu0 %v3895_v44 }
  0x3e   : > { %3398 = vmatmul.mubr.bf16.gmra.mrb[12].mxu1 %v3892_v42  ;;  %v3956_v42 = vld [vmem:[%s4093_s24 + $0x80] sm:$0xff]  }
  0x3f   : > { %3558 = vmatmul.mubr.bf16.gmra.mrb[12].mxu0 %v3894_v45  ;;  %3414 = vmatpush3.bf16.msra.mxu1 %v3893_v43  ;;  %v3957_v43 = vld [vmem:[%s4450_s1 + $0xf0] sm:$0xff]   ;;  %v3958_v45 = vld [vmem:[%s4093_s24 + $0xa8] sm:$0xff]  }
  0x40   : > { %3574 = vmatpush3.bf16.msra.mxu0 %v3895_v44  ;;  %3415 = vmatprep.subr.bf16.mxu1 %v3896_v46  ;;  %v3959_v44 = vld [vmem:[%s4450_s1 + $0x230] sm:$0xff]  }
  0x41   : > { %3575 = vmatprep.subr.bf16.mxu0 %v3897_v47  ;;  %3417 = vmatprep.mubr.bf16.mxu1 %v3898_v48  ;;  %v3962_v48 = vld [vmem:[%s4093_s24 + $0x18] sm:$0xff]  }
  0x42   : > { %3577 = vmatprep.mubr.bf16.mxu0 %v3899_v49  ;;  %v3963_v49 = vld [vmem:[%s4093_s24 + $0x40] sm:$0xff]  }
  0x43   : > { %3416 = vmatpush3.bf16.msra.mxu1 %v3896_v46  ;;  %v3960_v46 = vld [vmem:[%s4450_s1 + $0xf8] sm:$0xff]  }
  0x44   : > { %3576 = vmatpush3.bf16.msra.mxu0 %v3897_v47  ;;  %3433 = vmatprep.subr.bf16.mxu1 %v3901_v51  ;;  %v3961_v47 = vld [vmem:[%s4450_s1 + $0x238] sm:$0xff]  }
  0x45   : > { %3593 = vmatprep.subr.bf16.mxu0 %v3903_v52 }
  0x46   : > { %3418 = vmatmul.mubr.bf16.vlgmr.msra.gmra.mrb[0].mxu1 %v3900_v50  ;;  %v3964_v50 = vld [vmem:[%s4093_s24 + $0x28] sm:$0xff]  }
  0x47   : > { %3578 = vmatmul.mubr.bf16.vlgmr.msra.gmra.mrb[0].mxu0 %v3902_v53  ;;  %3434 = vmatpush3.bf16.msra.mxu1 %v3901_v51  ;;  %v3965_v51 = vld [vmem:[%s4450_s1 + $0x100] sm:$0xff]   ;;  %v3966_v53 = vld [vmem:[%s4093_s24 + $0x50] sm:$0xff]  }
  0x48   : > { %3594 = vmatpush3.bf16.msra.mxu0 %v3903_v52  ;;  %3435 = vmatprep.subr.bf16.mxu1 %v3904_v54  ;;  %v3967_v52 = vld [vmem:[%s4453_s4] sm:$0xff]  }
  0x49   : > { %3595 = vmatprep.subr.bf16.mxu0 %v3905_v55  ;;  %3421 = vmatprep.mubr.bf16.mxu1 %v3906_v56  ;;  %v3970_v56 = vld [vmem:[%s4093_s24 + $0x60] sm:$0xff]  }
  0x4a   : > { %3581 = vmatprep.mubr.bf16.mxu0 %v3907_v57  ;;  %v3974_v57 = vld [vmem:[%s4453_s4 + $0x8] sm:$0xff]  }
  0x4b   : > { %3436 = vmatpush3.bf16.msra.mxu1 %v3904_v54  ;;  %v3968_v54 = vld [vmem:[%s4450_s1 + $0x108] sm:$0xff]  }
  0x4c   : > { %3596 = vmatpush3.bf16.msra.mxu0 %v3905_v55  ;;  %3437 = vmatprep.subr.bf16.mxu1 %v3909_v59  ;;  %v3969_v55 = vld [vmem:[%s4093_s24 + $0x38] sm:$0xff]  }
  0x4d   : > { %3597 = vmatprep.subr.bf16.mxu0 %v3911_v60 }
  0x4e   : > { %3422 = vmatmul.mubr.bf16.gmra.mrb[4].mxu1 %v3908_v58  ;;  %v3971_v58 = vld [vmem:[%s4093_s24 + $0x48] sm:$0xff]  }
  0x4f   : > { %3582 = vmatmul.mubr.bf16.gmra.mrb[4].mxu0 %v3910_v61  ;;  %3438 = vmatpush3.bf16.msra.mxu1 %v3909_v59  ;;  %v3972_v59 = vld [vmem:[%s4450_s1 + $0x110] sm:$0xff]  }
  0x50   : > { %3598 = vmatpush3.bf16.msra.mxu0 %v3911_v60  ;;  %3439 = vmatprep.subr.bf16.mxu1 %v3912_v62  ;;  %v3981_v60 = vld [vmem:[%s4453_s4 + $0x10] sm:$0xff]  }
  0x51   : > { %3599 = vmatprep.subr.bf16.mxu0 %v3913_v63  ;;  %3425 = vmatprep.mubr.bf16.mxu1 %v3914_v0  ;;  %v3973_v61 = vld [vmem:[%s4093_s24 + $0x70] sm:$0xff]   ;;  %v3977_v0 = vld [vmem:[%s4093_s24 + $0x80] sm:$0xff]  }
  0x52   : > { %3585 = vmatprep.mubr.bf16.mxu0 %v3915_v1  ;;  %v3988_v1 = vld [vmem:[%s4453_s4 + $0x18] sm:$0xff]  }
  0x53   : > { %3440 = vmatpush3.bf16.msra.mxu1 %v3912_v62  ;;  %v3975_v62 = vld [vmem:[%s4450_s1 + $0x118] sm:$0xff]  }
  0x54   : > { %3600 = vmatpush3.bf16.msra.mxu0 %v3913_v63  ;;  %3441 = vmatprep.subr.bf16.mxu1 %v3917_v3  ;;  %v3976_v63 = vld [vmem:[%s4093_s24 + $0x58] sm:$0xff]  }
  0x55   : > { %3601 = vmatprep.subr.bf16.mxu0 %v3919_v4 }
  0x56   : > { %3426 = vmatmul.mubr.bf16.gmra.mrb[8].mxu1 %v3916_v2  ;;  %v3979_v2 = vld [vmem:[%s4450_s1 + $0x120] sm:$0xff]  }
  0x57   : > { %3586 = vmatmul.mubr.bf16.gmra.mrb[8].mxu0 %v3918_v5  ;;  %3442 = vmatpush3.bf16.msra.mxu1 %v3917_v3  ;;  %v3978_v3 = vld [vmem:[%s4093_s24 + $0x68] sm:$0xff]  }
  0x58   : > { %3602 = vmatpush3.bf16.msra.mxu0 %v3919_v4  ;;  %3443 = vmatprep.subr.bf16.mxu1 %v3920_v6  ;;  %v3980_v4 = vld [vmem:[%s4093_s24 + $0x90] sm:$0xff]   ;;  %v3982_v5 = vld [vmem:[%s4450_s1 + $0x128] sm:$0xff]  }
  0x59   : > { %3603 = vmatprep.subr.bf16.mxu0 %v3921_v7  ;;  %3429 = vmatprep.mubr.bf16.mxu1 %v3922_v8  ;;  %v3986_v8 = vld [vmem:[%s4450_s1 + $0x130] sm:$0xff]  }
  0x5a   : > { %3589 = vmatprep.mubr.bf16.mxu0 %v3923_v9  ;;  %v3985_v9 = vld [vmem:[%s4093_s24 + $0x88] sm:$0xff]  }
  0x5b   : > { %3444 = vmatpush3.bf16.msra.mxu1 %v3920_v6  ;;  %v3983_v6 = vld [vmem:[%s4093_s24 + $0x78] sm:$0xff]  }
  0x5c   : > { %3604 = vmatpush3.bf16.msra.mxu0 %v3921_v7  ;;  %3445 = vmatprep.subr.bf16.mxu1 %v3925_v11  ;;  %v3984_v7 = vld [vmem:[%s4093_s24 + $0xa0] sm:$0xff]  }
  0x5d   : > { %3605 = vmatprep.subr.bf16.mxu0 %v3927_v12 }
  0x5e   : > { %3430 = vmatmul.mubr.bf16.gmra.mrb[12].mxu1 %v3924_v10  ;;  %v3987_v10 = vld [vmem:[%s4093_s24 + $0xb0] sm:$0xff]  }
  0x5f   : > { %3590 = vmatmul.mubr.bf16.gmra.mrb[12].mxu0 %v3926_v13  ;;  %3446 = vmatpush3.bf16.msra.mxu1 %v3925_v11  ;;  %v3989_v11 = vld [vmem:[%s4450_s1 + $0x138] sm:$0xff]   ;;  %v3991_v13 = vld [vmem:[%s4348_s28] sm:$0xff]  }
  0x60   : > { %3606 = vmatpush3.bf16.msra.mxu0 %v3927_v12  ;;  %3447 = vmatprep.subr.bf16.mxu1 %v3928_v14  ;;  %v3990_v12 = vld [vmem:[%s4093_s24 + $0x20] sm:$0xff]  }
  0x61   : > { %3607 = vmatprep.subr.bf16.mxu0 %v3929_v15  ;;  %3449 = vmatprep.mubr.bf16.mxu1 %v3930_v16  ;;  %v3994_v16 = vld [vmem:[%s4093_s24 + $0x40] sm:$0xff]  }
  0x62   : > { %3609 = vmatprep.mubr.bf16.mxu0 %v3931_v17  ;;  %v3995_v17 = vld [vmem:[%s4348_s28 + $0x10] sm:$0xff]  }
  0x63   : > { %3448 = vmatpush3.bf16.msra.mxu1 %v3928_v14  ;;  %v3992_v14 = vld [vmem:[%s4093_s24 + $0x30] sm:$0xff]  }
  0x64   : > { %3608 = vmatpush3.bf16.msra.mxu0 %v3929_v15  ;;  %3465 = vmatprep.subr.bf16.mxu1 %v3933_v19  ;;  %v3993_v15 = vld [vmem:[%s4348_s28 + $0x8] sm:$0xff]  }
  0x65   : > { %3625 = vmatprep.subr.bf16.mxu0 %v3935_v20 }
  0x66   : > { %3450 = vmatmul.mubr.bf16.vlgmr.msra.gmra.mrb[0].mxu1 %v3932_v18  ;;  %v3996_v18 = vld [vmem:[%s4093_s24 + $0x50] sm:$0xff]  }
  0x67   : > { %3610 = vmatmul.mubr.bf16.vlgmr.msra.gmra.mrb[0].mxu0 %v3934_v21  ;;  %3466 = vmatpush3.bf16.msra.mxu1 %v3933_v19  ;;  %v3997_v19 = vld [vmem:[%s4348_s28 + $0x18] sm:$0xff]   ;;  %v3999_v21 = vld [vmem:[%s4348_s28 + $0x20] sm:$0xff]  }
  0x68   : > { %3626 = vmatpush3.bf16.msra.mxu0 %v3935_v20  ;;  %3467 = vmatprep.subr.bf16.mxu1 %v3936_v22  ;;  %v3998_v20 = vld [vmem:[%s4093_s24 + $0x60] sm:$0xff]  }
  0x69   : > { %3627 = vmatprep.subr.bf16.mxu0 %v3937_v23  ;;  %3453 = vmatprep.mubr.bf16.mxu1 %v3938_v24  ;;  %v4002_v24 = vld [vmem:[%s4093_s24 + $0x80] sm:$0xff]  }
  0x6a   : > { %3613 = vmatprep.mubr.bf16.mxu0 %v3939_v25  ;;  %v4003_v25 = vld [vmem:[%s4348_s28 + $0x30] sm:$0xff]  }
  0x6b   : > { %3468 = vmatpush3.bf16.msra.mxu1 %v3936_v22  ;;  %v4000_v22 = vld [vmem:[%s4093_s24 + $0x70] sm:$0xff]  }
  0x6c   : > { %3628 = vmatpush3.bf16.msra.mxu0 %v3937_v23  ;;  %3469 = vmatprep.subr.bf16.mxu1 %v3941_v27  ;;  %v4001_v23 = vld [vmem:[%s4348_s28 + $0x28] sm:$0xff]  }
  0x6d   : > { %3629 = vmatprep.subr.bf16.mxu0 %v3943_v28 }
  0x6e   : > { %3454 = vmatmul.mubr.bf16.gmra.mrb[4].mxu1 %v3940_v26  ;;  %v4004_v26 = vld [vmem:[%s4093_s24 + $0x90] sm:$0xff]  }
  0x6f   : > { %3614 = vmatmul.mubr.bf16.gmra.mrb[4].mxu0 %v3942_v29  ;;  %3470 = vmatpush3.bf16.msra.mxu1 %v3941_v27  ;;  %v4005_v27 = vld [vmem:[%s4348_s28 + $0x38] sm:$0xff]  }
  0x70   : > { %3630 = vmatpush3.bf16.msra.mxu0 %v3943_v28  ;;  %3471 = vmatprep.subr.bf16.mxu1 %v3944_v30  ;;  %v4392_v28 = vld [vmem:[%s4451_s2] ss:$0 sm:$0xff] }
  0x71   : > { %3631 = vmatprep.subr.bf16.mxu0 %v3945_v31  ;;  %3457 = vmatprep.mubr.bf16.mxu1 %v3946_v32 }
  0x72   : > { %3617 = vmatprep.mubr.bf16.mxu0 %v3947_v33  ;;  %v4398_v33 = vld [vmem:[%s4454_s5] ss:$0 sm:$0xff] }
  0x73   : > { %3472 = vmatpush3.bf16.msra.mxu1 %v3944_v30 }
  0x74   : > { %3632 = vmatpush3.bf16.msra.mxu0 %v3945_v31  ;;  %3473 = vmatprep.subr.bf16.mxu1 %v3949_v35 }
  0x75   : > { %3633 = vmatprep.subr.bf16.mxu0 %v3951_v36 }
  0x76   : > { %3458 = vmatmul.mubr.bf16.gmra.mrb[8].mxu1 %v3948_v34 }
  0x77   : > { %3618 = vmatmul.mubr.bf16.gmra.mrb[8].mxu0 %v3950_v37  ;;  %3474 = vmatpush3.bf16.msra.mxu1 %v3949_v35 }
  0x78   : > { %3634 = vmatpush3.bf16.msra.mxu0 %v3951_v36  ;;  %3475 = vmatprep.subr.bf16.mxu1 %v3952_v38 }
  0x79   : > { %3635 = vmatprep.subr.bf16.mxu0 %v3953_v39  ;;  %3461 = vmatprep.mubr.bf16.mxu1 %v3954_v40 }
  0x7a   : > { %3621 = vmatprep.mubr.bf16.mxu0 %v3955_v41 }
  0x7b   : > { %3476 = vmatpush3.bf16.msra.mxu1 %v3952_v38 }
  0x7c   : > { %3636 = vmatpush3.bf16.msra.mxu0 %v3953_v39  ;;  %3477 = vmatprep.subr.bf16.mxu1 %v3957_v43 }
  0x7d   : > { %3637 = vmatprep.subr.bf16.mxu0 %v3959_v44 }
  0x7e   : > { %3462 = vmatmul.mubr.bf16.gmra.mrb[12].mxu1 %v3956_v42 }
  0x7f   : > { %3622 = vmatmul.mubr.bf16.gmra.mrb[12].mxu0 %v3958_v45  ;;  %3478 = vmatpush3.bf16.msra.mxu1 %v3957_v43 }
  0x80   : > { %3638 = vmatpush3.bf16.msra.mxu0 %v3959_v44  ;;  %3479 = vmatprep.subr.bf16.mxu1 %v3960_v46 }
  0x81   : > { %3639 = vmatprep.subr.bf16.mxu0 %v3961_v47  ;;  %3481 = vmatprep.mubr.bf16.mxu1 %v3962_v48 }
  0x82   : > { %3641 = vmatprep.mubr.bf16.mxu0 %v3963_v49 }
  0x83   : > { %3480 = vmatpush3.bf16.msra.mxu1 %v3960_v46 }
  0x84   : > { %3640 = vmatpush3.bf16.msra.mxu0 %v3961_v47  ;;  %3497 = vmatprep.subr.bf16.mxu1 %v3965_v51 }
  0x85   : > { %3657 = vmatprep.subr.bf16.mxu0 %v3967_v52 }
  0x86   : > { %3482 = vmatmul.mubr.bf16.vlgmr.msra.gmra.mrb[0].mxu1 %v3964_v50 }
  0x87   : > { %3642 = vmatmul.mubr.bf16.vlgmr.msra.gmra.mrb[0].mxu0 %v3966_v53  ;;  %3498 = vmatpush3.bf16.msra.mxu1 %v3965_v51 }
  0x88   : > { %3658 = vmatpush3.bf16.msra.mxu0 %v3967_v52  ;;  %3499 = vmatprep.subr.bf16.mxu1 %v3968_v54 }
  0x89   : > { %3485 = vmatprep.mubr.bf16.mxu1 %v3969_v55  ;;  %3645 = vmatprep.mubr.bf16.mxu0 %v3970_v56 }
  0x8a   : > { %3659 = vmatprep.subr.bf16.mxu0 %v3974_v57 }
  0x8b   : > { %3500 = vmatpush3.bf16.msra.mxu1 %v3968_v54 }
  0x8c   : > { %3501 = vmatprep.subr.bf16.mxu1 %v3972_v59  ;;  %3660 = vmatpush3.bf16.msra.mxu0 %v3974_v57 }
  0x8d   : > { %3661 = vmatprep.subr.bf16.mxu0 %v3981_v60 }
  0x8e   : > { %3486 = vmatmul.mubr.bf16.gmra.mrb[4].mxu1 %v3971_v58 }
  0x8f   : > { %3646 = vmatmul.mubr.bf16.gmra.mrb[4].mxu0 %v3973_v61  ;;  %3502 = vmatpush3.bf16.msra.mxu1 %v3972_v59 }
  0x90   : > { %3503 = vmatprep.subr.bf16.mxu1 %v3975_v62  ;;  %3489 = vmatprep.mubr.bf16.mxu1 %v3976_v63 }
  0x91   : > { %3649 = vmatprep.mubr.bf16.mxu0 %v3977_v0  ;;  %3662 = vmatpush3.bf16.msra.mxu0 %v3981_v60 }
  0x92   : > { %3663 = vmatprep.subr.bf16.mxu0 %v3988_v1 }
  0x93   : > { %3504 = vmatpush3.bf16.msra.mxu1 %v3975_v62 }
  0x94   : > { %3505 = vmatprep.subr.bf16.mxu1 %v3979_v2 }
  0x95   : > { %3664 = vmatpush3.bf16.msra.mxu0 %v3988_v1 }
  0x96   : > { %3490 = vmatmul.mubr.bf16.gmra.mrb[8].mxu1 %v3978_v3 }
  0x97   : > { %3650 = vmatmul.mubr.bf16.gmra.mrb[8].mxu0 %v3980_v4  ;;  %3506 = vmatpush3.bf16.msra.mxu1 %v3979_v2 }
  0x98   : > { %3507 = vmatprep.subr.bf16.mxu1 %v3982_v5  ;;  %3493 = vmatprep.mubr.bf16.mxu1 %v3983_v6 }
  0x99   : > { %3653 = vmatprep.mubr.bf16.mxu0 %v3984_v7 }
  0x9b   : > { %3508 = vmatpush3.bf16.msra.mxu1 %v3982_v5 }
  0x9c   : > { %3509 = vmatprep.subr.bf16.mxu1 %v3986_v8 }
  0x9e   : > { %3494 = vmatmul.mubr.bf16.gmra.mrb[12].mxu1 %v3985_v9 }
  0x9f   : > { %3654 = vmatmul.mubr.bf16.gmra.mrb[12].mxu0 %v3987_v10  ;;  %3510 = vmatpush3.bf16.msra.mxu1 %v3986_v8 }
  0xa0   : > { %3511 = vmatprep.subr.bf16.mxu1 %v3989_v11  ;;  %3513 = vmatprep.mubr.bf16.mxu1 %v3990_v12 }
  0xa1   : > { %3665 = vmatprep.mubr.msk.bf16.mxu0 %vm2533_vm0, %v3991_v13 }
  0xa3   : > { %3512 = vmatpush3.bf16.msra.mxu1 %v3989_v11 }
  0xa6   : > { %3514 = vmatmul.mubr.bf16.vlgmr.msra.gmra.mrb[0].mxu1 %v3992_v14 }
  0xa7   : > { %3666 = vmatmul.mubr.msk.bf16.vlgmr.msra.gmra.mrb[0].mxu0 %vm2533_vm0, %v3993_v15  ;;  %3517 = vmatprep.mubr.bf16.mxu1 %v3994_v16 }
  0xa8   : > { %3669 = vmatprep.mubr.msk.bf16.mxu0 %vm2533_vm0, %v3995_v17 }
  0xae   : > { %3518 = vmatmul.mubr.bf16.gmra.mrb[4].mxu1 %v3996_v18 }
  0xaf   : > { %3670 = vmatmul.mubr.msk.bf16.gmra.mrb[4].mxu0 %vm2533_vm0, %v3997_v19  ;;  %3521 = vmatprep.mubr.bf16.mxu1 %v3998_v20 }
  0xb0   : > { %3673 = vmatprep.mubr.msk.bf16.mxu0 %vm2533_vm0, %v3999_v21 }
  0xb6   : > { %3522 = vmatmul.mubr.bf16.gmra.mrb[8].mxu1 %v4000_v22 }
  0xb7   : > { %3674 = vmatmul.mubr.msk.bf16.gmra.mrb[8].mxu0 %vm2533_vm0, %v4001_v23  ;;  %3525 = vmatprep.mubr.bf16.mxu1 %v4002_v24 }
  0xb8   : > { %3677 = vmatprep.mubr.msk.bf16.mxu0 %vm2533_vm0, %v4003_v25 }
  0xbe   : > { %3526 = vmatmul.mubr.bf16.gmra.mrb[12].mxu1 %v4004_v26 }
  0xbf   : > { %3678 = vmatmul.mubr.msk.bf16.gmra.mrb[12].mxu0 %vm2533_vm0, %v4005_v27 }
 0x179   : > { %v3515_v29 = vpop.f32.mrb[0].mxu1 }
 0x17a   : > { %v3681_v30 = vadd.f32 %v3515_v29, %v4392_v28  ;;  %v3667_v31 = vpop.f32.mrb[0].mxu0  ;;  %v1373_v32 = vpop.f32.mrb[1].mxu1 }
 0x17b   : > { %v3683_v34 = vadd.f32 %v4392_v28, %v1373_v32  ;;  %v2592_v35 = vpop.f32.mrb[1].mxu0  ;;  %v3516_v36 = vpop.f32.mrb[2].mxu1 }
 0x17c   : > { %v3682_v37 = vadd.f32 %v3681_v30, %v3667_v31  ;;  %v3685_v38 = vadd.f32 %v3516_v36, %v4392_v28  ;;  %v3668_v39 = vpop.f32.mrb[2].mxu0  ;;  %v1376_v40 = vpop.f32.mrb[3].mxu1 }
 0x17d   : > { %v3684_v41 = vadd.f32 %v3683_v34, %v2592_v35  ;;  %v3687_v42 = vadd.f32 %v4392_v28, %v1376_v40  ;;  %v2595_v43 = vpop.f32.mrb[3].mxu0 }
 0x17e   : > { %v2680_v44 = vadd.f32 %v3682_v37, %v4398_v33  ;;  %v3686_v45 = vadd.f32 %v3685_v38, %v3668_v39 }
 0x17f   : > { %v2678_v46 = vadd.f32 %v3684_v41, %v4398_v33  ;;  %v3688_v47 = vadd.f32 %v3687_v42, %v2595_v43 }
 0x180   : > { %v2681_v48 = vadd.f32 %v3686_v45, %v4398_v33  ;;  %v2696_v51 = vmax.f32 %v2680_v44, 0.0 }
 0x181   : > { %v2679_v49 = vadd.f32 %v3688_v47, %v4398_v33  ;;  %v3519_v50 = vpop.f32.mrb[4].mxu1  ;;  %v2694_v56 = vmax.f32 %v2678_v46, 0.0 }
 0x182   : > { %v2697_v52 = vmax.f32 %v2681_v48, 0.0  ;;  %v3689_v53 = vadd.f32 %v3519_v50, %v4392_v28  ;;  %v3671_v54 = vpop.f32.mrb[4].mxu0  ;;  %v1389_v55 = vpop.f32.mrb[5].mxu1 }
 0x183   : > { %v2695_v57 = vmax.f32 %v2679_v49, 0.0  ;;  %v3691_v58 = vadd.f32 %v4392_v28, %v1389_v55  ;;  %v2608_v59 = vpop.f32.mrb[5].mxu0  ;;  %v3520_v60 = vpop.f32.mrb[6].mxu1 }
 0x184   : > { %v2711_v61 = vpack.c.bf16 %v2697_v52, %v2696_v51  ;;  %v3690_v62 = vadd.f32 %v3689_v53, %v3671_v54  ;;  %v3693_v63 = vadd.f32 %v3520_v60, %v4392_v28  ;;  %v3672_v0 = vpop.f32.mrb[6].mxu0  ;;  %v1392_v1 = vpop.f32.mrb[7].mxu1 }
 0x185   : > { %v2710_v2 = vpack.c.bf16 %v2695_v57, %v2694_v56  ;;  %v3692_v3 = vadd.f32 %v3691_v58, %v2608_v59  ;;  %v3695_v4 = vadd.f32 %v4392_v28, %v1392_v1  ;;  %v2611_v5 = vpop.f32.mrb[7].mxu0 }
 0x186   : > { %2719 = vst [vmem:[%s4413_s16 + $0x8] sm:$0xff] %v2711_v61  ;;  %v2684_v6 = vadd.f32 %v3690_v62, %v4398_v33  ;;  %v3694_v7 = vadd.f32 %v3693_v63, %v3672_v0 }
 0x187   : > { %2718 = vst [vmem:[%s4413_s16] sm:$0xff] %v2710_v2  ;;  %v2682_v8 = vadd.f32 %v3692_v3, %v4398_v33  ;;  %v3696_v9 = vadd.f32 %v3695_v4, %v2611_v5 }
 0x188   : > { %v2685_v10 = vadd.f32 %v3694_v7, %v4398_v33  ;;  %v2700_v13 = vmax.f32 %v2684_v6, 0.0 }
 0x189   : > { %v2683_v11 = vadd.f32 %v3696_v9, %v4398_v33  ;;  %v3523_v12 = vpop.f32.mrb[8].mxu1  ;;  %v2698_v18 = vmax.f32 %v2682_v8, 0.0 }
 0x18a   : > { %v2701_v14 = vmax.f32 %v2685_v10, 0.0  ;;  %v3697_v15 = vadd.f32 %v3523_v12, %v4392_v28  ;;  %v3675_v16 = vpop.f32.mrb[8].mxu0  ;;  %v1405_v17 = vpop.f32.mrb[9].mxu1 }
 0x18b   : > { %v2699_v19 = vmax.f32 %v2683_v11, 0.0  ;;  %v3699_v20 = vadd.f32 %v4392_v28, %v1405_v17  ;;  %v2624_v21 = vpop.f32.mrb[9].mxu0  ;;  %v3524_v22 = vpop.f32.mrb[10].mxu1 }
 0x18c   : > { %v2713_v23 = vpack.c.bf16 %v2701_v14, %v2700_v13  ;;  %v3698_v24 = vadd.f32 %v3697_v15, %v3675_v16  ;;  %v3701_v25 = vadd.f32 %v3524_v22, %v4392_v28  ;;  %v3676_v26 = vpop.f32.mrb[10].mxu0  ;;  %v1408_v27 = vpop.f32.mrb[11].mxu1 }
 0x18d   : > { %v2712_v29 = vpack.c.bf16 %v2699_v19, %v2698_v18  ;;  %v3700_v30 = vadd.f32 %v3699_v20, %v2624_v21  ;;  %v3703_v31 = vadd.f32 %v4392_v28, %v1408_v27  ;;  %v2627_v32 = vpop.f32.mrb[11].mxu0 }
 0x18e   : > { %2721 = vst [vmem:[%s4413_s16 + $0x18] sm:$0xff] %v2713_v23  ;;  %v2688_v34 = vadd.f32 %v3698_v24, %v4398_v33  ;;  %v3702_v35 = vadd.f32 %v3701_v25, %v3676_v26 }
 0x18f   : > { %2720 = vst [vmem:[%s4413_s16 + $0x10] sm:$0xff] %v2712_v29  ;;  %v2686_v36 = vadd.f32 %v3700_v30, %v4398_v33  ;;  %v3704_v37 = vadd.f32 %v3703_v31, %v2627_v32 }
 0x190   : > { %v2689_v38 = vadd.f32 %v3702_v35, %v4398_v33  ;;  %v2704_v41 = vmax.f32 %v2688_v34, 0.0 }
 0x191   : > { %v2687_v39 = vadd.f32 %v3704_v37, %v4398_v33  ;;  %v3527_v40 = vpop.f32.mrb[12].mxu1  ;;  %v2702_v46 = vmax.f32 %v2686_v36, 0.0 }
 0x192   : > { %v2705_v42 = vmax.f32 %v2689_v38, 0.0  ;;  %v3705_v43 = vadd.f32 %v3527_v40, %v4392_v28  ;;  %v3679_v44 = vpop.f32.mrb[12].mxu0  ;;  %v1421_v45 = vpop.f32.mrb[13].mxu1 }
 0x193   : > { %v2703_v47 = vmax.f32 %v2687_v39, 0.0  ;;  %v3707_v48 = vadd.f32 %v4392_v28, %v1421_v45  ;;  %v2640_v49 = vpop.f32.mrb[13].mxu0  ;;  %v3528_v50 = vpop.f32.mrb[14].mxu1 }
 0x194   : > { %v2715_v51 = vpack.c.bf16 %v2705_v42, %v2704_v41  ;;  %v3706_v52 = vadd.f32 %v3705_v43, %v3679_v44  ;;  %v3709_v53 = vadd.f32 %v3528_v50, %v4392_v28  ;;  %v3680_v54 = vpop.f32.mrb[14].mxu0  ;;  %v1424_v55 = vpop.f32.mrb[15].mxu1 }
 0x195   : > { %v2714_v56 = vpack.c.bf16 %v2703_v47, %v2702_v46  ;;  %v3708_v57 = vadd.f32 %v3707_v48, %v2640_v49  ;;  %v3711_v58 = vadd.f32 %v4392_v28, %v1424_v55  ;;  %v2643_v59 = vpop.f32.mrb[15].mxu0 }
 0x196   : > { %2723 = vst [vmem:[%s4413_s16 + $0x28] sm:$0xff] %v2715_v51  ;;  %v2692_v60 = vadd.f32 %v3706_v52, %v4398_v33  ;;  %v3710_v61 = vadd.f32 %v3709_v53, %v3680_v54 }
 0x197   : > { %2722 = vst [vmem:[%s4413_s16 + $0x20] sm:$0xff] %v2714_v56  ;;  %v2690_v62 = vadd.f32 %v3708_v57, %v4398_v33  ;;  %v3712_v63 = vadd.f32 %v3711_v58, %v2643_v59 }
 0x198   : > { %v2693_v0 = vadd.f32 %v3710_v61, %v4398_v33  ;;  %v2708_v2 = vmax.f32 %v2692_v60, 0.0 }
 0x199   : > { %v2691_v1 = vadd.f32 %v3712_v63, %v4398_v33  ;;  %v2706_v4 = vmax.f32 %v2690_v62, 0.0 }
 0x19a   : > { %v2709_v3 = vmax.f32 %v2693_v0, 0.0 }
 0x19b   : > { %v2707_v5 = vmax.f32 %v2691_v1, 0.0 }
 0x19c   : > { %v2717_v28 = vpack.c.bf16 %v2709_v3, %v2708_v2 }
 0x19d   : > { %v2716_v6 = vpack.c.bf16 %v2707_v5, %v2706_v4 }
 0x19e   : > { %2725 = vst [vmem:[%s4413_s16 + $0x38] sm:$0xff] %v2717_v28 }
 0x19f   : > { %2724 = vst [vmem:[%s4413_s16 + $0x30] sm:$0xff] %v2716_v6 }
 0x1a0 PF: > { %s16_s21 = sadd.s32 1, %s4012_s21  }
 0x1a1   : > { %p13_p4 = scmp.ge.s32.totalorder %s16_s21, 4  }
 0x1a3   :  { %15 = sbr.rel (!%p13_p4) target bundleno = 1 (0x1), region = 89 }

// kernel: st_gcn_forward.13
= control target key start
LH: loop header
LB: loop body
LE: loop exit
PB: predicated region body
PF: predicated region fallthrough
CT: control target
= control target key end

     0   :  { %vm1064_vm0 = vcmask 130048   ;;  %s3521_s1 = inlined_call_operand.vmem [shape: bf16[656,256], index: 1, kind: input, shape index: {}]   ;;  %s3522_s0 = inlined_call_operand.vmem [shape: bf16[256,656], index: 0, kind: input, shape index: {}]   ;;  %s3523_s2 = inlined_call_operand.vmem [shape: bf16[256,256], index: 2, kind: output, shape index: {}]  }
   0x1   :  { %v2402_v0 = vld [vmem:[%s3521_s1 + $0x4] ss:$8 sps:$4 sm:$0xff]   ;;  %v2406_v2 = vld [vmem:[%s3521_s1] ss:$8 sps:$4 sm:$0xff]   ;;  %v2408_v4 = vld [vmem:[%s3521_s1 + $0x14] ss:$8 sps:$4 sm:$0xff]  }
   0x2   :  { %v2690_v1 = vld [vmem:[%s3521_s1 + $0x104] ss:$8 sps:$4 sm:$0xff]   ;;  %1113 = vmatprep.subr.bf16.mxu1 %v2402_v0  ;;  %v2698_v3 = vld [vmem:[%s3521_s1 + $0x100] ss:$8 sps:$4 sm:$0xff]   ;;  %v2708_v5 = vld [vmem:[%s3521_s1 + $0x114] ss:$8 sps:$4 sm:$0xff]  }
   0x3   :  { %1306 = vmatprep.subr.bf16.mxu0 %v2690_v1  ;;  %1114 = vmatpush1.bf16.msra.mxu1 %v2406_v2  ;;  %v2412_v6 = vld [vmem:[%s3521_s1 + $0x10] ss:$8 sps:$4 sm:$0xff]   ;;  %v2414_v8 = vld [vmem:[%s3521_s1 + $0x24] ss:$8 sps:$4 sm:$0xff]   ;;  %v2418_v10 = vld [vmem:[%s3521_s1 + $0x20] ss:$8 sps:$4 sm:$0xff]  }
   0x4   :  { %1307 = vmatpush1.bf16.msra.mxu0 %v2698_v3  ;;  %1115 = vmatprep.subr.bf16.mxu1 %v2408_v4  ;;  %v2716_v7 = vld [vmem:[%s3521_s1 + $0x110] ss:$8 sps:$4 sm:$0xff]   ;;  %v2725_v9 = vld [vmem:[%s3521_s1 + $0x124] ss:$8 sps:$4 sm:$0xff]   ;;  %v2733_v11 = vld [vmem:[%s3521_s1 + $0x120] ss:$8 sps:$4 sm:$0xff]  }
   0x5   :  { %1308 = vmatprep.subr.bf16.mxu0 %v2708_v5  ;;  %v2420_v12 = vld [vmem:[%s3521_s1 + $0x34] ss:$8 sps:$4 sm:$0xff]   ;;  %v2424_v14 = vld [vmem:[%s3521_s1 + $0x30] ss:$8 sps:$4 sm:$0xff]   ;;  %v2426_v16 = vld [vmem:[%s3521_s1 + $0x44] ss:$8 sps:$4 sm:$0xff]  }
   0x6   :  { %v2743_v13 = vld [vmem:[%s3521_s1 + $0x134] ss:$8 sps:$4 sm:$0xff]   ;;  %v2752_v15 = vld [vmem:[%s3521_s1 + $0x130] ss:$8 sps:$4 sm:$0xff]   ;;  %v2761_v17 = vld [vmem:[%s3521_s1 + $0x144] ss:$8 sps:$4 sm:$0xff]  }
   0x7   :  { %1116 = vmatpush1.bf16.msra.mxu1 %v2412_v6  ;;  %v2430_v18 = vld [vmem:[%s3521_s1 + $0x40] ss:$8 sps:$4 sm:$0xff]   ;;  %v2432_v20 = vld [vmem:[%s3521_s1 + $0x54] ss:$8 sps:$4 sm:$0xff]   ;;  %v2436_v22 = vld [vmem:[%s3521_s1 + $0x50] ss:$8 sps:$4 sm:$0xff]  }
   0x8   :  { %1309 = vmatpush1.bf16.msra.mxu0 %v2716_v7  ;;  %1117 = vmatprep.subr.bf16.mxu1 %v2414_v8  ;;  %v2769_v19 = vld [vmem:[%s3521_s1 + $0x140] ss:$8 sps:$4 sm:$0xff]   ;;  %v2779_v21 = vld [vmem:[%s3521_s1 + $0x154] ss:$8 sps:$4 sm:$0xff]   ;;  %v2788_v23 = vld [vmem:[%s3521_s1 + $0x150] ss:$8 sps:$4 sm:$0xff]  }
   0x9   :  { %1310 = vmatprep.subr.bf16.mxu0 %v2725_v9  ;;  %v2438_v24 = vld [vmem:[%s3521_s1 + $0x64] ss:$8 sps:$4 sm:$0xff]   ;;  %v2442_v26 = vld [vmem:[%s3521_s1 + $0x60] ss:$8 sps:$4 sm:$0xff]   ;;  %v2444_v28 = vld [vmem:[%s3521_s1 + $0x74] ss:$8 sps:$4 sm:$0xff]  }
   0xa   :  { %v2797_v25 = vld [vmem:[%s3521_s1 + $0x164] ss:$8 sps:$4 sm:$0xff]   ;;  %v2805_v27 = vld [vmem:[%s3521_s1 + $0x160] ss:$8 sps:$4 sm:$0xff]   ;;  %v2815_v29 = vld [vmem:[%s3521_s1 + $0x174] ss:$8 sps:$4 sm:$0xff]  }
   0xb   :  { %1118 = vmatpush1.bf16.msra.mxu1 %v2418_v10  ;;  %v2448_v30 = vld [vmem:[%s3521_s1 + $0x70] ss:$8 sps:$4 sm:$0xff]   ;;  %v2450_v32 = vld [vmem:[%s3521_s1 + $0x84] ss:$8 sps:$4 sm:$0xff]   ;;  %v2454_v34 = vld [vmem:[%s3521_s1 + $0x80] ss:$8 sps:$4 sm:$0xff]  }
   0xc   :  { %1311 = vmatpush1.bf16.msra.mxu0 %v2733_v11  ;;  %1119 = vmatprep.subr.bf16.mxu1 %v2420_v12  ;;  %v2824_v31 = vld [vmem:[%s3521_s1 + $0x170] ss:$8 sps:$4 sm:$0xff]   ;;  %v2833_v33 = vld [vmem:[%s3521_s1 + $0x184] ss:$8 sps:$4 sm:$0xff]   ;;  %v2841_v35 = vld [vmem:[%s3521_s1 + $0x180] ss:$8 sps:$4 sm:$0xff]  }
   0xd   :  { %1312 = vmatprep.subr.bf16.mxu0 %v2743_v13  ;;  %v2456_v36 = vld [vmem:[%s3521_s1 + $0x94] ss:$8 sps:$4 sm:$0xff]   ;;  %v2460_v38 = vld [vmem:[%s3521_s1 + $0x90] ss:$8 sps:$4 sm:$0xff]   ;;  %v2462_v40 = vld [vmem:[%s3521_s1 + $0xa4] ss:$8 sps:$4 sm:$0xff]  }
   0xe   :  { %v2851_v37 = vld [vmem:[%s3521_s1 + $0x194] ss:$8 sps:$4 sm:$0xff]   ;;  %v2860_v39 = vld [vmem:[%s3521_s1 + $0x190] ss:$8 sps:$4 sm:$0xff]   ;;  %v2869_v41 = vld [vmem:[%s3521_s1 + $0x1a4] ss:$8 sps:$4 sm:$0xff]  }
   0xf   :  { %1120 = vmatpush1.bf16.msra.mxu1 %v2424_v14  ;;  %v2466_v42 = vld [vmem:[%s3521_s1 + $0xa0] ss:$8 sps:$4 sm:$0xff]   ;;  %v2468_v44 = vld [vmem:[%s3521_s1 + $0xb4] ss:$8 sps:$4 sm:$0xff]   ;;  %v2472_v46 = vld [vmem:[%s3521_s1 + $0xb0] ss:$8 sps:$4 sm:$0xff]  }
  0x10   :  { %1313 = vmatpush1.bf16.msra.mxu0 %v2752_v15  ;;  %1121 = vmatprep.subr.bf16.mxu1 %v2426_v16  ;;  %v2877_v43 = vld [vmem:[%s3521_s1 + $0x1a0] ss:$8 sps:$4 sm:$0xff]   ;;  %v2887_v45 = vld [vmem:[%s3521_s1 + $0x1b4] ss:$8 sps:$4 sm:$0xff]   ;;  %v2895_v47 = vld [vmem:[%s3521_s1 + $0x1b0] ss:$8 sps:$4 sm:$0xff]  }
  0x11   :  { %1314 = vmatprep.subr.bf16.mxu0 %v2761_v17  ;;  %v2474_v48 = vld [vmem:[%s3521_s1 + $0xc4] ss:$8 sps:$4 sm:$0xff]   ;;  %v2478_v52 = vld [vmem:[%s3521_s1 + $0xc0] ss:$8 sps:$4 sm:$0xff]   ;;  %v2480_v54 = vld [vmem:[%s3521_s1 + $0xd4] ss:$8 sps:$4 sm:$0xff]  }
  0x12   :  { %v2500_v49 = vld [vmem:[%s3522_s0 + $0x4] ss:$24 sps:$4 sm:$0xff]   ;;  %v2920_v53 = vld [vmem:[%s3521_s1 + $0x1c0] ss:$8 sps:$4 sm:$0xff]   ;;  %v2484_v56 = vld [vmem:[%s3521_s1 + $0xd0] ss:$8 sps:$4 sm:$0xff]  }
  0x13   :  { %1122 = vmatpush1.bf16.msra.mxu1 %v2430_v18  ;;  %v2907_v50 = vld [vmem:[%s3521_s1 + $0x1c4] ss:$8 sps:$4 sm:$0xff]   ;;  %1145 = vmatprep.mubr.bf16.mxu1 %v2500_v49  ;;  %v2929_v55 = vld [vmem:[%s3521_s1 + $0x1d4] ss:$8 sps:$4 sm:$0xff]   ;;  %v2938_v57 = vld [vmem:[%s3521_s1 + $0x1d0] ss:$8 sps:$4 sm:$0xff]  }
  0x14   :  { %1315 = vmatpush1.bf16.msra.mxu0 %v2769_v19  ;;  %1123 = vmatprep.subr.bf16.mxu1 %v2432_v20  ;;  %v2503_v51 = vld [vmem:[%s3522_s0 + $0xc] ss:$24 sps:$4 sm:$0xff]   ;;  %v2490_v60 = vld [vmem:[%s3521_s1 + $0xe0] ss:$8 sps:$4 sm:$0xff]   ;;  %v2492_v62 = vld [vmem:[%s3521_s1 + $0xf4] ss:$8 sps:$4 sm:$0xff]  }
  0x15   :  { %1316 = vmatprep.subr.bf16.mxu0 %v2779_v21  ;;  %1338 = vmatprep.mubr.bf16.mxu0 %v2503_v51  ;;  %v2486_v58 = vld [vmem:[%s3521_s1 + $0xe4] ss:$8 sps:$4 sm:$0xff]   ;;  %v2955_v61 = vld [vmem:[%s3521_s1 + $0x1e0] ss:$8 sps:$4 sm:$0xff]   ;;  %v2965_v63 = vld [vmem:[%s3521_s1 + $0x1f4] ss:$8 sps:$4 sm:$0xff]  }
  0x16   :  { %v2947_v59 = vld [vmem:[%s3521_s1 + $0x1e4] ss:$8 sps:$4 sm:$0xff]   ;;  %v2496_v0 = vld [vmem:[%s3521_s1 + $0xf0] ss:$8 sps:$4 sm:$0xff]   ;;  %v2501_v8 = vld [vmem:[%s3522_s0 + $0x8] ss:$24 sps:$4 sm:$0xff]  }
  0x17   :  { %1124 = vmatpush1.bf16.msra.mxu1 %v2436_v22  ;;  %v2974_v2 = vld [vmem:[%s3521_s1 + $0x1f0] ss:$8 sps:$4 sm:$0xff]   ;;  %v2506_v4 = vld [vmem:[%s3521_s1 + $0x204] ss:$8 sps:$4 sm:$0xff]   ;;  %v2504_v10 = vld [vmem:[%s3521_s1 + $0x200] ss:$8 sps:$4 sm:$0xff]  }
  0x18   :  { %1317 = vmatpush1.bf16.msra.mxu0 %v2788_v23  ;;  %1125 = vmatprep.subr.bf16.mxu1 %v2438_v24  ;;  %v2498_v6 = vld [vmem:[%s3522_s0] ss:$24 sps:$4 sm:$0xff]   ;;  %v2507_v12 = vld [vmem:[%s3522_s0 + $0x34] ss:$24 sps:$4 sm:$0xff]   ;;  %v2511_v20 = vld [vmem:[%s3522_s0 + $0x30] ss:$24 sps:$4 sm:$0xff]  }
  0x19   :  { %1318 = vmatprep.subr.bf16.mxu0 %v2797_v25  ;;  %v2509_v14 = vld [vmem:[%s3522_s0 + $0x3c] ss:$24 sps:$4 sm:$0xff]   ;;  %v2513_v18 = vld [vmem:[%s3521_s1 + $0x210] ss:$8 sps:$4 sm:$0xff]   ;;  %v2518_v24 = vld [vmem:[%s3522_s0 + $0x6c] ss:$24 sps:$4 sm:$0xff]  }
  0x1a   :  { %v2515_v16 = vld [vmem:[%s3521_s1 + $0x214] ss:$8 sps:$4 sm:$0xff]   ;;  %v2550_v49 = vld [vmem:[%s3522_s0 + $0xf0] ss:$24 sps:$4 sm:$0xff]   ;;  %v2557_v51 = vld [vmem:[%s3522_s0 + $0x12c] ss:$24 sps:$4 sm:$0xff]  }
  0x1b   :  { %1126 = vmatpush1.bf16.msra.mxu1 %v2442_v26  ;;  %v2516_v22 = vld [vmem:[%s3522_s0 + $0x64] ss:$24 sps:$4 sm:$0xff]  }
  0x1c   :  { %1319 = vmatpush1.bf16.msra.mxu0 %v2805_v27  ;;  %1127 = vmatprep.subr.bf16.mxu1 %v2444_v28  ;;  %v2527_v26 = vld [vmem:[%s3521_s1 + $0x234] ss:$8 sps:$4 sm:$0xff]   ;;  %v2523_v28 = vld [vmem:[%s3522_s0 + $0x60] ss:$24 sps:$4 sm:$0xff]  }
  0x1d   :  { %1320 = vmatprep.subr.bf16.mxu0 %v2815_v29 }
  0x1f   :  { %1128 = vmatpush1.bf16.msra.mxu1 %v2448_v30  ;;  %v2524_v30 = vld [vmem:[%s3522_s0 + $0x68] ss:$24 sps:$4 sm:$0xff]  }
  0x20   :  { %1321 = vmatpush1.bf16.msra.mxu0 %v2824_v31  ;;  %1129 = vmatprep.subr.bf16.mxu1 %v2450_v32  ;;  %v2530_v32 = vld [vmem:[%s3522_s0 + $0x9c] ss:$24 sps:$4 sm:$0xff]  }
  0x21   :  { %1322 = vmatprep.subr.bf16.mxu0 %v2833_v33 }
  0x23   :  { %1130 = vmatpush1.bf16.msra.mxu1 %v2454_v34  ;;  %v2545_v34 = vld [vmem:[%s3521_s1 + $0x254] ss:$8 sps:$4 sm:$0xff]  }
  0x24   :  { %1323 = vmatpush1.bf16.msra.mxu0 %v2841_v35  ;;  %1131 = vmatprep.subr.bf16.mxu1 %v2456_v36  ;;  %v2532_v36 = vld [vmem:[%s3522_s0 + $0x90] ss:$24 sps:$4 sm:$0xff]  }
  0x25   :  { %1324 = vmatprep.subr.bf16.mxu0 %v2851_v37 }
  0x27   :  { %1132 = vmatpush1.bf16.msra.mxu1 %v2460_v38  ;;  %v2533_v38 = vld [vmem:[%s3522_s0 + $0x98] ss:$24 sps:$4 sm:$0xff]  }
  0x28   :  { %1325 = vmatpush1.bf16.msra.mxu0 %v2860_v39  ;;  %1133 = vmatprep.subr.bf16.mxu1 %v2462_v40  ;;  %v2539_v40 = vld [vmem:[%s3522_s0 + $0xcc] ss:$24 sps:$4 sm:$0xff]  }
  0x29   :  { %1326 = vmatprep.subr.bf16.mxu0 %v2869_v41 }
  0x2b   :  { %1134 = vmatpush1.bf16.msra.mxu1 %v2466_v42  ;;  %v2563_v42 = vld [vmem:[%s3521_s1 + $0x274] ss:$8 sps:$4 sm:$0xff]  }
  0x2c   :  { %1327 = vmatpush1.bf16.msra.mxu0 %v2877_v43  ;;  %1135 = vmatprep.subr.bf16.mxu1 %v2468_v44  ;;  %v2541_v44 = vld [vmem:[%s3522_s0 + $0xc0] ss:$24 sps:$4 sm:$0xff]  }
  0x2d   :  { %1328 = vmatprep.subr.bf16.mxu0 %v2887_v45 }
  0x2f   :  { %1136 = vmatpush1.bf16.msra.mxu1 %v2472_v46  ;;  %v2542_v46 = vld [vmem:[%s3522_s0 + $0xc8] ss:$24 sps:$4 sm:$0xff]  }
  0x30   :  { %1329 = vmatpush1.bf16.msra.mxu0 %v2895_v47  ;;  %1137 = vmatprep.subr.bf16.mxu1 %v2474_v48  ;;  %v2548_v48 = vld [vmem:[%s3522_s0 + $0xfc] ss:$24 sps:$4 sm:$0xff]  }
  0x31   :  { %1330 = vmatprep.subr.bf16.mxu0 %v2907_v50 }
  0x33   :  { %1138 = vmatpush1.bf16.msra.mxu1 %v2478_v52  ;;  %v2575_v52 = vld [vmem:[%s3522_s0 + $0x10] ss:$24 sps:$4 sm:$0xff]  }
  0x34   :  { %1331 = vmatpush1.bf16.msra.mxu0 %v2920_v53  ;;  %1139 = vmatprep.subr.bf16.mxu1 %v2480_v54  ;;  %v2579_v54 = vld [vmem:[%s3522_s0 + $0x1b4] ss:$24 sps:$4 sm:$0xff]  }
  0x35   :  { %1332 = vmatprep.subr.bf16.mxu0 %v2929_v55 }
  0x37   :  { %1140 = vmatpush1.bf16.msra.mxu1 %v2484_v56  ;;  %v2583_v56 = vld [vmem:[%s3522_s0 + $0x1b0] ss:$24 sps:$4 sm:$0xff]  }
  0x38   :  { %1333 = vmatpush1.bf16.msra.mxu0 %v2938_v57  ;;  %1141 = vmatprep.subr.bf16.mxu1 %v2486_v58  ;;  %v2585_v58 = vld [vmem:[%s3522_s0 + $0x1e4] ss:$24 sps:$4 sm:$0xff]  }
  0x39   :  { %1334 = vmatprep.subr.bf16.mxu0 %v2947_v59 }
  0x3b   :  { %1142 = vmatpush1.bf16.msra.mxu1 %v2490_v60  ;;  %v2589_v60 = vld [vmem:[%s3522_s0 + $0x1e0] ss:$24 sps:$4 sm:$0xff]  }
  0x3c   :  { %1335 = vmatpush1.bf16.msra.mxu0 %v2955_v61  ;;  %1143 = vmatprep.subr.bf16.mxu1 %v2492_v62  ;;  %v2591_v62 = vld [vmem:[%s3522_s0 + $0x214] ss:$24 sps:$4 sm:$0xff]  }
  0x3d   :  { %1336 = vmatprep.subr.bf16.mxu0 %v2965_v63 }
  0x3f   :  { %1144 = vmatpush1.bf16.msra.mxu1 %v2496_v0  ;;  %v2595_v0 = vld [vmem:[%s3522_s0 + $0x210] ss:$24 sps:$4 sm:$0xff]  }
  0x40   :  { %1337 = vmatpush1.bf16.msra.mxu0 %v2974_v2  ;;  %2242 = vmatprep.subr.bf16.mxu1 %v2690_v1  ;;  %v2522_v1 = vld [vmem:[%s3521_s1 + $0x224] ss:$8 sps:$4 sm:$0xff]  }
  0x41   :  { %1499 = vmatprep.subr.bf16.mxu0 %v2506_v4  ;;  %v2597_v4 = vld [vmem:[%s3522_s0 + $0x244] ss:$24 sps:$4 sm:$0xff]  }
  0x42   :  { %1146 = vmatmul.mubr.bf16.vlgmr.msra.gmra.mrb[0].mxu1 %v2498_v6  ;;  %v2599_v6 = vld [vmem:[%s3522_s0 + $0xd4] ss:$24 sps:$4 sm:$0xff]  }
  0x43   :  { %1339 = vmatmul.mubr.bf16.vlgmr.msra.gmra.mrb[0].mxu0 %v2501_v8  ;;  %2258 = vmatpush1.bf16.msra.mxu1 %v2698_v3  ;;  %v2512_v3 = vld [vmem:[%s3522_s0 + $0x38] ss:$24 sps:$4 sm:$0xff]  }
  0x44   :  { %1500 = vmatpush1.bf16.msra.mxu0 %v2504_v10  ;;  %1155 = vmatprep.mubr.bf16.mxu1 %v2507_v12  ;;  %v2601_v8 = vld [vmem:[%s3522_s0 + $0x240] ss:$24 sps:$4 sm:$0xff]   ;;  %v2602_v10 = vld [vmem:[%s3522_s0 + $0xd0] ss:$24 sps:$4 sm:$0xff]   ;;  %v2603_v12 = vld [vmem:[%s3522_s0 + $0x274] ss:$24 sps:$4 sm:$0xff]  }
  0x45   :  { %1348 = vmatprep.mubr.bf16.mxu0 %v2509_v14  ;;  %2243 = vmatprep.subr.bf16.mxu1 %v2708_v5  ;;  %v2520_v5 = vld [vmem:[%s3521_s1 + $0x220] ss:$8 sps:$4 sm:$0xff]   ;;  %v2605_v14 = vld [vmem:[%s3522_s0 + $0x104] ss:$24 sps:$4 sm:$0xff]  }
  0x46   :  { %1501 = vmatprep.subr.bf16.mxu0 %v2515_v16  ;;  %v2607_v16 = vld [vmem:[%s3522_s0 + $0x270] ss:$24 sps:$4 sm:$0xff]  }
  0x47   :  { %2259 = vmatpush1.bf16.msra.mxu1 %v2716_v7  ;;  %v2525_v7 = vld [vmem:[%s3521_s1 + $0x230] ss:$8 sps:$4 sm:$0xff]  }
  0x48   :  { %1502 = vmatpush1.bf16.msra.mxu0 %v2513_v18  ;;  %2244 = vmatprep.subr.bf16.mxu1 %v2725_v9  ;;  %v2536_v9 = vld [vmem:[%s3521_s1 + $0x244] ss:$8 sps:$4 sm:$0xff]   ;;  %v2608_v18 = vld [vmem:[%s3522_s0 + $0x100] ss:$24 sps:$4 sm:$0xff]  }
  0x49   :  { %1503 = vmatprep.subr.bf16.mxu0 %v2522_v1  ;;  %v2609_v1 = vld [vmem:[%s3522_s0 + $0x2a4] ss:$24 sps:$4 sm:$0xff]  }
  0x4a   :  { %1156 = vmatmul.mubr.bf16.gmra.mrb[4].mxu1 %v2511_v20  ;;  %v2611_v20 = vld [vmem:[%s3522_s0 + $0x134] ss:$24 sps:$4 sm:$0xff]  }
  0x4b   :  { %1349 = vmatmul.mubr.bf16.gmra.mrb[4].mxu0 %v2512_v3  ;;  %1165 = vmatprep.mubr.bf16.mxu1 %v2516_v22  ;;  %v2613_v3 = vld [vmem:[%s3522_s0 + $0x2a0] ss:$24 sps:$4 sm:$0xff]   ;;  %v2614_v22 = vld [vmem:[%s3522_s0 + $0x130] ss:$24 sps:$4 sm:$0xff]  }
  0x4c   :  { %1358 = vmatprep.mubr.bf16.mxu0 %v2518_v24  ;;  %1504 = vmatpush1.bf16.msra.mxu0 %v2520_v5  ;;  %v2615_v24 = vld [vmem:[%s3522_s0 + $0x2d4] ss:$24 sps:$4 sm:$0xff]   ;;  %v2617_v5 = vld [vmem:[%s3522_s0 + $0x164] ss:$24 sps:$4 sm:$0xff]  }
  0x4d   :  { %2260 = vmatpush1.bf16.msra.mxu1 %v2733_v11  ;;  %1505 = vmatprep.subr.bf16.mxu0 %v2527_v26  ;;  %v2528_v11 = vld [vmem:[%s3522_s0 + $0x94] ss:$24 sps:$4 sm:$0xff]   ;;  %v2619_v26 = vld [vmem:[%s3522_s0 + $0x2d0] ss:$24 sps:$4 sm:$0xff]  }
  0x4e   :  { %2245 = vmatprep.subr.bf16.mxu1 %v2743_v13  ;;  %v2534_v13 = vld [vmem:[%s3521_s1 + $0x240] ss:$8 sps:$4 sm:$0xff]  }
  0x50   :  { %1506 = vmatpush1.bf16.msra.mxu0 %v2525_v7  ;;  %v2620_v7 = vld [vmem:[%s3522_s0 + $0x160] ss:$24 sps:$4 sm:$0xff]  }
  0x51   :  { %2261 = vmatpush1.bf16.msra.mxu1 %v2752_v15  ;;  %1507 = vmatprep.subr.bf16.mxu0 %v2536_v9  ;;  %v2543_v15 = vld [vmem:[%s3521_s1 + $0x250] ss:$8 sps:$4 sm:$0xff]   ;;  %v2624_v9 = vld [vmem:[%s3522_s0 + $0x194] ss:$24 sps:$4 sm:$0xff]  }
  0x52   :  { %2246 = vmatprep.subr.bf16.mxu1 %v2761_v17  ;;  %1166 = vmatmul.mubr.bf16.gmra.mrb[8].mxu1 %v2523_v28  ;;  %v2554_v17 = vld [vmem:[%s3521_s1 + $0x264] ss:$8 sps:$4 sm:$0xff]  }
  0x53   :  { %1359 = vmatmul.mubr.bf16.gmra.mrb[8].mxu0 %v2524_v30  ;;  %1175 = vmatprep.mubr.bf16.mxu1 %v2528_v11  ;;  %v2623_v28 = vld [vmem:[%s3522_s0 + $0x18c] ss:$24 sps:$4 sm:$0xff]   ;;  %v2621_v30 = vld [vmem:[%s3522_s0 + $0x188] ss:$24 sps:$4 sm:$0xff]  }
  0x54   :  { %1368 = vmatprep.mubr.bf16.mxu0 %v2530_v32  ;;  %1508 = vmatpush1.bf16.msra.mxu0 %v2534_v13  ;;  %v2626_v11 = vld [vmem:[%s3522_s0 + $0x190] ss:$24 sps:$4 sm:$0xff]   ;;  %v2627_v32 = vld [vmem:[%s3522_s0 + $0x1bc] ss:$24 sps:$4 sm:$0xff]  }
  0x55   :  { %2262 = vmatpush1.bf16.msra.mxu1 %v2769_v19  ;;  %1509 = vmatprep.subr.bf16.mxu0 %v2545_v34  ;;  %v2537_v19 = vld [vmem:[%s3522_s0 + $0xc4] ss:$24 sps:$4 sm:$0xff]   ;;  %v2631_v34 = vld [vmem:[%s3522_s0 + $0x1b8] ss:$24 sps:$4 sm:$0xff]  }
  0x56   :  { %2247 = vmatprep.subr.bf16.mxu1 %v2779_v21  ;;  %v2552_v21 = vld [vmem:[%s3521_s1 + $0x260] ss:$8 sps:$4 sm:$0xff]   ;;  %v2629_v13 = vld [vmem:[%s3522_s0 + $0x1c4] ss:$24 sps:$4 sm:$0xff]  }
  0x58   :  { %1510 = vmatpush1.bf16.msra.mxu0 %v2543_v15  ;;  %v2632_v15 = vld [vmem:[%s3522_s0 + $0x1c0] ss:$24 sps:$4 sm:$0xff]  }
  0x59   :  { %2263 = vmatpush1.bf16.msra.mxu1 %v2788_v23  ;;  %1511 = vmatprep.subr.bf16.mxu0 %v2554_v17  ;;  %v2561_v23 = vld [vmem:[%s3521_s1 + $0x270] ss:$8 sps:$4 sm:$0xff]   ;;  %v2635_v17 = vld [vmem:[%s3522_s0 + $0x1f4] ss:$24 sps:$4 sm:$0xff]  }
  0x5a   :  { %2248 = vmatprep.subr.bf16.mxu1 %v2797_v25  ;;  %1176 = vmatmul.mubr.bf16.gmra.mrb[12].mxu1 %v2532_v36  ;;  %v2572_v25 = vld [vmem:[%s3521_s1 + $0x284] ss:$8 sps:$4 sm:$0xff]  }
  0x5b   :  { %1369 = vmatmul.mubr.bf16.gmra.mrb[12].mxu0 %v2533_v38  ;;  %1185 = vmatprep.mubr.bf16.mxu1 %v2537_v19  ;;  %v2633_v36 = vld [vmem:[%s3522_s0 + $0x1ec] ss:$24 sps:$4 sm:$0xff]   ;;  %v2637_v38 = vld [vmem:[%s3522_s0 + $0x1e8] ss:$24 sps:$4 sm:$0xff]  }
  0x5c   :  { %1378 = vmatprep.mubr.bf16.mxu0 %v2539_v40  ;;  %1512 = vmatpush1.bf16.msra.mxu0 %v2552_v21  ;;  %v2638_v19 = vld [vmem:[%s3522_s0 + $0x1f0] ss:$24 sps:$4 sm:$0xff]   ;;  %v2639_v40 = vld [vmem:[%s3522_s0 + $0x21c] ss:$24 sps:$4 sm:$0xff]  }
  0x5d   :  { %2264 = vmatpush1.bf16.msra.mxu1 %v2805_v27  ;;  %1513 = vmatprep.subr.bf16.mxu0 %v2563_v42  ;;  %v2546_v27 = vld [vmem:[%s3522_s0 + $0xf4] ss:$24 sps:$4 sm:$0xff]   ;;  %v2641_v21 = vld [vmem:[%s3522_s0 + $0x224] ss:$24 sps:$4 sm:$0xff]   ;;  %v2643_v42 = vld [vmem:[%s3522_s0 + $0x218] ss:$24 sps:$4 sm:$0xff]  }
  0x5e   :  { %2249 = vmatprep.subr.bf16.mxu1 %v2815_v29  ;;  %v2570_v29 = vld [vmem:[%s3521_s1 + $0x280] ss:$8 sps:$4 sm:$0xff]  }
  0x60   :  { %1514 = vmatpush1.bf16.msra.mxu0 %v2561_v23  ;;  %v2644_v23 = vld [vmem:[%s3522_s0 + $0x220] ss:$24 sps:$4 sm:$0xff]  }
  0x61   :  { %2265 = vmatpush1.bf16.msra.mxu1 %v2824_v31  ;;  %1515 = vmatprep.subr.bf16.mxu0 %v2572_v25  ;;  %v2551_v31 = vld [vmem:[%s3522_s0 + $0xf8] ss:$24 sps:$4 sm:$0xff]   ;;  %v2647_v25 = vld [vmem:[%s3522_s0 + $0x254] ss:$24 sps:$4 sm:$0xff]  }
  0x62   :  { %2250 = vmatprep.subr.bf16.mxu1 %v2833_v33  ;;  %1186 = vmatmul.mubr.bf16.gmra.mrb[16].mxu1 %v2541_v44  ;;  %v2555_v33 = vld [vmem:[%s3522_s0 + $0x124] ss:$24 sps:$4 sm:$0xff]  }
  0x63   :  { %1379 = vmatmul.mubr.bf16.gmra.mrb[16].mxu0 %v2542_v46  ;;  %1195 = vmatprep.mubr.bf16.mxu1 %v2546_v27  ;;  %v2645_v44 = vld [vmem:[%s3522_s0 + $0x24c] ss:$24 sps:$4 sm:$0xff]   ;;  %v2649_v46 = vld [vmem:[%s3522_s0 + $0x248] ss:$24 sps:$4 sm:$0xff]  }
  0x64   :  { %1388 = vmatprep.mubr.bf16.mxu0 %v2548_v48  ;;  %1516 = vmatpush1.bf16.msra.mxu0 %v2570_v29  ;;  %v2650_v27 = vld [vmem:[%s3522_s0 + $0x250] ss:$24 sps:$4 sm:$0xff]   ;;  %v2651_v48 = vld [vmem:[%s3522_s0 + $0x27c] ss:$24 sps:$4 sm:$0xff]  }
  0x65   :  { %2266 = vmatpush1.bf16.msra.mxu1 %v2841_v35  ;;  %v2559_v35 = vld [vmem:[%s3522_s0 + $0x120] ss:$24 sps:$4 sm:$0xff]   ;;  %v2653_v29 = vld [vmem:[%s3522_s0 + $0x284] ss:$24 sps:$4 sm:$0xff]  }
  0x66   :  { %2251 = vmatprep.subr.bf16.mxu1 %v2851_v37  ;;  %v2560_v37 = vld [vmem:[%s3522_s0 + $0x128] ss:$24 sps:$4 sm:$0xff]  }
  0x69   :  { %2267 = vmatpush1.bf16.msra.mxu1 %v2860_v39  ;;  %v2564_v39 = vld [vmem:[%s3522_s0 + $0x154] ss:$24 sps:$4 sm:$0xff]  }
  0x6a   :  { %2252 = vmatprep.subr.bf16.mxu1 %v2869_v41  ;;  %1196 = vmatmul.mubr.bf16.gmra.mrb[20].mxu1 %v2550_v49  ;;  %v2566_v41 = vld [vmem:[%s3522_s0 + $0x15c] ss:$24 sps:$4 sm:$0xff]   ;;  %v2655_v49 = vld [vmem:[%s3522_s0 + $0x278] ss:$24 sps:$4 sm:$0xff]  }
  0x6b   :  { %1389 = vmatmul.mubr.bf16.gmra.mrb[20].mxu0 %v2551_v31  ;;  %1205 = vmatprep.mubr.bf16.mxu1 %v2555_v33  ;;  %v2656_v31 = vld [vmem:[%s3522_s0 + $0x280] ss:$24 sps:$4 sm:$0xff]   ;;  %v2657_v33 = vld [vmem:[%s3522_s0 + $0x2ac] ss:$24 sps:$4 sm:$0xff]  }
  0x6c   :  { %1398 = vmatprep.mubr.bf16.mxu0 %v2557_v51  ;;  %v2659_v51 = vld [vmem:[%s3522_s0 + $0x2b4] ss:$24 sps:$4 sm:$0xff]  }
  0x6d   :  { %2268 = vmatpush1.bf16.msra.mxu1 %v2877_v43  ;;  %v2568_v43 = vld [vmem:[%s3522_s0 + $0x150] ss:$24 sps:$4 sm:$0xff]  }
  0x6e   :  { %2253 = vmatprep.subr.bf16.mxu1 %v2887_v45  ;;  %v2569_v45 = vld [vmem:[%s3522_s0 + $0x158] ss:$24 sps:$4 sm:$0xff]  }
  0x71   :  { %2269 = vmatpush1.bf16.msra.mxu1 %v2895_v47  ;;  %v2573_v47 = vld [vmem:[%s3522_s0 + $0x184] ss:$24 sps:$4 sm:$0xff]  }
  0x72   :  { %2254 = vmatprep.subr.bf16.mxu1 %v2907_v50  ;;  %1206 = vmatmul.mubr.bf16.gmra.mrb[24].mxu1 %v2559_v35  ;;  %v2577_v50 = vld [vmem:[%s3522_s0 + $0x14] ss:$24 sps:$4 sm:$0xff]   ;;  %v2661_v35 = vld [vmem:[%s3522_s0 + $0x2a8] ss:$24 sps:$4 sm:$0xff]  }
  0x73   :  { %1399 = vmatmul.mubr.bf16.gmra.mrb[24].mxu0 %v2560_v37  ;;  %1215 = vmatprep.mubr.bf16.mxu1 %v2564_v39  ;;  %v2662_v37 = vld [vmem:[%s3522_s0 + $0x2b0] ss:$24 sps:$4 sm:$0xff]   ;;  %v2663_v39 = vld [vmem:[%s3522_s0 + $0x2dc] ss:$24 sps:$4 sm:$0xff]  }
  0x74   :  { %1408 = vmatprep.mubr.bf16.mxu0 %v2566_v41  ;;  %v2665_v41 = vld [vmem:[%s3522_s0 + $0x2e4] ss:$24 sps:$4 sm:$0xff]  }
  0x75   :  { %2270 = vmatpush1.bf16.msra.mxu1 %v2920_v53  ;;  %v2578_v53 = vld [vmem:[%s3522_s0 + $0x180] ss:$24 sps:$4 sm:$0xff]  }
  0x76   :  { %2255 = vmatprep.subr.bf16.mxu1 %v2929_v55  ;;  %v2581_v55 = vld [vmem:[%s3522_s0 + $0x44] ss:$24 sps:$4 sm:$0xff]  }
  0x79   :  { %2271 = vmatpush1.bf16.msra.mxu1 %v2938_v57  ;;  %v2584_v57 = vld [vmem:[%s3522_s0 + $0x40] ss:$24 sps:$4 sm:$0xff]  }
  0x7a   :  { %2256 = vmatprep.subr.bf16.mxu1 %v2947_v59  ;;  %1216 = vmatmul.mubr.bf16.gmra.mrb[28].mxu1 %v2568_v43  ;;  %v2587_v59 = vld [vmem:[%s3522_s0 + $0x74] ss:$24 sps:$4 sm:$0xff]   ;;  %v2667_v43 = vld [vmem:[%s3522_s0 + $0x2d8] ss:$24 sps:$4 sm:$0xff]  }
  0x7b   :  { %1409 = vmatmul.mubr.bf16.gmra.mrb[28].mxu0 %v2569_v45  ;;  %1225 = vmatprep.mubr.bf16.mxu1 %v2573_v47  ;;  %v2668_v45 = vld [vmem:[%s3522_s0 + $0x2e0] ss:$24 sps:$4 sm:$0xff]  }
  0x7c   :  { %2162 = vmatprep.mubr.msk.bf16.mxu0 %vm1064_vm0, %v2577_v50 }
  0x7d   :  { %2272 = vmatpush1.bf16.msra.mxu1 %v2955_v61  ;;  %v2590_v61 = vld [vmem:[%s3522_s0 + $0x70] ss:$24 sps:$4 sm:$0xff]  }
  0x7e   :  { %2257 = vmatprep.subr.bf16.mxu1 %v2965_v63  ;;  %v2593_v63 = vld [vmem:[%s3522_s0 + $0xa4] ss:$24 sps:$4 sm:$0xff]  }
  0x81   :  { %2273 = vmatpush1.bf16.msra.mxu1 %v2974_v2  ;;  %v2596_v2 = vld [vmem:[%s3522_s0 + $0xa0] ss:$24 sps:$4 sm:$0xff]  }
  0x82   :  { %1226 = vmatmul.mubr.bf16.gmra.mrb[32].mxu1 %v2578_v53 }
  0x83   :  { %1532 = vmatmul.mubr.bf16.vlgmr.msra.gmra.mrb[0].mxu0 %v2575_v52  ;;  %1235 = vmatprep.mubr.bf16.mxu1 %v2579_v54 }
  0x84   :  { %2163 = vmatprep.mubr.msk.bf16.mxu0 %vm1064_vm0, %v2581_v55 }
  0x8a   :  { %1236 = vmatmul.mubr.bf16.gmra.mrb[36].mxu1 %v2583_v56 }
  0x8b   :  { %1542 = vmatmul.mubr.bf16.gmra.mrb[4].mxu0 %v2584_v57  ;;  %1245 = vmatprep.mubr.bf16.mxu1 %v2585_v58 }
  0x8c   :  { %2164 = vmatprep.mubr.msk.bf16.mxu0 %vm1064_vm0, %v2587_v59 }
  0x92   :  { %1246 = vmatmul.mubr.bf16.gmra.mrb[40].mxu1 %v2589_v60 }
  0x93   :  { %1552 = vmatmul.mubr.bf16.gmra.mrb[8].mxu0 %v2590_v61  ;;  %1255 = vmatprep.mubr.bf16.mxu1 %v2591_v62 }
  0x94   :  { %2165 = vmatprep.mubr.msk.bf16.mxu0 %vm1064_vm0, %v2593_v63 }
  0x9a   :  { %1256 = vmatmul.mubr.bf16.gmra.mrb[44].mxu1 %v2595_v0 }
  0x9b   :  { %1562 = vmatmul.mubr.bf16.gmra.mrb[12].mxu0 %v2596_v2  ;;  %1265 = vmatprep.mubr.bf16.mxu1 %v2597_v4 }
  0x9c   :  { %2166 = vmatprep.mubr.msk.bf16.mxu0 %vm1064_vm0, %v2599_v6 }
  0xa2   :  { %1266 = vmatmul.mubr.bf16.gmra.mrb[48].mxu1 %v2601_v8 }
  0xa3   :  { %1572 = vmatmul.mubr.bf16.gmra.mrb[16].mxu0 %v2602_v10  ;;  %1275 = vmatprep.mubr.bf16.mxu1 %v2603_v12 }
  0xa4   :  { %2167 = vmatprep.mubr.msk.bf16.mxu0 %vm1064_vm0, %v2605_v14 }
  0xaa   :  { %1276 = vmatmul.mubr.bf16.gmra.mrb[52].mxu1 %v2607_v16 }
  0xab   :  { %1582 = vmatmul.mubr.bf16.gmra.mrb[20].mxu0 %v2608_v18  ;;  %1285 = vmatprep.mubr.bf16.mxu1 %v2609_v1 }
  0xac   :  { %2168 = vmatprep.mubr.msk.bf16.mxu0 %vm1064_vm0, %v2611_v20 }
  0xb2   :  { %1286 = vmatmul.mubr.bf16.gmra.mrb[56].mxu1 %v2613_v3 }
  0xb3   :  { %1592 = vmatmul.mubr.bf16.gmra.mrb[24].mxu0 %v2614_v22  ;;  %1295 = vmatprep.mubr.bf16.mxu1 %v2615_v24 }
  0xb4   :  { %2169 = vmatprep.mubr.msk.bf16.mxu0 %vm1064_vm0, %v2617_v5 }
  0xba   :  { %1296 = vmatmul.mubr.bf16.gmra.mrb[60].mxu1 %v2619_v26 }
  0xbb   :  { %1602 = vmatmul.mubr.bf16.gmra.mrb[28].mxu0 %v2620_v7  ;;  %1418 = vmatprep.mubr.bf16.mxu1 %v2623_v28 }
  0xbc   :  { %2170 = vmatprep.mubr.msk.bf16.mxu0 %vm1064_vm0, %v2624_v9 }
  0xc2   :  { %1419 = vmatmul.mubr.bf16.vlgmr.msra.gmra.mrb[32].mxu1 %v2621_v30 }
  0xc3   :  { %1612 = vmatmul.mubr.bf16.gmra.mrb[32].mxu0 %v2626_v11  ;;  %1428 = vmatprep.mubr.bf16.mxu1 %v2627_v32 }
  0xc4   :  { %2171 = vmatprep.mubr.msk.bf16.mxu0 %vm1064_vm0, %v2629_v13 }
  0xca   :  { %1429 = vmatmul.mubr.bf16.gmra.mrb[36].mxu1 %v2631_v34 }
  0xcb   :  { %1622 = vmatmul.mubr.bf16.gmra.mrb[36].mxu0 %v2632_v15  ;;  %1438 = vmatprep.mubr.bf16.mxu1 %v2633_v36 }
  0xcc   :  { %2172 = vmatprep.mubr.msk.bf16.mxu0 %vm1064_vm0, %v2635_v17 }
  0xd2   :  { %1439 = vmatmul.mubr.bf16.gmra.mrb[40].mxu1 %v2637_v38 }
  0xd3   :  { %1632 = vmatmul.mubr.bf16.gmra.mrb[40].mxu0 %v2638_v19  ;;  %1448 = vmatprep.mubr.bf16.mxu1 %v2639_v40 }
  0xd4   :  { %2173 = vmatprep.mubr.msk.bf16.mxu0 %vm1064_vm0, %v2641_v21 }
  0xda   :  { %1449 = vmatmul.mubr.bf16.gmra.mrb[44].mxu1 %v2643_v42 }
  0xdb   :  { %1642 = vmatmul.mubr.bf16.gmra.mrb[44].mxu0 %v2644_v23  ;;  %1458 = vmatprep.mubr.bf16.mxu1 %v2645_v44 }
  0xdc   :  { %2174 = vmatprep.mubr.msk.bf16.mxu0 %vm1064_vm0, %v2647_v25 }
  0xe2   :  { %1459 = vmatmul.mubr.bf16.gmra.mrb[48].mxu1 %v2649_v46 }
  0xe3   :  { %1652 = vmatmul.mubr.bf16.gmra.mrb[48].mxu0 %v2650_v27  ;;  %1468 = vmatprep.mubr.bf16.mxu1 %v2651_v48 }
  0xe4   :  { %2175 = vmatprep.mubr.msk.bf16.mxu0 %vm1064_vm0, %v2653_v29 }
  0xea   :  { %1469 = vmatmul.mubr.bf16.gmra.mrb[52].mxu1 %v2655_v49 }
  0xeb   :  { %1662 = vmatmul.mubr.bf16.gmra.mrb[52].mxu0 %v2656_v31  ;;  %1478 = vmatprep.mubr.bf16.mxu1 %v2657_v33 }
  0xec   :  { %2176 = vmatprep.mubr.msk.bf16.mxu0 %vm1064_vm0, %v2659_v51 }
  0xf2   :  { %1479 = vmatmul.mubr.bf16.gmra.mrb[56].mxu1 %v2661_v35 }
  0xf3   :  { %1672 = vmatmul.mubr.bf16.gmra.mrb[56].mxu0 %v2662_v37  ;;  %1488 = vmatprep.mubr.bf16.mxu1 %v2663_v39 }
  0xf4   :  { %2177 = vmatprep.mubr.msk.bf16.mxu0 %vm1064_vm0, %v2665_v41 }
  0xfa   :  { %1489 = vmatmul.mubr.bf16.gmra.mrb[60].mxu1 %v2667_v43 }
  0xfb   :  { %1682 = vmatmul.mubr.bf16.gmra.mrb[60].mxu0 %v2668_v45 }
 0x115   :  { %v1147_v47 = vpop.f32.mrb[0].mxu1 }
 0x116   :  { %v1149_v50 = vpop.f32.mrb[1].mxu1 }
 0x117   :  { %v1151_v52 = vpop.f32.mrb[2].mxu1 }
 0x118   :  { %v1153_v53 = vpop.f32.mrb[3].mxu1 }
 0x11d   :  { %v1157_v54 = vpop.f32.mrb[4].mxu1 }
 0x11e   :  { %v1159_v55 = vpop.f32.mrb[5].mxu1 }
 0x11f   :  { %v1161_v56 = vpop.f32.mrb[6].mxu1 }
 0x120   :  { %v1163_v57 = vpop.f32.mrb[7].mxu1 }
 0x125   :  { %v1167_v58 = vpop.f32.mrb[8].mxu1 }
 0x126   :  { %v1169_v59 = vpop.f32.mrb[9].mxu1 }
 0x127   :  { %v1171_v60 = vpop.f32.mrb[10].mxu1 }
 0x128   :  { %v3362_v61 = vpop.f32.mrb[11].mxu1 }
 0x12d   :  { %v3364_v62 = vpop.f32.mrb[12].mxu1 }
 0x12e   :  { %v3366_v63 = vpop.f32.mrb[13].mxu1 }
 0x12f   :  { %v3368_v0 = vpop.f32.mrb[14].mxu1 }
 0x130   :  { %v3370_v2 = vpop.f32.mrb[15].mxu1 }
 0x135   :  { %v3372_v4 = vpop.f32.mrb[16].mxu1 }
 0x136   :  { %v3374_v6 = vpop.f32.mrb[17].mxu1 }
 0x137   :  { %v3376_v8 = vpop.f32.mrb[18].mxu1 }
 0x138   :  { %v3378_v10 = vpop.f32.mrb[19].mxu1 }
 0x13d   :  { %v3380_v12 = vpop.f32.mrb[20].mxu1 }
 0x13e   :  { %v3382_v14 = vpop.f32.mrb[21].mxu1 }
 0x13f   :  { %v3384_v16 = vpop.f32.mrb[22].mxu1 }
 0x140   :  { %v3386_v18 = vpop.f32.mrb[23].mxu1 }
 0x145   :  { %v3388_v1 = vpop.f32.mrb[24].mxu1 }
 0x146   :  { %v3390_v20 = vpop.f32.mrb[25].mxu1 }
 0x147   :  { %v3392_v3 = vpop.f32.mrb[26].mxu1 }
 0x148   :  { %v3394_v22 = vpop.f32.mrb[27].mxu1 }
 0x14d   :  { %v3396_v24 = vpop.f32.mrb[28].mxu1 }
 0x14e   :  { %v3398_v5 = vpop.f32.mrb[29].mxu1 }
 0x14f   :  { %v3400_v26 = vpop.f32.mrb[30].mxu1 }
 0x150   :  { %v3402_v7 = vpop.f32.mrb[31].mxu1 }
 0x156   :  { %v1533_v28 = vpop.f32.mrb[0].mxu0 }
 0x157   :  { %v2274_v9 = vadd.f32 %v1533_v28, %v1147_v47  ;;  %v1535_v30 = vpop.f32.mrb[1].mxu0 }
 0x158   :  { %v2275_v11 = vadd.f32 %v1535_v30, %v1149_v50  ;;  %v1537_v32 = vpop.f32.mrb[2].mxu0 }
 0x159   :  { %v1692_v13 = vmax.f32 %v2274_v9, 0.0  ;;  %v2276_v34 = vadd.f32 %v1537_v32, %v1151_v52  ;;  %v1539_v15 = vpop.f32.mrb[3].mxu0 }
 0x15a   :  { %v1693_v36 = vmax.f32 %v2275_v11, 0.0  ;;  %v2277_v17 = vadd.f32 %v1539_v15, %v1153_v53 }
 0x15b   :  { %v1694_v38 = vmax.f32 %v2276_v34, 0.0 }
 0x15c   :  { %v2210_v19 = vpack.c.bf16 %v1693_v36, %v1692_v13  ;;  %v1695_v40 = vmax.f32 %v2277_v17, 0.0 }
 0x15e   :  { %1948 = vst [vmem:[%s3523_s2] sm:$0xff] %v2210_v19  ;;  %v2211_v21 = vpack.c.bf16 %v1695_v40, %v1694_v38  ;;  %v1543_v42 = vpop.f32.mrb[4].mxu0 }
 0x15f   :  { %v2278_v23 = vadd.f32 %v1543_v42, %v1157_v54  ;;  %v1545_v44 = vpop.f32.mrb[5].mxu0 }
 0x160   :  { %1949 = vst [vmem:[%s3523_s2 + $0x8] sm:$0xff] %v2211_v21  ;;  %v2279_v25 = vadd.f32 %v1545_v44, %v1159_v55  ;;  %v1547_v46 = vpop.f32.mrb[6].mxu0 }
 0x161   :  { %v1696_v27 = vmax.f32 %v2278_v23, 0.0  ;;  %v2280_v48 = vadd.f32 %v1547_v46, %v1161_v56  ;;  %v1549_v29 = vpop.f32.mrb[7].mxu0 }
 0x162   :  { %v1697_v49 = vmax.f32 %v2279_v25, 0.0  ;;  %v2281_v31 = vadd.f32 %v1549_v29, %v1163_v57 }
 0x163   :  { %v1698_v33 = vmax.f32 %v2280_v48, 0.0 }
 0x164   :  { %v2212_v51 = vpack.c.bf16 %v1697_v49, %v1696_v27  ;;  %v1699_v35 = vmax.f32 %v2281_v31, 0.0 }
 0x166   :  { %1950 = vst [vmem:[%s3523_s2 + $0x10] sm:$0xff] %v2212_v51  ;;  %v2213_v37 = vpack.c.bf16 %v1699_v35, %v1698_v33  ;;  %v1553_v39 = vpop.f32.mrb[8].mxu0 }
 0x167   :  { %v2282_v41 = vadd.f32 %v1553_v39, %v1167_v58  ;;  %v1555_v43 = vpop.f32.mrb[9].mxu0 }
 0x168   :  { %1951 = vst [vmem:[%s3523_s2 + $0x18] sm:$0xff] %v2213_v37  ;;  %v2283_v45 = vadd.f32 %v1555_v43, %v1169_v59  ;;  %v1557_v47 = vpop.f32.mrb[10].mxu0 }
 0x169   :  { %v1700_v50 = vmax.f32 %v2282_v41, 0.0  ;;  %v2284_v52 = vadd.f32 %v1557_v47, %v1171_v60  ;;  %v1559_v53 = vpop.f32.mrb[11].mxu0 }
 0x16a   :  { %v1701_v54 = vmax.f32 %v2283_v45, 0.0  ;;  %v2285_v55 = vadd.f32 %v1559_v53, %v3362_v61 }
 0x16b   :  { %v1702_v56 = vmax.f32 %v2284_v52, 0.0 }
 0x16c   :  { %v2214_v57 = vpack.c.bf16 %v1701_v54, %v1700_v50  ;;  %v1703_v28 = vmax.f32 %v2285_v55, 0.0 }
 0x16e   :  { %1952 = vst [vmem:[%s3523_s2 + $0x20] sm:$0xff] %v2214_v57  ;;  %v2215_v58 = vpack.c.bf16 %v1703_v28, %v1702_v56  ;;  %v1563_v9 = vpop.f32.mrb[12].mxu0 }
 0x16f   :  { %v2286_v30 = vadd.f32 %v1563_v9, %v3364_v62  ;;  %v1565_v11 = vpop.f32.mrb[13].mxu0 }
 0x170   :  { %1953 = vst [vmem:[%s3523_s2 + $0x28] sm:$0xff] %v2215_v58  ;;  %v2287_v59 = vadd.f32 %v1565_v11, %v3366_v63  ;;  %v1567_v60 = vpop.f32.mrb[14].mxu0 }
 0x171   :  { %v1704_v61 = vmax.f32 %v2286_v30, 0.0  ;;  %v2288_v32 = vadd.f32 %v1567_v60, %v3368_v0  ;;  %v1569_v13 = vpop.f32.mrb[15].mxu0 }
 0x172   :  { %v1705_v34 = vmax.f32 %v2287_v59, 0.0  ;;  %v2289_v15 = vadd.f32 %v1569_v13, %v3370_v2 }
 0x173   :  { %v1706_v36 = vmax.f32 %v2288_v32, 0.0 }
 0x174   :  { %v2216_v17 = vpack.c.bf16 %v1705_v34, %v1704_v61  ;;  %v1707_v38 = vmax.f32 %v2289_v15, 0.0 }
 0x176   :  { %1954 = vst [vmem:[%s3523_s2 + $0x30] sm:$0xff] %v2216_v17  ;;  %v2217_v62 = vpack.c.bf16 %v1707_v38, %v1706_v36  ;;  %v1573_v19 = vpop.f32.mrb[16].mxu0 }
 0x177   :  { %v2290_v40 = vadd.f32 %v1573_v19, %v3372_v4  ;;  %v1575_v63 = vpop.f32.mrb[17].mxu0 }
 0x178   :  { %1955 = vst [vmem:[%s3523_s2 + $0x38] sm:$0xff] %v2217_v62  ;;  %v2291_v0 = vadd.f32 %v1575_v63, %v3374_v6  ;;  %v1577_v21 = vpop.f32.mrb[18].mxu0 }
 0x179   :  { %v1708_v2 = vmax.f32 %v2290_v40, 0.0  ;;  %v2292_v42 = vadd.f32 %v1577_v21, %v3376_v8  ;;  %v1579_v23 = vpop.f32.mrb[19].mxu0 }
 0x17a   :  { %v1709_v44 = vmax.f32 %v2291_v0, 0.0  ;;  %v2293_v25 = vadd.f32 %v1579_v23, %v3378_v10 }
 0x17b   :  { %v1710_v46 = vmax.f32 %v2292_v42, 0.0 }
 0x17c   :  { %v2218_v27 = vpack.c.bf16 %v1709_v44, %v1708_v2  ;;  %v1711_v48 = vmax.f32 %v2293_v25, 0.0 }
 0x17e   :  { %1956 = vst [vmem:[%s3523_s2 + $0x40] sm:$0xff] %v2218_v27  ;;  %v2219_v4 = vpack.c.bf16 %v1711_v48, %v1710_v46  ;;  %v1583_v29 = vpop.f32.mrb[20].mxu0 }
 0x17f   :  { %v2294_v49 = vadd.f32 %v1583_v29, %v3380_v12  ;;  %v1585_v6 = vpop.f32.mrb[21].mxu0 }
 0x180   :  { %1957 = vst [vmem:[%s3523_s2 + $0x48] sm:$0xff] %v2219_v4  ;;  %v2295_v8 = vadd.f32 %v1585_v6, %v3382_v14  ;;  %v1587_v31 = vpop.f32.mrb[22].mxu0 }
 0x181   :  { %v1712_v10 = vmax.f32 %v2294_v49, 0.0  ;;  %v2296_v33 = vadd.f32 %v1587_v31, %v3384_v16  ;;  %v1589_v51 = vpop.f32.mrb[23].mxu0 }
 0x182   :  { %v1713_v35 = vmax.f32 %v2295_v8, 0.0  ;;  %v2297_v37 = vadd.f32 %v1589_v51, %v3386_v18 }
 0x183   :  { %v1714_v39 = vmax.f32 %v2296_v33, 0.0 }
 0x184   :  { %v2220_v41 = vpack.c.bf16 %v1713_v35, %v1712_v10  ;;  %v1715_v43 = vmax.f32 %v2297_v37, 0.0 }
 0x186   :  { %1958 = vst [vmem:[%s3523_s2 + $0x50] sm:$0xff] %v2220_v41  ;;  %v2221_v12 = vpack.c.bf16 %v1715_v43, %v1714_v39  ;;  %v1593_v45 = vpop.f32.mrb[24].mxu0 }
 0x187   :  { %v2298_v47 = vadd.f32 %v1593_v45, %v3388_v1  ;;  %v1595_v14 = vpop.f32.mrb[25].mxu0 }
 0x188   :  { %1959 = vst [vmem:[%s3523_s2 + $0x58] sm:$0xff] %v2221_v12  ;;  %v2299_v16 = vadd.f32 %v1595_v14, %v3390_v20  ;;  %v1597_v50 = vpop.f32.mrb[26].mxu0 }
 0x189   :  { %v1716_v18 = vmax.f32 %v2298_v47, 0.0  ;;  %v2300_v52 = vadd.f32 %v1597_v50, %v3392_v3  ;;  %v1599_v53 = vpop.f32.mrb[27].mxu0 }
 0x18a   :  { %v1717_v54 = vmax.f32 %v2299_v16, 0.0  ;;  %v2301_v55 = vadd.f32 %v1599_v53, %v3394_v22 }
 0x18b   :  { %v1718_v56 = vmax.f32 %v2300_v52, 0.0 }
 0x18c   :  { %v2222_v57 = vpack.c.bf16 %v1717_v54, %v1716_v18  ;;  %v1719_v28 = vmax.f32 %v2301_v55, 0.0 }
 0x18e   :  { %1960 = vst [vmem:[%s3523_s2 + $0x60] sm:$0xff] %v2222_v57  ;;  %v2223_v1 = vpack.c.bf16 %v1719_v28, %v1718_v56  ;;  %v1603_v58 = vpop.f32.mrb[28].mxu0 }
 0x18f   :  { %v2302_v9 = vadd.f32 %v1603_v58, %v3396_v24  ;;  %v1605_v20 = vpop.f32.mrb[29].mxu0 }
 0x190   :  { %1961 = vst [vmem:[%s3523_s2 + $0x68] sm:$0xff] %v2223_v1  ;;  %v2303_v3 = vadd.f32 %v1605_v20, %v3398_v5  ;;  %v1607_v30 = vpop.f32.mrb[30].mxu0 }
 0x191   :  { %v1720_v22 = vmax.f32 %v2302_v9, 0.0  ;;  %v2304_v11 = vadd.f32 %v1607_v30, %v3400_v26  ;;  %v1609_v59 = vpop.f32.mrb[31].mxu0 }
 0x192   :  { %v1721_v60 = vmax.f32 %v2303_v3, 0.0  ;;  %v2305_v61 = vadd.f32 %v1609_v59, %v3402_v7 }
 0x193   :  { %v1722_v32 = vmax.f32 %v2304_v11, 0.0 }
 0x194   :  { %v2224_v13 = vpack.c.bf16 %v1721_v60, %v1720_v22  ;;  %v1723_v34 = vmax.f32 %v2305_v61, 0.0 }
 0x195   :  { %v1420_v15 = vpop.f32.mrb[32].mxu1 }
 0x196   :  { %1962 = vst [vmem:[%s3523_s2 + $0x70] sm:$0xff] %v2224_v13  ;;  %v2225_v24 = vpack.c.bf16 %v1723_v34, %v1722_v32  ;;  %v1613_v36 = vpop.f32.mrb[32].mxu0  ;;  %v1422_v5 = vpop.f32.mrb[33].mxu1 }
 0x197   :  { %v2306_v17 = vadd.f32 %v1613_v36, %v1420_v15  ;;  %v1615_v38 = vpop.f32.mrb[33].mxu0  ;;  %v1424_v62 = vpop.f32.mrb[34].mxu1 }
 0x198   :  { %1963 = vst [vmem:[%s3523_s2 + $0x78] sm:$0xff] %v2225_v24  ;;  %v2307_v26 = vadd.f32 %v1615_v38, %v1422_v5  ;;  %v1617_v7 = vpop.f32.mrb[34].mxu0  ;;  %v1426_v63 = vpop.f32.mrb[35].mxu1 }
 0x199   :  { %v1724_v19 = vmax.f32 %v2306_v17, 0.0  ;;  %v2308_v40 = vadd.f32 %v1617_v7, %v1424_v62  ;;  %v1619_v0 = vpop.f32.mrb[35].mxu0 }
 0x19a   :  { %v1725_v21 = vmax.f32 %v2307_v26, 0.0  ;;  %v2309_v2 = vadd.f32 %v1619_v0, %v1426_v63 }
 0x19b   :  { %v1726_v42 = vmax.f32 %v2308_v40, 0.0 }
 0x19c   :  { %v2226_v23 = vpack.c.bf16 %v1725_v21, %v1724_v19  ;;  %v1727_v44 = vmax.f32 %v2309_v2, 0.0 }
 0x19d   :  { %v1430_v46 = vpop.f32.mrb[36].mxu1 }
 0x19e   :  { %1964 = vst [vmem:[%s3523_s2 + $0x80] sm:$0xff] %v2226_v23  ;;  %v2227_v25 = vpack.c.bf16 %v1727_v44, %v1726_v42  ;;  %v1623_v27 = vpop.f32.mrb[36].mxu0  ;;  %v1432_v4 = vpop.f32.mrb[37].mxu1 }
 0x19f   :  { %v2310_v48 = vadd.f32 %v1623_v27, %v1430_v46  ;;  %v1625_v29 = vpop.f32.mrb[37].mxu0  ;;  %v1434_v6 = vpop.f32.mrb[38].mxu1 }
 0x1a0   :  { %1965 = vst [vmem:[%s3523_s2 + $0x88] sm:$0xff] %v2227_v25  ;;  %v2311_v49 = vadd.f32 %v1625_v29, %v1432_v4  ;;  %v1627_v8 = vpop.f32.mrb[38].mxu0  ;;  %v1436_v33 = vpop.f32.mrb[39].mxu1 }
 0x1a1   :  { %v1728_v31 = vmax.f32 %v2310_v48, 0.0  ;;  %v2312_v10 = vadd.f32 %v1627_v8, %v1434_v6  ;;  %v1629_v51 = vpop.f32.mrb[39].mxu0 }
 0x1a2   :  { %v1729_v35 = vmax.f32 %v2311_v49, 0.0  ;;  %v2313_v37 = vadd.f32 %v1629_v51, %v1436_v33 }
 0x1a3   :  { %v1730_v39 = vmax.f32 %v2312_v10, 0.0 }
 0x1a4   :  { %v2228_v41 = vpack.c.bf16 %v1729_v35, %v1728_v31  ;;  %v1731_v43 = vmax.f32 %v2313_v37, 0.0 }
 0x1a5   :  { %v1440_v45 = vpop.f32.mrb[40].mxu1 }
 0x1a6   :  { %1966 = vst [vmem:[%s3523_s2 + $0x90] sm:$0xff] %v2228_v41  ;;  %v2229_v12 = vpack.c.bf16 %v1731_v43, %v1730_v39  ;;  %v1633_v47 = vpop.f32.mrb[40].mxu0  ;;  %v1442_v16 = vpop.f32.mrb[41].mxu1 }
 0x1a7   :  { %v2314_v14 = vadd.f32 %v1633_v47, %v1440_v45  ;;  %v1635_v50 = vpop.f32.mrb[41].mxu0  ;;  %v1444_v52 = vpop.f32.mrb[42].mxu1 }
 0x1a8   :  { %1967 = vst [vmem:[%s3523_s2 + $0x98] sm:$0xff] %v2229_v12  ;;  %v2315_v18 = vadd.f32 %v1635_v50, %v1442_v16  ;;  %v1637_v53 = vpop.f32.mrb[42].mxu0  ;;  %v1446_v56 = vpop.f32.mrb[43].mxu1 }
 0x1a9   :  { %v1732_v54 = vmax.f32 %v2314_v14, 0.0  ;;  %v2316_v55 = vadd.f32 %v1637_v53, %v1444_v52  ;;  %v1639_v57 = vpop.f32.mrb[43].mxu0 }
 0x1aa   :  { %v1733_v28 = vmax.f32 %v2315_v18, 0.0  ;;  %v2317_v1 = vadd.f32 %v1639_v57, %v1446_v56 }
 0x1ab   :  { %v1734_v58 = vmax.f32 %v2316_v55, 0.0 }
 0x1ac   :  { %v2230_v9 = vpack.c.bf16 %v1733_v28, %v1732_v54  ;;  %v1735_v20 = vmax.f32 %v2317_v1, 0.0 }
 0x1ad   :  { %v1450_v30 = vpop.f32.mrb[44].mxu1 }
 0x1ae   :  { %1968 = vst [vmem:[%s3523_s2 + $0xa0] sm:$0xff] %v2230_v9  ;;  %v2231_v3 = vpack.c.bf16 %v1735_v20, %v1734_v58  ;;  %v1643_v22 = vpop.f32.mrb[44].mxu0  ;;  %v1452_v59 = vpop.f32.mrb[45].mxu1 }
 0x1af   :  { %v2318_v11 = vadd.f32 %v1643_v22, %v1450_v30  ;;  %v1645_v60 = vpop.f32.mrb[45].mxu0  ;;  %v1454_v32 = vpop.f32.mrb[46].mxu1 }
 0x1b0   :  { %1969 = vst [vmem:[%s3523_s2 + $0xa8] sm:$0xff] %v2231_v3  ;;  %v2319_v61 = vadd.f32 %v1645_v60, %v1452_v59  ;;  %v1647_v13 = vpop.f32.mrb[46].mxu0  ;;  %v1456_v15 = vpop.f32.mrb[47].mxu1 }
 0x1b1   :  { %v1736_v34 = vmax.f32 %v2318_v11, 0.0  ;;  %v2320_v24 = vadd.f32 %v1647_v13, %v1454_v32  ;;  %v1649_v36 = vpop.f32.mrb[47].mxu0 }
 0x1b2   :  { %v1737_v17 = vmax.f32 %v2319_v61, 0.0  ;;  %v2321_v5 = vadd.f32 %v1649_v36, %v1456_v15 }
 0x1b3   :  { %v1738_v38 = vmax.f32 %v2320_v24, 0.0 }
 0x1b4   :  { %v2232_v26 = vpack.c.bf16 %v1737_v17, %v1736_v34  ;;  %v1739_v62 = vmax.f32 %v2321_v5, 0.0 }
 0x1b5   :  { %v1460_v19 = vpop.f32.mrb[48].mxu1 }
 0x1b6   :  { %1970 = vst [vmem:[%s3523_s2 + $0xb0] sm:$0xff] %v2232_v26  ;;  %v2233_v7 = vpack.c.bf16 %v1739_v62, %v1738_v38  ;;  %v1653_v40 = vpop.f32.mrb[48].mxu0  ;;  %v1462_v0 = vpop.f32.mrb[49].mxu1 }
 0x1b7   :  { %v2322_v63 = vadd.f32 %v1653_v40, %v1460_v19  ;;  %v1655_v21 = vpop.f32.mrb[49].mxu0  ;;  %v1464_v42 = vpop.f32.mrb[50].mxu1 }
 0x1b8   :  { %1971 = vst [vmem:[%s3523_s2 + $0xb8] sm:$0xff] %v2233_v7  ;;  %v2323_v2 = vadd.f32 %v1655_v21, %v1462_v0  ;;  %v1657_v23 = vpop.f32.mrb[50].mxu0  ;;  %v1466_v46 = vpop.f32.mrb[51].mxu1 }
 0x1b9   :  { %v1740_v44 = vmax.f32 %v2322_v63, 0.0  ;;  %v2324_v25 = vadd.f32 %v1657_v23, %v1464_v42  ;;  %v1659_v27 = vpop.f32.mrb[51].mxu0 }
 0x1ba   :  { %v1741_v48 = vmax.f32 %v2323_v2, 0.0  ;;  %v2325_v4 = vadd.f32 %v1659_v27, %v1466_v46 }
 0x1bb   :  { %v1742_v29 = vmax.f32 %v2324_v25, 0.0 }
 0x1bc   :  { %v2234_v49 = vpack.c.bf16 %v1741_v48, %v1740_v44  ;;  %v1743_v6 = vmax.f32 %v2325_v4, 0.0 }
 0x1bd   :  { %v1470_v31 = vpop.f32.mrb[52].mxu1 }
 0x1be   :  { %1972 = vst [vmem:[%s3523_s2 + $0xc0] sm:$0xff] %v2234_v49  ;;  %v2235_v8 = vpack.c.bf16 %v1743_v6, %v1742_v29  ;;  %v1663_v10 = vpop.f32.mrb[52].mxu0  ;;  %v1472_v51 = vpop.f32.mrb[53].mxu1 }
 0x1bf   :  { %v2326_v33 = vadd.f32 %v1663_v10, %v1470_v31  ;;  %v1665_v35 = vpop.f32.mrb[53].mxu0  ;;  %v1474_v39 = vpop.f32.mrb[54].mxu1 }
 0x1c0   :  { %1973 = vst [vmem:[%s3523_s2 + $0xc8] sm:$0xff] %v2235_v8  ;;  %v2327_v37 = vadd.f32 %v1665_v35, %v1472_v51  ;;  %v1667_v41 = vpop.f32.mrb[54].mxu0  ;;  %v1476_v45 = vpop.f32.mrb[55].mxu1 }
 0x1c1   :  { %v1744_v43 = vmax.f32 %v2326_v33, 0.0  ;;  %v2328_v12 = vadd.f32 %v1667_v41, %v1474_v39  ;;  %v1669_v47 = vpop.f32.mrb[55].mxu0 }
 0x1c2   :  { %v1745_v14 = vmax.f32 %v2327_v37, 0.0  ;;  %v2329_v16 = vadd.f32 %v1669_v47, %v1476_v45 }
 0x1c3   :  { %v1746_v50 = vmax.f32 %v2328_v12, 0.0 }
 0x1c4   :  { %v2236_v18 = vpack.c.bf16 %v1745_v14, %v1744_v43  ;;  %v1747_v52 = vmax.f32 %v2329_v16, 0.0 }
 0x1c5   :  { %v1480_v54 = vpop.f32.mrb[56].mxu1 }
 0x1c6   :  { %1974 = vst [vmem:[%s3523_s2 + $0xd0] sm:$0xff] %v2236_v18  ;;  %v2237_v53 = vpack.c.bf16 %v1747_v52, %v1746_v50  ;;  %v1673_v55 = vpop.f32.mrb[56].mxu0  ;;  %v1482_v57 = vpop.f32.mrb[57].mxu1 }
 0x1c7   :  { %v2330_v56 = vadd.f32 %v1673_v55, %v1480_v54  ;;  %v1675_v28 = vpop.f32.mrb[57].mxu0  ;;  %v1484_v58 = vpop.f32.mrb[58].mxu1 }
 0x1c8   :  { %1975 = vst [vmem:[%s3523_s2 + $0xd8] sm:$0xff] %v2237_v53  ;;  %v2331_v1 = vadd.f32 %v1675_v28, %v1482_v57  ;;  %v1677_v9 = vpop.f32.mrb[58].mxu0  ;;  %v1486_v30 = vpop.f32.mrb[59].mxu1 }
 0x1c9   :  { %v1748_v20 = vmax.f32 %v2330_v56, 0.0  ;;  %v2332_v3 = vadd.f32 %v1677_v9, %v1484_v58  ;;  %v1679_v22 = vpop.f32.mrb[59].mxu0 }
 0x1ca   :  { %v1749_v11 = vmax.f32 %v2331_v1, 0.0  ;;  %v2333_v59 = vadd.f32 %v1679_v22, %v1486_v30 }
 0x1cb   :  { %v1750_v60 = vmax.f32 %v2332_v3, 0.0 }
 0x1cc   :  { %v2238_v61 = vpack.c.bf16 %v1749_v11, %v1748_v20  ;;  %v1751_v32 = vmax.f32 %v2333_v59, 0.0 }
 0x1cd   :  { %v1490_v34 = vpop.f32.mrb[60].mxu1 }
 0x1ce   :  { %1976 = vst [vmem:[%s3523_s2 + $0xe0] sm:$0xff] %v2238_v61  ;;  %v2239_v13 = vpack.c.bf16 %v1751_v32, %v1750_v60  ;;  %v1683_v24 = vpop.f32.mrb[60].mxu0  ;;  %v1492_v36 = vpop.f32.mrb[61].mxu1 }
 0x1cf   :  { %v2334_v15 = vadd.f32 %v1683_v24, %v1490_v34  ;;  %v1685_v17 = vpop.f32.mrb[61].mxu0  ;;  %v1494_v38 = vpop.f32.mrb[62].mxu1 }
 0x1d0   :  { %1977 = vst [vmem:[%s3523_s2 + $0xe8] sm:$0xff] %v2239_v13  ;;  %v2335_v5 = vadd.f32 %v1685_v17, %v1492_v36  ;;  %v1687_v26 = vpop.f32.mrb[62].mxu0  ;;  %v1496_v19 = vpop.f32.mrb[63].mxu1 }
 0x1d1   :  { %v1752_v62 = vmax.f32 %v2334_v15, 0.0  ;;  %v2336_v7 = vadd.f32 %v1687_v26, %v1494_v38  ;;  %v1689_v40 = vpop.f32.mrb[63].mxu0 }
 0x1d2   :  { %v1753_v63 = vmax.f32 %v2335_v5, 0.0  ;;  %v2337_v0 = vadd.f32 %v1689_v40, %v1496_v19 }
 0x1d3   :  { %v1754_v21 = vmax.f32 %v2336_v7, 0.0 }
 0x1d4   :  { %v2240_v2 = vpack.c.bf16 %v1753_v63, %v1752_v62  ;;  %v1755_v42 = vmax.f32 %v2337_v0, 0.0 }
 0x1d6   :  { %1978 = vst [vmem:[%s3523_s2 + $0xf0] sm:$0xff] %v2240_v2  ;;  %v2241_v23 = vpack.c.bf16 %v1755_v42, %v1754_v21 }
 0x1d8   :  { %1979 = vst [vmem:[%s3523_s2 + $0xf8] sm:$0xff] %v2241_v23 }

// kernel: st_gcn_forward.14
= control target key start
LH: loop header
LB: loop body
LE: loop exit
PB: predicated region body
PF: predicated region fallthrough
CT: control target
= control target key end

     0   :  { %s5092_s21 = smov 0   ;;  %s6249_s0 = inlined_call_operand.vmem [shape: bf16[2,8,32,256], index: 0, kind: input, shape index: {}]   ;;  %s6250_s1 = inlined_call_operand.vmem [shape: bf16[9,256,256], index: 1, kind: input, shape index: {}]   ;;  %s6251_s2 = inlined_call_operand.vmem [shape: f32[1,256], index: 2, kind: input, shape index: {}]   ;;  %s6252_s3 = inlined_call_operand.vmem [shape: bf16[2,64,128], index: 3, kind: input, shape index: {}]   ;;  %s6253_s4 = inlined_call_operand.vmem [shape: bf16[128,256], index: 4, kind: input, shape index: {}]   ;;  %s6254_s5 = inlined_call_operand.vmem [shape: f32[1,256], index: 5, kind: input, shape index: {}]   ;;  %s6255_s6 = inlined_call_operand.vmem [shape: bf16[2,64,256], index: 6, kind: output, shape index: {}]  }
   0x1 LB: > { %s3626_s22 = sadd.s32 4294967295, %s5054_s21   ;;  %p3630_p0 = scmp.ge.s32.totalorder %s5054_s21, 1  ;;  %s5054_s21 = sphi %s5092_s21, %s16_s21  }
   0x2   : > { %p222_p1 = scmp.lt.s32.totalorder %s5054_s21, 3 }
   0x4   : > { %p223_p2 = pnand %p3630_p0, %p222_p1 }
   0x5   : > { %v4519_v0 = vld [vmem:[%s6250_s1 + $0x104] ss:$8 sps:$4 sm:$0xff] (!%p223_p2)   ;;  %v4523_v2 = vld [vmem:[%s6250_s1 + $0x100] ss:$8 sps:$4 sm:$0xff] (!%p223_p2)   ;;  %v4525_v4 = vld [vmem:[%s6250_s1 + $0x114] ss:$8 sps:$4 sm:$0xff] (!%p223_p2)  }
   0x6   : > { %226 = sbr.rel (%p223_p2) target bundleno = 576 (0x240), region = 44  ;;  %v4521_v1 = vld [vmem:[%s6250_s1 + $0x504] ss:$8 sps:$4 sm:$0xff] (!%p223_p2)   ;;  %554 = vmatprep.subr.bf16.mxu1 (!%p223_p2), %v4519_v0  ;;  %v4524_v3 = vld [vmem:[%s6250_s1 + $0x500] ss:$8 sps:$4 sm:$0xff] (!%p223_p2)   ;;  %p257_p3 = scmp.lt.s32.totalorder (!%p223_p2), %s3626_s22, 1 }
   0x7   : > { %2133 = vmatprep.subr.bf16.mxu0 (!%p223_p2), %v4521_v1  ;;  %555 = vmatpush1.bf16.msra.mxu1 (!%p223_p2), %v4523_v2  ;;  %v4527_v5 = vld [vmem:[%s6250_s1 + $0x514] ss:$8 sps:$4 sm:$0xff] (!%p223_p2)   ;;  %v4529_v6 = vld [vmem:[%s6250_s1 + $0x110] ss:$8 sps:$4 sm:$0xff] (!%p223_p2)   ;;  %v4531_v8 = vld [vmem:[%s6250_s1 + $0x124] ss:$8 sps:$4 sm:$0xff] (!%p223_p2)  }
   0x8   : > { %2134 = vmatpush1.bf16.msra.mxu0 (!%p223_p2), %v4524_v3  ;;  %556 = vmatprep.subr.bf16.mxu1 (!%p223_p2), %v4525_v4  ;;  %v4530_v7 = vld [vmem:[%s6250_s1 + $0x510] ss:$8 sps:$4 sm:$0xff] (!%p223_p2)   ;;  %v4533_v9 = vld [vmem:[%s6250_s1 + $0x524] ss:$8 sps:$4 sm:$0xff] (!%p223_p2)   ;;  %v4535_v10 = vld [vmem:[%s6250_s1 + $0x120] ss:$8 sps:$4 sm:$0xff] (!%p223_p2)  }
   0x9   : > { %2135 = vmatprep.subr.bf16.mxu0 (!%p223_p2), %v4527_v5  ;;  %v4536_v11 = vld [vmem:[%s6250_s1 + $0x520] ss:$8 sps:$4 sm:$0xff] (!%p223_p2)   ;;  %v4537_v12 = vld [vmem:[%s6250_s1 + $0x134] ss:$8 sps:$4 sm:$0xff] (!%p223_p2)   ;;  %v4541_v14 = vld [vmem:[%s6250_s1 + $0x130] ss:$8 sps:$4 sm:$0xff] (!%p223_p2)  }
   0xa   : > { %v4539_v13 = vld [vmem:[%s6250_s1 + $0x534] ss:$8 sps:$4 sm:$0xff] (!%p223_p2)   ;;  %v4542_v15 = vld [vmem:[%s6250_s1 + $0x530] ss:$8 sps:$4 sm:$0xff] (!%p223_p2)   ;;  %v4543_v16 = vld [vmem:[%s6250_s1 + $0x144] ss:$8 sps:$4 sm:$0xff] (!%p223_p2)  }
   0xb   : > { %557 = vmatpush1.bf16.msra.mxu1 (!%p223_p2), %v4529_v6  ;;  %v4545_v17 = vld [vmem:[%s6250_s1 + $0x544] ss:$8 sps:$4 sm:$0xff] (!%p223_p2)   ;;  %v4547_v18 = vld [vmem:[%s6250_s1 + $0x140] ss:$8 sps:$4 sm:$0xff] (!%p223_p2)   ;;  %v4549_v20 = vld [vmem:[%s6250_s1 + $0x154] ss:$8 sps:$4 sm:$0xff] (!%p223_p2)  }
   0xc   : > { %2136 = vmatpush1.bf16.msra.mxu0 (!%p223_p2), %v4530_v7  ;;  %558 = vmatprep.subr.bf16.mxu1 (!%p223_p2), %v4531_v8  ;;  %v4548_v19 = vld [vmem:[%s6250_s1 + $0x540] ss:$8 sps:$4 sm:$0xff] (!%p223_p2)   ;;  %v4551_v21 = vld [vmem:[%s6250_s1 + $0x554] ss:$8 sps:$4 sm:$0xff] (!%p223_p2)   ;;  %v4553_v22 = vld [vmem:[%s6250_s1 + $0x150] ss:$8 sps:$4 sm:$0xff] (!%p223_p2)  }
   0xd   : > { %2137 = vmatprep.subr.bf16.mxu0 %v4533_v9  ;;  %v4554_v23 = vld [vmem:[%s6250_s1 + $0x550] ss:$8 sps:$4 sm:$0xff]   ;;  %v4555_v24 = vld [vmem:[%s6250_s1 + $0x164] ss:$8 sps:$4 sm:$0xff]   ;;  %v4559_v26 = vld [vmem:[%s6250_s1 + $0x160] ss:$8 sps:$4 sm:$0xff]  }
   0xe   : > { %v4557_v25 = vld [vmem:[%s6250_s1 + $0x564] ss:$8 sps:$4 sm:$0xff]   ;;  %v4560_v27 = vld [vmem:[%s6250_s1 + $0x560] ss:$8 sps:$4 sm:$0xff]   ;;  %v4561_v28 = vld [vmem:[%s6250_s1 + $0x174] ss:$8 sps:$4 sm:$0xff]  }
   0xf   : > { %559 = vmatpush1.bf16.msra.mxu1 %v4535_v10  ;;  %v4563_v29 = vld [vmem:[%s6250_s1 + $0x574] ss:$8 sps:$4 sm:$0xff]   ;;  %v4565_v30 = vld [vmem:[%s6250_s1 + $0x170] ss:$8 sps:$4 sm:$0xff]   ;;  %v4567_v32 = vld [vmem:[%s6250_s1 + $0x184] ss:$8 sps:$4 sm:$0xff]  }
  0x10   : > { %2138 = vmatpush1.bf16.msra.mxu0 %v4536_v11  ;;  %560 = vmatprep.subr.bf16.mxu1 %v4537_v12  ;;  %v4566_v31 = vld [vmem:[%s6250_s1 + $0x570] ss:$8 sps:$4 sm:$0xff]   ;;  %v4569_v33 = vld [vmem:[%s6250_s1 + $0x584] ss:$8 sps:$4 sm:$0xff]   ;;  %v4571_v34 = vld [vmem:[%s6250_s1 + $0x180] ss:$8 sps:$4 sm:$0xff]  }
  0x11   : > { %2139 = vmatprep.subr.bf16.mxu0 %v4539_v13  ;;  %v4572_v35 = vld [vmem:[%s6250_s1 + $0x580] ss:$8 sps:$4 sm:$0xff]   ;;  %v4573_v36 = vld [vmem:[%s6250_s1 + $0x194] ss:$8 sps:$4 sm:$0xff]   ;;  %s6257_s22 = smov (!%p257_p3, %s3626_s22), 1 }
  0x12   : > { %v4575_v37 = vld [vmem:[%s6250_s1 + $0x594] ss:$8 sps:$4 sm:$0xff]   ;;  %v4577_v38 = vld [vmem:[%s6250_s1 + $0x190] ss:$8 sps:$4 sm:$0xff]   ;;  %v4579_v40 = vld [vmem:[%s6250_s1 + $0x1a4] ss:$8 sps:$4 sm:$0xff]  }
  0x13   : > { %561 = vmatpush1.bf16.msra.mxu1 %v4541_v14  ;;  %v4578_v39 = vld [vmem:[%s6250_s1 + $0x590] ss:$8 sps:$4 sm:$0xff]   ;;  %v4581_v41 = vld [vmem:[%s6250_s1 + $0x5a4] ss:$8 sps:$4 sm:$0xff]   ;;  %s4339_s17 = sshll.u32 %s6257_s22, 8  ;;  %s4340_s7 = sshll.u32 %s6257_s22, 5 }
  0x14   : > { %2140 = vmatpush1.bf16.msra.mxu0 %v4542_v15  ;;  %562 = vmatprep.subr.bf16.mxu1 %v4543_v16  ;;  %v4583_v42 = vld [vmem:[%s6250_s1 + $0x1a0] ss:$8 sps:$4 sm:$0xff]   ;;  %v4585_v44 = vld [vmem:[%s6250_s1 + $0x1b4] ss:$8 sps:$4 sm:$0xff]   ;;  %s5245_s28 = scalar_lea.vmem %s6249_s0, %s4339_s17  ;;  %v4589_v46 = vld [vmem:[%s6250_s1 + $0x1b0] ss:$8 sps:$4 sm:$0xff]   ;;  %s5871_s18 = scalar_lea.vmem %s6252_s3, %s4340_s7 }
  0x15   : > { %2141 = vmatprep.subr.bf16.mxu0 %v4545_v17  ;;  %v4584_v43 = vld [vmem:[%s6250_s1 + $0x5a0] ss:$8 sps:$4 sm:$0xff]   ;;  %v4587_v45 = vld [vmem:[%s6250_s1 + $0x5b4] ss:$8 sps:$4 sm:$0xff]   ;;  %v4590_v47 = vld [vmem:[%s6250_s1 + $0x5b0] ss:$8 sps:$4 sm:$0xff]  }
  0x16   : > { %v4617_v48 = vld [vmem:[%s5245_s28 + $0x14] ss:$8 sps:$4 sm:$0xff]   ;;  %v4591_v49 = vld [vmem:[%s6250_s1 + $0x1c4] ss:$8 sps:$4 sm:$0xff]   ;;  %v4595_v52 = vld [vmem:[%s6250_s1 + $0x1c0] ss:$8 sps:$4 sm:$0xff]  }
  0x17   : > { %563 = vmatpush1.bf16.msra.mxu1 %v4547_v18  ;;  %v4593_v50 = vld [vmem:[%s6250_s1 + $0x5c4] ss:$8 sps:$4 sm:$0xff]   ;;  %586 = vmatprep.mubr.bf16.mxu1 %v4617_v48  ;;  %v5264_v51 = vld [vmem:[%s5245_s28 + $0x54] ss:$8 sps:$4 sm:$0xff]   ;;  %v4596_v53 = vld [vmem:[%s6250_s1 + $0x5c0] ss:$8 sps:$4 sm:$0xff]  }
  0x18   : > { %2142 = vmatpush1.bf16.msra.mxu0 %v4548_v19  ;;  %564 = vmatprep.subr.bf16.mxu1 %v4549_v20  ;;  %v4597_v54 = vld [vmem:[%s6250_s1 + $0x1d4] ss:$8 sps:$4 sm:$0xff]   ;;  %v4601_v56 = vld [vmem:[%s6250_s1 + $0x1d0] ss:$8 sps:$4 sm:$0xff]   ;;  %v4603_v58 = vld [vmem:[%s6250_s1 + $0x1e4] ss:$8 sps:$4 sm:$0xff]  }
  0x19   : > { %2143 = vmatprep.subr.bf16.mxu0 %v4551_v21  ;;  %v4599_v55 = vld [vmem:[%s6250_s1 + $0x5d4] ss:$8 sps:$4 sm:$0xff]   ;;  %2165 = vmatprep.mubr.bf16.mxu0 %v5264_v51  ;;  %v4602_v57 = vld [vmem:[%s6250_s1 + $0x5d0] ss:$8 sps:$4 sm:$0xff]   ;;  %v4605_v59 = vld [vmem:[%s6250_s1 + $0x5e4] ss:$8 sps:$4 sm:$0xff]  }
  0x1a   : > { %v4607_v60 = vld [vmem:[%s6250_s1 + $0x1e0] ss:$8 sps:$4 sm:$0xff]   ;;  %v4609_v62 = vld [vmem:[%s6250_s1 + $0x1f4] ss:$8 sps:$4 sm:$0xff]   ;;  %v4613_v0 = vld [vmem:[%s6250_s1 + $0x1f0] ss:$8 sps:$4 sm:$0xff]  }
  0x1b   : > { %565 = vmatpush1.bf16.msra.mxu1 %v4553_v22  ;;  %v4608_v61 = vld [vmem:[%s6250_s1 + $0x5e0] ss:$8 sps:$4 sm:$0xff]   ;;  %v4611_v63 = vld [vmem:[%s6250_s1 + $0x5f4] ss:$8 sps:$4 sm:$0xff]   ;;  %v4614_v1 = vld [vmem:[%s6250_s1 + $0x5f0] ss:$8 sps:$4 sm:$0xff]  }
  0x1c   : > { %2144 = vmatpush1.bf16.msra.mxu0 %v4554_v23  ;;  %566 = vmatprep.subr.bf16.mxu1 %v4555_v24  ;;  %v4620_v2 = vld [vmem:[%s6250_s1 + $0x4] ss:$8 sps:$4 sm:$0xff]   ;;  %v4615_v4 = vld [vmem:[%s5245_s28 + $0x10] ss:$8 sps:$4 sm:$0xff]   ;;  %v4618_v5 = vld [vmem:[%s6250_s1] ss:$8 sps:$4 sm:$0xff]  }
  0x1d   : > { %2145 = vmatprep.subr.bf16.mxu0 %v4557_v25  ;;  %v4626_v3 = vld [vmem:[%s6250_s1 + $0x604] ss:$8 sps:$4 sm:$0xff]   ;;  %v4621_v6 = vld [vmem:[%s5245_s28 + $0x50] ss:$8 sps:$4 sm:$0xff]   ;;  %v4624_v7 = vld [vmem:[%s6250_s1 + $0x600] ss:$8 sps:$4 sm:$0xff]  }
  0x1e   : > { %v4629_v8 = vld [vmem:[%s6250_s1 + $0x14] ss:$8 sps:$4 sm:$0xff]   ;;  %v4627_v10 = vld [vmem:[%s6250_s1 + $0x10] ss:$8 sps:$4 sm:$0xff]   ;;  %v4635_v12 = vld [vmem:[%s6250_s1 + $0x24] ss:$8 sps:$4 sm:$0xff]  }
  0x1f   : > { %567 = vmatpush1.bf16.msra.mxu1 %v4559_v26  ;;  %v4632_v9 = vld [vmem:[%s6250_s1 + $0x614] ss:$8 sps:$4 sm:$0xff]   ;;  %v4630_v11 = vld [vmem:[%s6250_s1 + $0x610] ss:$8 sps:$4 sm:$0xff]   ;;  %v4638_v13 = vld [vmem:[%s6250_s1 + $0x624] ss:$8 sps:$4 sm:$0xff]  }
  0x20   : > { %2146 = vmatpush1.bf16.msra.mxu0 %v4560_v27  ;;  %568 = vmatprep.subr.bf16.mxu1 %v4561_v28  ;;  %v4633_v14 = vld [vmem:[%s6250_s1 + $0x20] ss:$8 sps:$4 sm:$0xff]   ;;  %v4641_v16 = vld [vmem:[%s6250_s1 + $0x34] ss:$8 sps:$4 sm:$0xff]   ;;  %v4639_v19 = vld [vmem:[%s6250_s1 + $0x30] ss:$8 sps:$4 sm:$0xff]  }
  0x21   : > { %2147 = vmatprep.subr.bf16.mxu0 %v4563_v29  ;;  %v4636_v15 = vld [vmem:[%s6250_s1 + $0x620] ss:$8 sps:$4 sm:$0xff]   ;;  %v4681_v17 = vld [vmem:[%s5245_s28 + $0x34] ss:$8 sps:$4 sm:$0xff]   ;;  %v4642_v20 = vld [vmem:[%s6250_s1 + $0x630] ss:$8 sps:$4 sm:$0xff]  }
  0x22   : > { %v4644_v18 = vld [vmem:[%s6250_s1 + $0x634] ss:$8 sps:$4 sm:$0xff]   ;;  %v4647_v22 = vld [vmem:[%s6250_s1 + $0x44] ss:$8 sps:$4 sm:$0xff]   ;;  %v4691_v24 = vld [vmem:[%s5245_s28 + $0x30] ss:$8 sps:$4 sm:$0xff]  }
  0x23   : > { %569 = vmatpush1.bf16.msra.mxu1 %v4565_v30  ;;  %v5361_v21 = vld [vmem:[%s5245_s28 + $0x74] ss:$8 sps:$4 sm:$0xff]   ;;  %v4650_v23 = vld [vmem:[%s6250_s1 + $0x644] ss:$8 sps:$4 sm:$0xff]   ;;  %v5371_v25 = vld [vmem:[%s5245_s28 + $0x70] ss:$8 sps:$4 sm:$0xff]  }
  0x24   : > { %2148 = vmatpush1.bf16.msra.mxu0 %v4566_v31  ;;  %570 = vmatprep.subr.bf16.mxu1 %v4567_v32  ;;  %v4645_v26 = vld [vmem:[%s6250_s1 + $0x40] ss:$8 sps:$4 sm:$0xff]   ;;  %v4653_v28 = vld [vmem:[%s6250_s1 + $0x54] ss:$8 sps:$4 sm:$0xff]   ;;  %v4651_v31 = vld [vmem:[%s6250_s1 + $0x50] ss:$8 sps:$4 sm:$0xff]  }
  0x25   : > { %2149 = vmatprep.subr.bf16.mxu0 %v4569_v33  ;;  %v4648_v27 = vld [vmem:[%s6250_s1 + $0x640] ss:$8 sps:$4 sm:$0xff]   ;;  %v4656_v29 = vld [vmem:[%s6250_s1 + $0x654] ss:$8 sps:$4 sm:$0xff]   ;;  %v4654_v32 = vld [vmem:[%s6250_s1 + $0x650] ss:$8 sps:$4 sm:$0xff]  }
  0x26   : > { %v5389_v30 = vld [vmem:[%s5245_s28 + $0x94] ss:$8 sps:$4 sm:$0xff]   ;;  %v5398_v33 = vld [vmem:[%s5245_s28 + $0x90] ss:$8 sps:$4 sm:$0xff]   ;;  %v4672_v48 = vld [vmem:[%s6250_s1 + $0x680] ss:$8 sps:$4 sm:$0xff]  }
  0x27   : > { %571 = vmatpush1.bf16.msra.mxu1 %v4571_v34  ;;  %v4659_v34 = vld [vmem:[%s6250_s1 + $0x64] ss:$8 sps:$4 sm:$0xff]   ;;  %s4341_s12 = sshll.u32 %s6257_s22, 6 }
  0x28   : > { %2150 = vmatpush1.bf16.msra.mxu0 %v4572_v35  ;;  %572 = vmatprep.subr.bf16.mxu1 %v4573_v36  ;;  %v4662_v35 = vld [vmem:[%s6250_s1 + $0x664] ss:$8 sps:$4 sm:$0xff]   ;;  %v4657_v36 = vld [vmem:[%s6250_s1 + $0x60] ss:$8 sps:$4 sm:$0xff]   ;;  %s6204_s15 = scalar_lea.vmem %s6255_s6, %s4341_s12 }
  0x29   : > { %2151 = vmatprep.subr.bf16.mxu0 %v4575_v37  ;;  %v4660_v37 = vld [vmem:[%s6250_s1 + $0x660] ss:$8 sps:$4 sm:$0xff]  }
  0x2b   : > { %573 = vmatpush1.bf16.msra.mxu1 %v4577_v38  ;;  %v4665_v38 = vld [vmem:[%s6250_s1 + $0x74] ss:$8 sps:$4 sm:$0xff]  }
  0x2c   : > { %2152 = vmatpush1.bf16.msra.mxu0 %v4578_v39  ;;  %574 = vmatprep.subr.bf16.mxu1 %v4579_v40  ;;  %v5419_v39 = vld [vmem:[%s5245_s28 + $0xb4] ss:$8 sps:$4 sm:$0xff]  }
  0x2d   : > { %2153 = vmatprep.subr.bf16.mxu0 %v4581_v41  ;;  %v4668_v40 = vld [vmem:[%s6250_s1 + $0x674] ss:$8 sps:$4 sm:$0xff]   ;;  %v4663_v41 = vld [vmem:[%s6250_s1 + $0x70] ss:$8 sps:$4 sm:$0xff]  }
  0x2f   : > { %575 = vmatpush1.bf16.msra.mxu1 %v4583_v42  ;;  %v4666_v42 = vld [vmem:[%s6250_s1 + $0x670] ss:$8 sps:$4 sm:$0xff]  }
  0x30   : > { %2154 = vmatpush1.bf16.msra.mxu0 %v4584_v43  ;;  %576 = vmatprep.subr.bf16.mxu1 %v4585_v44  ;;  %v5432_v43 = vld [vmem:[%s5245_s28 + $0xb0] ss:$8 sps:$4 sm:$0xff]   ;;  %v4671_v44 = vld [vmem:[%s6250_s1 + $0x84] ss:$8 sps:$4 sm:$0xff]  }
  0x31   : > { %2155 = vmatprep.subr.bf16.mxu0 %v4587_v45  ;;  %v4674_v45 = vld [vmem:[%s6250_s1 + $0x684] ss:$8 sps:$4 sm:$0xff]  }
  0x33   : > { %577 = vmatpush1.bf16.msra.mxu1 %v4589_v46  ;;  %v4669_v46 = vld [vmem:[%s6250_s1 + $0x80] ss:$8 sps:$4 sm:$0xff]  }
  0x34   : > { %2156 = vmatpush1.bf16.msra.mxu0 %v4590_v47  ;;  %578 = vmatprep.subr.bf16.mxu1 %v4591_v49  ;;  %v4731_v47 = vld [vmem:[%s5245_s28 + $0x4] ss:$8 sps:$4 sm:$0xff]   ;;  %v4677_v49 = vld [vmem:[%s6250_s1 + $0x94] ss:$8 sps:$4 sm:$0xff]  }
  0x35   : > { %2157 = vmatprep.subr.bf16.mxu0 %v4593_v50  ;;  %v4680_v50 = vld [vmem:[%s6250_s1 + $0x694] ss:$8 sps:$4 sm:$0xff]  }
  0x37   : > { %579 = vmatpush1.bf16.msra.mxu1 %v4595_v52  ;;  %v4675_v52 = vld [vmem:[%s6250_s1 + $0x90] ss:$8 sps:$4 sm:$0xff]  }
  0x38   : > { %2158 = vmatpush1.bf16.msra.mxu0 %v4596_v53  ;;  %580 = vmatprep.subr.bf16.mxu1 %v4597_v54  ;;  %v4678_v53 = vld [vmem:[%s6250_s1 + $0x690] ss:$8 sps:$4 sm:$0xff]   ;;  %v4685_v54 = vld [vmem:[%s6250_s1 + $0xa4] ss:$8 sps:$4 sm:$0xff]  }
  0x39   : > { %2159 = vmatprep.subr.bf16.mxu0 %v4599_v55  ;;  %v4690_v55 = vld [vmem:[%s6250_s1 + $0x6a4] ss:$8 sps:$4 sm:$0xff]  }
  0x3b   : > { %581 = vmatpush1.bf16.msra.mxu1 %v4601_v56  ;;  %v4683_v56 = vld [vmem:[%s6250_s1 + $0xa0] ss:$8 sps:$4 sm:$0xff]  }
  0x3c   : > { %2160 = vmatpush1.bf16.msra.mxu0 %v4602_v57  ;;  %582 = vmatprep.subr.bf16.mxu1 %v4603_v58  ;;  %v4688_v57 = vld [vmem:[%s6250_s1 + $0x6a0] ss:$8 sps:$4 sm:$0xff]   ;;  %v4695_v58 = vld [vmem:[%s6250_s1 + $0xb4] ss:$8 sps:$4 sm:$0xff]  }
  0x3d   : > { %2161 = vmatprep.subr.bf16.mxu0 %v4605_v59  ;;  %v4698_v59 = vld [vmem:[%s6250_s1 + $0x6b4] ss:$8 sps:$4 sm:$0xff]  }
  0x3f   : > { %583 = vmatpush1.bf16.msra.mxu1 %v4607_v60  ;;  %v4693_v60 = vld [vmem:[%s6250_s1 + $0xb0] ss:$8 sps:$4 sm:$0xff]  }
  0x40   : > { %2162 = vmatpush1.bf16.msra.mxu0 %v4608_v61  ;;  %584 = vmatprep.subr.bf16.mxu1 %v4609_v62  ;;  %v4696_v61 = vld [vmem:[%s6250_s1 + $0x6b0] ss:$8 sps:$4 sm:$0xff]   ;;  %v4701_v62 = vld [vmem:[%s6250_s1 + $0xc4] ss:$8 sps:$4 sm:$0xff]  }
  0x41   : > { %2163 = vmatprep.subr.bf16.mxu0 %v4611_v63  ;;  %v4706_v63 = vld [vmem:[%s6250_s1 + $0x6c4] ss:$8 sps:$4 sm:$0xff]  }
  0x43   : > { %585 = vmatpush1.bf16.msra.mxu1 %v4613_v0  ;;  %v4699_v0 = vld [vmem:[%s6250_s1 + $0xc0] ss:$8 sps:$4 sm:$0xff]  }
  0x44   : > { %2164 = vmatpush1.bf16.msra.mxu0 %v4614_v1  ;;  %827 = vmatprep.subr.bf16.mxu1 %v4620_v2  ;;  %v4704_v1 = vld [vmem:[%s6250_s1 + $0x6c0] ss:$8 sps:$4 sm:$0xff]   ;;  %v4710_v2 = vld [vmem:[%s6250_s1 + $0xd4] ss:$8 sps:$4 sm:$0xff]  }
  0x45   : > { %2464 = vmatprep.subr.bf16.mxu0 %v4626_v3  ;;  %v4713_v3 = vld [vmem:[%s6250_s1 + $0x6d4] ss:$8 sps:$4 sm:$0xff]  }
  0x46   : > { %587 = vmatmul.mubr.bf16.vlgmr.msra.gmra.mrb[0].mxu1 %v4615_v4  ;;  %v4708_v4 = vld [vmem:[%s6250_s1 + $0xd0] ss:$8 sps:$4 sm:$0xff]  }
  0x47   : > { %2166 = vmatmul.mubr.bf16.vlgmr.msra.gmra.mrb[0].mxu0 %v4621_v6  ;;  %828 = vmatpush1.bf16.msra.mxu1 %v4618_v5  ;;  %v4711_v5 = vld [vmem:[%s6250_s1 + $0x6d0] ss:$8 sps:$4 sm:$0xff]  }
  0x48   : > { %2465 = vmatpush1.bf16.msra.mxu0 %v4624_v7  ;;  %829 = vmatprep.subr.bf16.mxu1 %v4629_v8  ;;  %v4721_v7 = vld [vmem:[%s6250_s1 + $0x6e4] ss:$8 sps:$4 sm:$0xff]   ;;  %v4714_v8 = vld [vmem:[%s6250_s1 + $0xe0] ss:$8 sps:$4 sm:$0xff]  }
  0x49   : > { %2466 = vmatprep.subr.bf16.mxu0 %v4632_v9  ;;  %596 = vmatprep.mubr.bf16.mxu1 %v4681_v17  ;;  %v4719_v9 = vld [vmem:[%s6250_s1 + $0x6e0] ss:$8 sps:$4 sm:$0xff]  }
  0x4a   : > { %2175 = vmatprep.mubr.bf16.mxu0 %v5361_v21  ;;  %v4732_v17 = vld [vmem:[%s6250_s1 + $0x200] ss:$8 sps:$4 sm:$0xff]  }
  0x4b   : > { %830 = vmatpush1.bf16.msra.mxu1 %v4627_v10  ;;  %v4725_v10 = vld [vmem:[%s6250_s1 + $0xf4] ss:$8 sps:$4 sm:$0xff]  }
  0x4c   : > { %2467 = vmatpush1.bf16.msra.mxu0 %v4630_v11  ;;  %831 = vmatprep.subr.bf16.mxu1 %v4635_v12  ;;  %v4728_v11 = vld [vmem:[%s6250_s1 + $0x6f4] ss:$8 sps:$4 sm:$0xff]   ;;  %v4723_v12 = vld [vmem:[%s6250_s1 + $0xf0] ss:$8 sps:$4 sm:$0xff]  }
  0x4d   : > { %2468 = vmatprep.subr.bf16.mxu0 %v4638_v13  ;;  %v4726_v13 = vld [vmem:[%s6250_s1 + $0x6f0] ss:$8 sps:$4 sm:$0xff]  }
  0x4e   : > { %597 = vmatmul.mubr.bf16.gmra.mrb[4].mxu1 %v4691_v24  ;;  %v5563_v24 = vld [vmem:[%s5245_s28 + $0x84] ss:$8 sps:$4 sm:$0xff]  }
  0x4f   : > { %832 = vmatpush1.bf16.msra.mxu1 %v4633_v14  ;;  %2176 = vmatmul.mubr.bf16.gmra.mrb[4].mxu0 %v5371_v25  ;;  %v4734_v14 = vld [vmem:[%s6250_s1 + $0x204] ss:$8 sps:$4 sm:$0xff]  }
  0x50   : > { %2469 = vmatpush1.bf16.msra.mxu0 %v4636_v15  ;;  %833 = vmatprep.subr.bf16.mxu1 %v4641_v16  ;;  %v4740_v15 = vld [vmem:[%s6250_s1 + $0x704] ss:$8 sps:$4 sm:$0xff]   ;;  %v4729_v16 = vld [vmem:[%s5245_s28] ss:$8 sps:$4 sm:$0xff]  }
  0x51   : > { %2470 = vmatprep.subr.bf16.mxu0 %v4644_v18  ;;  %606 = vmatprep.mubr.bf16.mxu1 %v5264_v51  ;;  %v5456_v51 = vld [vmem:[%s5245_s28 + $0x64] ss:$8 sps:$4 sm:$0xff]   ;;  %v5548_v18 = vld [vmem:[%s5245_s28 + $0x60] ss:$8 sps:$4 sm:$0xff]  }
  0x52   : > { %2185 = vmatprep.mubr.bf16.mxu0 %v5389_v30 }
  0x53   : > { %834 = vmatpush1.bf16.msra.mxu1 %v4639_v19  ;;  %v4738_v19 = vld [vmem:[%s6250_s1 + $0x700] ss:$8 sps:$4 sm:$0xff]  }
  0x54   : > { %2471 = vmatpush1.bf16.msra.mxu0 %v4642_v20  ;;  %835 = vmatprep.subr.bf16.mxu1 %v4647_v22  ;;  %v4743_v20 = vld [vmem:[%s6250_s1 + $0x214] ss:$8 sps:$4 sm:$0xff]  }
  0x55   : > { %2472 = vmatprep.subr.bf16.mxu0 %v4650_v23  ;;  %v4746_v22 = vld [vmem:[%s6250_s1 + $0x714] ss:$8 sps:$4 sm:$0xff]   ;;  %v5560_v23 = vld [vmem:[%s5245_s28 + $0x24] ss:$8 sps:$4 sm:$0xff]  }
  0x56   : > { %607 = vmatmul.mubr.bf16.gmra.mrb[8].mxu1 %v4621_v6  ;;  %v4716_v6 = vld [vmem:[%s6250_s1 + $0xe4] ss:$8 sps:$4 sm:$0xff]  }
  0x57   : > { %836 = vmatpush1.bf16.msra.mxu1 %v4645_v26  ;;  %2186 = vmatmul.mubr.bf16.gmra.mrb[8].mxu0 %v5398_v33  ;;  %v4741_v26 = vld [vmem:[%s6250_s1 + $0x210] ss:$8 sps:$4 sm:$0xff]  }
  0x58   : > { %2473 = vmatpush1.bf16.msra.mxu0 %v4648_v27  ;;  %837 = vmatprep.subr.bf16.mxu1 %v4653_v28  ;;  %v4744_v27 = vld [vmem:[%s6250_s1 + $0x710] ss:$8 sps:$4 sm:$0xff]   ;;  %v4749_v28 = vld [vmem:[%s6250_s1 + $0x224] ss:$8 sps:$4 sm:$0xff]  }
  0x59   : > { %2474 = vmatprep.subr.bf16.mxu0 %v4656_v29  ;;  %616 = vmatprep.mubr.bf16.mxu1 %v5361_v21  ;;  %v4752_v29 = vld [vmem:[%s6250_s1 + $0x724] ss:$8 sps:$4 sm:$0xff]  }
  0x5a   : > { %2195 = vmatprep.mubr.bf16.mxu0 %v5419_v39 }
  0x5b   : > { %838 = vmatpush1.bf16.msra.mxu1 %v4651_v31  ;;  %v4747_v31 = vld [vmem:[%s6250_s1 + $0x220] ss:$8 sps:$4 sm:$0xff]  }
  0x5c   : > { %2475 = vmatpush1.bf16.msra.mxu0 %v4654_v32  ;;  %839 = vmatprep.subr.bf16.mxu1 %v4659_v34  ;;  %v4750_v32 = vld [vmem:[%s6250_s1 + $0x720] ss:$8 sps:$4 sm:$0xff]  }
  0x5d   : > { %2476 = vmatprep.subr.bf16.mxu0 %v4662_v35  ;;  %v5587_v34 = vld [vmem:[%s5245_s28 + $0x20] ss:$8 sps:$4 sm:$0xff]  }
  0x5e   : > { %617 = vmatmul.mubr.bf16.gmra.mrb[12].mxu1 %v5371_v25  ;;  %v5590_v35 = vld [vmem:[%s5245_s28 + $0x80] ss:$8 sps:$4 sm:$0xff]  }
  0x5f   : > { %840 = vmatpush1.bf16.msra.mxu1 %v4657_v36  ;;  %2196 = vmatmul.mubr.bf16.gmra.mrb[12].mxu0 %v5432_v43  ;;  %v4755_v36 = vld [vmem:[%s6250_s1 + $0x234] ss:$8 sps:$4 sm:$0xff]  }
  0x60   : > { %2477 = vmatpush1.bf16.msra.mxu0 %v4660_v37  ;;  %841 = vmatprep.subr.bf16.mxu1 %v4665_v38  ;;  %v4758_v37 = vld [vmem:[%s6250_s1 + $0x734] ss:$8 sps:$4 sm:$0xff]   ;;  %v5599_v38 = vld [vmem:[%s5245_s28 + $0x44] ss:$8 sps:$4 sm:$0xff]  }
  0x61   : > { %2478 = vmatprep.subr.bf16.mxu0 %v4668_v40  ;;  %859 = vmatprep.mubr.bf16.mxu1 %v4731_v47  ;;  %v5602_v40 = vld [vmem:[%s5245_s28 + $0xa4] ss:$8 sps:$4 sm:$0xff]   ;;  %v4762_v47 = vld [vmem:[%s6250_s1 + $0x740] ss:$8 sps:$4 sm:$0xff]  }
  0x62   : > { %2496 = vmatprep.mubr.bf16.mxu0 %v5456_v51 }
  0x63   : > { %842 = vmatpush1.bf16.msra.mxu1 %v4663_v41  ;;  %v4753_v41 = vld [vmem:[%s6250_s1 + $0x230] ss:$8 sps:$4 sm:$0xff]  }
  0x64   : > { %2479 = vmatpush1.bf16.msra.mxu0 %v4666_v42  ;;  %843 = vmatprep.subr.bf16.mxu1 %v4671_v44  ;;  %v4756_v42 = vld [vmem:[%s6250_s1 + $0x730] ss:$8 sps:$4 sm:$0xff]   ;;  %v4761_v44 = vld [vmem:[%s6250_s1 + $0x244] ss:$8 sps:$4 sm:$0xff]  }
  0x65   : > { %2480 = vmatprep.subr.bf16.mxu0 %v4674_v45  ;;  %v4764_v45 = vld [vmem:[%s6250_s1 + $0x744] ss:$8 sps:$4 sm:$0xff]  }
  0x67   : > { %844 = vmatpush1.bf16.msra.mxu1 %v4669_v46  ;;  %v4759_v46 = vld [vmem:[%s6250_s1 + $0x240] ss:$8 sps:$4 sm:$0xff]  }
  0x68   : > { %2481 = vmatpush1.bf16.msra.mxu0 %v4672_v48  ;;  %845 = vmatprep.subr.bf16.mxu1 %v4677_v49  ;;  %v5627_v48 = vld [vmem:[%s5245_s28 + $0x40] ss:$8 sps:$4 sm:$0xff]  }
  0x69   : > { %2482 = vmatprep.subr.bf16.mxu0 %v4680_v50  ;;  %v5630_v49 = vld [vmem:[%s5245_s28 + $0xa0] ss:$8 sps:$4 sm:$0xff]   ;;  %v4767_v50 = vld [vmem:[%s6250_s1 + $0x254] ss:$8 sps:$4 sm:$0xff]  }
  0x6b   : > { %846 = vmatpush1.bf16.msra.mxu1 %v4675_v52  ;;  %v4770_v52 = vld [vmem:[%s6250_s1 + $0x754] ss:$8 sps:$4 sm:$0xff]  }
  0x6c   : > { %2483 = vmatpush1.bf16.msra.mxu0 %v4678_v53  ;;  %847 = vmatprep.subr.bf16.mxu1 %v4685_v54  ;;  %v5639_v53 = vld [vmem:[%s5245_s28 + $0xc4] ss:$8 sps:$4 sm:$0xff]   ;;  %v4765_v54 = vld [vmem:[%s6250_s1 + $0x250] ss:$8 sps:$4 sm:$0xff]  }
  0x6d   : > { %2484 = vmatprep.subr.bf16.mxu0 %v4690_v55  ;;  %v4768_v55 = vld [vmem:[%s6250_s1 + $0x750] ss:$8 sps:$4 sm:$0xff]  }
  0x6f   : > { %848 = vmatpush1.bf16.msra.mxu1 %v4683_v56  ;;  %v4773_v56 = vld [vmem:[%s6250_s1 + $0x264] ss:$8 sps:$4 sm:$0xff]  }
  0x70   : > { %2485 = vmatpush1.bf16.msra.mxu0 %v4688_v57  ;;  %849 = vmatprep.subr.bf16.mxu1 %v4695_v58  ;;  %v4776_v57 = vld [vmem:[%s6250_s1 + $0x764] ss:$8 sps:$4 sm:$0xff]   ;;  %v4771_v58 = vld [vmem:[%s6250_s1 + $0x260] ss:$8 sps:$4 sm:$0xff]  }
  0x71   : > { %2486 = vmatprep.subr.bf16.mxu0 %v4698_v59  ;;  %v4774_v59 = vld [vmem:[%s6250_s1 + $0x760] ss:$8 sps:$4 sm:$0xff]  }
  0x73   : > { %850 = vmatpush1.bf16.msra.mxu1 %v4693_v60  ;;  %v5664_v60 = vld [vmem:[%s5245_s28 + $0xc0] ss:$8 sps:$4 sm:$0xff]  }
  0x74   : > { %2487 = vmatpush1.bf16.msra.mxu0 %v4696_v61  ;;  %851 = vmatprep.subr.bf16.mxu1 %v4701_v62  ;;  %v4779_v61 = vld [vmem:[%s6250_s1 + $0x274] ss:$8 sps:$4 sm:$0xff]  }
  0x75   : > { %2488 = vmatprep.subr.bf16.mxu0 %v4706_v63  ;;  %v4782_v62 = vld [vmem:[%s6250_s1 + $0x774] ss:$8 sps:$4 sm:$0xff]   ;;  %v4777_v63 = vld [vmem:[%s6250_s1 + $0x270] ss:$8 sps:$4 sm:$0xff]  }
  0x77   : > { %852 = vmatpush1.bf16.msra.mxu1 %v4699_v0  ;;  %v4780_v0 = vld [vmem:[%s6250_s1 + $0x770] ss:$8 sps:$4 sm:$0xff]  }
  0x78   : > { %2489 = vmatpush1.bf16.msra.mxu0 %v4704_v1  ;;  %853 = vmatprep.subr.bf16.mxu1 %v4710_v2  ;;  %v4785_v1 = vld [vmem:[%s6250_s1 + $0x284] ss:$8 sps:$4 sm:$0xff]  }
  0x79   : > { %2490 = vmatprep.subr.bf16.mxu0 %v4713_v3  ;;  %v4788_v2 = vld [vmem:[%s6250_s1 + $0x784] ss:$8 sps:$4 sm:$0xff]   ;;  %v4783_v3 = vld [vmem:[%s6250_s1 + $0x280] ss:$8 sps:$4 sm:$0xff]  }
  0x7b   : > { %854 = vmatpush1.bf16.msra.mxu1 %v4708_v4  ;;  %v4786_v4 = vld [vmem:[%s6250_s1 + $0x780] ss:$8 sps:$4 sm:$0xff]  }
  0x7c   : > { %2491 = vmatpush1.bf16.msra.mxu0 %v4711_v5  ;;  %855 = vmatprep.subr.bf16.mxu1 %v4716_v6  ;;  %v4791_v5 = vld [vmem:[%s6250_s1 + $0x294] ss:$8 sps:$4 sm:$0xff]   ;;  %v4789_v6 = vld [vmem:[%s6250_s1 + $0x290] ss:$8 sps:$4 sm:$0xff]  }
  0x7d   : > { %2492 = vmatprep.subr.bf16.mxu0 %v4721_v7  ;;  %v4792_v7 = vld [vmem:[%s6250_s1 + $0x790] ss:$8 sps:$4 sm:$0xff]  }
  0x7f   : > { %856 = vmatpush1.bf16.msra.mxu1 %v4714_v8  ;;  %v4799_v8 = vld [vmem:[%s6250_s1 + $0x2a4] ss:$8 sps:$4 sm:$0xff]  }
  0x80   : > { %2493 = vmatpush1.bf16.msra.mxu0 %v4719_v9  ;;  %857 = vmatprep.subr.bf16.mxu1 %v4725_v10  ;;  %v4804_v9 = vld [vmem:[%s6250_s1 + $0x7a4] ss:$8 sps:$4 sm:$0xff]   ;;  %v4797_v10 = vld [vmem:[%s6250_s1 + $0x2a0] ss:$8 sps:$4 sm:$0xff]  }
  0x81   : > { %2494 = vmatprep.subr.bf16.mxu0 %v4728_v11  ;;  %v4802_v11 = vld [vmem:[%s6250_s1 + $0x7a0] ss:$8 sps:$4 sm:$0xff]  }
  0x83   : > { %858 = vmatpush1.bf16.msra.mxu1 %v4723_v12  ;;  %v4809_v12 = vld [vmem:[%s6250_s1 + $0x2b4] ss:$8 sps:$4 sm:$0xff]  }
  0x84   : > { %2495 = vmatpush1.bf16.msra.mxu0 %v4726_v13  ;;  %1142 = vmatprep.subr.bf16.mxu1 %v4734_v14  ;;  %v4812_v13 = vld [vmem:[%s6250_s1 + $0x7b4] ss:$8 sps:$4 sm:$0xff]   ;;  %v4807_v14 = vld [vmem:[%s6250_s1 + $0x2b0] ss:$8 sps:$4 sm:$0xff]  }
  0x85   : > { %2794 = vmatprep.subr.bf16.mxu0 %v4740_v15  ;;  %v4810_v15 = vld [vmem:[%s6250_s1 + $0x7b0] ss:$8 sps:$4 sm:$0xff]  }
  0x86   : > { %860 = vmatmul.mubr.bf16.vlgmr.msra.gmra.mrb[0].mxu1 %v4729_v16  ;;  %v4817_v16 = vld [vmem:[%s6250_s1 + $0x2c4] ss:$8 sps:$4 sm:$0xff]  }
  0x87   : > { %2497 = vmatmul.mubr.bf16.vlgmr.msra.gmra.mrb[0].mxu0 %v5548_v18  ;;  %1143 = vmatpush1.bf16.msra.mxu1 %v4732_v17  ;;  %v4822_v17 = vld [vmem:[%s6250_s1 + $0x7c4] ss:$8 sps:$4 sm:$0xff]  }
  0x88   : > { %2795 = vmatpush1.bf16.msra.mxu0 %v4738_v19  ;;  %1144 = vmatprep.subr.bf16.mxu1 %v4743_v20  ;;  %v4815_v19 = vld [vmem:[%s6250_s1 + $0x2c0] ss:$8 sps:$4 sm:$0xff]  }
  0x89   : > { %2796 = vmatprep.subr.bf16.mxu0 %v4746_v22  ;;  %869 = vmatprep.mubr.bf16.mxu1 %v5560_v23  ;;  %v4820_v20 = vld [vmem:[%s6250_s1 + $0x7c0] ss:$8 sps:$4 sm:$0xff]   ;;  %v4827_v22 = vld [vmem:[%s6250_s1 + $0x2d4] ss:$8 sps:$4 sm:$0xff]  }
  0x8a   : > { %2506 = vmatprep.mubr.bf16.mxu0 %v5563_v24 }
  0x8b   : > { %1145 = vmatpush1.bf16.msra.mxu1 %v4741_v26  ;;  %v4825_v26 = vld [vmem:[%s6250_s1 + $0x2d0] ss:$8 sps:$4 sm:$0xff]  }
  0x8c   : > { %2797 = vmatpush1.bf16.msra.mxu0 %v4744_v27  ;;  %1146 = vmatprep.subr.bf16.mxu1 %v4749_v28  ;;  %v4828_v27 = vld [vmem:[%s6250_s1 + $0x7d0] ss:$8 sps:$4 sm:$0xff]   ;;  %v4833_v28 = vld [vmem:[%s6250_s1 + $0x2e4] ss:$8 sps:$4 sm:$0xff]  }
  0x8d   : > { %2798 = vmatprep.subr.bf16.mxu0 %v4752_v29  ;;  %v4838_v29 = vld [vmem:[%s6250_s1 + $0x7e4] ss:$8 sps:$4 sm:$0xff]  }
  0x8e   : > { %870 = vmatmul.mubr.bf16.gmra.mrb[4].mxu1 %v5587_v34 }
  0x8f   : > { %2507 = vmatmul.mubr.bf16.gmra.mrb[4].mxu0 %v5590_v35  ;;  %1147 = vmatpush1.bf16.msra.mxu1 %v4747_v31  ;;  %v4831_v31 = vld [vmem:[%s6250_s1 + $0x2e0] ss:$8 sps:$4 sm:$0xff]  }
  0x90   : > { %2799 = vmatpush1.bf16.msra.mxu0 %v4750_v32  ;;  %1148 = vmatprep.subr.bf16.mxu1 %v4755_v36  ;;  %v4836_v32 = vld [vmem:[%s6250_s1 + $0x7e0] ss:$8 sps:$4 sm:$0xff]   ;;  %v4842_v36 = vld [vmem:[%s6250_s1 + $0x2f4] ss:$8 sps:$4 sm:$0xff]  }
  0x91   : > { %2800 = vmatprep.subr.bf16.mxu0 %v4758_v37  ;;  %879 = vmatprep.mubr.bf16.mxu1 %v5599_v38  ;;  %v4845_v37 = vld [vmem:[%s6250_s1 + $0x7f4] ss:$8 sps:$4 sm:$0xff]  }
  0x92   : > { %2516 = vmatprep.mubr.bf16.mxu0 %v5602_v40 }
  0x93   : > { %1149 = vmatpush1.bf16.msra.mxu1 %v4753_v41  ;;  %v4840_v41 = vld [vmem:[%s6250_s1 + $0x2f0] ss:$8 sps:$4 sm:$0xff]  }
  0x94   : > { %2801 = vmatpush1.bf16.msra.mxu0 %v4756_v42  ;;  %1150 = vmatprep.subr.bf16.mxu1 %v4761_v44  ;;  %v4843_v42 = vld [vmem:[%s6250_s1 + $0x7f0] ss:$8 sps:$4 sm:$0xff]   ;;  %v4848_v44 = vld [vmem:[%s6250_s1 + $0x304] ss:$8 sps:$4 sm:$0xff]  }
  0x95   : > { %2802 = vmatprep.subr.bf16.mxu0 %v4764_v45  ;;  %v4851_v45 = vld [vmem:[%s6250_s1 + $0x804] ss:$8 sps:$4 sm:$0xff]  }
  0x96   : > { %880 = vmatmul.mubr.bf16.gmra.mrb[8].mxu1 %v5627_v48 }
  0x97   : > { %2517 = vmatmul.mubr.bf16.gmra.mrb[8].mxu0 %v5630_v49  ;;  %1151 = vmatpush1.bf16.msra.mxu1 %v4759_v46  ;;  %v4846_v46 = vld [vmem:[%s6250_s1 + $0x300] ss:$8 sps:$4 sm:$0xff]  }
  0x98   : > { %2803 = vmatpush1.bf16.msra.mxu0 %v4762_v47  ;;  %1152 = vmatprep.subr.bf16.mxu1 %v4767_v50  ;;  %v4849_v47 = vld [vmem:[%s6250_s1 + $0x800] ss:$8 sps:$4 sm:$0xff]   ;;  %v4854_v50 = vld [vmem:[%s6250_s1 + $0x314] ss:$8 sps:$4 sm:$0xff]  }
  0x99   : > { %2804 = vmatprep.subr.bf16.mxu0 %v4770_v52  ;;  %889 = vmatprep.mubr.bf16.mxu1 %v5456_v51  ;;  %v4857_v52 = vld [vmem:[%s6250_s1 + $0x814] ss:$8 sps:$4 sm:$0xff]  }
  0x9a   : > { %2526 = vmatprep.mubr.bf16.mxu0 %v5639_v53 }
  0x9b   : > { %1153 = vmatpush1.bf16.msra.mxu1 %v4765_v54  ;;  %v4852_v54 = vld [vmem:[%s6250_s1 + $0x310] ss:$8 sps:$4 sm:$0xff]  }
  0x9c   : > { %2805 = vmatpush1.bf16.msra.mxu0 %v4768_v55  ;;  %1154 = vmatprep.subr.bf16.mxu1 %v4773_v56  ;;  %v4855_v55 = vld [vmem:[%s6250_s1 + $0x810] ss:$8 sps:$4 sm:$0xff]   ;;  %v4860_v56 = vld [vmem:[%s6250_s1 + $0x324] ss:$8 sps:$4 sm:$0xff]  }
  0x9d   : > { %2806 = vmatprep.subr.bf16.mxu0 %v4776_v57  ;;  %v4861_v57 = vld [vmem:[%s6250_s1 + $0x820] ss:$8 sps:$4 sm:$0xff]  }
  0x9e   : > { %890 = vmatmul.mubr.bf16.gmra.mrb[12].mxu1 %v5548_v18 }
  0x9f   : > { %2527 = vmatmul.mubr.bf16.gmra.mrb[12].mxu0 %v5664_v60  ;;  %1155 = vmatpush1.bf16.msra.mxu1 %v4771_v58  ;;  %v4866_v58 = vld [vmem:[%s6250_s1 + $0x334] ss:$8 sps:$4 sm:$0xff]  }
  0xa0   : > { %2807 = vmatpush1.bf16.msra.mxu0 %v4774_v59  ;;  %1156 = vmatprep.subr.bf16.mxu1 %v4779_v61  ;;  %v4867_v59 = vld [vmem:[%s6250_s1 + $0x830] ss:$8 sps:$4 sm:$0xff]   ;;  %v4872_v61 = vld [vmem:[%s6250_s1 + $0x344] ss:$8 sps:$4 sm:$0xff]  }
  0xa1   : > { %2808 = vmatprep.subr.bf16.mxu0 %v4782_v62  ;;  %1174 = vmatprep.mubr.bf16.mxu1 %v5560_v23  ;;  %v4830_v23 = vld [vmem:[%s6250_s1 + $0x7d4] ss:$8 sps:$4 sm:$0xff]   ;;  %v4875_v62 = vld [vmem:[%s6250_s1 + $0x844] ss:$8 sps:$4 sm:$0xff]  }
  0xa2   : > { %2826 = vmatprep.mubr.bf16.mxu0 %v5361_v21  ;;  %v4794_v21 = vld [vmem:[%s6250_s1 + $0x794] ss:$8 sps:$4 sm:$0xff]  }
  0xa3   : > { %1157 = vmatpush1.bf16.msra.mxu1 %v4777_v63  ;;  %v4878_v63 = vld [vmem:[%s6250_s1 + $0x354] ss:$8 sps:$4 sm:$0xff]  }
  0xa4   : > { %2809 = vmatpush1.bf16.msra.mxu0 %v4780_v0  ;;  %1158 = vmatprep.subr.bf16.mxu1 %v4785_v1  ;;  %v4876_v0 = vld [vmem:[%s6250_s1 + $0x350] ss:$8 sps:$4 sm:$0xff]  }
  0xa5   : > { %2810 = vmatprep.subr.bf16.mxu0 %v4788_v2  ;;  %v4879_v1 = vld [vmem:[%s6250_s1 + $0x850] ss:$8 sps:$4 sm:$0xff]   ;;  %v4884_v2 = vld [vmem:[%s6250_s1 + $0x364] ss:$8 sps:$4 sm:$0xff]  }
  0xa7   : > { %1159 = vmatpush1.bf16.msra.mxu1 %v4783_v3  ;;  %v4887_v3 = vld [vmem:[%s6250_s1 + $0x864] ss:$8 sps:$4 sm:$0xff]  }
  0xa8   : > { %2811 = vmatpush1.bf16.msra.mxu0 %v4786_v4  ;;  %1160 = vmatprep.subr.bf16.mxu1 %v4791_v5  ;;  %v4885_v4 = vld [vmem:[%s6250_s1 + $0x860] ss:$8 sps:$4 sm:$0xff]   ;;  %v4890_v5 = vld [vmem:[%s6250_s1 + $0x374] ss:$8 sps:$4 sm:$0xff]  }
  0xa9   : > { %2812 = vmatprep.subr.bf16.mxu0 %v4794_v21  ;;  %v4893_v21 = vld [vmem:[%s6250_s1 + $0x874] ss:$8 sps:$4 sm:$0xff]  }
  0xab   : > { %1161 = vmatpush1.bf16.msra.mxu1 %v4789_v6  ;;  %v4947_v6 = vld [vmem:[%s5245_s28 + $0x34] ss:$8 sps:$4 sm:$0xff]  }
  0xac   : > { %2813 = vmatpush1.bf16.msra.mxu0 %v4792_v7  ;;  %1162 = vmatprep.subr.bf16.mxu1 %v4799_v8  ;;  %v4888_v7 = vld [vmem:[%s6250_s1 + $0x370] ss:$8 sps:$4 sm:$0xff]  }
  0xad   : > { %2814 = vmatprep.subr.bf16.mxu0 %v4804_v9  ;;  %v4891_v8 = vld [vmem:[%s6250_s1 + $0x870] ss:$8 sps:$4 sm:$0xff]   ;;  %v4896_v9 = vld [vmem:[%s6250_s1 + $0x384] ss:$8 sps:$4 sm:$0xff]  }
  0xaf   : > { %1163 = vmatpush1.bf16.msra.mxu1 %v4797_v10  ;;  %v4899_v10 = vld [vmem:[%s6250_s1 + $0x884] ss:$8 sps:$4 sm:$0xff]  }
  0xb0   : > { %2815 = vmatpush1.bf16.msra.mxu0 %v4802_v11  ;;  %1164 = vmatprep.subr.bf16.mxu1 %v4809_v12  ;;  %v4894_v11 = vld [vmem:[%s6250_s1 + $0x380] ss:$8 sps:$4 sm:$0xff]  }
  0xb1   : > { %2816 = vmatprep.subr.bf16.mxu0 %v4812_v13  ;;  %v4897_v12 = vld [vmem:[%s6250_s1 + $0x880] ss:$8 sps:$4 sm:$0xff]   ;;  %v4902_v13 = vld [vmem:[%s6250_s1 + $0x394] ss:$8 sps:$4 sm:$0xff]  }
  0xb3   : > { %1165 = vmatpush1.bf16.msra.mxu1 %v4807_v14  ;;  %v4900_v14 = vld [vmem:[%s6250_s1 + $0x390] ss:$8 sps:$4 sm:$0xff]  }
  0xb4   : > { %2817 = vmatpush1.bf16.msra.mxu0 %v4810_v15  ;;  %1166 = vmatprep.subr.bf16.mxu1 %v4817_v16  ;;  %v4903_v15 = vld [vmem:[%s6250_s1 + $0x890] ss:$8 sps:$4 sm:$0xff]   ;;  %v4908_v16 = vld [vmem:[%s6250_s1 + $0x3a4] ss:$8 sps:$4 sm:$0xff]  }
  0xb5   : > { %2818 = vmatprep.subr.bf16.mxu0 %v4822_v17  ;;  %v4911_v17 = vld [vmem:[%s6250_s1 + $0x8a4] ss:$8 sps:$4 sm:$0xff]  }
  0xb7   : > { %1167 = vmatpush1.bf16.msra.mxu1 %v4815_v19  ;;  %v4906_v19 = vld [vmem:[%s6250_s1 + $0x3a0] ss:$8 sps:$4 sm:$0xff]  }
  0xb8   : > { %2819 = vmatpush1.bf16.msra.mxu0 %v4820_v20  ;;  %1168 = vmatprep.subr.bf16.mxu1 %v4827_v22  ;;  %v4909_v20 = vld [vmem:[%s6250_s1 + $0x8a0] ss:$8 sps:$4 sm:$0xff]   ;;  %v4914_v22 = vld [vmem:[%s6250_s1 + $0x3b4] ss:$8 sps:$4 sm:$0xff]  }
  0xb9   : > { %2820 = vmatprep.subr.bf16.mxu0 %v4830_v23  ;;  %v4917_v23 = vld [vmem:[%s6250_s1 + $0x8b4] ss:$8 sps:$4 sm:$0xff]  }
  0xbb   : > { %1169 = vmatpush1.bf16.msra.mxu1 %v4825_v26  ;;  %v4912_v26 = vld [vmem:[%s6250_s1 + $0x3b0] ss:$8 sps:$4 sm:$0xff]  }
  0xbc   : > { %2821 = vmatpush1.bf16.msra.mxu0 %v4828_v27  ;;  %1170 = vmatprep.subr.bf16.mxu1 %v4833_v28  ;;  %v4915_v27 = vld [vmem:[%s6250_s1 + $0x8b0] ss:$8 sps:$4 sm:$0xff]   ;;  %v4920_v28 = vld [vmem:[%s6250_s1 + $0x3c4] ss:$8 sps:$4 sm:$0xff]  }
  0xbd   : > { %2822 = vmatprep.subr.bf16.mxu0 %v4838_v29  ;;  %v4923_v29 = vld [vmem:[%s6250_s1 + $0x8c4] ss:$8 sps:$4 sm:$0xff]  }
  0xbf   : > { %1171 = vmatpush1.bf16.msra.mxu1 %v4831_v31  ;;  %v4918_v31 = vld [vmem:[%s6250_s1 + $0x3c0] ss:$8 sps:$4 sm:$0xff]  }
  0xc0   : > { %2823 = vmatpush1.bf16.msra.mxu0 %v4836_v32  ;;  %1172 = vmatprep.subr.bf16.mxu1 %v4842_v36  ;;  %v4921_v32 = vld [vmem:[%s6250_s1 + $0x8c0] ss:$8 sps:$4 sm:$0xff]   ;;  %v4926_v36 = vld [vmem:[%s6250_s1 + $0x3d4] ss:$8 sps:$4 sm:$0xff]  }
  0xc1   : > { %2824 = vmatprep.subr.bf16.mxu0 %v4845_v37  ;;  %v4929_v37 = vld [vmem:[%s6250_s1 + $0x8d4] ss:$8 sps:$4 sm:$0xff]  }
  0xc3   : > { %1173 = vmatpush1.bf16.msra.mxu1 %v4840_v41  ;;  %v4924_v41 = vld [vmem:[%s6250_s1 + $0x3d0] ss:$8 sps:$4 sm:$0xff]  }
  0xc4   : > { %2825 = vmatpush1.bf16.msra.mxu0 %v4843_v42  ;;  %1472 = vmatprep.subr.bf16.mxu1 %v4848_v44  ;;  %v4927_v42 = vld [vmem:[%s6250_s1 + $0x8d0] ss:$8 sps:$4 sm:$0xff]   ;;  %v4934_v44 = vld [vmem:[%s6250_s1 + $0x3e4] ss:$8 sps:$4 sm:$0xff]  }
  0xc5   : > { %3125 = vmatprep.subr.bf16.mxu0 %v4851_v45  ;;  %v4938_v45 = vld [vmem:[%s6250_s1 + $0x8e4] ss:$8 sps:$4 sm:$0xff]  }
  0xc6   : > { %1175 = vmatmul.mubr.bf16.vlgmr.msra.gmra.mrb[0].mxu1 %v5587_v34  ;;  %v4858_v34 = vld [vmem:[%s6250_s1 + $0x320] ss:$8 sps:$4 sm:$0xff]  }
  0xc7   : > { %2827 = vmatmul.mubr.bf16.vlgmr.msra.gmra.mrb[0].mxu0 %v5371_v25  ;;  %1473 = vmatpush1.bf16.msra.mxu1 %v4846_v46  ;;  %v4863_v25 = vld [vmem:[%s6250_s1 + $0x824] ss:$8 sps:$4 sm:$0xff]   ;;  %v4932_v46 = vld [vmem:[%s6250_s1 + $0x3e0] ss:$8 sps:$4 sm:$0xff]  }
  0xc8   : > { %3126 = vmatpush1.bf16.msra.mxu0 %v4849_v47  ;;  %1474 = vmatprep.subr.bf16.mxu1 %v4854_v50  ;;  %v4936_v47 = vld [vmem:[%s6250_s1 + $0x8e0] ss:$8 sps:$4 sm:$0xff]   ;;  %v4941_v50 = vld [vmem:[%s6250_s1 + $0x3f4] ss:$8 sps:$4 sm:$0xff]  }
  0xc9   : > { %3127 = vmatprep.subr.bf16.mxu0 %v4857_v52  ;;  %2836 = vmatprep.mubr.bf16.mxu0 %v5389_v30  ;;  %v4869_v30 = vld [vmem:[%s6250_s1 + $0x834] ss:$8 sps:$4 sm:$0xff]  }
  0xca   : > { %1184 = vmatprep.mubr.bf16.mxu1 %v5599_v38  ;;  %v4864_v38 = vld [vmem:[%s6250_s1 + $0x330] ss:$8 sps:$4 sm:$0xff]   ;;  %v4944_v52 = vld [vmem:[%s6250_s1 + $0x8f4] ss:$8 sps:$4 sm:$0xff]  }
  0xcb   : > { %1475 = vmatpush1.bf16.msra.mxu1 %v4852_v54  ;;  %v4939_v54 = vld [vmem:[%s6250_s1 + $0x3f0] ss:$8 sps:$4 sm:$0xff]  }
  0xcc   : > { %3128 = vmatpush1.bf16.msra.mxu0 %v4855_v55  ;;  %1476 = vmatprep.subr.bf16.mxu1 %v4860_v56  ;;  %v4942_v55 = vld [vmem:[%s6250_s1 + $0x8f0] ss:$8 sps:$4 sm:$0xff]   ;;  %v4950_v56 = vld [vmem:[%s6250_s1 + $0x404] ss:$8 sps:$4 sm:$0xff]  }
  0xcd   : > { %3129 = vmatprep.subr.bf16.mxu0 %v4863_v25  ;;  %v4953_v25 = vld [vmem:[%s6253_s4 + $0x4] ss:$8 sps:$4 sm:$0xff]  }
  0xce   : > { %1185 = vmatmul.mubr.bf16.gmra.mrb[4].mxu1 %v5627_v48  ;;  %v4873_v48 = vld [vmem:[%s6250_s1 + $0x840] ss:$8 sps:$4 sm:$0xff]  }
  0xcf   : > { %2837 = vmatmul.mubr.bf16.gmra.mrb[4].mxu0 %v5398_v33  ;;  %1477 = vmatpush1.bf16.msra.mxu1 %v4858_v34  ;;  %v4870_v33 = vld [vmem:[%s6250_s1 + $0x340] ss:$8 sps:$4 sm:$0xff]   ;;  %v4945_v34 = vld [vmem:[%s5245_s28 + $0x30] ss:$8 sps:$4 sm:$0xff]  }
  0xd0   : > { %3130 = vmatpush1.bf16.msra.mxu0 %v4861_v57  ;;  %1478 = vmatprep.subr.bf16.mxu1 %v4866_v58  ;;  %v4948_v57 = vld [vmem:[%s6250_s1 + $0x400] ss:$8 sps:$4 sm:$0xff]  }
  0xd1   : > { %3131 = vmatprep.subr.bf16.mxu0 %v4869_v30  ;;  %2846 = vmatprep.mubr.bf16.mxu0 %v5419_v39  ;;  %v4881_v39 = vld [vmem:[%s6250_s1 + $0x854] ss:$8 sps:$4 sm:$0xff]   ;;  %v4951_v58 = vld [vmem:[%s6253_s4] ss:$8 sps:$4 sm:$0xff]  }
  0xd2   : > { %1194 = vmatprep.mubr.bf16.mxu1 %v5456_v51  ;;  %v4930_v51 = vld [vmem:[%s5245_s28 + $0xd4] ss:$8 sps:$4 sm:$0xff]  }
  0xd3   : > { %1479 = vmatpush1.bf16.msra.mxu1 %v4864_v38  ;;  %v4956_v30 = vld [vmem:[%s6250_s1 + $0x414] ss:$8 sps:$4 sm:$0xff]  }
  0xd4   : > { %3132 = vmatpush1.bf16.msra.mxu0 %v4867_v59  ;;  %1480 = vmatprep.subr.bf16.mxu1 %v4872_v61  ;;  %v4959_v38 = vld [vmem:[%s6253_s4 + $0x14] ss:$8 sps:$4 sm:$0xff]   ;;  %v4954_v61 = vld [vmem:[%s6250_s1 + $0x410] ss:$8 sps:$4 sm:$0xff]  }
  0xd5   : > { %3133 = vmatprep.subr.bf16.mxu0 %v4875_v62  ;;  %v5006_v59 = vld [vmem:[%s5245_s28 + $0x54] ss:$8 sps:$4 sm:$0xff]   ;;  %v4957_v62 = vld [vmem:[%s6253_s4 + $0x10] ss:$8 sps:$4 sm:$0xff]  }
  0xd6   : > { %1195 = vmatmul.mubr.bf16.gmra.mrb[8].mxu1 %v5548_v18  ;;  %v4935_v18 = vld [vmem:[%s5245_s28 + $0xd0] ss:$8 sps:$4 sm:$0xff]  }
  0xd7   : > { %2847 = vmatmul.mubr.bf16.gmra.mrb[8].mxu0 %v5432_v43  ;;  %1481 = vmatpush1.bf16.msra.mxu1 %v4870_v33  ;;  %v4882_v43 = vld [vmem:[%s6250_s1 + $0x360] ss:$8 sps:$4 sm:$0xff]   ;;  %v4962_v33 = vld [vmem:[%s6250_s1 + $0x424] ss:$8 sps:$4 sm:$0xff]  }
  0xd8   : > { %3134 = vmatpush1.bf16.msra.mxu0 %v4873_v48  ;;  %1482 = vmatprep.subr.bf16.mxu1 %v4878_v63  ;;  %v5008_v48 = vld [vmem:[%s5245_s28 + $0x50] ss:$8 sps:$4 sm:$0xff]   ;;  %v4960_v63 = vld [vmem:[%s6250_s1 + $0x420] ss:$8 sps:$4 sm:$0xff]  }
  0xd9   : > { %3135 = vmatprep.subr.bf16.mxu0 %v4881_v39  ;;  %2856 = vmatprep.mubr.bf16.mxu0 %v4930_v51  ;;  %v4963_v39 = vld [vmem:[%s6253_s4 + $0x20] ss:$8 sps:$4 sm:$0xff]   ;;  %v4968_v51 = vld [vmem:[%s6250_s1 + $0x434] ss:$8 sps:$4 sm:$0xff]  }
  0xda   : > { %1204 = vmatprep.mubr.bf16.mxu1 %v5563_v24 }
  0xdb   : > { %1483 = vmatpush1.bf16.msra.mxu1 %v4876_v0  ;;  %v5016_v0 = vld [vmem:[%s5245_s28 + $0x74] ss:$8 sps:$4 sm:$0xff]  }
  0xdc   : > { %3136 = vmatpush1.bf16.msra.mxu0 %v4879_v1  ;;  %1484 = vmatprep.subr.bf16.mxu1 %v4884_v2  ;;  %v4966_v1 = vld [vmem:[%s6250_s1 + $0x430] ss:$8 sps:$4 sm:$0xff]  }
  0xdd   : > { %3137 = vmatprep.subr.bf16.mxu0 %v4887_v3  ;;  %v4969_v2 = vld [vmem:[%s6253_s4 + $0x30] ss:$8 sps:$4 sm:$0xff]   ;;  %v4974_v3 = vld [vmem:[%s6250_s1 + $0x444] ss:$8 sps:$4 sm:$0xff]  }
  0xde   : > { %1205 = vmatmul.mubr.bf16.gmra.mrb[12].mxu1 %v5590_v35 }
  0xdf   : > { %2857 = vmatmul.mubr.bf16.gmra.mrb[12].mxu0 %v4935_v18  ;;  %1485 = vmatpush1.bf16.msra.mxu1 %v4882_v43  ;;  %v5018_v43 = vld [vmem:[%s5245_s28 + $0x70] ss:$8 sps:$4 sm:$0xff]   ;;  %v4972_v18 = vld [vmem:[%s6250_s1 + $0x440] ss:$8 sps:$4 sm:$0xff]  }
  0xe0   : > { %3138 = vmatpush1.bf16.msra.mxu0 %v4885_v4  ;;  %1486 = vmatprep.subr.bf16.mxu1 %v4890_v5  ;;  %v4975_v4 = vld [vmem:[%s6253_s4 + $0x40] ss:$8 sps:$4 sm:$0xff]   ;;  %v4980_v5 = vld [vmem:[%s6250_s1 + $0x454] ss:$8 sps:$4 sm:$0xff]  }
  0xe1   : > { %3139 = vmatprep.subr.bf16.mxu0 %v4893_v21  ;;  %3157 = vmatprep.mubr.bf16.mxu0 %v5563_v24  ;;  %v4905_v24 = vld [vmem:[%s6250_s1 + $0x894] ss:$8 sps:$4 sm:$0xff]   ;;  %v4984_v21 = vld [vmem:[%s5245_s28 + $0xe4] ss:$8 sps:$4 sm:$0xff]  }
  0xe2   : > { %1504 = vmatprep.mubr.bf16.mxu1 %v4947_v6  ;;  %v5026_v6 = vld [vmem:[%s5245_s28 + $0x94] ss:$8 sps:$4 sm:$0xff]  }
  0xe3   : > { %1487 = vmatpush1.bf16.msra.mxu1 %v4888_v7  ;;  %v4978_v7 = vld [vmem:[%s6250_s1 + $0x450] ss:$8 sps:$4 sm:$0xff]  }
  0xe4   : > { %3140 = vmatpush1.bf16.msra.mxu0 %v4891_v8  ;;  %1488 = vmatprep.subr.bf16.mxu1 %v4896_v9  ;;  %v4981_v8 = vld [vmem:[%s6253_s4 + $0x50] ss:$8 sps:$4 sm:$0xff]   ;;  %v4988_v9 = vld [vmem:[%s6250_s1 + $0x464] ss:$8 sps:$4 sm:$0xff]  }
  0xe5   : > { %3141 = vmatprep.subr.bf16.mxu0 %v4899_v10  ;;  %v4989_v10 = vld [vmem:[%s5245_s28 + $0xe0] ss:$8 sps:$4 sm:$0xff]  }
  0xe7   : > { %1489 = vmatpush1.bf16.msra.mxu1 %v4894_v11  ;;  %v5028_v11 = vld [vmem:[%s5245_s28 + $0x90] ss:$8 sps:$4 sm:$0xff]  }
  0xe8   : > { %3142 = vmatpush1.bf16.msra.mxu0 %v4897_v12  ;;  %1490 = vmatprep.subr.bf16.mxu1 %v4902_v13  ;;  %v4986_v12 = vld [vmem:[%s6250_s1 + $0x460] ss:$8 sps:$4 sm:$0xff]  }
  0xe9   : > { %3143 = vmatprep.subr.bf16.mxu0 %v4905_v24  ;;  %v4990_v13 = vld [vmem:[%s6253_s4 + $0x60] ss:$8 sps:$4 sm:$0xff]   ;;  %v4995_v24 = vld [vmem:[%s6250_s1 + $0x474] ss:$8 sps:$4 sm:$0xff]  }
  0xeb   : > { %1491 = vmatpush1.bf16.msra.mxu1 %v4900_v14  ;;  %v4998_v14 = vld [vmem:[%s6253_s4 + $0x74] ss:$8 sps:$4 sm:$0xff]  }
  0xec   : > { %3144 = vmatpush1.bf16.msra.mxu0 %v4903_v15  ;;  %1492 = vmatprep.subr.bf16.mxu1 %v4908_v16  ;;  %v5038_v15 = vld [vmem:[%s5245_s28 + $0x44] ss:$8 sps:$4 sm:$0xff]   ;;  %v4993_v16 = vld [vmem:[%s6250_s1 + $0x470] ss:$8 sps:$4 sm:$0xff]  }
  0xed   : > { %3145 = vmatprep.subr.bf16.mxu0 %v4911_v17  ;;  %v4996_v17 = vld [vmem:[%s6253_s4 + $0x70] ss:$8 sps:$4 sm:$0xff]  }
  0xef   : > { %1493 = vmatpush1.bf16.msra.mxu1 %v4906_v19  ;;  %v5001_v19 = vld [vmem:[%s6250_s1 + $0x484] ss:$8 sps:$4 sm:$0xff]  }
  0xf0   : > { %3146 = vmatpush1.bf16.msra.mxu0 %v4909_v20  ;;  %1494 = vmatprep.subr.bf16.mxu1 %v4914_v22  ;;  %v5056_v20 = vmov 0   ;;  %v5002_v22 = vld [vmem:[%s5871_s18] sm:$0xff]  }
  0xf1   : > { %3147 = vmatprep.subr.bf16.mxu0 %v4917_v23  ;;  %v4999_v23 = vld [vmem:[%s6250_s1 + $0x480] ss:$8 sps:$4 sm:$0xff]  }
  0xf3   : > { %1495 = vmatpush1.bf16.msra.mxu1 %v4912_v26  ;;  %v5005_v26 = vld [vmem:[%s6250_s1 + $0x494] ss:$8 sps:$4 sm:$0xff]  }
  0xf4   : > { %3148 = vmatpush1.bf16.msra.mxu0 %v4915_v27  ;;  %1496 = vmatprep.subr.bf16.mxu1 %v4920_v28  ;;  %v5003_v27 = vld [vmem:[%s6250_s1 + $0x490] ss:$8 sps:$4 sm:$0xff]   ;;  %v5011_v28 = vld [vmem:[%s6250_s1 + $0x4a4] ss:$8 sps:$4 sm:$0xff]  }
  0xf5   : > { %3149 = vmatprep.subr.bf16.mxu0 %v4923_v29  ;;  %v5012_v29 = vld [vmem:[%s5871_s18 + $0x8] sm:$0xff]  }
  0xf7   : > { %1497 = vmatpush1.bf16.msra.mxu1 %v4918_v31  ;;  %v5009_v31 = vld [vmem:[%s6250_s1 + $0x4a0] ss:$8 sps:$4 sm:$0xff]  }
  0xf8   : > { %3150 = vmatpush1.bf16.msra.mxu0 %v4921_v32  ;;  %1498 = vmatprep.subr.bf16.mxu1 %v4926_v36  ;;  %v5015_v32 = vld [vmem:[%s6250_s1 + $0x4b4] ss:$8 sps:$4 sm:$0xff]   ;;  %v5013_v36 = vld [vmem:[%s6250_s1 + $0x4b0] ss:$8 sps:$4 sm:$0xff]  }
  0xf9   : > { %3151 = vmatprep.subr.bf16.mxu0 %v4929_v37  ;;  %v5021_v37 = vld [vmem:[%s6250_s1 + $0x4c4] ss:$8 sps:$4 sm:$0xff]  }
  0xfb   : > { %1499 = vmatpush1.bf16.msra.mxu1 %v4924_v41  ;;  %v5022_v41 = vld [vmem:[%s5871_s18 + $0x10] sm:$0xff]  }
  0xfc   : > { %3152 = vmatpush1.bf16.msra.mxu0 %v4927_v42  ;;  %1500 = vmatprep.subr.bf16.mxu1 %v4934_v44  ;;  %v5019_v42 = vld [vmem:[%s6250_s1 + $0x4c0] ss:$8 sps:$4 sm:$0xff]   ;;  %v5025_v44 = vld [vmem:[%s6250_s1 + $0x4d4] ss:$8 sps:$4 sm:$0xff]  }
  0xfd   : > { %3153 = vmatprep.subr.bf16.mxu0 %v4938_v45  ;;  %v5023_v45 = vld [vmem:[%s6250_s1 + $0x4d0] ss:$8 sps:$4 sm:$0xff]  }
  0xff   : > { %1501 = vmatpush1.bf16.msra.mxu1 %v4932_v46  ;;  %v5031_v46 = vld [vmem:[%s6250_s1 + $0x4e4] ss:$8 sps:$4 sm:$0xff]  }
 0x100   : > { %3154 = vmatpush1.bf16.msra.mxu0 %v4936_v47  ;;  %1502 = vmatprep.subr.bf16.mxu1 %v4941_v50  ;;  %v5032_v47 = vld [vmem:[%s5871_s18 + $0x18] sm:$0xff]   ;;  %v5029_v50 = vld [vmem:[%s6250_s1 + $0x4e0] ss:$8 sps:$4 sm:$0xff]  }
 0x101   : > { %3155 = vmatprep.subr.bf16.mxu0 %v4944_v52  ;;  %v5035_v52 = vld [vmem:[%s6250_s1 + $0x4f4] ss:$8 sps:$4 sm:$0xff]  }
 0x103   : > { %1503 = vmatpush1.bf16.msra.mxu1 %v4939_v54  ;;  %v5033_v54 = vld [vmem:[%s6250_s1 + $0x4f0] ss:$8 sps:$4 sm:$0xff]  }
 0x104   : > { %3156 = vmatpush1.bf16.msra.mxu0 %v4942_v55  ;;  %1803 = vmatprep.subr.bf16.mxu1 %v4950_v56  ;;  %v5036_v55 = vld [vmem:[%s5245_s28 + $0x40] ss:$8 sps:$4 sm:$0xff]   ;;  %v5039_v56 = vld [vmem:[%s5245_s28 + $0x64] ss:$8 sps:$4 sm:$0xff]  }
 0x105   : > { %3370 = vmatprep.subr.bf16.mxu0 %v4953_v25  ;;  %v5041_v25 = vld [vmem:[%s5245_s28 + $0x60] ss:$8 sps:$4 sm:$0xff]  }
 0x106   : > { %1505 = vmatmul.mubr.bf16.vlgmr.msra.gmra.mrb[0].mxu1 %v4945_v34  ;;  %v5042_v34 = vld [vmem:[%s5245_s28 + $0x84] ss:$8 sps:$4 sm:$0xff]  }
 0x107   : > { %3158 = vmatmul.mubr.bf16.vlgmr.msra.gmra.mrb[0].mxu0 %v5590_v35  ;;  %1804 = vmatpush1.bf16.msra.mxu1 %v4948_v57  ;;  %v4965_v35 = vld [vmem:[%s6253_s4 + $0x24] ss:$8 sps:$4 sm:$0xff]   ;;  %v5044_v57 = vld [vmem:[%s5245_s28 + $0x80] ss:$8 sps:$4 sm:$0xff]  }
 0x108   : > { %3371 = vmatpush1.bf16.msra.mxu0 %v4951_v58  ;;  %1805 = vmatprep.subr.bf16.mxu1 %v4956_v30  ;;  %v5045_v58 = vld [vmem:[%s5245_s28 + $0xa4] ss:$8 sps:$4 sm:$0xff]   ;;  %v5047_v30 = vld [vmem:[%s5245_s28 + $0xa0] ss:$8 sps:$4 sm:$0xff]  }
 0x109   : > { %3372 = vmatprep.subr.bf16.mxu0 %v4959_v38  ;;  %3167 = vmatprep.mubr.bf16.mxu0 %v5602_v40  ;;  %v4971_v40 = vld [vmem:[%s6253_s4 + $0x34] ss:$8 sps:$4 sm:$0xff]  }
 0x10a   : > { %1514 = vmatprep.mubr.bf16.mxu1 %v5006_v59 }
 0x10b   : > { %1806 = vmatpush1.bf16.msra.mxu1 %v4954_v61 }
 0x10c   : > { %3373 = vmatpush1.bf16.msra.mxu0 %v4957_v62  ;;  %1807 = vmatprep.subr.bf16.mxu1 %v4962_v33 }
 0x10d   : > { %3374 = vmatprep.subr.bf16.mxu0 %v4965_v35 }
 0x10e   : > { %1515 = vmatmul.mubr.bf16.gmra.mrb[4].mxu1 %v5008_v48 }
 0x10f   : > { %3168 = vmatmul.mubr.bf16.gmra.mrb[4].mxu0 %v5630_v49  ;;  %1808 = vmatpush1.bf16.msra.mxu1 %v4960_v63  ;;  %v4977_v49 = vld [vmem:[%s6253_s4 + $0x44] ss:$8 sps:$4 sm:$0xff]  }
 0x110   : > { %3375 = vmatpush1.bf16.msra.mxu0 %v4963_v39  ;;  %1809 = vmatprep.subr.bf16.mxu1 %v4968_v51 }
 0x111   : > { %3376 = vmatprep.subr.bf16.mxu0 %v4971_v40  ;;  %3177 = vmatprep.mubr.bf16.mxu0 %v5639_v53  ;;  %v4983_v53 = vld [vmem:[%s6253_s4 + $0x54] ss:$8 sps:$4 sm:$0xff]   ;;  %v3216_v40 = vlaneseq }
 0x112   : > { %1524 = vmatprep.mubr.bf16.mxu1 %v5016_v0 }
 0x113   : > { %1810 = vmatpush1.bf16.msra.mxu1 %v4966_v1 }
 0x114   : > { %3377 = vmatpush1.bf16.msra.mxu0 %v4969_v2  ;;  %1811 = vmatprep.subr.bf16.mxu1 %v4974_v3  ;;  %v3217_v2 = vshrl.u32 %v3216_v40, 7 }
 0x115   : > { %3378 = vmatprep.subr.bf16.mxu0 %v4977_v49 }
 0x116   : > { %1525 = vmatmul.mubr.bf16.gmra.mrb[8].mxu1 %v5018_v43  ;;  %v3218_v43 = vsub.s32 0, %v3217_v2 }
 0x117   : > { %3178 = vmatmul.mubr.bf16.gmra.mrb[8].mxu0 %v5664_v60  ;;  %1812 = vmatpush1.bf16.msra.mxu1 %v4972_v18  ;;  %v4992_v60 = vld [vmem:[%s6253_s4 + $0x64] ss:$8 sps:$4 sm:$0xff]  }
 0x118   : > { %3379 = vmatpush1.bf16.msra.mxu0 %v4975_v4  ;;  %1813 = vmatprep.subr.bf16.mxu1 %v4980_v5  ;;  %v3214_v4 = vld [vmem:[%s6251_s2] sm:$0x3]  ;;  %v3222_v5 = vsub.s32 1, %v3217_v2 }
 0x119   : > { %3380 = vmatprep.subr.bf16.mxu0 %v4983_v53  ;;  %3187 = vmatprep.mubr.bf16.mxu0 %v4984_v21  ;;  %v6181_v21 = vrot.slane %v3214_v4, %v3218_v43 }
 0x11a   : > { %1534 = vmatprep.mubr.bf16.mxu1 %v5026_v6  ;;  %v3459_v6 = vld [vmem:[%s6254_s5] sm:$0x3] }
 0x11b   : > { %1814 = vmatpush1.bf16.msra.mxu1 %v4978_v7  ;;  %v6186_v7 = vrot.slane %v3214_v4, %v3222_v5 }
 0x11c   : > { %3381 = vmatpush1.bf16.msra.mxu0 %v4981_v8  ;;  %1815 = vmatprep.subr.bf16.mxu1 %v4988_v9 }
 0x11d   : > { %3382 = vmatprep.subr.bf16.mxu0 %v4992_v60  ;;  %v6189_v60 = vrot.slane %v3459_v6, %v3218_v43 }
 0x11e   : > { %1535 = vmatmul.mubr.bf16.gmra.mrb[12].mxu1 %v5028_v11 }
 0x11f   : > { %3188 = vmatmul.mubr.bf16.gmra.mrb[12].mxu0 %v4989_v10  ;;  %1816 = vmatpush1.bf16.msra.mxu1 %v4986_v12  ;;  %v6192_v12 = vrot.slane %v3459_v6, %v3222_v5 }
 0x120   : > { %3383 = vmatpush1.bf16.msra.mxu0 %v4990_v13  ;;  %1817 = vmatprep.subr.bf16.mxu1 %v4995_v24 }
 0x121   : > { %3384 = vmatprep.subr.bf16.mxu0 %v4998_v14  ;;  %3402 = vmatprep.mubr.bf16.mxu0 %v5056_v20 }
 0x122   : > { %1835 = vmatprep.mubr.bf16.mxu1 %v5038_v15 }
 0x123   : > { %1818 = vmatpush1.bf16.msra.mxu1 %v4993_v16 }
 0x124   : > { %3385 = vmatpush1.bf16.msra.mxu0 %v4996_v17  ;;  %1819 = vmatprep.subr.bf16.mxu1 %v5001_v19 }
 0x127   : > { %3403 = vmatmul.mubr.bf16.vlgmr.msra.gmra.mrb[0].mxu0 %v5002_v22  ;;  %1820 = vmatpush1.bf16.msra.mxu1 %v4999_v23 }
 0x128   : > { %3412 = vmatprep.mubr.bf16.mxu0 %v5056_v20  ;;  %1821 = vmatprep.subr.bf16.mxu1 %v5005_v26 }
 0x12b   : > { %1822 = vmatpush1.bf16.msra.mxu1 %v5003_v27 }
 0x12c   : > { %1823 = vmatprep.subr.bf16.mxu1 %v5011_v28 }
 0x12f   : > { %3413 = vmatmul.mubr.bf16.gmra.mrb[4].mxu0 %v5012_v29  ;;  %1824 = vmatpush1.bf16.msra.mxu1 %v5009_v31 }
 0x130   : > { %3422 = vmatprep.mubr.bf16.mxu0 %v5056_v20  ;;  %1825 = vmatprep.subr.bf16.mxu1 %v5015_v32 }
 0x133   : > { %1826 = vmatpush1.bf16.msra.mxu1 %v5013_v36 }
 0x134   : > { %1827 = vmatprep.subr.bf16.mxu1 %v5021_v37 }
 0x137   : > { %3423 = vmatmul.mubr.bf16.gmra.mrb[8].mxu0 %v5022_v41  ;;  %1828 = vmatpush1.bf16.msra.mxu1 %v5019_v42 }
 0x138   : > { %3432 = vmatprep.mubr.bf16.mxu0 %v5056_v20  ;;  %1829 = vmatprep.subr.bf16.mxu1 %v5025_v44 }
 0x13b   : > { %1830 = vmatpush1.bf16.msra.mxu1 %v5023_v45 }
 0x13c   : > { %1831 = vmatprep.subr.bf16.mxu1 %v5031_v46 }
 0x13f   : > { %3433 = vmatmul.mubr.bf16.gmra.mrb[12].mxu0 %v5032_v47  ;;  %1832 = vmatpush1.bf16.msra.mxu1 %v5029_v50 }
 0x140   : > { %1833 = vmatprep.subr.bf16.mxu1 %v5035_v52 }
 0x143   : > { %1834 = vmatpush1.bf16.msra.mxu1 %v5033_v54 }
 0x146   : > { %1836 = vmatmul.mubr.bf16.vlgmr.msra.gmra.mrb[0].mxu1 %v5036_v55 }
 0x147   : > { %1845 = vmatprep.mubr.bf16.mxu1 %v5039_v56 }
 0x14e   : > { %1846 = vmatmul.mubr.bf16.gmra.mrb[4].mxu1 %v5041_v25 }
 0x14f   : > { %1855 = vmatprep.mubr.bf16.mxu1 %v5042_v34 }
 0x156   : > { %1856 = vmatmul.mubr.bf16.gmra.mrb[8].mxu1 %v5044_v57 }
 0x157   : > { %1865 = vmatprep.mubr.bf16.mxu1 %v5045_v58 }
 0x15e   : > { %1866 = vmatmul.mubr.bf16.gmra.mrb[12].mxu1 %v5047_v30 }
 0x1fa   : > { %v3404_v38 = vpop.f32.mrb[0].mxu0 }
 0x1fb   : > { %v3406_v59 = vpop.f32.mrb[1].mxu0 }
 0x1fc   : > { %v3408_v61 = vpop.f32.mrb[2].mxu0 }
 0x1fd   : > { %v3410_v62 = vpop.f32.mrb[3].mxu0 }
 0x202   : > { %v3414_v33 = vpop.f32.mrb[4].mxu0 }
 0x203   : > { %v3416_v35 = vpop.f32.mrb[5].mxu0 }
 0x204   : > { %v3418_v48 = vpop.f32.mrb[6].mxu0 }
 0x205   : > { %v3420_v63 = vpop.f32.mrb[7].mxu0 }
 0x20a   : > { %v6162_v39 = vpop.f32.mrb[8].mxu0 }
 0x20b   : > { %v6164_v51 = vpop.f32.mrb[9].mxu0 }
 0x20c   : > { %v6166_v0 = vpop.f32.mrb[10].mxu0 }
 0x20d   : > { %v6168_v1 = vpop.f32.mrb[11].mxu0 }
 0x212   : > { %v6170_v3 = vpop.f32.mrb[12].mxu0 }
 0x213   : > { %v6172_v49 = vpop.f32.mrb[13].mxu0 }
 0x214   : > { %v6174_v18 = vpop.f32.mrb[14].mxu0 }
 0x215   : > { %v6179_v53 = vpop.f32.mrb[15].mxu0 }
 0x219   : > { %v1837_v8 = vpop.f32.mrb[0].mxu1 }
 0x21a   : > { %v4350_v9 = vadd.f32 %v6181_v21, %v1837_v8  ;;  %v1839_v10 = vpop.f32.mrb[1].mxu1 }
 0x21b   : > { %v4352_v11 = vadd.f32 %v6186_v7, %v1839_v10  ;;  %v1841_v13 = vpop.f32.mrb[2].mxu1 }
 0x21c   : > { %v4351_v24 = vadd.f32 %v4350_v9, %v3404_v38  ;;  %v4354_v14 = vadd.f32 %v6181_v21, %v1841_v13  ;;  %v1843_v15 = vpop.f32.mrb[3].mxu1 }
 0x21d   : > { %v4353_v16 = vadd.f32 %v4352_v11, %v3406_v59  ;;  %v4356_v17 = vadd.f32 %v6186_v7, %v1843_v15 }
 0x21e   : > { %v3471_v19 = vadd.f32 %v4351_v24, %v6189_v60  ;;  %v4355_v20 = vadd.f32 %v4354_v14, %v3408_v61 }
 0x21f   : > { %v3472_v22 = vadd.f32 %v4353_v16, %v6192_v12  ;;  %v4357_v23 = vadd.f32 %v4356_v17, %v3410_v62 }
 0x220   : > { %v3487_v26 = vmax.f32 %v3471_v19, 0.0  ;;  %v3473_v27 = vadd.f32 %v4355_v20, %v6189_v60 }
 0x221   : > { %v3488_v28 = vmax.f32 %v3472_v22, 0.0  ;;  %v3474_v29 = vadd.f32 %v4357_v23, %v6192_v12  ;;  %v1847_v31 = vpop.f32.mrb[4].mxu1 }
 0x222   : > { %v3489_v32 = vmax.f32 %v3473_v27, 0.0  ;;  %v4358_v36 = vadd.f32 %v6181_v21, %v1847_v31  ;;  %v1849_v37 = vpop.f32.mrb[5].mxu1 }
 0x223   : > { %v4342_v41 = vpack.c.bf16 %v3488_v28, %v3487_v26  ;;  %v3490_v42 = vmax.f32 %v3474_v29, 0.0  ;;  %v4360_v44 = vadd.f32 %v6186_v7, %v1849_v37  ;;  %v1851_v45 = vpop.f32.mrb[6].mxu1 }
 0x224   : > { %v4359_v46 = vadd.f32 %v4358_v36, %v3414_v33  ;;  %v4362_v47 = vadd.f32 %v6181_v21, %v1851_v45  ;;  %v1853_v50 = vpop.f32.mrb[7].mxu1 }
 0x225   : > { %3551 = vst [vmem:[%s6204_s15] sm:$0xff] %v4342_v41  ;;  %v4343_v52 = vpack.c.bf16 %v3490_v42, %v3489_v32  ;;  %v4361_v54 = vadd.f32 %v4360_v44, %v3416_v35  ;;  %v4364_v55 = vadd.f32 %v6186_v7, %v1853_v50 }
 0x226   : > { %v3475_v56 = vadd.f32 %v4359_v46, %v6189_v60  ;;  %v4363_v25 = vadd.f32 %v4362_v47, %v3418_v48 }
 0x227   : > { %3552 = vst [vmem:[%s6204_s15 + $0x8] sm:$0xff] %v4343_v52  ;;  %v3476_v34 = vadd.f32 %v4361_v54, %v6192_v12  ;;  %v4365_v57 = vadd.f32 %v4364_v55, %v3420_v63 }
 0x228   : > { %v3491_v58 = vmax.f32 %v3475_v56, 0.0  ;;  %v3477_v30 = vadd.f32 %v4363_v25, %v6189_v60 }
 0x229   : > { %v3492_v38 = vmax.f32 %v3476_v34, 0.0  ;;  %v3478_v59 = vadd.f32 %v4365_v57, %v6192_v12  ;;  %v1857_v61 = vpop.f32.mrb[8].mxu1 }
 0x22a   : > { %v3493_v62 = vmax.f32 %v3477_v30, 0.0  ;;  %v4366_v33 = vadd.f32 %v6181_v21, %v1857_v61  ;;  %v1859_v35 = vpop.f32.mrb[9].mxu1 }
 0x22b   : > { %v4344_v40 = vpack.c.bf16 %v3492_v38, %v3491_v58  ;;  %v3494_v2 = vmax.f32 %v3478_v59, 0.0  ;;  %v4368_v48 = vadd.f32 %v6186_v7, %v1859_v35  ;;  %v1861_v43 = vpop.f32.mrb[10].mxu1 }
 0x22c   : > { %v4367_v63 = vadd.f32 %v4366_v33, %v6162_v39  ;;  %v4370_v4 = vadd.f32 %v6181_v21, %v1861_v43  ;;  %v1863_v5 = vpop.f32.mrb[11].mxu1 }
 0x22d   : > { %3553 = vst [vmem:[%s6204_s15 + $0x10] sm:$0xff] %v4344_v40  ;;  %v4345_v6 = vpack.c.bf16 %v3494_v2, %v3493_v62  ;;  %v4369_v8 = vadd.f32 %v4368_v48, %v6164_v51  ;;  %v4372_v9 = vadd.f32 %v6186_v7, %v1863_v5 }
 0x22e   : > { %v3479_v10 = vadd.f32 %v4367_v63, %v6189_v60  ;;  %v4371_v11 = vadd.f32 %v4370_v4, %v6166_v0 }
 0x22f   : > { %3554 = vst [vmem:[%s6204_s15 + $0x18] sm:$0xff] %v4345_v6  ;;  %v3480_v13 = vadd.f32 %v4369_v8, %v6192_v12  ;;  %v4373_v24 = vadd.f32 %v4372_v9, %v6168_v1 }
 0x230   : > { %v3495_v39 = vmax.f32 %v3479_v10, 0.0  ;;  %v3481_v14 = vadd.f32 %v4371_v11, %v6189_v60 }
 0x231   : > { %v3496_v15 = vmax.f32 %v3480_v13, 0.0  ;;  %v3482_v16 = vadd.f32 %v4373_v24, %v6192_v12  ;;  %v1867_v17 = vpop.f32.mrb[12].mxu1 }
 0x232   : > { %v3497_v51 = vmax.f32 %v3481_v14, 0.0  ;;  %v4374_v19 = vadd.f32 %v6181_v21, %v1867_v17  ;;  %v1869_v20 = vpop.f32.mrb[13].mxu1 }
 0x233   : > { %v4346_v22 = vpack.c.bf16 %v3496_v15, %v3495_v39  ;;  %v3498_v0 = vmax.f32 %v3482_v16, 0.0  ;;  %v4376_v23 = vadd.f32 %v6186_v7, %v1869_v20  ;;  %v1871_v26 = vpop.f32.mrb[14].mxu1 }
 0x234   : > { %v4375_v1 = vadd.f32 %v4374_v19, %v6170_v3  ;;  %v4378_v27 = vadd.f32 %v6181_v21, %v1871_v26  ;;  %v1873_v28 = vpop.f32.mrb[15].mxu1 }
 0x235   : > { %3555 = vst [vmem:[%s6204_s15 + $0x20] sm:$0xff] %v4346_v22  ;;  %v4347_v29 = vpack.c.bf16 %v3498_v0, %v3497_v51  ;;  %v4377_v31 = vadd.f32 %v4376_v23, %v6172_v49  ;;  %v4380_v32 = vadd.f32 %v6186_v7, %v1873_v28 }
 0x236   : > { %v3483_v36 = vadd.f32 %v4375_v1, %v6189_v60  ;;  %v4379_v37 = vadd.f32 %v4378_v27, %v6174_v18 }
 0x237   : > { %3556 = vst [vmem:[%s6204_s15 + $0x28] sm:$0xff] %v4347_v29  ;;  %v3484_v41 = vadd.f32 %v4377_v31, %v6192_v12  ;;  %v4381_v3 = vadd.f32 %v4380_v32, %v6179_v53 }
 0x238   : > { %v3499_v42 = vmax.f32 %v3483_v36, 0.0  ;;  %v3485_v21 = vadd.f32 %v4379_v37, %v6189_v60 }
 0x239   : > { %v3500_v44 = vmax.f32 %v3484_v41, 0.0  ;;  %v3486_v45 = vadd.f32 %v4381_v3, %v6192_v12 }
 0x23a   : > { %v3501_v46 = vmax.f32 %v3485_v21, 0.0 }
 0x23b   : > { %v4348_v49 = vpack.c.bf16 %v3500_v44, %v3499_v42  ;;  %v3502_v47 = vmax.f32 %v3486_v45, 0.0 }
 0x23d   : > { %3557 = vst [vmem:[%s6204_s15 + $0x30] sm:$0xff] %v4348_v49  ;;  %v4349_v7 = vpack.c.bf16 %v3502_v47, %v3501_v46 }
 0x23f   : > { %3558 = vst [vmem:[%s6204_s15 + $0x38] sm:$0xff] %v4349_v7 }
 0x240 PF: > { %s16_s21 = sadd.s32 1, %s5054_s21  }
 0x241   : > { %p13_p4 = scmp.ge.s32.totalorder %s16_s21, 4  }
 0x243   :  { %15 = sbr.rel (!%p13_p4) target bundleno = 1 (0x1), region = 89 }

// kernel: st_gcn_forward.15
= control target key start
LH: loop header
LB: loop body
LE: loop exit
PB: predicated region body
PF: predicated region fallthrough
CT: control target
= control target key end

     0   :  { %vm1520_vm0 = vcmask 130048   ;;  %s4015_s1 = inlined_call_operand.vmem [shape: bf16[1296,256], index: 1, kind: input, shape index: {}]   ;;  %s4016_s0 = inlined_call_operand.vmem [shape: bf16[128,1296], index: 0, kind: input, shape index: {}]   ;;  %s4017_s2 = inlined_call_operand.vmem [shape: bf16[128,256], index: 2, kind: output, shape index: {}]  }
   0x1   :  { %v2822_v0 = vld [vmem:[%s4015_s1 + $0x4] ss:$8 sps:$4 sm:$0xff]   ;;  %v2826_v2 = vld [vmem:[%s4015_s1] ss:$8 sps:$4 sm:$0xff]   ;;  %v2828_v4 = vld [vmem:[%s4015_s1 + $0x14] ss:$8 sps:$4 sm:$0xff]  }
   0x2   :  { %v2824_v1 = vld [vmem:[%s4015_s1 + $0x304] ss:$8 sps:$4 sm:$0xff]   ;;  %1545 = vmatprep.subr.bf16.mxu1 %v2822_v0  ;;  %v2827_v3 = vld [vmem:[%s4015_s1 + $0x300] ss:$8 sps:$4 sm:$0xff]   ;;  %v2830_v5 = vld [vmem:[%s4015_s1 + $0x314] ss:$8 sps:$4 sm:$0xff]  }
   0x3   :  { %1884 = vmatprep.subr.bf16.mxu0 %v2824_v1  ;;  %1546 = vmatpush1.bf16.msra.mxu1 %v2826_v2  ;;  %v2832_v6 = vld [vmem:[%s4015_s1 + $0x10] ss:$8 sps:$4 sm:$0xff]   ;;  %v2834_v8 = vld [vmem:[%s4015_s1 + $0x24] ss:$8 sps:$4 sm:$0xff]   ;;  %v2838_v10 = vld [vmem:[%s4015_s1 + $0x20] ss:$8 sps:$4 sm:$0xff]  }
   0x4   :  { %1885 = vmatpush1.bf16.msra.mxu0 %v2827_v3  ;;  %1547 = vmatprep.subr.bf16.mxu1 %v2828_v4  ;;  %v2833_v7 = vld [vmem:[%s4015_s1 + $0x310] ss:$8 sps:$4 sm:$0xff]   ;;  %v2836_v9 = vld [vmem:[%s4015_s1 + $0x324] ss:$8 sps:$4 sm:$0xff]   ;;  %v2839_v11 = vld [vmem:[%s4015_s1 + $0x320] ss:$8 sps:$4 sm:$0xff]  }
   0x5   :  { %1886 = vmatprep.subr.bf16.mxu0 %v2830_v5  ;;  %v2840_v12 = vld [vmem:[%s4015_s1 + $0x34] ss:$8 sps:$4 sm:$0xff]   ;;  %v2844_v14 = vld [vmem:[%s4015_s1 + $0x30] ss:$8 sps:$4 sm:$0xff]   ;;  %v2846_v16 = vld [vmem:[%s4015_s1 + $0x44] ss:$8 sps:$4 sm:$0xff]  }
   0x6   :  { %v2842_v13 = vld [vmem:[%s4015_s1 + $0x334] ss:$8 sps:$4 sm:$0xff]   ;;  %v2845_v15 = vld [vmem:[%s4015_s1 + $0x330] ss:$8 sps:$4 sm:$0xff]   ;;  %v2848_v17 = vld [vmem:[%s4015_s1 + $0x344] ss:$8 sps:$4 sm:$0xff]  }
   0x7   :  { %1548 = vmatpush1.bf16.msra.mxu1 %v2832_v6  ;;  %v2850_v18 = vld [vmem:[%s4015_s1 + $0x40] ss:$8 sps:$4 sm:$0xff]   ;;  %v2852_v20 = vld [vmem:[%s4015_s1 + $0x54] ss:$8 sps:$4 sm:$0xff]   ;;  %v2856_v22 = vld [vmem:[%s4015_s1 + $0x50] ss:$8 sps:$4 sm:$0xff]  }
   0x8   :  { %1887 = vmatpush1.bf16.msra.mxu0 %v2833_v7  ;;  %1549 = vmatprep.subr.bf16.mxu1 %v2834_v8  ;;  %v2851_v19 = vld [vmem:[%s4015_s1 + $0x340] ss:$8 sps:$4 sm:$0xff]   ;;  %v2854_v21 = vld [vmem:[%s4015_s1 + $0x354] ss:$8 sps:$4 sm:$0xff]   ;;  %v2857_v23 = vld [vmem:[%s4015_s1 + $0x350] ss:$8 sps:$4 sm:$0xff]  }
   0x9   :  { %1888 = vmatprep.subr.bf16.mxu0 %v2836_v9  ;;  %v2858_v24 = vld [vmem:[%s4015_s1 + $0x64] ss:$8 sps:$4 sm:$0xff]   ;;  %v2862_v26 = vld [vmem:[%s4015_s1 + $0x60] ss:$8 sps:$4 sm:$0xff]   ;;  %v2864_v28 = vld [vmem:[%s4015_s1 + $0x74] ss:$8 sps:$4 sm:$0xff]  }
   0xa   :  { %v2860_v25 = vld [vmem:[%s4015_s1 + $0x364] ss:$8 sps:$4 sm:$0xff]   ;;  %v2863_v27 = vld [vmem:[%s4015_s1 + $0x360] ss:$8 sps:$4 sm:$0xff]   ;;  %v2866_v29 = vld [vmem:[%s4015_s1 + $0x374] ss:$8 sps:$4 sm:$0xff]  }
   0xb   :  { %1550 = vmatpush1.bf16.msra.mxu1 %v2838_v10  ;;  %v2868_v30 = vld [vmem:[%s4015_s1 + $0x70] ss:$8 sps:$4 sm:$0xff]   ;;  %v2870_v32 = vld [vmem:[%s4015_s1 + $0x84] ss:$8 sps:$4 sm:$0xff]   ;;  %v2874_v34 = vld [vmem:[%s4015_s1 + $0x80] ss:$8 sps:$4 sm:$0xff]  }
   0xc   :  { %1889 = vmatpush1.bf16.msra.mxu0 %v2839_v11  ;;  %1551 = vmatprep.subr.bf16.mxu1 %v2840_v12  ;;  %v2869_v31 = vld [vmem:[%s4015_s1 + $0x370] ss:$8 sps:$4 sm:$0xff]   ;;  %v2872_v33 = vld [vmem:[%s4015_s1 + $0x384] ss:$8 sps:$4 sm:$0xff]   ;;  %v2875_v35 = vld [vmem:[%s4015_s1 + $0x380] ss:$8 sps:$4 sm:$0xff]  }
   0xd   :  { %1890 = vmatprep.subr.bf16.mxu0 %v2842_v13  ;;  %v2876_v36 = vld [vmem:[%s4015_s1 + $0x94] ss:$8 sps:$4 sm:$0xff]   ;;  %v2880_v38 = vld [vmem:[%s4015_s1 + $0x90] ss:$8 sps:$4 sm:$0xff]   ;;  %v2882_v40 = vld [vmem:[%s4015_s1 + $0xa4] ss:$8 sps:$4 sm:$0xff]  }
   0xe   :  { %v2878_v37 = vld [vmem:[%s4015_s1 + $0x394] ss:$8 sps:$4 sm:$0xff]   ;;  %v2881_v39 = vld [vmem:[%s4015_s1 + $0x390] ss:$8 sps:$4 sm:$0xff]   ;;  %v2884_v41 = vld [vmem:[%s4015_s1 + $0x3a4] ss:$8 sps:$4 sm:$0xff]  }
   0xf   :  { %1552 = vmatpush1.bf16.msra.mxu1 %v2844_v14  ;;  %v2886_v42 = vld [vmem:[%s4015_s1 + $0xa0] ss:$8 sps:$4 sm:$0xff]   ;;  %v2888_v44 = vld [vmem:[%s4015_s1 + $0xb4] ss:$8 sps:$4 sm:$0xff]   ;;  %v2892_v46 = vld [vmem:[%s4015_s1 + $0xb0] ss:$8 sps:$4 sm:$0xff]  }
  0x10   :  { %1891 = vmatpush1.bf16.msra.mxu0 %v2845_v15  ;;  %1553 = vmatprep.subr.bf16.mxu1 %v2846_v16  ;;  %v2887_v43 = vld [vmem:[%s4015_s1 + $0x3a0] ss:$8 sps:$4 sm:$0xff]   ;;  %v2890_v45 = vld [vmem:[%s4015_s1 + $0x3b4] ss:$8 sps:$4 sm:$0xff]   ;;  %v2893_v47 = vld [vmem:[%s4015_s1 + $0x3b0] ss:$8 sps:$4 sm:$0xff]  }
  0x11   :  { %1892 = vmatprep.subr.bf16.mxu0 %v2848_v17  ;;  %v2894_v48 = vld [vmem:[%s4015_s1 + $0xc4] ss:$8 sps:$4 sm:$0xff]   ;;  %v2923_v51 = vld [vmem:[%s4016_s0 + $0x1c] ss:$44 sps:$4 sm:$0xff]   ;;  %v2904_v56 = vld [vmem:[%s4015_s1 + $0xd0] ss:$8 sps:$4 sm:$0xff]  }
  0x12   :  { %v2920_v49 = vld [vmem:[%s4016_s0 + $0x4] ss:$44 sps:$4 sm:$0xff]   ;;  %v2898_v52 = vld [vmem:[%s4015_s1 + $0xc0] ss:$8 sps:$4 sm:$0xff]   ;;  %1916 = vmatprep.mubr.bf16.mxu0 %v2923_v51  ;;  %v2900_v54 = vld [vmem:[%s4015_s1 + $0xd4] ss:$8 sps:$4 sm:$0xff]  }
  0x13   :  { %1554 = vmatpush1.bf16.msra.mxu1 %v2850_v18  ;;  %v2896_v50 = vld [vmem:[%s4015_s1 + $0x3c4] ss:$8 sps:$4 sm:$0xff]   ;;  %1577 = vmatprep.mubr.bf16.mxu1 %v2920_v49  ;;  %v2899_v53 = vld [vmem:[%s4015_s1 + $0x3c0] ss:$8 sps:$4 sm:$0xff]   ;;  %v2902_v55 = vld [vmem:[%s4015_s1 + $0x3d4] ss:$8 sps:$4 sm:$0xff]  }
  0x14   :  { %1893 = vmatpush1.bf16.msra.mxu0 %v2851_v19  ;;  %1555 = vmatprep.subr.bf16.mxu1 %v2852_v20  ;;  %v2905_v57 = vld [vmem:[%s4015_s1 + $0x3d0] ss:$8 sps:$4 sm:$0xff]   ;;  %v2906_v58 = vld [vmem:[%s4015_s1 + $0xe4] ss:$8 sps:$4 sm:$0xff]   ;;  %v2910_v60 = vld [vmem:[%s4015_s1 + $0xe0] ss:$8 sps:$4 sm:$0xff]  }
  0x15   :  { %1894 = vmatprep.subr.bf16.mxu0 %v2854_v21  ;;  %v2908_v59 = vld [vmem:[%s4015_s1 + $0x3e4] ss:$8 sps:$4 sm:$0xff]   ;;  %v2911_v61 = vld [vmem:[%s4015_s1 + $0x3e0] ss:$8 sps:$4 sm:$0xff]   ;;  %v2912_v62 = vld [vmem:[%s4015_s1 + $0xf4] ss:$8 sps:$4 sm:$0xff]  }
  0x16   :  { %v2914_v63 = vld [vmem:[%s4015_s1 + $0x3f4] ss:$8 sps:$4 sm:$0xff]   ;;  %v2916_v0 = vld [vmem:[%s4015_s1 + $0xf0] ss:$8 sps:$4 sm:$0xff]   ;;  %v2926_v2 = vld [vmem:[%s4015_s1 + $0x104] ss:$8 sps:$4 sm:$0xff]  }
  0x17   :  { %1556 = vmatpush1.bf16.msra.mxu1 %v2856_v22  ;;  %v2917_v1 = vld [vmem:[%s4015_s1 + $0x3f0] ss:$8 sps:$4 sm:$0xff]   ;;  %v2929_v3 = vld [vmem:[%s4015_s1 + $0x404] ss:$8 sps:$4 sm:$0xff]   ;;  %v2924_v6 = vld [vmem:[%s4015_s1 + $0x100] ss:$8 sps:$4 sm:$0xff]  }
  0x18   :  { %1895 = vmatpush1.bf16.msra.mxu0 %v2857_v23  ;;  %1557 = vmatprep.subr.bf16.mxu1 %v2858_v24  ;;  %v2918_v4 = vld [vmem:[%s4016_s0] ss:$44 sps:$4 sm:$0xff]   ;;  %v2921_v5 = vld [vmem:[%s4016_s0 + $0x18] ss:$44 sps:$4 sm:$0xff]   ;;  %v2932_v8 = vld [vmem:[%s4015_s1 + $0x114] ss:$8 sps:$4 sm:$0xff]  }
  0x19   :  { %1896 = vmatprep.subr.bf16.mxu0 %v2860_v25  ;;  %v2927_v7 = vld [vmem:[%s4015_s1 + $0x400] ss:$8 sps:$4 sm:$0xff]   ;;  %v2935_v9 = vld [vmem:[%s4015_s1 + $0x414] ss:$8 sps:$4 sm:$0xff]   ;;  %v2930_v12 = vld [vmem:[%s4015_s1 + $0x110] ss:$8 sps:$4 sm:$0xff]  }
  0x1a   :  { %v2936_v10 = vld [vmem:[%s4016_s0 + $0x5c] ss:$44 sps:$4 sm:$0xff]   ;;  %v2938_v11 = vld [vmem:[%s4016_s0 + $0x74] ss:$44 sps:$4 sm:$0xff]   ;;  %v2933_v13 = vld [vmem:[%s4015_s1 + $0x410] ss:$8 sps:$4 sm:$0xff]  }
  0x1b   :  { %1558 = vmatpush1.bf16.msra.mxu1 %v2862_v26  ;;  %v2943_v14 = vld [vmem:[%s4015_s1 + $0x124] ss:$8 sps:$4 sm:$0xff]   ;;  %v2941_v17 = vld [vmem:[%s4015_s1 + $0x120] ss:$8 sps:$4 sm:$0xff]   ;;  %v2944_v18 = vld [vmem:[%s4016_s0 + $0x70] ss:$44 sps:$4 sm:$0xff]  }
  0x1c   :  { %1897 = vmatpush1.bf16.msra.mxu0 %v2863_v27  ;;  %1559 = vmatprep.subr.bf16.mxu1 %v2864_v28  ;;  %v2947_v15 = vld [vmem:[%s4015_s1 + $0x424] ss:$8 sps:$4 sm:$0xff]   ;;  %v2945_v19 = vld [vmem:[%s4015_s1 + $0x420] ss:$8 sps:$4 sm:$0xff]   ;;  %v2950_v20 = vld [vmem:[%s4015_s1 + $0x134] ss:$8 sps:$4 sm:$0xff]  }
  0x1d   :  { %1898 = vmatprep.subr.bf16.mxu0 %v2866_v29  ;;  %v2940_v16 = vld [vmem:[%s4016_s0 + $0x58] ss:$44 sps:$4 sm:$0xff]   ;;  %v2953_v21 = vld [vmem:[%s4015_s1 + $0x434] ss:$8 sps:$4 sm:$0xff]   ;;  %v2959_v29 = vld [vmem:[%s4015_s1 + $0x140] ss:$8 sps:$4 sm:$0xff]  }
  0x1e   :  { %v2954_v22 = vld [vmem:[%s4016_s0 + $0xb4] ss:$44 sps:$4 sm:$0xff]   ;;  %v2956_v23 = vld [vmem:[%s4016_s0 + $0xcc] ss:$44 sps:$4 sm:$0xff]   ;;  %v2958_v28 = vld [vmem:[%s4016_s0 + $0xb0] ss:$44 sps:$4 sm:$0xff]  }
  0x1f   :  { %1560 = vmatpush1.bf16.msra.mxu1 %v2868_v30  ;;  %v2948_v24 = vld [vmem:[%s4015_s1 + $0x130] ss:$8 sps:$4 sm:$0xff]   ;;  %v2961_v26 = vld [vmem:[%s4015_s1 + $0x144] ss:$8 sps:$4 sm:$0xff]   ;;  %v2962_v30 = vld [vmem:[%s4016_s0 + $0xc8] ss:$44 sps:$4 sm:$0xff]  }
  0x20   :  { %1899 = vmatpush1.bf16.msra.mxu0 %v2869_v31  ;;  %1561 = vmatprep.subr.bf16.mxu1 %v2870_v32  ;;  %v2951_v25 = vld [vmem:[%s4015_s1 + $0x430] ss:$8 sps:$4 sm:$0xff]   ;;  %v2965_v27 = vld [vmem:[%s4015_s1 + $0x444] ss:$8 sps:$4 sm:$0xff]   ;;  %v2963_v31 = vld [vmem:[%s4015_s1 + $0x440] ss:$8 sps:$4 sm:$0xff]  }
  0x21   :  { %1900 = vmatprep.subr.bf16.mxu0 %v2872_v33  ;;  %v2968_v32 = vld [vmem:[%s4015_s1 + $0x154] ss:$8 sps:$4 sm:$0xff]   ;;  %v2987_v49 = vld [vmem:[%s4015_s1 + $0x470] ss:$8 sps:$4 sm:$0xff]   ;;  %v3001_v51 = vld [vmem:[%s4015_s1 + $0x484] ss:$8 sps:$4 sm:$0xff]  }
  0x22   :  { %v2971_v33 = vld [vmem:[%s4015_s1 + $0x454] ss:$8 sps:$4 sm:$0xff]  }
  0x23   :  { %1562 = vmatpush1.bf16.msra.mxu1 %v2874_v34  ;;  %v2972_v34 = vld [vmem:[%s4016_s0 + $0x10c] ss:$44 sps:$4 sm:$0xff]  }
  0x24   :  { %1901 = vmatpush1.bf16.msra.mxu0 %v2875_v35  ;;  %1563 = vmatprep.subr.bf16.mxu1 %v2876_v36  ;;  %v2974_v35 = vld [vmem:[%s4016_s0 + $0x124] ss:$44 sps:$4 sm:$0xff]  }
  0x25   :  { %1902 = vmatprep.subr.bf16.mxu0 %v2878_v37  ;;  %v2966_v36 = vld [vmem:[%s4015_s1 + $0x150] ss:$8 sps:$4 sm:$0xff]  }
  0x26   :  { %v2969_v37 = vld [vmem:[%s4015_s1 + $0x450] ss:$8 sps:$4 sm:$0xff]  }
  0x27   :  { %1564 = vmatpush1.bf16.msra.mxu1 %v2880_v38  ;;  %v2979_v38 = vld [vmem:[%s4015_s1 + $0x164] ss:$8 sps:$4 sm:$0xff]  }
  0x28   :  { %1903 = vmatpush1.bf16.msra.mxu0 %v2881_v39  ;;  %1565 = vmatprep.subr.bf16.mxu1 %v2882_v40  ;;  %v2983_v39 = vld [vmem:[%s4015_s1 + $0x464] ss:$8 sps:$4 sm:$0xff]   ;;  %v2976_v40 = vld [vmem:[%s4016_s0 + $0x108] ss:$44 sps:$4 sm:$0xff]  }
  0x29   :  { %1904 = vmatprep.subr.bf16.mxu0 %v2884_v41  ;;  %v2977_v41 = vld [vmem:[%s4015_s1 + $0x160] ss:$8 sps:$4 sm:$0xff]  }
  0x2b   :  { %1566 = vmatpush1.bf16.msra.mxu1 %v2886_v42  ;;  %v2980_v42 = vld [vmem:[%s4016_s0 + $0x120] ss:$44 sps:$4 sm:$0xff]  }
  0x2c   :  { %1905 = vmatpush1.bf16.msra.mxu0 %v2887_v43  ;;  %1567 = vmatprep.subr.bf16.mxu1 %v2888_v44  ;;  %v2981_v43 = vld [vmem:[%s4015_s1 + $0x460] ss:$8 sps:$4 sm:$0xff]   ;;  %v2986_v44 = vld [vmem:[%s4015_s1 + $0x174] ss:$8 sps:$4 sm:$0xff]  }
  0x2d   :  { %1906 = vmatprep.subr.bf16.mxu0 %v2890_v45  ;;  %v2989_v45 = vld [vmem:[%s4015_s1 + $0x474] ss:$8 sps:$4 sm:$0xff]  }
  0x2f   :  { %1568 = vmatpush1.bf16.msra.mxu1 %v2892_v46  ;;  %v2990_v46 = vld [vmem:[%s4016_s0 + $0x164] ss:$44 sps:$4 sm:$0xff]  }
  0x30   :  { %1907 = vmatpush1.bf16.msra.mxu0 %v2893_v47  ;;  %1569 = vmatprep.subr.bf16.mxu1 %v2894_v48  ;;  %v2992_v47 = vld [vmem:[%s4016_s0 + $0x17c] ss:$44 sps:$4 sm:$0xff]   ;;  %v2984_v48 = vld [vmem:[%s4015_s1 + $0x170] ss:$8 sps:$4 sm:$0xff]  }
  0x31   :  { %1908 = vmatprep.subr.bf16.mxu0 %v2896_v50  ;;  %v2997_v50 = vld [vmem:[%s4015_s1 + $0x184] ss:$8 sps:$4 sm:$0xff]  }
  0x33   :  { %1570 = vmatpush1.bf16.msra.mxu1 %v2898_v52  ;;  %v2994_v52 = vld [vmem:[%s4016_s0 + $0x160] ss:$44 sps:$4 sm:$0xff]  }
  0x34   :  { %1909 = vmatpush1.bf16.msra.mxu0 %v2899_v53  ;;  %1571 = vmatprep.subr.bf16.mxu1 %v2900_v54  ;;  %v2995_v53 = vld [vmem:[%s4015_s1 + $0x180] ss:$8 sps:$4 sm:$0xff]   ;;  %v2998_v54 = vld [vmem:[%s4016_s0 + $0x178] ss:$44 sps:$4 sm:$0xff]  }
  0x35   :  { %1910 = vmatprep.subr.bf16.mxu0 %v2902_v55  ;;  %v2999_v55 = vld [vmem:[%s4015_s1 + $0x480] ss:$8 sps:$4 sm:$0xff]  }
  0x37   :  { %1572 = vmatpush1.bf16.msra.mxu1 %v2904_v56  ;;  %v3004_v56 = vld [vmem:[%s4015_s1 + $0x194] ss:$8 sps:$4 sm:$0xff]  }
  0x38   :  { %1911 = vmatpush1.bf16.msra.mxu0 %v2905_v57  ;;  %1573 = vmatprep.subr.bf16.mxu1 %v2906_v58  ;;  %v3007_v57 = vld [vmem:[%s4015_s1 + $0x494] ss:$8 sps:$4 sm:$0xff]  }
  0x39   :  { %1912 = vmatprep.subr.bf16.mxu0 %v2908_v59  ;;  %v3008_v58 = vld [vmem:[%s4016_s0 + $0x1bc] ss:$44 sps:$4 sm:$0xff]   ;;  %v3010_v59 = vld [vmem:[%s4016_s0 + $0x1d4] ss:$44 sps:$4 sm:$0xff]  }
  0x3b   :  { %1574 = vmatpush1.bf16.msra.mxu1 %v2910_v60  ;;  %v3002_v60 = vld [vmem:[%s4015_s1 + $0x190] ss:$8 sps:$4 sm:$0xff]  }
  0x3c   :  { %1913 = vmatpush1.bf16.msra.mxu0 %v2911_v61  ;;  %1575 = vmatprep.subr.bf16.mxu1 %v2912_v62  ;;  %v3005_v61 = vld [vmem:[%s4015_s1 + $0x490] ss:$8 sps:$4 sm:$0xff]   ;;  %v3015_v62 = vld [vmem:[%s4015_s1 + $0x1a4] ss:$8 sps:$4 sm:$0xff]  }
  0x3d   :  { %1914 = vmatprep.subr.bf16.mxu0 %v2914_v63  ;;  %v3019_v63 = vld [vmem:[%s4015_s1 + $0x4a4] ss:$8 sps:$4 sm:$0xff]  }
  0x3f   :  { %1576 = vmatpush1.bf16.msra.mxu1 %v2916_v0  ;;  %v3012_v0 = vld [vmem:[%s4016_s0 + $0x1b8] ss:$44 sps:$4 sm:$0xff]  }
  0x40   :  { %1915 = vmatpush1.bf16.msra.mxu0 %v2917_v1  ;;  %1658 = vmatprep.subr.bf16.mxu1 %v2926_v2  ;;  %v3013_v1 = vld [vmem:[%s4015_s1 + $0x1a0] ss:$8 sps:$4 sm:$0xff]   ;;  %v3016_v2 = vld [vmem:[%s4016_s0 + $0x1d0] ss:$44 sps:$4 sm:$0xff]  }
  0x41   :  { %1997 = vmatprep.subr.bf16.mxu0 %v2929_v3  ;;  %v3017_v3 = vld [vmem:[%s4015_s1 + $0x4a0] ss:$8 sps:$4 sm:$0xff]  }
  0x42   :  { %1578 = vmatmul.mubr.bf16.vlgmr.msra.gmra.mrb[0].mxu1 %v2918_v4  ;;  %v3022_v4 = vld [vmem:[%s4015_s1 + $0x1b4] ss:$8 sps:$4 sm:$0xff]  }
  0x43   :  { %1917 = vmatmul.mubr.bf16.vlgmr.msra.gmra.mrb[0].mxu0 %v2921_v5  ;;  %1659 = vmatpush1.bf16.msra.mxu1 %v2924_v6  ;;  %v3025_v5 = vld [vmem:[%s4015_s1 + $0x4b4] ss:$8 sps:$4 sm:$0xff]  }
  0x44   :  { %1998 = vmatpush1.bf16.msra.mxu0 %v2927_v7  ;;  %1660 = vmatprep.subr.bf16.mxu1 %v2932_v8  ;;  %v3026_v6 = vld [vmem:[%s4016_s0 + $0x214] ss:$44 sps:$4 sm:$0xff]   ;;  %v3028_v7 = vld [vmem:[%s4016_s0 + $0x22c] ss:$44 sps:$4 sm:$0xff]  }
  0x45   :  { %1999 = vmatprep.subr.bf16.mxu0 %v2935_v9  ;;  %1587 = vmatprep.mubr.bf16.mxu1 %v2936_v10  ;;  %v3020_v8 = vld [vmem:[%s4015_s1 + $0x1b0] ss:$8 sps:$4 sm:$0xff]   ;;  %v3033_v10 = vld [vmem:[%s4015_s1 + $0x1c4] ss:$8 sps:$4 sm:$0xff]  }
  0x46   :  { %1926 = vmatprep.mubr.bf16.mxu0 %v2938_v11  ;;  %v3023_v9 = vld [vmem:[%s4015_s1 + $0x4b0] ss:$8 sps:$4 sm:$0xff]  }
  0x47   :  { %1661 = vmatpush1.bf16.msra.mxu1 %v2930_v12  ;;  %v3030_v11 = vld [vmem:[%s4016_s0 + $0x210] ss:$44 sps:$4 sm:$0xff]   ;;  %v3037_v12 = vld [vmem:[%s4015_s1 + $0x4c4] ss:$8 sps:$4 sm:$0xff]  }
  0x48   :  { %2000 = vmatpush1.bf16.msra.mxu0 %v2933_v13  ;;  %1662 = vmatprep.subr.bf16.mxu1 %v2943_v14  ;;  %v3031_v13 = vld [vmem:[%s4015_s1 + $0x1c0] ss:$8 sps:$4 sm:$0xff]  }
  0x49   :  { %2001 = vmatprep.subr.bf16.mxu0 %v2947_v15  ;;  %v3034_v14 = vld [vmem:[%s4016_s0 + $0x228] ss:$44 sps:$4 sm:$0xff]  }
  0x4a   :  { %1588 = vmatmul.mubr.bf16.gmra.mrb[4].mxu1 %v2940_v16  ;;  %v3035_v15 = vld [vmem:[%s4015_s1 + $0x4c0] ss:$8 sps:$4 sm:$0xff]   ;;  %v3040_v16 = vld [vmem:[%s4015_s1 + $0x1d4] ss:$8 sps:$4 sm:$0xff]  }
  0x4b   :  { %1927 = vmatmul.mubr.bf16.gmra.mrb[4].mxu0 %v2944_v18  ;;  %1663 = vmatpush1.bf16.msra.mxu1 %v2941_v17  ;;  %v3043_v17 = vld [vmem:[%s4015_s1 + $0x4d4] ss:$8 sps:$4 sm:$0xff]   ;;  %v3044_v18 = vld [vmem:[%s4016_s0 + $0x26c] ss:$44 sps:$4 sm:$0xff]  }
  0x4c   :  { %2002 = vmatpush1.bf16.msra.mxu0 %v2945_v19  ;;  %1664 = vmatprep.subr.bf16.mxu1 %v2950_v20  ;;  %v3046_v19 = vld [vmem:[%s4016_s0 + $0x284] ss:$44 sps:$4 sm:$0xff]  }
  0x4d   :  { %2003 = vmatprep.subr.bf16.mxu0 %v2953_v21  ;;  %1597 = vmatprep.mubr.bf16.mxu1 %v2954_v22  ;;  %v3038_v20 = vld [vmem:[%s4015_s1 + $0x1d0] ss:$8 sps:$4 sm:$0xff]   ;;  %v3051_v22 = vld [vmem:[%s4015_s1 + $0x1e4] ss:$8 sps:$4 sm:$0xff]  }
  0x4e   :  { %1936 = vmatprep.mubr.bf16.mxu0 %v2956_v23  ;;  %v3041_v21 = vld [vmem:[%s4015_s1 + $0x4d0] ss:$8 sps:$4 sm:$0xff]   ;;  %v3055_v23 = vld [vmem:[%s4015_s1 + $0x4e4] ss:$8 sps:$4 sm:$0xff]  }
  0x4f   :  { %1665 = vmatpush1.bf16.msra.mxu1 %v2948_v24  ;;  %v3048_v24 = vld [vmem:[%s4016_s0 + $0x268] ss:$44 sps:$4 sm:$0xff]  }
  0x50   :  { %2004 = vmatpush1.bf16.msra.mxu0 %v2951_v25  ;;  %1666 = vmatprep.subr.bf16.mxu1 %v2961_v26  ;;  %v3049_v25 = vld [vmem:[%s4015_s1 + $0x1e0] ss:$8 sps:$4 sm:$0xff]  }
  0x51   :  { %2005 = vmatprep.subr.bf16.mxu0 %v2965_v27  ;;  %v3052_v26 = vld [vmem:[%s4016_s0 + $0x280] ss:$44 sps:$4 sm:$0xff]  }
  0x52   :  { %1598 = vmatmul.mubr.bf16.gmra.mrb[8].mxu1 %v2958_v28  ;;  %v3053_v27 = vld [vmem:[%s4015_s1 + $0x4e0] ss:$8 sps:$4 sm:$0xff]   ;;  %v3058_v28 = vld [vmem:[%s4015_s1 + $0x1f4] ss:$8 sps:$4 sm:$0xff]  }
  0x53   :  { %1937 = vmatmul.mubr.bf16.gmra.mrb[8].mxu0 %v2962_v30  ;;  %1667 = vmatpush1.bf16.msra.mxu1 %v2959_v29  ;;  %v3061_v29 = vld [vmem:[%s4015_s1 + $0x4f4] ss:$8 sps:$4 sm:$0xff]   ;;  %v3064_v30 = vld [vmem:[%s4016_s0 + $0xc] ss:$44 sps:$4 sm:$0xff]  }
  0x54   :  { %2006 = vmatpush1.bf16.msra.mxu0 %v2963_v31  ;;  %1668 = vmatprep.subr.bf16.mxu1 %v2968_v32  ;;  %v3067_v31 = vld [vmem:[%s4016_s0 + $0x24] ss:$44 sps:$4 sm:$0xff]  }
  0x55   :  { %2007 = vmatprep.subr.bf16.mxu0 %v2971_v33  ;;  %1607 = vmatprep.mubr.bf16.mxu1 %v2972_v34  ;;  %v3056_v32 = vld [vmem:[%s4015_s1 + $0x1f0] ss:$8 sps:$4 sm:$0xff]   ;;  %v3070_v34 = vld [vmem:[%s4015_s1 + $0x204] ss:$8 sps:$4 sm:$0xff]  }
  0x56   :  { %1946 = vmatprep.mubr.bf16.mxu0 %v2974_v35  ;;  %v3059_v33 = vld [vmem:[%s4015_s1 + $0x4f0] ss:$8 sps:$4 sm:$0xff]   ;;  %v3073_v35 = vld [vmem:[%s4015_s1 + $0x504] ss:$8 sps:$4 sm:$0xff]  }
  0x57   :  { %1669 = vmatpush1.bf16.msra.mxu1 %v2966_v36  ;;  %v3062_v36 = vld [vmem:[%s4016_s0 + $0x8] ss:$44 sps:$4 sm:$0xff]  }
  0x58   :  { %2008 = vmatpush1.bf16.msra.mxu0 %v2969_v37  ;;  %1670 = vmatprep.subr.bf16.mxu1 %v2979_v38  ;;  %v3065_v37 = vld [vmem:[%s4016_s0 + $0x20] ss:$44 sps:$4 sm:$0xff]  }
  0x59   :  { %2009 = vmatprep.subr.bf16.mxu0 %v2983_v39  ;;  %v3068_v38 = vld [vmem:[%s4015_s1 + $0x200] ss:$8 sps:$4 sm:$0xff]  }
  0x5a   :  { %1608 = vmatmul.mubr.bf16.gmra.mrb[12].mxu1 %v2976_v40  ;;  %v3071_v39 = vld [vmem:[%s4015_s1 + $0x500] ss:$8 sps:$4 sm:$0xff]   ;;  %v3076_v40 = vld [vmem:[%s4015_s1 + $0x214] ss:$8 sps:$4 sm:$0xff]  }
  0x5b   :  { %1947 = vmatmul.mubr.bf16.gmra.mrb[12].mxu0 %v2980_v42  ;;  %1671 = vmatpush1.bf16.msra.mxu1 %v2977_v41  ;;  %v3077_v41 = vld [vmem:[%s4016_s0 + $0x64] ss:$44 sps:$4 sm:$0xff]   ;;  %v3079_v42 = vld [vmem:[%s4016_s0 + $0x7c] ss:$44 sps:$4 sm:$0xff]  }
  0x5c   :  { %2010 = vmatpush1.bf16.msra.mxu0 %v2981_v43  ;;  %1672 = vmatprep.subr.bf16.mxu1 %v2986_v44  ;;  %v3074_v43 = vld [vmem:[%s4015_s1 + $0x210] ss:$8 sps:$4 sm:$0xff]   ;;  %v3084_v44 = vld [vmem:[%s4015_s1 + $0x224] ss:$8 sps:$4 sm:$0xff]  }
  0x5d   :  { %2011 = vmatprep.subr.bf16.mxu0 %v2989_v45  ;;  %1617 = vmatprep.mubr.bf16.mxu1 %v2990_v46  ;;  %v3081_v45 = vld [vmem:[%s4016_s0 + $0x60] ss:$44 sps:$4 sm:$0xff]  }
  0x5e   :  { %1956 = vmatprep.mubr.bf16.mxu0 %v2992_v47  ;;  %v3082_v46 = vld [vmem:[%s4015_s1 + $0x220] ss:$8 sps:$4 sm:$0xff]   ;;  %v3085_v47 = vld [vmem:[%s4016_s0 + $0x78] ss:$44 sps:$4 sm:$0xff]  }
  0x5f   :  { %1673 = vmatpush1.bf16.msra.mxu1 %v2984_v48  ;;  %v3088_v48 = vld [vmem:[%s4015_s1 + $0x234] ss:$8 sps:$4 sm:$0xff]  }
  0x60   :  { %2012 = vmatpush1.bf16.msra.mxu0 %v2987_v49  ;;  %1674 = vmatprep.subr.bf16.mxu1 %v2997_v50  ;;  %v3089_v49 = vld [vmem:[%s4016_s0 + $0xbc] ss:$44 sps:$4 sm:$0xff]   ;;  %v3091_v50 = vld [vmem:[%s4016_s0 + $0xd4] ss:$44 sps:$4 sm:$0xff]  }
  0x61   :  { %2013 = vmatprep.subr.bf16.mxu0 %v3001_v51  ;;  %v3086_v51 = vld [vmem:[%s4015_s1 + $0x230] ss:$8 sps:$4 sm:$0xff]  }
  0x62   :  { %1618 = vmatmul.mubr.bf16.gmra.mrb[16].mxu1 %v2994_v52  ;;  %v3096_v52 = vld [vmem:[%s4015_s1 + $0x244] ss:$8 sps:$4 sm:$0xff]  }
  0x63   :  { %1957 = vmatmul.mubr.bf16.gmra.mrb[16].mxu0 %v2998_v54  ;;  %1675 = vmatpush1.bf16.msra.mxu1 %v2995_v53  ;;  %v3093_v53 = vld [vmem:[%s4016_s0 + $0xb8] ss:$44 sps:$4 sm:$0xff]   ;;  %v3094_v54 = vld [vmem:[%s4015_s1 + $0x240] ss:$8 sps:$4 sm:$0xff]  }
  0x64   :  { %2014 = vmatpush1.bf16.msra.mxu0 %v2999_v55  ;;  %1676 = vmatprep.subr.bf16.mxu1 %v3004_v56  ;;  %v3097_v55 = vld [vmem:[%s4016_s0 + $0xd0] ss:$44 sps:$4 sm:$0xff]  }
  0x65   :  { %2015 = vmatprep.subr.bf16.mxu0 %v3007_v57  ;;  %1627 = vmatprep.mubr.bf16.mxu1 %v3008_v58  ;;  %v3100_v56 = vld [vmem:[%s4015_s1 + $0x254] ss:$8 sps:$4 sm:$0xff]   ;;  %v3103_v58 = vld [vmem:[%s4016_s0 + $0x12c] ss:$44 sps:$4 sm:$0xff]  }
  0x66   :  { %1966 = vmatprep.mubr.bf16.mxu0 %v3010_v59  ;;  %v3101_v57 = vld [vmem:[%s4016_s0 + $0x114] ss:$44 sps:$4 sm:$0xff]   ;;  %v3098_v59 = vld [vmem:[%s4015_s1 + $0x250] ss:$8 sps:$4 sm:$0xff]  }
  0x67   :  { %1677 = vmatpush1.bf16.msra.mxu1 %v3002_v60  ;;  %v3108_v60 = vld [vmem:[%s4015_s1 + $0x264] ss:$8 sps:$4 sm:$0xff]  }
  0x68   :  { %2016 = vmatpush1.bf16.msra.mxu0 %v3005_v61  ;;  %1678 = vmatprep.subr.bf16.mxu1 %v3015_v62  ;;  %v3105_v61 = vld [vmem:[%s4016_s0 + $0x110] ss:$44 sps:$4 sm:$0xff]   ;;  %v3106_v62 = vld [vmem:[%s4015_s1 + $0x260] ss:$8 sps:$4 sm:$0xff]  }
  0x69   :  { %2017 = vmatprep.subr.bf16.mxu0 %v3019_v63  ;;  %v3109_v63 = vld [vmem:[%s4016_s0 + $0x128] ss:$44 sps:$4 sm:$0xff]  }
  0x6a   :  { %1628 = vmatmul.mubr.bf16.gmra.mrb[20].mxu1 %v3012_v0  ;;  %v3112_v0 = vld [vmem:[%s4015_s1 + $0x274] ss:$8 sps:$4 sm:$0xff]  }
  0x6b   :  { %1967 = vmatmul.mubr.bf16.gmra.mrb[20].mxu0 %v3016_v2  ;;  %1679 = vmatpush1.bf16.msra.mxu1 %v3013_v1  ;;  %v3113_v1 = vld [vmem:[%s4016_s0 + $0x16c] ss:$44 sps:$4 sm:$0xff]   ;;  %v3115_v2 = vld [vmem:[%s4016_s0 + $0x184] ss:$44 sps:$4 sm:$0xff]  }
  0x6c   :  { %2018 = vmatpush1.bf16.msra.mxu0 %v3017_v3  ;;  %1680 = vmatprep.subr.bf16.mxu1 %v3022_v4  ;;  %v3110_v3 = vld [vmem:[%s4015_s1 + $0x270] ss:$8 sps:$4 sm:$0xff]   ;;  %v3117_v4 = vld [vmem:[%s4016_s0 + $0x168] ss:$44 sps:$4 sm:$0xff]  }
  0x6d   :  { %2019 = vmatprep.subr.bf16.mxu0 %v3025_v5  ;;  %1637 = vmatprep.mubr.bf16.mxu1 %v3026_v6  ;;  %v3120_v5 = vld [vmem:[%s4015_s1 + $0x284] ss:$8 sps:$4 sm:$0xff]   ;;  %v3118_v6 = vld [vmem:[%s4015_s1 + $0x280] ss:$8 sps:$4 sm:$0xff]  }
  0x6e   :  { %1976 = vmatprep.mubr.bf16.mxu0 %v3028_v7  ;;  %v3121_v7 = vld [vmem:[%s4016_s0 + $0x180] ss:$44 sps:$4 sm:$0xff]  }
  0x6f   :  { %1681 = vmatpush1.bf16.msra.mxu1 %v3020_v8  ;;  %v3124_v8 = vld [vmem:[%s4015_s1 + $0x294] ss:$8 sps:$4 sm:$0xff]  }
  0x70   :  { %2020 = vmatpush1.bf16.msra.mxu0 %v3023_v9  ;;  %1682 = vmatprep.subr.bf16.mxu1 %v3033_v10  ;;  %v3125_v9 = vld [vmem:[%s4016_s0 + $0x1c4] ss:$44 sps:$4 sm:$0xff]   ;;  %v3127_v10 = vld [vmem:[%s4016_s0 + $0x1dc] ss:$44 sps:$4 sm:$0xff]  }
  0x71   :  { %2021 = vmatprep.subr.bf16.mxu0 %v3037_v12  ;;  %v3129_v12 = vld [vmem:[%s4016_s0 + $0x1c0] ss:$44 sps:$4 sm:$0xff]  }
  0x72   :  { %1638 = vmatmul.mubr.bf16.gmra.mrb[24].mxu1 %v3030_v11  ;;  %v3122_v11 = vld [vmem:[%s4015_s1 + $0x290] ss:$8 sps:$4 sm:$0xff]  }
  0x73   :  { %1977 = vmatmul.mubr.bf16.gmra.mrb[24].mxu0 %v3034_v14  ;;  %1683 = vmatpush1.bf16.msra.mxu1 %v3031_v13  ;;  %v3132_v13 = vld [vmem:[%s4015_s1 + $0x2a4] ss:$8 sps:$4 sm:$0xff]   ;;  %v3130_v14 = vld [vmem:[%s4015_s1 + $0x2a0] ss:$8 sps:$4 sm:$0xff]  }
  0x74   :  { %2022 = vmatpush1.bf16.msra.mxu0 %v3035_v15  ;;  %1684 = vmatprep.subr.bf16.mxu1 %v3040_v16  ;;  %v3133_v15 = vld [vmem:[%s4016_s0 + $0x1d8] ss:$44 sps:$4 sm:$0xff]   ;;  %v3137_v16 = vld [vmem:[%s4016_s0 + $0x21c] ss:$44 sps:$4 sm:$0xff]  }
  0x75   :  { %2023 = vmatprep.subr.bf16.mxu0 %v3043_v17  ;;  %1647 = vmatprep.mubr.bf16.mxu1 %v3044_v18  ;;  %v3136_v17 = vld [vmem:[%s4015_s1 + $0x2b4] ss:$8 sps:$4 sm:$0xff]  }
  0x76   :  { %1986 = vmatprep.mubr.bf16.mxu0 %v3046_v19  ;;  %v3139_v18 = vld [vmem:[%s4016_s0 + $0x234] ss:$44 sps:$4 sm:$0xff]   ;;  %v3134_v19 = vld [vmem:[%s4015_s1 + $0x2b0] ss:$8 sps:$4 sm:$0xff]  }
  0x77   :  { %1685 = vmatpush1.bf16.msra.mxu1 %v3038_v20  ;;  %v3144_v20 = vld [vmem:[%s4015_s1 + $0x2c4] ss:$8 sps:$4 sm:$0xff]  }
  0x78   :  { %2024 = vmatpush1.bf16.msra.mxu0 %v3041_v21  ;;  %1686 = vmatprep.subr.bf16.mxu1 %v3051_v22  ;;  %v3141_v21 = vld [vmem:[%s4016_s0 + $0x218] ss:$44 sps:$4 sm:$0xff]   ;;  %v3145_v22 = vld [vmem:[%s4016_s0 + $0x230] ss:$44 sps:$4 sm:$0xff]  }
  0x79   :  { %2025 = vmatprep.subr.bf16.mxu0 %v3055_v23  ;;  %v3142_v23 = vld [vmem:[%s4015_s1 + $0x2c0] ss:$8 sps:$4 sm:$0xff]  }
  0x7a   :  { %1648 = vmatmul.mubr.bf16.gmra.mrb[28].mxu1 %v3048_v24  ;;  %v3149_v24 = vld [vmem:[%s4016_s0 + $0x274] ss:$44 sps:$4 sm:$0xff]  }
  0x7b   :  { %1987 = vmatmul.mubr.bf16.gmra.mrb[28].mxu0 %v3052_v26  ;;  %1687 = vmatpush1.bf16.msra.mxu1 %v3049_v25  ;;  %v3148_v25 = vld [vmem:[%s4015_s1 + $0x2d4] ss:$8 sps:$4 sm:$0xff]   ;;  %v3151_v26 = vld [vmem:[%s4016_s0 + $0x28c] ss:$44 sps:$4 sm:$0xff]  }
  0x7c   :  { %2026 = vmatpush1.bf16.msra.mxu0 %v3053_v27  ;;  %1688 = vmatprep.subr.bf16.mxu1 %v3058_v28  ;;  %v3146_v27 = vld [vmem:[%s4015_s1 + $0x2d0] ss:$8 sps:$4 sm:$0xff]   ;;  %v3156_v28 = vld [vmem:[%s4015_s1 + $0x2e4] ss:$8 sps:$4 sm:$0xff]  }
  0x7d   :  { %2027 = vmatprep.subr.bf16.mxu0 %v3061_v29  ;;  %1690 = vmatprep.mubr.bf16.mxu1 %v3064_v30  ;;  %v3153_v29 = vld [vmem:[%s4016_s0 + $0x270] ss:$44 sps:$4 sm:$0xff]   ;;  %v3157_v30 = vld [vmem:[%s4016_s0 + $0x288] ss:$44 sps:$4 sm:$0xff]  }
  0x7e   :  { %2029 = vmatprep.mubr.bf16.mxu0 %v3067_v31  ;;  %v3154_v31 = vld [vmem:[%s4015_s1 + $0x2e0] ss:$8 sps:$4 sm:$0xff]  }
  0x7f   :  { %1689 = vmatpush1.bf16.msra.mxu1 %v3056_v32  ;;  %v3163_v32 = vld [vmem:[%s4016_s0 + $0x14] ss:$44 sps:$4 sm:$0xff]  }
  0x80   :  { %2028 = vmatpush1.bf16.msra.mxu0 %v3059_v33  ;;  %1771 = vmatprep.subr.bf16.mxu1 %v3070_v34  ;;  %v3160_v33 = vld [vmem:[%s4015_s1 + $0x2f4] ss:$8 sps:$4 sm:$0xff]   ;;  %v3158_v34 = vld [vmem:[%s4015_s1 + $0x2f0] ss:$8 sps:$4 sm:$0xff]  }
  0x81   :  { %2110 = vmatprep.subr.bf16.mxu0 %v3073_v35  ;;  %v3193_v35 = vmov 0  }
  0x82   :  { %1691 = vmatmul.mubr.bf16.vlgmr.msra.gmra.mrb[0].mxu1 %v3062_v36  ;;  %v3161_v36 = vld [vmem:[%s4016_s0 + $0x10] ss:$44 sps:$4 sm:$0xff]  }
  0x83   :  { %2030 = vmatmul.mubr.bf16.vlgmr.msra.gmra.mrb[0].mxu0 %v3065_v37  ;;  %1772 = vmatpush1.bf16.msra.mxu1 %v3068_v38  ;;  %v3164_v37 = vld [vmem:[%s4016_s0 + $0x28] ss:$44 sps:$4 sm:$0xff]   ;;  %v3165_v38 = vld [vmem:[%s4016_s0 + $0x6c] ss:$44 sps:$4 sm:$0xff]  }
  0x84   :  { %2111 = vmatpush1.bf16.msra.mxu0 %v3071_v39  ;;  %1773 = vmatprep.subr.bf16.mxu1 %v3076_v40  ;;  %v3167_v39 = vld [vmem:[%s4016_s0 + $0x68] ss:$44 sps:$4 sm:$0xff]   ;;  %v3168_v40 = vld [vmem:[%s4016_s0 + $0x80] ss:$44 sps:$4 sm:$0xff]  }
  0x85   :  { %1700 = vmatprep.mubr.bf16.mxu1 %v3077_v41  ;;  %2039 = vmatprep.mubr.bf16.mxu0 %v3079_v42  ;;  %v3169_v41 = vld [vmem:[%s4016_s0 + $0xc4] ss:$44 sps:$4 sm:$0xff]   ;;  %v3171_v42 = vld [vmem:[%s4016_s0 + $0xc0] ss:$44 sps:$4 sm:$0xff]  }
  0x87   :  { %1774 = vmatpush1.bf16.msra.mxu1 %v3074_v43  ;;  %v3172_v43 = vld [vmem:[%s4016_s0 + $0xd8] ss:$44 sps:$4 sm:$0xff]  }
  0x88   :  { %1775 = vmatprep.subr.bf16.mxu1 %v3084_v44  ;;  %v3173_v44 = vld [vmem:[%s4016_s0 + $0x11c] ss:$44 sps:$4 sm:$0xff]  }
  0x8a   :  { %1701 = vmatmul.mubr.bf16.gmra.mrb[4].mxu1 %v3081_v45  ;;  %v3175_v45 = vld [vmem:[%s4016_s0 + $0x118] ss:$44 sps:$4 sm:$0xff]  }
  0x8b   :  { %2040 = vmatmul.mubr.bf16.gmra.mrb[4].mxu0 %v3085_v47  ;;  %1776 = vmatpush1.bf16.msra.mxu1 %v3082_v46  ;;  %v3176_v46 = vld [vmem:[%s4016_s0 + $0x130] ss:$44 sps:$4 sm:$0xff]   ;;  %v3177_v47 = vld [vmem:[%s4016_s0 + $0x174] ss:$44 sps:$4 sm:$0xff]  }
  0x8c   :  { %1710 = vmatprep.mubr.bf16.mxu1 %v3089_v49  ;;  %1777 = vmatprep.subr.bf16.mxu1 %v3088_v48  ;;  %v3179_v48 = vld [vmem:[%s4016_s0 + $0x170] ss:$44 sps:$4 sm:$0xff]   ;;  %v3180_v49 = vld [vmem:[%s4016_s0 + $0x188] ss:$44 sps:$4 sm:$0xff]  }
  0x8d   :  { %2049 = vmatprep.mubr.bf16.mxu0 %v3091_v50  ;;  %v3181_v50 = vld [vmem:[%s4016_s0 + $0x1cc] ss:$44 sps:$4 sm:$0xff]  }
  0x8f   :  { %1778 = vmatpush1.bf16.msra.mxu1 %v3086_v51  ;;  %v3183_v51 = vld [vmem:[%s4016_s0 + $0x1c8] ss:$44 sps:$4 sm:$0xff]  }
  0x90   :  { %1779 = vmatprep.subr.bf16.mxu1 %v3096_v52  ;;  %v3184_v52 = vld [vmem:[%s4016_s0 + $0x1e0] ss:$44 sps:$4 sm:$0xff]  }
  0x92   :  { %1711 = vmatmul.mubr.bf16.gmra.mrb[8].mxu1 %v3093_v53  ;;  %v3185_v53 = vld [vmem:[%s4016_s0 + $0x224] ss:$44 sps:$4 sm:$0xff]  }
  0x93   :  { %2050 = vmatmul.mubr.bf16.gmra.mrb[8].mxu0 %v3097_v55  ;;  %1780 = vmatpush1.bf16.msra.mxu1 %v3094_v54  ;;  %v3187_v54 = vld [vmem:[%s4016_s0 + $0x220] ss:$44 sps:$4 sm:$0xff]   ;;  %v3188_v55 = vld [vmem:[%s4016_s0 + $0x238] ss:$44 sps:$4 sm:$0xff]  }
  0x94   :  { %1720 = vmatprep.mubr.bf16.mxu1 %v3101_v57  ;;  %1781 = vmatprep.subr.bf16.mxu1 %v3100_v56  ;;  %v3189_v56 = vld [vmem:[%s4016_s0 + $0x27c] ss:$44 sps:$4 sm:$0xff]   ;;  %v3191_v57 = vld [vmem:[%s4016_s0 + $0x278] ss:$44 sps:$4 sm:$0xff]  }
  0x95   :  { %2059 = vmatprep.mubr.bf16.mxu0 %v3103_v58  ;;  %v3192_v58 = vld [vmem:[%s4016_s0 + $0x290] ss:$44 sps:$4 sm:$0xff]  }
  0x97   :  { %1782 = vmatpush1.bf16.msra.mxu1 %v3098_v59 }
  0x98   :  { %1783 = vmatprep.subr.bf16.mxu1 %v3108_v60 }
  0x9a   :  { %1721 = vmatmul.mubr.bf16.gmra.mrb[12].mxu1 %v3105_v61 }
  0x9b   :  { %2060 = vmatmul.mubr.bf16.gmra.mrb[12].mxu0 %v3109_v63  ;;  %1784 = vmatpush1.bf16.msra.mxu1 %v3106_v62 }
  0x9c   :  { %1730 = vmatprep.mubr.bf16.mxu1 %v3113_v1  ;;  %1785 = vmatprep.subr.bf16.mxu1 %v3112_v0 }
  0x9d   :  { %2069 = vmatprep.mubr.bf16.mxu0 %v3115_v2 }
  0x9f   :  { %1786 = vmatpush1.bf16.msra.mxu1 %v3110_v3 }
  0xa0   :  { %1787 = vmatprep.subr.bf16.mxu1 %v3120_v5 }
  0xa2   :  { %1731 = vmatmul.mubr.bf16.gmra.mrb[16].mxu1 %v3117_v4 }
  0xa3   :  { %2070 = vmatmul.mubr.bf16.gmra.mrb[16].mxu0 %v3121_v7  ;;  %1788 = vmatpush1.bf16.msra.mxu1 %v3118_v6 }
  0xa4   :  { %1740 = vmatprep.mubr.bf16.mxu1 %v3125_v9  ;;  %1789 = vmatprep.subr.bf16.mxu1 %v3124_v8 }
  0xa5   :  { %2079 = vmatprep.mubr.bf16.mxu0 %v3127_v10 }
  0xa7   :  { %1790 = vmatpush1.bf16.msra.mxu1 %v3122_v11 }
  0xa8   :  { %1791 = vmatprep.subr.bf16.mxu1 %v3132_v13 }
  0xaa   :  { %1741 = vmatmul.mubr.bf16.gmra.mrb[20].mxu1 %v3129_v12 }
  0xab   :  { %2080 = vmatmul.mubr.bf16.gmra.mrb[20].mxu0 %v3133_v15  ;;  %1792 = vmatpush1.bf16.msra.mxu1 %v3130_v14 }
  0xac   :  { %1750 = vmatprep.mubr.bf16.mxu1 %v3137_v16  ;;  %1793 = vmatprep.subr.bf16.mxu1 %v3136_v17 }
  0xad   :  { %2089 = vmatprep.mubr.bf16.mxu0 %v3139_v18 }
  0xaf   :  { %1794 = vmatpush1.bf16.msra.mxu1 %v3134_v19 }
  0xb0   :  { %1795 = vmatprep.subr.bf16.mxu1 %v3144_v20 }
  0xb2   :  { %1751 = vmatmul.mubr.bf16.gmra.mrb[24].mxu1 %v3141_v21 }
  0xb3   :  { %2090 = vmatmul.mubr.bf16.gmra.mrb[24].mxu0 %v3145_v22  ;;  %1796 = vmatpush1.bf16.msra.mxu1 %v3142_v23 }
  0xb4   :  { %1760 = vmatprep.mubr.bf16.mxu1 %v3149_v24  ;;  %1797 = vmatprep.subr.bf16.mxu1 %v3148_v25 }
  0xb5   :  { %2099 = vmatprep.mubr.bf16.mxu0 %v3151_v26 }
  0xb7   :  { %1798 = vmatpush1.bf16.msra.mxu1 %v3146_v27 }
  0xb8   :  { %1799 = vmatprep.subr.bf16.mxu1 %v3156_v28 }
  0xba   :  { %1761 = vmatmul.mubr.bf16.gmra.mrb[28].mxu1 %v3153_v29 }
  0xbb   :  { %2100 = vmatmul.mubr.bf16.gmra.mrb[28].mxu0 %v3157_v30  ;;  %1800 = vmatpush1.bf16.msra.mxu1 %v3154_v31 }
  0xbc   :  { %1803 = vmatprep.mubr.bf16.mxu1 %v3163_v32  ;;  %1801 = vmatprep.subr.bf16.mxu1 %v3160_v33 }
  0xbd   :  { %2142 = vmatprep.mubr.bf16.mxu0 %v3193_v35 }
  0xbf   :  { %1802 = vmatpush1.bf16.msra.mxu1 %v3158_v34 }
  0xc2   :  { %1804 = vmatmul.mubr.bf16.vlgmr.msra.gmra.mrb[0].mxu1 %v3161_v36 }
  0xc3   :  { %2621 = vmatmul.mubr.msk.bf16.vlgmr.msra.gmra.mrb[0].mxu0 %vm1520_vm0, %v3164_v37  ;;  %1813 = vmatprep.mubr.bf16.mxu1 %v3165_v38 }
  0xc4   :  { %2152 = vmatprep.mubr.bf16.mxu0 %v3193_v35 }
  0xca   :  { %1814 = vmatmul.mubr.bf16.gmra.mrb[4].mxu1 %v3167_v39 }
  0xcb   :  { %2622 = vmatmul.mubr.msk.bf16.gmra.mrb[4].mxu0 %vm1520_vm0, %v3168_v40  ;;  %1823 = vmatprep.mubr.bf16.mxu1 %v3169_v41 }
  0xcc   :  { %2162 = vmatprep.mubr.bf16.mxu0 %v3193_v35 }
  0xd2   :  { %1824 = vmatmul.mubr.bf16.gmra.mrb[8].mxu1 %v3171_v42 }
  0xd3   :  { %2623 = vmatmul.mubr.msk.bf16.gmra.mrb[8].mxu0 %vm1520_vm0, %v3172_v43  ;;  %1833 = vmatprep.mubr.bf16.mxu1 %v3173_v44 }
  0xd4   :  { %2172 = vmatprep.mubr.bf16.mxu0 %v3193_v35 }
  0xda   :  { %1834 = vmatmul.mubr.bf16.gmra.mrb[12].mxu1 %v3175_v45 }
  0xdb   :  { %2624 = vmatmul.mubr.msk.bf16.gmra.mrb[12].mxu0 %vm1520_vm0, %v3176_v46  ;;  %1843 = vmatprep.mubr.bf16.mxu1 %v3177_v47 }
  0xdc   :  { %2182 = vmatprep.mubr.bf16.mxu0 %v3193_v35 }
  0xe2   :  { %1844 = vmatmul.mubr.bf16.gmra.mrb[16].mxu1 %v3179_v48 }
  0xe3   :  { %2625 = vmatmul.mubr.msk.bf16.gmra.mrb[16].mxu0 %vm1520_vm0, %v3180_v49  ;;  %1853 = vmatprep.mubr.bf16.mxu1 %v3181_v50 }
  0xe4   :  { %2192 = vmatprep.mubr.bf16.mxu0 %v3193_v35 }
  0xea   :  { %1854 = vmatmul.mubr.bf16.gmra.mrb[20].mxu1 %v3183_v51 }
  0xeb   :  { %2626 = vmatmul.mubr.msk.bf16.gmra.mrb[20].mxu0 %vm1520_vm0, %v3184_v52  ;;  %1863 = vmatprep.mubr.bf16.mxu1 %v3185_v53 }
  0xec   :  { %2202 = vmatprep.mubr.bf16.mxu0 %v3193_v35 }
  0xf2   :  { %1864 = vmatmul.mubr.bf16.gmra.mrb[24].mxu1 %v3187_v54 }
  0xf3   :  { %2627 = vmatmul.mubr.msk.bf16.gmra.mrb[24].mxu0 %vm1520_vm0, %v3188_v55  ;;  %1873 = vmatprep.mubr.bf16.mxu1 %v3189_v56 }
  0xf4   :  { %2212 = vmatprep.mubr.bf16.mxu0 %v3193_v35 }
  0xfa   :  { %1874 = vmatmul.mubr.bf16.gmra.mrb[28].mxu1 %v3191_v57 }
  0xfb   :  { %2628 = vmatmul.mubr.msk.bf16.gmra.mrb[28].mxu0 %vm1520_vm0, %v3192_v58 }
 0x195   :  { %v1805_v59 = vpop.f32.mrb[0].mxu1 }
 0x196   :  { %v2144_v60 = vpop.f32.mrb[0].mxu0  ;;  %v1807_v62 = vpop.f32.mrb[1].mxu1 }
 0x197   :  { %v2661_v61 = vadd.f32 %v2144_v60, %v1805_v59  ;;  %v2146_v63 = vpop.f32.mrb[1].mxu0  ;;  %v1809_v1 = vpop.f32.mrb[2].mxu1 }
 0x198   :  { %v2662_v0 = vadd.f32 %v2146_v63, %v1807_v62  ;;  %v2148_v2 = vpop.f32.mrb[2].mxu0  ;;  %v1811_v5 = vpop.f32.mrb[3].mxu1 }
 0x199   :  { %v2223_v3 = vmax.f32 %v2661_v61, 0.0  ;;  %v2663_v4 = vadd.f32 %v2148_v2, %v1809_v1  ;;  %v2150_v6 = vpop.f32.mrb[3].mxu0 }
 0x19a   :  { %v2224_v7 = vmax.f32 %v2662_v0, 0.0  ;;  %v2664_v8 = vadd.f32 %v2150_v6, %v1811_v5 }
 0x19b   :  { %v2225_v9 = vmax.f32 %v2663_v4, 0.0 }
 0x19c   :  { %v2645_v10 = vpack.c.bf16 %v2224_v7, %v2223_v3  ;;  %v2226_v11 = vmax.f32 %v2664_v8, 0.0 }
 0x19d   :  { %v1815_v13 = vpop.f32.mrb[4].mxu1 }
 0x19e   :  { %2351 = vst [vmem:[%s4017_s2] sm:$0xff] %v2645_v10  ;;  %v2646_v12 = vpack.c.bf16 %v2226_v11, %v2225_v9  ;;  %v2154_v14 = vpop.f32.mrb[4].mxu0  ;;  %v1817_v16 = vpop.f32.mrb[5].mxu1 }
 0x19f   :  { %v2665_v15 = vadd.f32 %v2154_v14, %v1815_v13  ;;  %v2156_v17 = vpop.f32.mrb[5].mxu0  ;;  %v1819_v19 = vpop.f32.mrb[6].mxu1 }
 0x1a0   :  { %2352 = vst [vmem:[%s4017_s2 + $0x8] sm:$0xff] %v2646_v12  ;;  %v2666_v18 = vadd.f32 %v2156_v17, %v1817_v16  ;;  %v2158_v20 = vpop.f32.mrb[6].mxu0  ;;  %v1821_v23 = vpop.f32.mrb[7].mxu1 }
 0x1a1   :  { %v2227_v21 = vmax.f32 %v2665_v15, 0.0  ;;  %v2667_v22 = vadd.f32 %v2158_v20, %v1819_v19  ;;  %v2160_v24 = vpop.f32.mrb[7].mxu0 }
 0x1a2   :  { %v2228_v25 = vmax.f32 %v2666_v18, 0.0  ;;  %v2668_v26 = vadd.f32 %v2160_v24, %v1821_v23 }
 0x1a3   :  { %v2229_v27 = vmax.f32 %v2667_v22, 0.0 }
 0x1a4   :  { %v2647_v28 = vpack.c.bf16 %v2228_v25, %v2227_v21  ;;  %v2230_v29 = vmax.f32 %v2668_v26, 0.0 }
 0x1a5   :  { %v1825_v31 = vpop.f32.mrb[8].mxu1 }
 0x1a6   :  { %2353 = vst [vmem:[%s4017_s2 + $0x10] sm:$0xff] %v2647_v28  ;;  %v2648_v30 = vpack.c.bf16 %v2230_v29, %v2229_v27  ;;  %v2164_v32 = vpop.f32.mrb[8].mxu0  ;;  %v1827_v34 = vpop.f32.mrb[9].mxu1 }
 0x1a7   :  { %v2669_v33 = vadd.f32 %v2164_v32, %v1825_v31  ;;  %v2166_v35 = vpop.f32.mrb[9].mxu0  ;;  %v1829_v37 = vpop.f32.mrb[10].mxu1 }
 0x1a8   :  { %2354 = vst [vmem:[%s4017_s2 + $0x18] sm:$0xff] %v2648_v30  ;;  %v2670_v36 = vadd.f32 %v2166_v35, %v1827_v34  ;;  %v2168_v38 = vpop.f32.mrb[10].mxu0  ;;  %v1831_v41 = vpop.f32.mrb[11].mxu1 }
 0x1a9   :  { %v2231_v39 = vmax.f32 %v2669_v33, 0.0  ;;  %v2671_v40 = vadd.f32 %v2168_v38, %v1829_v37  ;;  %v2170_v42 = vpop.f32.mrb[11].mxu0 }
 0x1aa   :  { %v2232_v43 = vmax.f32 %v2670_v36, 0.0  ;;  %v2672_v44 = vadd.f32 %v2170_v42, %v1831_v41 }
 0x1ab   :  { %v2233_v45 = vmax.f32 %v2671_v40, 0.0 }
 0x1ac   :  { %v2649_v46 = vpack.c.bf16 %v2232_v43, %v2231_v39  ;;  %v2234_v47 = vmax.f32 %v2672_v44, 0.0 }
 0x1ad   :  { %v1835_v49 = vpop.f32.mrb[12].mxu1 }
 0x1ae   :  { %2355 = vst [vmem:[%s4017_s2 + $0x20] sm:$0xff] %v2649_v46  ;;  %v2650_v48 = vpack.c.bf16 %v2234_v47, %v2233_v45  ;;  %v2174_v50 = vpop.f32.mrb[12].mxu0  ;;  %v1837_v52 = vpop.f32.mrb[13].mxu1 }
 0x1af   :  { %v2673_v51 = vadd.f32 %v2174_v50, %v1835_v49  ;;  %v2176_v53 = vpop.f32.mrb[13].mxu0  ;;  %v1839_v55 = vpop.f32.mrb[14].mxu1 }
 0x1b0   :  { %2356 = vst [vmem:[%s4017_s2 + $0x28] sm:$0xff] %v2650_v48  ;;  %v2674_v54 = vadd.f32 %v2176_v53, %v1837_v52  ;;  %v2178_v56 = vpop.f32.mrb[14].mxu0  ;;  %v1841_v59 = vpop.f32.mrb[15].mxu1 }
 0x1b1   :  { %v2235_v57 = vmax.f32 %v2673_v51, 0.0  ;;  %v2675_v58 = vadd.f32 %v2178_v56, %v1839_v55  ;;  %v2180_v60 = vpop.f32.mrb[15].mxu0 }
 0x1b2   :  { %v2236_v61 = vmax.f32 %v2674_v54, 0.0  ;;  %v2676_v62 = vadd.f32 %v2180_v60, %v1841_v59 }
 0x1b3   :  { %v2237_v63 = vmax.f32 %v2675_v58, 0.0 }
 0x1b4   :  { %v2651_v0 = vpack.c.bf16 %v2236_v61, %v2235_v57  ;;  %v2238_v1 = vmax.f32 %v2676_v62, 0.0 }
 0x1b5   :  { %v1845_v3 = vpop.f32.mrb[16].mxu1 }
 0x1b6   :  { %2357 = vst [vmem:[%s4017_s2 + $0x30] sm:$0xff] %v2651_v0  ;;  %v2652_v2 = vpack.c.bf16 %v2238_v1, %v2237_v63  ;;  %v2184_v4 = vpop.f32.mrb[16].mxu0  ;;  %v1847_v6 = vpop.f32.mrb[17].mxu1 }
 0x1b7   :  { %v2677_v5 = vadd.f32 %v2184_v4, %v1845_v3  ;;  %v2186_v7 = vpop.f32.mrb[17].mxu0  ;;  %v1849_v9 = vpop.f32.mrb[18].mxu1 }
 0x1b8   :  { %2358 = vst [vmem:[%s4017_s2 + $0x38] sm:$0xff] %v2652_v2  ;;  %v2678_v8 = vadd.f32 %v2186_v7, %v1847_v6  ;;  %v2188_v10 = vpop.f32.mrb[18].mxu0  ;;  %v1851_v13 = vpop.f32.mrb[19].mxu1 }
 0x1b9   :  { %v2239_v11 = vmax.f32 %v2677_v5, 0.0  ;;  %v2679_v12 = vadd.f32 %v2188_v10, %v1849_v9  ;;  %v2190_v14 = vpop.f32.mrb[19].mxu0 }
 0x1ba   :  { %v2240_v15 = vmax.f32 %v2678_v8, 0.0  ;;  %v2680_v16 = vadd.f32 %v2190_v14, %v1851_v13 }
 0x1bb   :  { %v2241_v17 = vmax.f32 %v2679_v12, 0.0 }
 0x1bc   :  { %v2653_v18 = vpack.c.bf16 %v2240_v15, %v2239_v11  ;;  %v2242_v19 = vmax.f32 %v2680_v16, 0.0 }
 0x1bd   :  { %v1855_v21 = vpop.f32.mrb[20].mxu1 }
 0x1be   :  { %2359 = vst [vmem:[%s4017_s2 + $0x40] sm:$0xff] %v2653_v18  ;;  %v2654_v20 = vpack.c.bf16 %v2242_v19, %v2241_v17  ;;  %v2194_v22 = vpop.f32.mrb[20].mxu0  ;;  %v1857_v24 = vpop.f32.mrb[21].mxu1 }
 0x1bf   :  { %v2681_v23 = vadd.f32 %v2194_v22, %v1855_v21  ;;  %v2196_v25 = vpop.f32.mrb[21].mxu0  ;;  %v1859_v27 = vpop.f32.mrb[22].mxu1 }
 0x1c0   :  { %2360 = vst [vmem:[%s4017_s2 + $0x48] sm:$0xff] %v2654_v20  ;;  %v2682_v26 = vadd.f32 %v2196_v25, %v1857_v24  ;;  %v2198_v28 = vpop.f32.mrb[22].mxu0  ;;  %v1861_v31 = vpop.f32.mrb[23].mxu1 }
 0x1c1   :  { %v2243_v29 = vmax.f32 %v2681_v23, 0.0  ;;  %v2683_v30 = vadd.f32 %v2198_v28, %v1859_v27  ;;  %v2200_v32 = vpop.f32.mrb[23].mxu0 }
 0x1c2   :  { %v2244_v33 = vmax.f32 %v2682_v26, 0.0  ;;  %v2684_v34 = vadd.f32 %v2200_v32, %v1861_v31 }
 0x1c3   :  { %v2245_v35 = vmax.f32 %v2683_v30, 0.0 }
 0x1c4   :  { %v2655_v36 = vpack.c.bf16 %v2244_v33, %v2243_v29  ;;  %v2246_v37 = vmax.f32 %v2684_v34, 0.0 }
 0x1c5   :  { %v1865_v39 = vpop.f32.mrb[24].mxu1 }
 0x1c6   :  { %2361 = vst [vmem:[%s4017_s2 + $0x50] sm:$0xff] %v2655_v36  ;;  %v2656_v38 = vpack.c.bf16 %v2246_v37, %v2245_v35  ;;  %v2204_v40 = vpop.f32.mrb[24].mxu0  ;;  %v1867_v42 = vpop.f32.mrb[25].mxu1 }
 0x1c7   :  { %v2685_v41 = vadd.f32 %v2204_v40, %v1865_v39  ;;  %v2206_v43 = vpop.f32.mrb[25].mxu0  ;;  %v1869_v45 = vpop.f32.mrb[26].mxu1 }
 0x1c8   :  { %2362 = vst [vmem:[%s4017_s2 + $0x58] sm:$0xff] %v2656_v38  ;;  %v2686_v44 = vadd.f32 %v2206_v43, %v1867_v42  ;;  %v2208_v46 = vpop.f32.mrb[26].mxu0  ;;  %v1871_v49 = vpop.f32.mrb[27].mxu1 }
 0x1c9   :  { %v2247_v47 = vmax.f32 %v2685_v41, 0.0  ;;  %v2687_v48 = vadd.f32 %v2208_v46, %v1869_v45  ;;  %v2210_v50 = vpop.f32.mrb[27].mxu0 }
 0x1ca   :  { %v2248_v51 = vmax.f32 %v2686_v44, 0.0  ;;  %v2688_v52 = vadd.f32 %v2210_v50, %v1871_v49 }
 0x1cb   :  { %v2249_v53 = vmax.f32 %v2687_v48, 0.0 }
 0x1cc   :  { %v2657_v54 = vpack.c.bf16 %v2248_v51, %v2247_v47  ;;  %v2250_v55 = vmax.f32 %v2688_v52, 0.0 }
 0x1cd   :  { %v1875_v57 = vpop.f32.mrb[28].mxu1 }
 0x1ce   :  { %2363 = vst [vmem:[%s4017_s2 + $0x60] sm:$0xff] %v2657_v54  ;;  %v2658_v56 = vpack.c.bf16 %v2250_v55, %v2249_v53  ;;  %v2214_v58 = vpop.f32.mrb[28].mxu0  ;;  %v1877_v60 = vpop.f32.mrb[29].mxu1 }
 0x1cf   :  { %v2689_v59 = vadd.f32 %v2214_v58, %v1875_v57  ;;  %v2216_v61 = vpop.f32.mrb[29].mxu0  ;;  %v1879_v63 = vpop.f32.mrb[30].mxu1 }
 0x1d0   :  { %2364 = vst [vmem:[%s4017_s2 + $0x68] sm:$0xff] %v2658_v56  ;;  %v2690_v62 = vadd.f32 %v2216_v61, %v1877_v60  ;;  %v2218_v0 = vpop.f32.mrb[30].mxu0  ;;  %v1881_v3 = vpop.f32.mrb[31].mxu1 }
 0x1d1   :  { %v2251_v1 = vmax.f32 %v2689_v59, 0.0  ;;  %v2691_v2 = vadd.f32 %v2218_v0, %v1879_v63  ;;  %v2220_v4 = vpop.f32.mrb[31].mxu0 }
 0x1d2   :  { %v2252_v5 = vmax.f32 %v2690_v62, 0.0  ;;  %v2692_v6 = vadd.f32 %v2220_v4, %v1881_v3 }
 0x1d3   :  { %v2253_v7 = vmax.f32 %v2691_v2, 0.0 }
 0x1d4   :  { %v2659_v8 = vpack.c.bf16 %v2252_v5, %v2251_v1  ;;  %v2254_v9 = vmax.f32 %v2692_v6, 0.0 }
 0x1d6   :  { %2365 = vst [vmem:[%s4017_s2 + $0x70] sm:$0xff] %v2659_v8  ;;  %v2660_v10 = vpack.c.bf16 %v2254_v9, %v2253_v7 }
 0x1d8   :  { %2366 = vst [vmem:[%s4017_s2 + $0x78] sm:$0xff] %v2660_v10 }

// kernel: st_gcn_forward.17
= control target key start
LH: loop header
LB: loop body
LE: loop exit
PB: predicated region body
PF: predicated region fallthrough
CT: control target
= control target key end

     0   :  { %v113_v63 = vlaneseq  ;;  %vm132_vm0 = vcmask 1041409   ;;  %vm138_vm1 = vcmask 1041408   ;;  %vm152_vm2 = vcmask 1024   ;;  %s230_s0 = inlined_call_operand.vmem [shape: bf16[2,56,256], index: 0, kind: input, shape index: {}]   ;;  %s231_s2 = inlined_call_operand.<no memory space> [shape: f32[1,1], index: 2, kind: input, shape index: {}]   ;;  %s232_s1 = inlined_call_operand.vmem [shape: f32[1,256], index: 1, kind: input, shape index: {}]   ;;  %s233_s3 = inlined_call_operand.vmem [shape: f32[2,1], index: 3, kind: output, shape index: {}]  }
   0x1   :  { %v16_v0 = vld [vmem:[%s230_s0] sm:$0xff]  ;;  %v8_v1 = vstv %s231_s2  ;;  %v17_v2 = vld [vmem:[%s230_s0 + $0x8] sm:$0xff]  ;;  %v23_v3 = vld [vmem:[%s230_s0 + $0x38] sm:$0xff] }
   0x2   :  { %9 = vst [vmem:[#allocation2] sm:$0x1] %v8_v1  ;;  %v24_v4 = vld [vmem:[%s230_s0 + $0x40] sm:$0xff]  ;;  %v18_v5 = vld [vmem:[%s230_s0 + $0x10] sm:$0xff]  ;;  %v25_v6 = vld [vmem:[%s230_s0 + $0x48] sm:$0xff]  ;;  %v30_v7 = vunpack.c.l.bf16 %v16_v0  ;;  %v31_v8 = vunpack.c.h.bf16 %v16_v0  ;;  %v32_v11 = vunpack.c.l.bf16 %v17_v2  ;;  %v33_v12 = vunpack.c.h.bf16 %v17_v2 }
   0x3   :  { %v19_v9 = vld [vmem:[%s230_s0 + $0x18] sm:$0xff]  ;;  %v26_v10 = vld [vmem:[%s230_s0 + $0x50] sm:$0xff]  ;;  %v44_v13 = vunpack.c.l.bf16 %v23_v3  ;;  %v45_v14 = vunpack.c.h.bf16 %v23_v3  ;;  %v46_v15 = vunpack.c.l.bf16 %v24_v4  ;;  %v47_v16 = vunpack.c.h.bf16 %v24_v4  ;;  %v20_v17 = vld [vmem:[%s230_s0 + $0x20] sm:$0xff] }
   0x4   :  { %v27_v18 = vld [vmem:[%s230_s0 + $0x58] sm:$0xff]  ;;  %v34_v19 = vunpack.c.l.bf16 %v18_v5  ;;  %v35_v20 = vunpack.c.h.bf16 %v18_v5  ;;  %v48_v21 = vunpack.c.l.bf16 %v25_v6  ;;  %v49_v22 = vunpack.c.h.bf16 %v25_v6  ;;  %v21_v27 = vld [vmem:[%s230_s0 + $0x28] sm:$0xff]  ;;  %v28_v28 = vld [vmem:[%s230_s0 + $0x60] sm:$0xff] }
   0x5   :  { %v36_v23 = vunpack.c.l.bf16 %v19_v9  ;;  %v37_v24 = vunpack.c.h.bf16 %v19_v9  ;;  %v50_v25 = vunpack.c.l.bf16 %v26_v10  ;;  %v51_v26 = vunpack.c.h.bf16 %v26_v10  ;;  %v22_v37 = vld [vmem:[%s230_s0 + $0x30] sm:$0xff]  ;;  %v29_v38 = vld [vmem:[%s230_s0 + $0x68] sm:$0xff] }
   0x6   :  { %v58_v29 = vadd.f32 %v32_v11, %v30_v7  ;;  %v70_v30 = vadd.f32 %v33_v12, %v31_v8  ;;  %v82_v31 = vadd.f32 %v46_v15, %v44_v13  ;;  %v94_v32 = vadd.f32 %v47_v16, %v45_v14 }
   0x7   :  { %v38_v33 = vunpack.c.l.bf16 %v20_v17  ;;  %v39_v34 = vunpack.c.h.bf16 %v20_v17  ;;  %v52_v35 = vunpack.c.l.bf16 %v27_v18  ;;  %v53_v36 = vunpack.c.h.bf16 %v27_v18 }
   0x8   :  { %v59_v39 = vadd.f32 %v58_v29, %v34_v19  ;;  %v71_v40 = vadd.f32 %v70_v30, %v35_v20  ;;  %v83_v41 = vadd.f32 %v82_v31, %v48_v21  ;;  %v95_v42 = vadd.f32 %v94_v32, %v49_v22  ;;  %v111_v22 = vld [vmem:[%s232_s1] sm:$0x3] }
   0x9   :  { %v40_v43 = vunpack.c.l.bf16 %v21_v27  ;;  %v41_v44 = vunpack.c.h.bf16 %v21_v27  ;;  %v54_v45 = vunpack.c.l.bf16 %v28_v28  ;;  %v55_v46 = vunpack.c.h.bf16 %v28_v28 }
   0xa   :  { %v60_v47 = vadd.f32 %v59_v39, %v36_v23  ;;  %v72_v48 = vadd.f32 %v71_v40, %v37_v24  ;;  %v84_v49 = vadd.f32 %v83_v41, %v50_v25  ;;  %v96_v50 = vadd.f32 %v95_v42, %v51_v26 }
   0xb   :  { %v42_v51 = vunpack.c.l.bf16 %v22_v37  ;;  %v43_v52 = vunpack.c.h.bf16 %v22_v37  ;;  %v56_v53 = vunpack.c.l.bf16 %v29_v38  ;;  %v57_v54 = vunpack.c.h.bf16 %v29_v38 }
   0xc   :  { %v61_v55 = vadd.f32 %v60_v47, %v38_v33  ;;  %v73_v56 = vadd.f32 %v72_v48, %v39_v34  ;;  %v85_v57 = vadd.f32 %v84_v49, %v52_v35  ;;  %v97_v58 = vadd.f32 %v96_v50, %v53_v36  ;;  %v158_v49 = vld [vmem:[#allocation2] ss:$0 sm:$0xff] }
   0xd   :  { %v114_v8 = vshrl.u32 %v113_v63, 7 }
   0xe   :  { %v62_v59 = vadd.f32 %v61_v55, %v40_v43  ;;  %v74_v60 = vadd.f32 %v73_v56, %v41_v44  ;;  %v86_v61 = vadd.f32 %v85_v57, %v54_v45  ;;  %v98_v62 = vadd.f32 %v97_v58, %v55_v46 }
   0xf   :  { %v115_v17 = vsub.s32 0, %v114_v8  ;;  %v119_v23 = vsub.s32 1, %v114_v8 }
  0x10   :  { %v63_v0 = vadd.f32 %v62_v59, %v42_v51  ;;  %v75_v1 = vadd.f32 %v74_v60, %v43_v52  ;;  %v87_v2 = vadd.f32 %v86_v61, %v56_v53  ;;  %v99_v3 = vadd.f32 %v98_v62, %v57_v54 }
  0x11   :  { %v116_v28 = vrot.slane %v111_v22, %v115_v17  ;;  %v120_v33 = vrot.slane %v111_v22, %v119_v23 }
  0x12   :  { %v64_v4 = vrot.slane %v63_v0, 4  ;;  %v76_v5 = vrot.slane %v75_v1, 4  ;;  %v88_v6 = vrot.slane %v87_v2, 4  ;;  %v100_v7 = vrot.slane %v99_v3, 4 }
  0x14   :  { %v65_v9 = vadd.f32 %v64_v4, %v63_v0  ;;  %v77_v10 = vadd.f32 %v76_v5, %v75_v1  ;;  %v89_v11 = vadd.f32 %v88_v6, %v87_v2  ;;  %v101_v12 = vadd.f32 %v100_v7, %v99_v3 }
  0x16   :  { %v66_v13 = vrot.slane %v65_v9, 2  ;;  %v78_v14 = vrot.slane %v77_v10, 2  ;;  %v90_v15 = vrot.slane %v89_v11, 2  ;;  %v102_v16 = vrot.slane %v101_v12, 2 }
  0x18   :  { %v67_v18 = vadd.f32 %v66_v13, %v65_v9  ;;  %v79_v19 = vadd.f32 %v78_v14, %v77_v10  ;;  %v91_v20 = vadd.f32 %v90_v15, %v89_v11  ;;  %v103_v21 = vadd.f32 %v102_v16, %v101_v12 }
  0x1a   :  { %v68_v24 = vrot.slane %v67_v18, 1  ;;  %v80_v25 = vrot.slane %v79_v19, 1  ;;  %v92_v26 = vrot.slane %v91_v20, 1  ;;  %v104_v27 = vrot.slane %v103_v21, 1 }
  0x1c   :  { %v69_v29 = vadd.f32 %v68_v24, %v67_v18  ;;  %v81_v30 = vadd.f32 %v80_v25, %v79_v19  ;;  %v93_v31 = vadd.f32 %v92_v26, %v91_v20  ;;  %v105_v32 = vadd.f32 %v104_v27, %v103_v21 }
  0x1e   :  { %v107_v34 = vmul.f32 0.017857144, %v69_v29  ;;  %v108_v35 = vmul.f32 0.017857144, %v81_v30  ;;  %v109_v36 = vmul.f32 0.017857144, %v93_v31 }
  0x1f   :  { %v110_v37 = vmul.f32 0.017857144, %v105_v32 }
  0x20   :  { %v123_v38 = vmul.f32 %v116_v28, %v107_v34  ;;  %v125_v39 = vmul.f32 %v116_v28, %v109_v36  ;;  %v124_v40 = vmul.f32 %v120_v33, %v108_v35 }
  0x21   :  { %v126_v41 = vmul.f32 %v120_v33, %v110_v37 }
  0x22   :  { %v131_v42 = vrot.slane %v125_v39, 7 }
  0x23   :  { %v134_v43 = vrot.slane %v126_v41, 7 }
  0x24   :  { %v133_v44 = vsel %vm132_vm0, %v131_v42, %v123_v38 }
  0x25   :  { %v135_v45 = vsel %vm132_vm0, %v134_v43, %v124_v40  ;;  %v139_v46 = vsel %vm138_vm1, %v133_v44, 0.0 }
  0x26   :  { %v140_v47 = vsel %vm138_vm1, %v135_v45, 0.0 }
  0x27   :  { %v141_v48 = vadd.f32 %v140_v47, %v139_v46 }
  0x29   :  { %142 = vadd.xlane.f32.xlu0 %v141_v48 }
  0xb6   :  { %v143_v50 = vpop.xlane.xlu0 %142 }
  0xb7   :  { %v151_v51 = vadd.f32 %v158_v49, %v143_v50 }
  0xb9   :  { %153 = vst.msk [vmem:[%s233_s3] sm:$0x3] %vm152_vm2, %v151_v51 }

// kernel: st_gcn_forward.16
= control target key start
LH: loop header
LB: loop body
LE: loop exit
PB: predicated region body
PF: predicated region fallthrough
CT: control target
= control target key end

     0   :  { %s4649_s15 = smov 0   ;;  %s5791_s0 = inlined_call_operand.vmem [shape: bf16[2,192,256], index: 0, kind: input, shape index: {}]   ;;  %s5792_s1 = inlined_call_operand.vmem [shape: bf16[9,256,256], index: 1, kind: input, shape index: {}]   ;;  %s5793_s2 = inlined_call_operand.vmem [shape: f32[1,256], index: 2, kind: input, shape index: {}]   ;;  %s5794_s3 = inlined_call_operand.vmem [shape: bf16[2,64,256], index: 3, kind: input, shape index: {}]   ;;  %s5795_s4 = inlined_call_operand.vmem [shape: bf16[2,64,256], index: 4, kind: output, shape index: {}]  }
   0x1 LB: > { %s3326_s16 = sadd.s32 4294967295, %s4622_s15   ;;  %p3330_p0 = scmp.ge.s32.totalorder %s4622_s15, 1  ;;  %s4622_s15 = sphi %s4649_s15, %s14_s15  }
   0x2   : > { %p172_p1 = scmp.lt.s32.totalorder %s4622_s15, 3 }
   0x4   : > { %p173_p2 = pnand %p3330_p0, %p172_p1 }
   0x5   : > { %v4135_v0 = vld [vmem:[%s5792_s1 + $0x104] ss:$8 sps:$4 sm:$0xff] (!%p173_p2)   ;;  %v4139_v2 = vld [vmem:[%s5792_s1 + $0x100] ss:$8 sps:$4 sm:$0xff] (!%p173_p2)   ;;  %v4141_v4 = vld [vmem:[%s5792_s1 + $0x114] ss:$8 sps:$4 sm:$0xff] (!%p173_p2)  }
   0x6   : > { %176 = sbr.rel (%p173_p2) target bundleno = 563 (0x233), region = 36  ;;  %v4137_v1 = vld [vmem:[%s5792_s1 + $0x404] ss:$8 sps:$4 sm:$0xff] (!%p173_p2)   ;;  %493 = vmatprep.subr.bf16.mxu1 (!%p173_p2), %v4135_v0  ;;  %v4140_v3 = vld [vmem:[%s5792_s1 + $0x400] ss:$8 sps:$4 sm:$0xff] (!%p173_p2)   ;;  %p203_p3 = scmp.lt.s32.totalorder (!%p173_p2), %s3326_s16, 1 }
   0x7   : > { %1710 = vmatprep.subr.bf16.mxu0 (!%p173_p2), %v4137_v1  ;;  %494 = vmatpush1.bf16.msra.mxu1 (!%p173_p2), %v4139_v2  ;;  %v4143_v5 = vld [vmem:[%s5792_s1 + $0x414] ss:$8 sps:$4 sm:$0xff] (!%p173_p2)   ;;  %v4145_v6 = vld [vmem:[%s5792_s1 + $0x110] ss:$8 sps:$4 sm:$0xff] (!%p173_p2)   ;;  %v4147_v8 = vld [vmem:[%s5792_s1 + $0x124] ss:$8 sps:$4 sm:$0xff] (!%p173_p2)  }
   0x8   : > { %1711 = vmatpush1.bf16.msra.mxu0 (!%p173_p2), %v4140_v3  ;;  %495 = vmatprep.subr.bf16.mxu1 (!%p173_p2), %v4141_v4  ;;  %v4146_v7 = vld [vmem:[%s5792_s1 + $0x410] ss:$8 sps:$4 sm:$0xff] (!%p173_p2)   ;;  %v4149_v9 = vld [vmem:[%s5792_s1 + $0x424] ss:$8 sps:$4 sm:$0xff] (!%p173_p2)   ;;  %v4151_v10 = vld [vmem:[%s5792_s1 + $0x120] ss:$8 sps:$4 sm:$0xff] (!%p173_p2)  }
   0x9   : > { %1712 = vmatprep.subr.bf16.mxu0 (!%p173_p2), %v4143_v5  ;;  %v4152_v11 = vld [vmem:[%s5792_s1 + $0x420] ss:$8 sps:$4 sm:$0xff] (!%p173_p2)   ;;  %v4153_v12 = vld [vmem:[%s5792_s1 + $0x134] ss:$8 sps:$4 sm:$0xff] (!%p173_p2)   ;;  %v4157_v14 = vld [vmem:[%s5792_s1 + $0x130] ss:$8 sps:$4 sm:$0xff] (!%p173_p2)  }
   0xa   : > { %v4155_v13 = vld [vmem:[%s5792_s1 + $0x434] ss:$8 sps:$4 sm:$0xff] (!%p173_p2)   ;;  %v4158_v15 = vld [vmem:[%s5792_s1 + $0x430] ss:$8 sps:$4 sm:$0xff] (!%p173_p2)   ;;  %v4159_v16 = vld [vmem:[%s5792_s1 + $0x144] ss:$8 sps:$4 sm:$0xff] (!%p173_p2)  }
   0xb   : > { %496 = vmatpush1.bf16.msra.mxu1 (!%p173_p2), %v4145_v6  ;;  %v4161_v17 = vld [vmem:[%s5792_s1 + $0x444] ss:$8 sps:$4 sm:$0xff] (!%p173_p2)   ;;  %v4163_v18 = vld [vmem:[%s5792_s1 + $0x140] ss:$8 sps:$4 sm:$0xff] (!%p173_p2)   ;;  %v4165_v20 = vld [vmem:[%s5792_s1 + $0x154] ss:$8 sps:$4 sm:$0xff] (!%p173_p2)  }
   0xc   : > { %1713 = vmatpush1.bf16.msra.mxu0 (!%p173_p2), %v4146_v7  ;;  %497 = vmatprep.subr.bf16.mxu1 (!%p173_p2), %v4147_v8  ;;  %v4164_v19 = vld [vmem:[%s5792_s1 + $0x440] ss:$8 sps:$4 sm:$0xff] (!%p173_p2)   ;;  %v4167_v21 = vld [vmem:[%s5792_s1 + $0x454] ss:$8 sps:$4 sm:$0xff] (!%p173_p2)   ;;  %v4169_v22 = vld [vmem:[%s5792_s1 + $0x150] ss:$8 sps:$4 sm:$0xff] (!%p173_p2)  }
   0xd   : > { %1714 = vmatprep.subr.bf16.mxu0 %v4149_v9  ;;  %v4170_v23 = vld [vmem:[%s5792_s1 + $0x450] ss:$8 sps:$4 sm:$0xff]   ;;  %v4171_v24 = vld [vmem:[%s5792_s1 + $0x164] ss:$8 sps:$4 sm:$0xff]   ;;  %v4175_v26 = vld [vmem:[%s5792_s1 + $0x160] ss:$8 sps:$4 sm:$0xff]  }
   0xe   : > { %v4173_v25 = vld [vmem:[%s5792_s1 + $0x464] ss:$8 sps:$4 sm:$0xff]   ;;  %v4176_v27 = vld [vmem:[%s5792_s1 + $0x460] ss:$8 sps:$4 sm:$0xff]   ;;  %v4177_v28 = vld [vmem:[%s5792_s1 + $0x174] ss:$8 sps:$4 sm:$0xff]  }
   0xf   : > { %498 = vmatpush1.bf16.msra.mxu1 %v4151_v10  ;;  %v4179_v29 = vld [vmem:[%s5792_s1 + $0x474] ss:$8 sps:$4 sm:$0xff]   ;;  %v4181_v30 = vld [vmem:[%s5792_s1 + $0x170] ss:$8 sps:$4 sm:$0xff]   ;;  %v4183_v32 = vld [vmem:[%s5792_s1 + $0x184] ss:$8 sps:$4 sm:$0xff]  }
  0x10   : > { %1715 = vmatpush1.bf16.msra.mxu0 %v4152_v11  ;;  %499 = vmatprep.subr.bf16.mxu1 %v4153_v12  ;;  %v4182_v31 = vld [vmem:[%s5792_s1 + $0x470] ss:$8 sps:$4 sm:$0xff]   ;;  %v4185_v33 = vld [vmem:[%s5792_s1 + $0x484] ss:$8 sps:$4 sm:$0xff]   ;;  %v4187_v34 = vld [vmem:[%s5792_s1 + $0x180] ss:$8 sps:$4 sm:$0xff]  }
  0x11   : > { %1716 = vmatprep.subr.bf16.mxu0 %v4155_v13  ;;  %v4188_v35 = vld [vmem:[%s5792_s1 + $0x480] ss:$8 sps:$4 sm:$0xff]   ;;  %v4189_v36 = vld [vmem:[%s5792_s1 + $0x194] ss:$8 sps:$4 sm:$0xff]   ;;  %s5797_s16 = smov (!%p203_p3, %s3326_s16), 1 }
  0x12   : > { %v4191_v37 = vld [vmem:[%s5792_s1 + $0x494] ss:$8 sps:$4 sm:$0xff]   ;;  %v4193_v38 = vld [vmem:[%s5792_s1 + $0x190] ss:$8 sps:$4 sm:$0xff]   ;;  %v4195_v40 = vld [vmem:[%s5792_s1 + $0x1a4] ss:$8 sps:$4 sm:$0xff]  }
  0x13   : > { %500 = vmatpush1.bf16.msra.mxu1 %v4157_v14  ;;  %v4194_v39 = vld [vmem:[%s5792_s1 + $0x490] ss:$8 sps:$4 sm:$0xff]   ;;  %s4126_s27 = smul.u32 192, %s5797_s16  ;;  %v4197_v41 = vld [vmem:[%s5792_s1 + $0x4a4] ss:$8 sps:$4 sm:$0xff]  }
  0x14   : > { %1717 = vmatpush1.bf16.msra.mxu0 %v4158_v15  ;;  %501 = vmatprep.subr.bf16.mxu1 %v4159_v16  ;;  %v4199_v42 = vld [vmem:[%s5792_s1 + $0x1a0] ss:$8 sps:$4 sm:$0xff]   ;;  %v4201_v44 = vld [vmem:[%s5792_s1 + $0x1b4] ss:$8 sps:$4 sm:$0xff]   ;;  %v4205_v46 = vld [vmem:[%s5792_s1 + $0x1b0] ss:$8 sps:$4 sm:$0xff]  }
  0x15   : > { %1718 = vmatprep.subr.bf16.mxu0 %v4161_v17  ;;  %v4200_v43 = vld [vmem:[%s5792_s1 + $0x4a0] ss:$8 sps:$4 sm:$0xff]   ;;  %s4802_s12 = scalar_lea.vmem %s5791_s0, %s4126_s27  ;;  %v4203_v45 = vld [vmem:[%s5792_s1 + $0x4b4] ss:$8 sps:$4 sm:$0xff]   ;;  %v4206_v47 = vld [vmem:[%s5792_s1 + $0x4b0] ss:$8 sps:$4 sm:$0xff]  }
  0x16   : > { %v4814_v48 = vld [vmem:[%s4802_s12 + $0x14] ss:$8 sps:$4 sm:$0xff]   ;;  %v4207_v49 = vld [vmem:[%s5792_s1 + $0x1c4] ss:$8 sps:$4 sm:$0xff]   ;;  %v4211_v52 = vld [vmem:[%s5792_s1 + $0x1c0] ss:$8 sps:$4 sm:$0xff]  }
  0x17   : > { %502 = vmatpush1.bf16.msra.mxu1 %v4163_v18  ;;  %v4209_v50 = vld [vmem:[%s5792_s1 + $0x4c4] ss:$8 sps:$4 sm:$0xff]   ;;  %525 = vmatprep.mubr.bf16.mxu1 %v4814_v48  ;;  %v4212_v53 = vld [vmem:[%s5792_s1 + $0x4c0] ss:$8 sps:$4 sm:$0xff]   ;;  %v4213_v54 = vld [vmem:[%s5792_s1 + $0x1d4] ss:$8 sps:$4 sm:$0xff]  }
  0x18   : > { %1719 = vmatpush1.bf16.msra.mxu0 %v4164_v19  ;;  %503 = vmatprep.subr.bf16.mxu1 %v4165_v20  ;;  %v4824_v51 = vld [vmem:[%s4802_s12 + $0x44] ss:$8 sps:$4 sm:$0xff]   ;;  %v4215_v55 = vld [vmem:[%s5792_s1 + $0x4d4] ss:$8 sps:$4 sm:$0xff]   ;;  %v4217_v56 = vld [vmem:[%s5792_s1 + $0x1d0] ss:$8 sps:$4 sm:$0xff]  }
  0x19   : > { %1720 = vmatprep.subr.bf16.mxu0 %v4167_v21  ;;  %1742 = vmatprep.mubr.bf16.mxu0 %v4824_v51  ;;  %v4218_v57 = vld [vmem:[%s5792_s1 + $0x4d0] ss:$8 sps:$4 sm:$0xff]   ;;  %v4219_v58 = vld [vmem:[%s5792_s1 + $0x1e4] ss:$8 sps:$4 sm:$0xff]   ;;  %v4223_v60 = vld [vmem:[%s5792_s1 + $0x1e0] ss:$8 sps:$4 sm:$0xff]  }
  0x1a   : > { %v4221_v59 = vld [vmem:[%s5792_s1 + $0x4e4] ss:$8 sps:$4 sm:$0xff]   ;;  %v4224_v61 = vld [vmem:[%s5792_s1 + $0x4e0] ss:$8 sps:$4 sm:$0xff]   ;;  %v4225_v62 = vld [vmem:[%s5792_s1 + $0x1f4] ss:$8 sps:$4 sm:$0xff]  }
  0x1b   : > { %504 = vmatpush1.bf16.msra.mxu1 %v4169_v22  ;;  %v4227_v63 = vld [vmem:[%s5792_s1 + $0x4f4] ss:$8 sps:$4 sm:$0xff]   ;;  %v4229_v0 = vld [vmem:[%s5792_s1 + $0x1f0] ss:$8 sps:$4 sm:$0xff]   ;;  %v4236_v2 = vld [vmem:[%s5792_s1 + $0x4] ss:$8 sps:$4 sm:$0xff]  }
  0x1c   : > { %1721 = vmatpush1.bf16.msra.mxu0 %v4170_v23  ;;  %505 = vmatprep.subr.bf16.mxu1 %v4171_v24  ;;  %v4230_v1 = vld [vmem:[%s5792_s1 + $0x4f0] ss:$8 sps:$4 sm:$0xff]   ;;  %v4242_v3 = vld [vmem:[%s5792_s1 + $0x504] ss:$8 sps:$4 sm:$0xff]   ;;  %v4234_v5 = vld [vmem:[%s5792_s1] ss:$8 sps:$4 sm:$0xff]  }
  0x1d   : > { %1722 = vmatprep.subr.bf16.mxu0 %v4173_v25  ;;  %v4876_v4 = vld [vmem:[%s4802_s12 + $0x10] ss:$8 sps:$4 sm:$0xff]   ;;  %v4882_v6 = vld [vmem:[%s4802_s12 + $0x40] ss:$8 sps:$4 sm:$0xff]   ;;  %v4245_v8 = vld [vmem:[%s5792_s1 + $0x14] ss:$8 sps:$4 sm:$0xff]  }
  0x1e   : > { %v4240_v7 = vld [vmem:[%s5792_s1 + $0x500] ss:$8 sps:$4 sm:$0xff]   ;;  %v4248_v9 = vld [vmem:[%s5792_s1 + $0x514] ss:$8 sps:$4 sm:$0xff]   ;;  %v4243_v10 = vld [vmem:[%s5792_s1 + $0x10] ss:$8 sps:$4 sm:$0xff]  }
  0x1f   : > { %506 = vmatpush1.bf16.msra.mxu1 %v4175_v26  ;;  %v4246_v11 = vld [vmem:[%s5792_s1 + $0x510] ss:$8 sps:$4 sm:$0xff]   ;;  %v4251_v12 = vld [vmem:[%s5792_s1 + $0x24] ss:$8 sps:$4 sm:$0xff]   ;;  %v4249_v14 = vld [vmem:[%s5792_s1 + $0x20] ss:$8 sps:$4 sm:$0xff]  }
  0x20   : > { %1723 = vmatpush1.bf16.msra.mxu0 %v4176_v27  ;;  %507 = vmatprep.subr.bf16.mxu1 %v4177_v28  ;;  %v4254_v13 = vld [vmem:[%s5792_s1 + $0x524] ss:$8 sps:$4 sm:$0xff]   ;;  %v4252_v15 = vld [vmem:[%s5792_s1 + $0x520] ss:$8 sps:$4 sm:$0xff]   ;;  %v4257_v16 = vld [vmem:[%s5792_s1 + $0x34] ss:$8 sps:$4 sm:$0xff]  }
  0x21   : > { %1724 = vmatprep.subr.bf16.mxu0 %v4179_v29  ;;  %v4917_v17 = vld [vmem:[%s4802_s12 + $0x24] ss:$8 sps:$4 sm:$0xff]   ;;  %v4260_v18 = vld [vmem:[%s5792_s1 + $0x534] ss:$8 sps:$4 sm:$0xff]   ;;  %v4255_v19 = vld [vmem:[%s5792_s1 + $0x30] ss:$8 sps:$4 sm:$0xff]  }
  0x22   : > { %v4258_v20 = vld [vmem:[%s5792_s1 + $0x530] ss:$8 sps:$4 sm:$0xff]   ;;  %v4930_v21 = vld [vmem:[%s4802_s12 + $0x54] ss:$8 sps:$4 sm:$0xff]   ;;  %v4263_v22 = vld [vmem:[%s5792_s1 + $0x44] ss:$8 sps:$4 sm:$0xff]  }
  0x23   : > { %508 = vmatpush1.bf16.msra.mxu1 %v4181_v30  ;;  %v4266_v23 = vld [vmem:[%s5792_s1 + $0x544] ss:$8 sps:$4 sm:$0xff]   ;;  %v4939_v24 = vld [vmem:[%s4802_s12 + $0x20] ss:$8 sps:$4 sm:$0xff]   ;;  %v4942_v25 = vld [vmem:[%s4802_s12 + $0x50] ss:$8 sps:$4 sm:$0xff]  }
  0x24   : > { %1725 = vmatpush1.bf16.msra.mxu0 %v4182_v31  ;;  %509 = vmatprep.subr.bf16.mxu1 %v4183_v32  ;;  %v4261_v26 = vld [vmem:[%s5792_s1 + $0x40] ss:$8 sps:$4 sm:$0xff]   ;;  %v4269_v28 = vld [vmem:[%s5792_s1 + $0x54] ss:$8 sps:$4 sm:$0xff]   ;;  %v4267_v31 = vld [vmem:[%s5792_s1 + $0x50] ss:$8 sps:$4 sm:$0xff]  }
  0x25   : > { %1726 = vmatprep.subr.bf16.mxu0 %v4185_v33  ;;  %v4264_v27 = vld [vmem:[%s5792_s1 + $0x540] ss:$8 sps:$4 sm:$0xff]   ;;  %v4957_v29 = vld [vmem:[%s4802_s12 + $0x34] ss:$8 sps:$4 sm:$0xff]   ;;  %v4270_v32 = vld [vmem:[%s5792_s1 + $0x550] ss:$8 sps:$4 sm:$0xff]  }
  0x26   : > { %v4272_v30 = vld [vmem:[%s5792_s1 + $0x554] ss:$8 sps:$4 sm:$0xff]   ;;  %v4970_v33 = vld [vmem:[%s4802_s12 + $0x64] ss:$8 sps:$4 sm:$0xff]  }
  0x27   : > { %510 = vmatpush1.bf16.msra.mxu1 %v4187_v34  ;;  %v4275_v34 = vld [vmem:[%s5792_s1 + $0x64] ss:$8 sps:$4 sm:$0xff]  }
  0x28   : > { %1727 = vmatpush1.bf16.msra.mxu0 %v4188_v35  ;;  %511 = vmatprep.subr.bf16.mxu1 %v4189_v36  ;;  %v4278_v35 = vld [vmem:[%s5792_s1 + $0x564] ss:$8 sps:$4 sm:$0xff]   ;;  %v4979_v36 = vld [vmem:[%s4802_s12 + $0x30] ss:$8 sps:$4 sm:$0xff]  }
  0x29   : > { %1728 = vmatprep.subr.bf16.mxu0 %v4191_v37  ;;  %v4982_v37 = vld [vmem:[%s4802_s12 + $0x60] ss:$8 sps:$4 sm:$0xff]  }
  0x2b   : > { %512 = vmatpush1.bf16.msra.mxu1 %v4193_v38  ;;  %v4273_v38 = vld [vmem:[%s5792_s1 + $0x60] ss:$8 sps:$4 sm:$0xff]  }
  0x2c   : > { %1729 = vmatpush1.bf16.msra.mxu0 %v4194_v39  ;;  %513 = vmatprep.subr.bf16.mxu1 %v4195_v40  ;;  %v4276_v39 = vld [vmem:[%s5792_s1 + $0x560] ss:$8 sps:$4 sm:$0xff]   ;;  %v4281_v40 = vld [vmem:[%s5792_s1 + $0x74] ss:$8 sps:$4 sm:$0xff]  }
  0x2d   : > { %1730 = vmatprep.subr.bf16.mxu0 %v4197_v41  ;;  %v4284_v41 = vld [vmem:[%s5792_s1 + $0x574] ss:$8 sps:$4 sm:$0xff]  }
  0x2f   : > { %514 = vmatpush1.bf16.msra.mxu1 %v4199_v42  ;;  %v5001_v42 = vld [vmem:[%s4802_s12 + $0x74] ss:$8 sps:$4 sm:$0xff]  }
  0x30   : > { %1731 = vmatpush1.bf16.msra.mxu0 %v4200_v43  ;;  %515 = vmatprep.subr.bf16.mxu1 %v4201_v44  ;;  %v4279_v43 = vld [vmem:[%s5792_s1 + $0x70] ss:$8 sps:$4 sm:$0xff]  }
  0x31   : > { %1732 = vmatprep.subr.bf16.mxu0 %v4203_v45  ;;  %v4282_v44 = vld [vmem:[%s5792_s1 + $0x570] ss:$8 sps:$4 sm:$0xff]  }
  0x32   : > { %v5010_v45 = vld [vmem:[%s4802_s12 + $0x70] ss:$8 sps:$4 sm:$0xff]  }
  0x33   : > { %516 = vmatpush1.bf16.msra.mxu1 %v4205_v46  ;;  %v4287_v46 = vld [vmem:[%s5792_s1 + $0x84] ss:$8 sps:$4 sm:$0xff]  }
  0x34   : > { %1733 = vmatpush1.bf16.msra.mxu0 %v4206_v47  ;;  %517 = vmatprep.subr.bf16.mxu1 %v4207_v49  ;;  %v4290_v47 = vld [vmem:[%s5792_s1 + $0x584] ss:$8 sps:$4 sm:$0xff]   ;;  %v4285_v49 = vld [vmem:[%s5792_s1 + $0x80] ss:$8 sps:$4 sm:$0xff]  }
  0x35   : > { %1734 = vmatprep.subr.bf16.mxu0 %v4209_v50  ;;  %v4288_v50 = vld [vmem:[%s5792_s1 + $0x580] ss:$8 sps:$4 sm:$0xff]  }
  0x37   : > { %518 = vmatpush1.bf16.msra.mxu1 %v4211_v52  ;;  %v4293_v52 = vld [vmem:[%s5792_s1 + $0x94] ss:$8 sps:$4 sm:$0xff]  }
  0x38   : > { %1735 = vmatpush1.bf16.msra.mxu0 %v4212_v53  ;;  %519 = vmatprep.subr.bf16.mxu1 %v4213_v54  ;;  %v4296_v53 = vld [vmem:[%s5792_s1 + $0x594] ss:$8 sps:$4 sm:$0xff]   ;;  %v4291_v54 = vld [vmem:[%s5792_s1 + $0x90] ss:$8 sps:$4 sm:$0xff]  }
  0x39   : > { %1736 = vmatprep.subr.bf16.mxu0 %v4215_v55  ;;  %v4294_v55 = vld [vmem:[%s5792_s1 + $0x590] ss:$8 sps:$4 sm:$0xff]  }
  0x3b   : > { %520 = vmatpush1.bf16.msra.mxu1 %v4217_v56  ;;  %v4301_v56 = vld [vmem:[%s5792_s1 + $0xa4] ss:$8 sps:$4 sm:$0xff]  }
  0x3c   : > { %1737 = vmatpush1.bf16.msra.mxu0 %v4218_v57  ;;  %521 = vmatprep.subr.bf16.mxu1 %v4219_v58  ;;  %v4306_v57 = vld [vmem:[%s5792_s1 + $0x5a4] ss:$8 sps:$4 sm:$0xff]   ;;  %v4299_v58 = vld [vmem:[%s5792_s1 + $0xa0] ss:$8 sps:$4 sm:$0xff]  }
  0x3d   : > { %1738 = vmatprep.subr.bf16.mxu0 %v4221_v59  ;;  %v4304_v59 = vld [vmem:[%s5792_s1 + $0x5a0] ss:$8 sps:$4 sm:$0xff]  }
  0x3f   : > { %522 = vmatpush1.bf16.msra.mxu1 %v4223_v60  ;;  %v4311_v60 = vld [vmem:[%s5792_s1 + $0xb4] ss:$8 sps:$4 sm:$0xff]  }
  0x40   : > { %1739 = vmatpush1.bf16.msra.mxu0 %v4224_v61  ;;  %523 = vmatprep.subr.bf16.mxu1 %v4225_v62  ;;  %v4314_v61 = vld [vmem:[%s5792_s1 + $0x5b4] ss:$8 sps:$4 sm:$0xff]   ;;  %v4309_v62 = vld [vmem:[%s5792_s1 + $0xb0] ss:$8 sps:$4 sm:$0xff]  }
  0x41   : > { %1740 = vmatprep.subr.bf16.mxu0 %v4227_v63  ;;  %v4312_v63 = vld [vmem:[%s5792_s1 + $0x5b0] ss:$8 sps:$4 sm:$0xff]  }
  0x43   : > { %524 = vmatpush1.bf16.msra.mxu1 %v4229_v0  ;;  %v4319_v0 = vld [vmem:[%s5792_s1 + $0xc4] ss:$8 sps:$4 sm:$0xff]  }
  0x44   : > { %1741 = vmatpush1.bf16.msra.mxu0 %v4230_v1  ;;  %736 = vmatprep.subr.bf16.mxu1 %v4236_v2  ;;  %v4324_v1 = vld [vmem:[%s5792_s1 + $0x5c4] ss:$8 sps:$4 sm:$0xff]   ;;  %v4317_v2 = vld [vmem:[%s5792_s1 + $0xc0] ss:$8 sps:$4 sm:$0xff]  }
  0x45   : > { %2040 = vmatprep.subr.bf16.mxu0 %v4242_v3  ;;  %v4322_v3 = vld [vmem:[%s5792_s1 + $0x5c0] ss:$8 sps:$4 sm:$0xff]  }
  0x46   : > { %526 = vmatmul.mubr.bf16.vlgmr.msra.gmra.mrb[0].mxu1 %v4876_v4 }
  0x47   : > { %1743 = vmatmul.mubr.bf16.vlgmr.msra.gmra.mrb[0].mxu0 %v4882_v6  ;;  %737 = vmatpush1.bf16.msra.mxu1 %v4234_v5  ;;  %v4329_v5 = vld [vmem:[%s5792_s1 + $0xd4] ss:$8 sps:$4 sm:$0xff]  }
  0x48   : > { %2041 = vmatpush1.bf16.msra.mxu0 %v4240_v7  ;;  %738 = vmatprep.subr.bf16.mxu1 %v4245_v8  ;;  %v4327_v7 = vld [vmem:[%s5792_s1 + $0xd0] ss:$8 sps:$4 sm:$0xff]  }
  0x49   : > { %2042 = vmatprep.subr.bf16.mxu0 %v4248_v9  ;;  %535 = vmatprep.mubr.bf16.mxu1 %v4917_v17  ;;  %v4330_v8 = vld [vmem:[%s5792_s1 + $0x5d0] ss:$8 sps:$4 sm:$0xff]   ;;  %v4335_v9 = vld [vmem:[%s5792_s1 + $0xe4] ss:$8 sps:$4 sm:$0xff]  }
  0x4a   : > { %1752 = vmatprep.mubr.bf16.mxu0 %v4930_v21 }
  0x4b   : > { %739 = vmatpush1.bf16.msra.mxu1 %v4243_v10  ;;  %v4340_v10 = vld [vmem:[%s5792_s1 + $0x5e4] ss:$8 sps:$4 sm:$0xff]  }
  0x4c   : > { %2043 = vmatpush1.bf16.msra.mxu0 %v4246_v11  ;;  %740 = vmatprep.subr.bf16.mxu1 %v4251_v12  ;;  %v4333_v11 = vld [vmem:[%s5792_s1 + $0xe0] ss:$8 sps:$4 sm:$0xff]  }
  0x4d   : > { %2044 = vmatprep.subr.bf16.mxu0 %v4254_v13  ;;  %v4338_v12 = vld [vmem:[%s5792_s1 + $0x5e0] ss:$8 sps:$4 sm:$0xff]   ;;  %v4344_v13 = vld [vmem:[%s5792_s1 + $0xf4] ss:$8 sps:$4 sm:$0xff]  }
  0x4e   : > { %536 = vmatmul.mubr.bf16.gmra.mrb[4].mxu1 %v4939_v24 }
  0x4f   : > { %741 = vmatpush1.bf16.msra.mxu1 %v4249_v14  ;;  %1753 = vmatmul.mubr.bf16.gmra.mrb[4].mxu0 %v4942_v25  ;;  %v4347_v14 = vld [vmem:[%s5792_s1 + $0x5f4] ss:$8 sps:$4 sm:$0xff]  }
  0x50   : > { %2045 = vmatpush1.bf16.msra.mxu0 %v4252_v15  ;;  %742 = vmatprep.subr.bf16.mxu1 %v4257_v16  ;;  %v4342_v15 = vld [vmem:[%s5792_s1 + $0xf0] ss:$8 sps:$4 sm:$0xff]  }
  0x51   : > { %2046 = vmatprep.subr.bf16.mxu0 %v4260_v18  ;;  %545 = vmatprep.mubr.bf16.mxu1 %v4957_v29  ;;  %v4345_v16 = vld [vmem:[%s5792_s1 + $0x5f0] ss:$8 sps:$4 sm:$0xff]   ;;  %v4353_v18 = vld [vmem:[%s5792_s1 + $0x204] ss:$8 sps:$4 sm:$0xff]  }
  0x52   : > { %1762 = vmatprep.mubr.bf16.mxu0 %v4970_v33 }
  0x53   : > { %743 = vmatpush1.bf16.msra.mxu1 %v4255_v19  ;;  %v4356_v19 = vld [vmem:[%s5792_s1 + $0x604] ss:$8 sps:$4 sm:$0xff]  }
  0x54   : > { %2047 = vmatpush1.bf16.msra.mxu0 %v4258_v20  ;;  %744 = vmatprep.subr.bf16.mxu1 %v4263_v22  ;;  %v4348_v20 = vld [vmem:[%s4802_s12] ss:$8 sps:$4 sm:$0xff]  }
  0x55   : > { %2048 = vmatprep.subr.bf16.mxu0 %v4266_v23  ;;  %v4354_v22 = vld [vmem:[%s5792_s1 + $0x600] ss:$8 sps:$4 sm:$0xff]   ;;  %v4359_v23 = vld [vmem:[%s5792_s1 + $0x214] ss:$8 sps:$4 sm:$0xff]  }
  0x56   : > { %546 = vmatmul.mubr.bf16.gmra.mrb[8].mxu1 %v4979_v36 }
  0x57   : > { %745 = vmatpush1.bf16.msra.mxu1 %v4261_v26  ;;  %1763 = vmatmul.mubr.bf16.gmra.mrb[8].mxu0 %v4982_v37  ;;  %v4362_v26 = vld [vmem:[%s5792_s1 + $0x614] ss:$8 sps:$4 sm:$0xff]  }
  0x58   : > { %2049 = vmatpush1.bf16.msra.mxu0 %v4264_v27  ;;  %746 = vmatprep.subr.bf16.mxu1 %v4269_v28  ;;  %v4357_v27 = vld [vmem:[%s5792_s1 + $0x210] ss:$8 sps:$4 sm:$0xff]  }
  0x59   : > { %2050 = vmatprep.subr.bf16.mxu0 %v4272_v30  ;;  %555 = vmatprep.mubr.bf16.mxu1 %v4824_v51  ;;  %v4350_v51 = vld [vmem:[%s4802_s12 + $0x4] ss:$8 sps:$4 sm:$0xff]   ;;  %v4360_v28 = vld [vmem:[%s5792_s1 + $0x610] ss:$8 sps:$4 sm:$0xff]  }
  0x5a   : > { %1772 = vmatprep.mubr.bf16.mxu0 %v5001_v42  ;;  %v4365_v30 = vld [vmem:[%s5792_s1 + $0x224] ss:$8 sps:$4 sm:$0xff]  }
  0x5b   : > { %747 = vmatpush1.bf16.msra.mxu1 %v4267_v31  ;;  %v4363_v31 = vld [vmem:[%s5792_s1 + $0x220] ss:$8 sps:$4 sm:$0xff]  }
  0x5c   : > { %2051 = vmatpush1.bf16.msra.mxu0 %v4270_v32  ;;  %748 = vmatprep.subr.bf16.mxu1 %v4275_v34  ;;  %v4366_v32 = vld [vmem:[%s5792_s1 + $0x620] ss:$8 sps:$4 sm:$0xff]   ;;  %v4371_v34 = vld [vmem:[%s5792_s1 + $0x234] ss:$8 sps:$4 sm:$0xff]  }
  0x5d   : > { %2052 = vmatprep.subr.bf16.mxu0 %v4278_v35  ;;  %v4369_v35 = vld [vmem:[%s5792_s1 + $0x230] ss:$8 sps:$4 sm:$0xff]  }
  0x5e   : > { %556 = vmatmul.mubr.bf16.gmra.mrb[12].mxu1 %v4882_v6  ;;  %v4332_v6 = vld [vmem:[%s5792_s1 + $0x5d4] ss:$8 sps:$4 sm:$0xff]  }
  0x5f   : > { %749 = vmatpush1.bf16.msra.mxu1 %v4273_v38  ;;  %1773 = vmatmul.mubr.bf16.gmra.mrb[12].mxu0 %v5010_v45  ;;  %v4372_v38 = vld [vmem:[%s5792_s1 + $0x630] ss:$8 sps:$4 sm:$0xff]  }
  0x60   : > { %2053 = vmatpush1.bf16.msra.mxu0 %v4276_v39  ;;  %750 = vmatprep.subr.bf16.mxu1 %v4281_v40  ;;  %v4377_v39 = vld [vmem:[%s5792_s1 + $0x244] ss:$8 sps:$4 sm:$0xff]  }
  0x61   : > { %2054 = vmatprep.subr.bf16.mxu0 %v4284_v41  ;;  %768 = vmatprep.mubr.bf16.mxu1 %v4350_v51  ;;  %v4380_v40 = vld [vmem:[%s5792_s1 + $0x644] ss:$8 sps:$4 sm:$0xff]   ;;  %v4378_v41 = vld [vmem:[%s5792_s1 + $0x640] ss:$8 sps:$4 sm:$0xff]  }
  0x62   : > { %2072 = vmatprep.mubr.bf16.mxu0 %v4930_v21  ;;  %v4351_v21 = vld [vmem:[%s5792_s1 + $0x200] ss:$8 sps:$4 sm:$0xff]   ;;  %v4392_v51 = vld [vmem:[%s5792_s1 + $0x664] ss:$8 sps:$4 sm:$0xff]  }
  0x63   : > { %751 = vmatpush1.bf16.msra.mxu1 %v4279_v43  ;;  %v4383_v43 = vld [vmem:[%s5792_s1 + $0x254] ss:$8 sps:$4 sm:$0xff]  }
  0x64   : > { %2055 = vmatpush1.bf16.msra.mxu0 %v4282_v44  ;;  %752 = vmatprep.subr.bf16.mxu1 %v4287_v46  ;;  %v4386_v44 = vld [vmem:[%s5792_s1 + $0x654] ss:$8 sps:$4 sm:$0xff]   ;;  %v5188_v46 = vld [vmem:[%s4802_s12 + $0x84] ss:$8 sps:$4 sm:$0xff]  }
  0x65   : > { %2056 = vmatprep.subr.bf16.mxu0 %v4290_v47  ;;  %v4381_v47 = vld [vmem:[%s5792_s1 + $0x250] ss:$8 sps:$4 sm:$0xff]  }
  0x67   : > { %753 = vmatpush1.bf16.msra.mxu1 %v4285_v49  ;;  %v4384_v49 = vld [vmem:[%s5792_s1 + $0x650] ss:$8 sps:$4 sm:$0xff]  }
  0x68   : > { %2057 = vmatpush1.bf16.msra.mxu0 %v4288_v50  ;;  %754 = vmatprep.subr.bf16.mxu1 %v4293_v52  ;;  %v4389_v50 = vld [vmem:[%s5792_s1 + $0x264] ss:$8 sps:$4 sm:$0xff]   ;;  %v4387_v52 = vld [vmem:[%s5792_s1 + $0x260] ss:$8 sps:$4 sm:$0xff]  }
  0x69   : > { %2058 = vmatprep.subr.bf16.mxu0 %v4296_v53  ;;  %v4390_v53 = vld [vmem:[%s5792_s1 + $0x660] ss:$8 sps:$4 sm:$0xff]  }
  0x6b   : > { %755 = vmatpush1.bf16.msra.mxu1 %v4291_v54  ;;  %v5213_v54 = vld [vmem:[%s4802_s12 + $0x80] ss:$8 sps:$4 sm:$0xff]  }
  0x6c   : > { %2059 = vmatpush1.bf16.msra.mxu0 %v4294_v55  ;;  %756 = vmatprep.subr.bf16.mxu1 %v4301_v56  ;;  %v4395_v55 = vld [vmem:[%s5792_s1 + $0x274] ss:$8 sps:$4 sm:$0xff]  }
  0x6d   : > { %2060 = vmatprep.subr.bf16.mxu0 %v4306_v57  ;;  %v4398_v56 = vld [vmem:[%s5792_s1 + $0x674] ss:$8 sps:$4 sm:$0xff]   ;;  %v4393_v57 = vld [vmem:[%s5792_s1 + $0x270] ss:$8 sps:$4 sm:$0xff]  }
  0x6f   : > { %757 = vmatpush1.bf16.msra.mxu1 %v4299_v58  ;;  %v4396_v58 = vld [vmem:[%s5792_s1 + $0x670] ss:$8 sps:$4 sm:$0xff]  }
  0x70   : > { %2061 = vmatpush1.bf16.msra.mxu0 %v4304_v59  ;;  %758 = vmatprep.subr.bf16.mxu1 %v4311_v60  ;;  %v4401_v59 = vld [vmem:[%s5792_s1 + $0x284] ss:$8 sps:$4 sm:$0xff]  }
  0x71   : > { %2062 = vmatprep.subr.bf16.mxu0 %v4314_v61  ;;  %v4404_v60 = vld [vmem:[%s5792_s1 + $0x684] ss:$8 sps:$4 sm:$0xff]   ;;  %v4399_v61 = vld [vmem:[%s5792_s1 + $0x280] ss:$8 sps:$4 sm:$0xff]  }
  0x73   : > { %759 = vmatpush1.bf16.msra.mxu1 %v4309_v62  ;;  %v4402_v62 = vld [vmem:[%s5792_s1 + $0x680] ss:$8 sps:$4 sm:$0xff]  }
  0x74   : > { %2063 = vmatpush1.bf16.msra.mxu0 %v4312_v63  ;;  %760 = vmatprep.subr.bf16.mxu1 %v4319_v0  ;;  %v4407_v63 = vld [vmem:[%s5792_s1 + $0x294] ss:$8 sps:$4 sm:$0xff]   ;;  %v4408_v0 = vld [vmem:[%s5792_s1 + $0x690] ss:$8 sps:$4 sm:$0xff]  }
  0x75   : > { %2064 = vmatprep.subr.bf16.mxu0 %v4324_v1  ;;  %v4413_v1 = vld [vmem:[%s5792_s1 + $0x2a4] ss:$8 sps:$4 sm:$0xff]  }
  0x77   : > { %761 = vmatpush1.bf16.msra.mxu1 %v4317_v2  ;;  %v4416_v2 = vld [vmem:[%s5792_s1 + $0x6a4] ss:$8 sps:$4 sm:$0xff]  }
  0x78   : > { %2065 = vmatpush1.bf16.msra.mxu0 %v4322_v3  ;;  %762 = vmatprep.subr.bf16.mxu1 %v4329_v5  ;;  %v4411_v3 = vld [vmem:[%s5792_s1 + $0x2a0] ss:$8 sps:$4 sm:$0xff]  }
  0x79   : > { %2066 = vmatprep.subr.bf16.mxu0 %v4332_v6  ;;  %v4414_v5 = vld [vmem:[%s5792_s1 + $0x6a0] ss:$8 sps:$4 sm:$0xff]   ;;  %v4419_v6 = vld [vmem:[%s5792_s1 + $0x2b4] ss:$8 sps:$4 sm:$0xff]  }
  0x7b   : > { %763 = vmatpush1.bf16.msra.mxu1 %v4327_v7  ;;  %v4422_v7 = vld [vmem:[%s5792_s1 + $0x6b4] ss:$8 sps:$4 sm:$0xff]  }
  0x7c   : > { %2067 = vmatpush1.bf16.msra.mxu0 %v4330_v8  ;;  %764 = vmatprep.subr.bf16.mxu1 %v4335_v9  ;;  %v4417_v8 = vld [vmem:[%s5792_s1 + $0x2b0] ss:$8 sps:$4 sm:$0xff]  }
  0x7d   : > { %2068 = vmatprep.subr.bf16.mxu0 %v4340_v10  ;;  %v4420_v9 = vld [vmem:[%s5792_s1 + $0x6b0] ss:$8 sps:$4 sm:$0xff]   ;;  %v4425_v10 = vld [vmem:[%s5792_s1 + $0x2c4] ss:$8 sps:$4 sm:$0xff]  }
  0x7f   : > { %765 = vmatpush1.bf16.msra.mxu1 %v4333_v11  ;;  %v4428_v11 = vld [vmem:[%s5792_s1 + $0x6c4] ss:$8 sps:$4 sm:$0xff]  }
  0x80   : > { %2069 = vmatpush1.bf16.msra.mxu0 %v4338_v12  ;;  %766 = vmatprep.subr.bf16.mxu1 %v4344_v13  ;;  %v4423_v12 = vld [vmem:[%s5792_s1 + $0x2c0] ss:$8 sps:$4 sm:$0xff]  }
  0x81   : > { %2070 = vmatprep.subr.bf16.mxu0 %v4347_v14  ;;  %v4426_v13 = vld [vmem:[%s5792_s1 + $0x6c0] ss:$8 sps:$4 sm:$0xff]   ;;  %v4431_v14 = vld [vmem:[%s5792_s1 + $0x2d4] ss:$8 sps:$4 sm:$0xff]  }
  0x83   : > { %767 = vmatpush1.bf16.msra.mxu1 %v4342_v15  ;;  %v4434_v15 = vld [vmem:[%s5792_s1 + $0x6d4] ss:$8 sps:$4 sm:$0xff]  }
  0x84   : > { %2071 = vmatpush1.bf16.msra.mxu0 %v4345_v16  ;;  %1050 = vmatprep.subr.bf16.mxu1 %v4353_v18  ;;  %v4429_v16 = vld [vmem:[%s5792_s1 + $0x2d0] ss:$8 sps:$4 sm:$0xff]  }
  0x85   : > { %2370 = vmatprep.subr.bf16.mxu0 %v4356_v19  ;;  %v4432_v18 = vld [vmem:[%s5792_s1 + $0x6d0] ss:$8 sps:$4 sm:$0xff]   ;;  %v4437_v19 = vld [vmem:[%s5792_s1 + $0x2e4] ss:$8 sps:$4 sm:$0xff]  }
  0x86   : > { %769 = vmatmul.mubr.bf16.vlgmr.msra.gmra.mrb[0].mxu1 %v4348_v20  ;;  %v4442_v20 = vld [vmem:[%s5792_s1 + $0x6e4] ss:$8 sps:$4 sm:$0xff]  }
  0x87   : > { %2073 = vmatmul.mubr.bf16.vlgmr.msra.gmra.mrb[0].mxu0 %v4942_v25  ;;  %1051 = vmatpush1.bf16.msra.mxu1 %v4351_v21  ;;  %v4368_v25 = vld [vmem:[%s5792_s1 + $0x624] ss:$8 sps:$4 sm:$0xff]   ;;  %v4435_v21 = vld [vmem:[%s5792_s1 + $0x2e0] ss:$8 sps:$4 sm:$0xff]  }
  0x88   : > { %2371 = vmatpush1.bf16.msra.mxu0 %v4354_v22  ;;  %1052 = vmatprep.subr.bf16.mxu1 %v4359_v23  ;;  %v4440_v22 = vld [vmem:[%s5792_s1 + $0x6e0] ss:$8 sps:$4 sm:$0xff]   ;;  %v4446_v23 = vld [vmem:[%s5792_s1 + $0x2f4] ss:$8 sps:$4 sm:$0xff]  }
  0x89   : > { %2372 = vmatprep.subr.bf16.mxu0 %v4362_v26  ;;  %778 = vmatprep.mubr.bf16.mxu1 %v4814_v48  ;;  %v4374_v48 = vld [vmem:[%s5792_s1 + $0x634] ss:$8 sps:$4 sm:$0xff]  }
  0x8a   : > { %2082 = vmatprep.mubr.bf16.mxu0 %v4970_v33  ;;  %v4449_v26 = vld [vmem:[%s5792_s1 + $0x6f4] ss:$8 sps:$4 sm:$0xff]  }
  0x8b   : > { %1053 = vmatpush1.bf16.msra.mxu1 %v4357_v27  ;;  %v4444_v27 = vld [vmem:[%s5792_s1 + $0x2f0] ss:$8 sps:$4 sm:$0xff]  }
  0x8c   : > { %2373 = vmatpush1.bf16.msra.mxu0 %v4360_v28  ;;  %1054 = vmatprep.subr.bf16.mxu1 %v4365_v30  ;;  %v4447_v28 = vld [vmem:[%s5792_s1 + $0x6f0] ss:$8 sps:$4 sm:$0xff]   ;;  %v4452_v30 = vld [vmem:[%s5792_s1 + $0x304] ss:$8 sps:$4 sm:$0xff]  }
  0x8d   : > { %2374 = vmatprep.subr.bf16.mxu0 %v4368_v25  ;;  %v4455_v25 = vld [vmem:[%s5792_s1 + $0x704] ss:$8 sps:$4 sm:$0xff]  }
  0x8e   : > { %779 = vmatmul.mubr.bf16.gmra.mrb[4].mxu1 %v4876_v4  ;;  %v4375_v4 = vld [vmem:[%s5792_s1 + $0x240] ss:$8 sps:$4 sm:$0xff]  }
  0x8f   : > { %2083 = vmatmul.mubr.bf16.gmra.mrb[4].mxu0 %v4982_v37  ;;  %1055 = vmatpush1.bf16.msra.mxu1 %v4363_v31  ;;  %v4450_v31 = vld [vmem:[%s5792_s1 + $0x300] ss:$8 sps:$4 sm:$0xff]  }
  0x90   : > { %2375 = vmatpush1.bf16.msra.mxu0 %v4366_v32  ;;  %1056 = vmatprep.subr.bf16.mxu1 %v4371_v34  ;;  %v4453_v32 = vld [vmem:[%s5792_s1 + $0x700] ss:$8 sps:$4 sm:$0xff]   ;;  %v4458_v34 = vld [vmem:[%s5792_s1 + $0x314] ss:$8 sps:$4 sm:$0xff]  }
  0x91   : > { %2376 = vmatprep.subr.bf16.mxu0 %v4374_v48  ;;  %788 = vmatprep.mubr.bf16.mxu1 %v4917_v17  ;;  %v4461_v48 = vld [vmem:[%s5792_s1 + $0x714] ss:$8 sps:$4 sm:$0xff]  }
  0x92   : > { %2092 = vmatprep.mubr.bf16.mxu0 %v5001_v42 }
  0x93   : > { %1057 = vmatpush1.bf16.msra.mxu1 %v4369_v35  ;;  %v4456_v35 = vld [vmem:[%s5792_s1 + $0x310] ss:$8 sps:$4 sm:$0xff]  }
  0x94   : > { %2377 = vmatpush1.bf16.msra.mxu0 %v4372_v38  ;;  %1058 = vmatprep.subr.bf16.mxu1 %v4377_v39  ;;  %v4459_v38 = vld [vmem:[%s5792_s1 + $0x710] ss:$8 sps:$4 sm:$0xff]   ;;  %v4464_v39 = vld [vmem:[%s5792_s1 + $0x324] ss:$8 sps:$4 sm:$0xff]  }
  0x95   : > { %2378 = vmatprep.subr.bf16.mxu0 %v4380_v40  ;;  %v4465_v40 = vld [vmem:[%s5792_s1 + $0x720] ss:$8 sps:$4 sm:$0xff]  }
  0x96   : > { %789 = vmatmul.mubr.bf16.gmra.mrb[8].mxu1 %v4939_v24 }
  0x97   : > { %2093 = vmatmul.mubr.bf16.gmra.mrb[8].mxu0 %v5010_v45  ;;  %1059 = vmatpush1.bf16.msra.mxu1 %v4375_v4  ;;  %v4470_v4 = vld [vmem:[%s5792_s1 + $0x334] ss:$8 sps:$4 sm:$0xff]  }
  0x98   : > { %2379 = vmatpush1.bf16.msra.mxu0 %v4378_v41  ;;  %1060 = vmatprep.subr.bf16.mxu1 %v4383_v43  ;;  %v5374_v41 = vld [vmem:[%s4802_s12 + $0x44] ss:$8 sps:$4 sm:$0xff]   ;;  %v4468_v43 = vld [vmem:[%s5792_s1 + $0x330] ss:$8 sps:$4 sm:$0xff]  }
  0x99   : > { %2380 = vmatprep.subr.bf16.mxu0 %v4386_v44  ;;  %798 = vmatprep.mubr.bf16.mxu1 %v4957_v29  ;;  %v4471_v44 = vld [vmem:[%s5792_s1 + $0x730] ss:$8 sps:$4 sm:$0xff]  }
  0x9a   : > { %2102 = vmatprep.mubr.bf16.mxu0 %v5188_v46 }
  0x9b   : > { %1061 = vmatpush1.bf16.msra.mxu1 %v4381_v47  ;;  %v4476_v47 = vld [vmem:[%s5792_s1 + $0x344] ss:$8 sps:$4 sm:$0xff]  }
  0x9c   : > { %2381 = vmatpush1.bf16.msra.mxu0 %v4384_v49  ;;  %1062 = vmatprep.subr.bf16.mxu1 %v4389_v50  ;;  %v4479_v49 = vld [vmem:[%s5792_s1 + $0x744] ss:$8 sps:$4 sm:$0xff]   ;;  %v5399_v50 = vld [vmem:[%s4802_s12 + $0x40] ss:$8 sps:$4 sm:$0xff]  }
  0x9d   : > { %2382 = vmatprep.subr.bf16.mxu0 %v4392_v51  ;;  %v4482_v51 = vld [vmem:[%s5792_s1 + $0x354] ss:$8 sps:$4 sm:$0xff]  }
  0x9e   : > { %799 = vmatmul.mubr.bf16.gmra.mrb[12].mxu1 %v4979_v36 }
  0x9f   : > { %2103 = vmatmul.mubr.bf16.gmra.mrb[12].mxu0 %v5213_v54  ;;  %1063 = vmatpush1.bf16.msra.mxu1 %v4387_v52  ;;  %v4485_v52 = vld [vmem:[%s5792_s1 + $0x754] ss:$8 sps:$4 sm:$0xff]  }
  0xa0   : > { %2383 = vmatpush1.bf16.msra.mxu0 %v4390_v53  ;;  %1064 = vmatprep.subr.bf16.mxu1 %v4395_v55  ;;  %v5408_v53 = vld [vmem:[%s4802_s12 + $0x54] ss:$8 sps:$4 sm:$0xff]  }
  0xa1   : > { %2384 = vmatprep.subr.bf16.mxu0 %v4398_v56  ;;  %1082 = vmatprep.mubr.bf16.mxu1 %v4917_v17  ;;  %v4410_v17 = vld [vmem:[%s5792_s1 + $0x694] ss:$8 sps:$4 sm:$0xff]   ;;  %v4480_v56 = vld [vmem:[%s5792_s1 + $0x350] ss:$8 sps:$4 sm:$0xff]  }
  0xa2   : > { %2402 = vmatprep.mubr.bf16.mxu0 %v4970_v33  ;;  %v4405_v33 = vld [vmem:[%s5792_s1 + $0x290] ss:$8 sps:$4 sm:$0xff]   ;;  %v5411_v55 = vld [vmem:[%s4802_s12 + $0x94] ss:$8 sps:$4 sm:$0xff]  }
  0xa3   : > { %1065 = vmatpush1.bf16.msra.mxu1 %v4393_v57  ;;  %v4483_v57 = vld [vmem:[%s5792_s1 + $0x750] ss:$8 sps:$4 sm:$0xff]  }
  0xa4   : > { %2385 = vmatpush1.bf16.msra.mxu0 %v4396_v58  ;;  %1066 = vmatprep.subr.bf16.mxu1 %v4401_v59  ;;  %v4488_v58 = vld [vmem:[%s5792_s1 + $0x364] ss:$8 sps:$4 sm:$0xff]  }
  0xa5   : > { %2386 = vmatprep.subr.bf16.mxu0 %v4404_v60  ;;  %v4491_v59 = vld [vmem:[%s5792_s1 + $0x764] ss:$8 sps:$4 sm:$0xff]   ;;  %v5430_v60 = vld [vmem:[%s4802_s12 + $0x50] ss:$8 sps:$4 sm:$0xff]  }
  0xa7   : > { %1067 = vmatpush1.bf16.msra.mxu1 %v4399_v61  ;;  %v5433_v61 = vld [vmem:[%s4802_s12 + $0x90] ss:$8 sps:$4 sm:$0xff]  }
  0xa8   : > { %2387 = vmatpush1.bf16.msra.mxu0 %v4402_v62  ;;  %1068 = vmatprep.subr.bf16.mxu1 %v4407_v63  ;;  %v4486_v62 = vld [vmem:[%s5792_s1 + $0x360] ss:$8 sps:$4 sm:$0xff]  }
  0xa9   : > { %2388 = vmatprep.subr.bf16.mxu0 %v4410_v17  ;;  %v4489_v63 = vld [vmem:[%s5792_s1 + $0x760] ss:$8 sps:$4 sm:$0xff]   ;;  %v4494_v17 = vld [vmem:[%s5792_s1 + $0x374] ss:$8 sps:$4 sm:$0xff]  }
  0xab   : > { %1069 = vmatpush1.bf16.msra.mxu1 %v4405_v33  ;;  %v4497_v33 = vld [vmem:[%s5792_s1 + $0x774] ss:$8 sps:$4 sm:$0xff]  }
  0xac   : > { %2389 = vmatpush1.bf16.msra.mxu0 %v4408_v0  ;;  %1070 = vmatprep.subr.bf16.mxu1 %v4413_v1  ;;  %v4557_v0 = vld [vmem:[%s4802_s12 + $0x34] ss:$8 sps:$4 sm:$0xff]   ;;  %v4492_v1 = vld [vmem:[%s5792_s1 + $0x370] ss:$8 sps:$4 sm:$0xff]  }
  0xad   : > { %2390 = vmatprep.subr.bf16.mxu0 %v4416_v2  ;;  %v4495_v2 = vld [vmem:[%s5792_s1 + $0x770] ss:$8 sps:$4 sm:$0xff]  }
  0xaf   : > { %1071 = vmatpush1.bf16.msra.mxu1 %v4411_v3  ;;  %v4500_v3 = vld [vmem:[%s5792_s1 + $0x384] ss:$8 sps:$4 sm:$0xff]  }
  0xb0   : > { %2391 = vmatpush1.bf16.msra.mxu0 %v4414_v5  ;;  %1072 = vmatprep.subr.bf16.mxu1 %v4419_v6  ;;  %v4503_v5 = vld [vmem:[%s5792_s1 + $0x784] ss:$8 sps:$4 sm:$0xff]   ;;  %v4498_v6 = vld [vmem:[%s5792_s1 + $0x380] ss:$8 sps:$4 sm:$0xff]  }
  0xb1   : > { %2392 = vmatprep.subr.bf16.mxu0 %v4422_v7  ;;  %v4501_v7 = vld [vmem:[%s5792_s1 + $0x780] ss:$8 sps:$4 sm:$0xff]  }
  0xb3   : > { %1073 = vmatpush1.bf16.msra.mxu1 %v4417_v8  ;;  %v4506_v8 = vld [vmem:[%s5792_s1 + $0x394] ss:$8 sps:$4 sm:$0xff]  }
  0xb4   : > { %2393 = vmatpush1.bf16.msra.mxu0 %v4420_v9  ;;  %1074 = vmatprep.subr.bf16.mxu1 %v4425_v10  ;;  %v4504_v9 = vld [vmem:[%s5792_s1 + $0x390] ss:$8 sps:$4 sm:$0xff]  }
  0xb5   : > { %2394 = vmatprep.subr.bf16.mxu0 %v4428_v11  ;;  %v4507_v10 = vld [vmem:[%s5792_s1 + $0x790] ss:$8 sps:$4 sm:$0xff]   ;;  %v4512_v11 = vld [vmem:[%s5792_s1 + $0x3a4] ss:$8 sps:$4 sm:$0xff]  }
  0xb7   : > { %1075 = vmatpush1.bf16.msra.mxu1 %v4423_v12  ;;  %v4515_v12 = vld [vmem:[%s5792_s1 + $0x7a4] ss:$8 sps:$4 sm:$0xff]  }
  0xb8   : > { %2395 = vmatpush1.bf16.msra.mxu0 %v4426_v13  ;;  %1076 = vmatprep.subr.bf16.mxu1 %v4431_v14  ;;  %v4510_v13 = vld [vmem:[%s5792_s1 + $0x3a0] ss:$8 sps:$4 sm:$0xff]  }
  0xb9   : > { %2396 = vmatprep.subr.bf16.mxu0 %v4434_v15  ;;  %v4513_v14 = vld [vmem:[%s5792_s1 + $0x7a0] ss:$8 sps:$4 sm:$0xff]   ;;  %v4518_v15 = vld [vmem:[%s5792_s1 + $0x3b4] ss:$8 sps:$4 sm:$0xff]  }
  0xbb   : > { %1077 = vmatpush1.bf16.msra.mxu1 %v4429_v16  ;;  %v4521_v16 = vld [vmem:[%s5792_s1 + $0x7b4] ss:$8 sps:$4 sm:$0xff]  }
  0xbc   : > { %2397 = vmatpush1.bf16.msra.mxu0 %v4432_v18  ;;  %1078 = vmatprep.subr.bf16.mxu1 %v4437_v19  ;;  %v4516_v18 = vld [vmem:[%s5792_s1 + $0x3b0] ss:$8 sps:$4 sm:$0xff]  }
  0xbd   : > { %2398 = vmatprep.subr.bf16.mxu0 %v4442_v20  ;;  %v4519_v19 = vld [vmem:[%s5792_s1 + $0x7b0] ss:$8 sps:$4 sm:$0xff]   ;;  %v4527_v20 = vld [vmem:[%s5792_s1 + $0x3c4] ss:$8 sps:$4 sm:$0xff]  }
  0xbf   : > { %1079 = vmatpush1.bf16.msra.mxu1 %v4435_v21  ;;  %v4530_v21 = vld [vmem:[%s5792_s1 + $0x7c4] ss:$8 sps:$4 sm:$0xff]  }
  0xc0   : > { %2399 = vmatpush1.bf16.msra.mxu0 %v4440_v22  ;;  %1080 = vmatprep.subr.bf16.mxu1 %v4446_v23  ;;  %v4525_v22 = vld [vmem:[%s5792_s1 + $0x3c0] ss:$8 sps:$4 sm:$0xff]  }
  0xc1   : > { %2400 = vmatprep.subr.bf16.mxu0 %v4449_v26  ;;  %v4528_v23 = vld [vmem:[%s5792_s1 + $0x7c0] ss:$8 sps:$4 sm:$0xff]   ;;  %v4533_v26 = vld [vmem:[%s5792_s1 + $0x3d4] ss:$8 sps:$4 sm:$0xff]  }
  0xc3   : > { %1081 = vmatpush1.bf16.msra.mxu1 %v4444_v27  ;;  %v4536_v27 = vld [vmem:[%s5792_s1 + $0x7d4] ss:$8 sps:$4 sm:$0xff]  }
  0xc4   : > { %2401 = vmatpush1.bf16.msra.mxu0 %v4447_v28  ;;  %1380 = vmatprep.subr.bf16.mxu1 %v4452_v30  ;;  %v4531_v28 = vld [vmem:[%s5792_s1 + $0x3d0] ss:$8 sps:$4 sm:$0xff]  }
  0xc5   : > { %2700 = vmatprep.subr.bf16.mxu0 %v4455_v25  ;;  %v4534_v30 = vld [vmem:[%s5792_s1 + $0x7d0] ss:$8 sps:$4 sm:$0xff]   ;;  %v4544_v25 = vld [vmem:[%s5792_s1 + $0x3e4] ss:$8 sps:$4 sm:$0xff]  }
  0xc6   : > { %1083 = vmatmul.mubr.bf16.vlgmr.msra.gmra.mrb[0].mxu1 %v4939_v24  ;;  %v4467_v24 = vld [vmem:[%s5792_s1 + $0x724] ss:$8 sps:$4 sm:$0xff]  }
  0xc7   : > { %2403 = vmatmul.mubr.bf16.vlgmr.msra.gmra.mrb[0].mxu0 %v4982_v37  ;;  %1381 = vmatpush1.bf16.msra.mxu1 %v4450_v31  ;;  %v4462_v37 = vld [vmem:[%s5792_s1 + $0x320] ss:$8 sps:$4 sm:$0xff]   ;;  %v4548_v31 = vld [vmem:[%s5792_s1 + $0x7e4] ss:$8 sps:$4 sm:$0xff]  }
  0xc8   : > { %2701 = vmatpush1.bf16.msra.mxu0 %v4453_v32  ;;  %1382 = vmatprep.subr.bf16.mxu1 %v4458_v34  ;;  %v4542_v32 = vld [vmem:[%s5792_s1 + $0x3e0] ss:$8 sps:$4 sm:$0xff]  }
  0xc9   : > { %2702 = vmatprep.subr.bf16.mxu0 %v4461_v48  ;;  %1092 = vmatprep.mubr.bf16.mxu1 %v4957_v29  ;;  %v4473_v29 = vld [vmem:[%s5792_s1 + $0x734] ss:$8 sps:$4 sm:$0xff]   ;;  %v4546_v34 = vld [vmem:[%s5792_s1 + $0x7e0] ss:$8 sps:$4 sm:$0xff]  }
  0xca   : > { %2412 = vmatprep.mubr.bf16.mxu0 %v5001_v42  ;;  %v4551_v48 = vld [vmem:[%s5792_s1 + $0x3f4] ss:$8 sps:$4 sm:$0xff]  }
  0xcb   : > { %1383 = vmatpush1.bf16.msra.mxu1 %v4456_v35  ;;  %v4554_v35 = vld [vmem:[%s5792_s1 + $0x7f4] ss:$8 sps:$4 sm:$0xff]  }
  0xcc   : > { %2703 = vmatpush1.bf16.msra.mxu0 %v4459_v38  ;;  %1384 = vmatprep.subr.bf16.mxu1 %v4464_v39  ;;  %v4549_v38 = vld [vmem:[%s5792_s1 + $0x3f0] ss:$8 sps:$4 sm:$0xff]  }
  0xcd   : > { %2704 = vmatprep.subr.bf16.mxu0 %v4467_v24  ;;  %v4552_v39 = vld [vmem:[%s5792_s1 + $0x7f0] ss:$8 sps:$4 sm:$0xff]   ;;  %v4560_v24 = vld [vmem:[%s5792_s1 + $0x804] ss:$8 sps:$4 sm:$0xff]  }
  0xce   : > { %1093 = vmatmul.mubr.bf16.gmra.mrb[4].mxu1 %v4979_v36  ;;  %v4474_v36 = vld [vmem:[%s5792_s1 + $0x340] ss:$8 sps:$4 sm:$0xff]  }
  0xcf   : > { %2413 = vmatmul.mubr.bf16.gmra.mrb[4].mxu0 %v5010_v45  ;;  %1385 = vmatpush1.bf16.msra.mxu1 %v4462_v37  ;;  %v4477_v45 = vld [vmem:[%s5792_s1 + $0x740] ss:$8 sps:$4 sm:$0xff]   ;;  %v4555_v37 = vld [vmem:[%s4802_s12 + $0x30] ss:$8 sps:$4 sm:$0xff]  }
  0xd0   : > { %2705 = vmatpush1.bf16.msra.mxu0 %v4465_v40  ;;  %1386 = vmatprep.subr.bf16.mxu1 %v4470_v4  ;;  %v4558_v40 = vld [vmem:[%s5792_s1 + $0x800] ss:$8 sps:$4 sm:$0xff]   ;;  %v4563_v4 = vld [vmem:[%s5792_s1 + $0x814] ss:$8 sps:$4 sm:$0xff]  }
  0xd1   : > { %2706 = vmatprep.subr.bf16.mxu0 %v4473_v29  ;;  %1102 = vmatprep.mubr.bf16.mxu1 %v5374_v41  ;;  %v4615_v29 = vld [vmem:[%s4802_s12 + $0x70] ss:$8 sps:$4 sm:$0xff]  }
  0xd2   : > { %2422 = vmatprep.mubr.bf16.mxu0 %v5188_v46 }
  0xd3   : > { %1387 = vmatpush1.bf16.msra.mxu1 %v4468_v43  ;;  %v4561_v43 = vld [vmem:[%s5792_s1 + $0x810] ss:$8 sps:$4 sm:$0xff]  }
  0xd4   : > { %2707 = vmatpush1.bf16.msra.mxu0 %v4471_v44  ;;  %1388 = vmatprep.subr.bf16.mxu1 %v4476_v47  ;;  %v4566_v44 = vld [vmem:[%s5792_s1 + $0x824] ss:$8 sps:$4 sm:$0xff]   ;;  %v4564_v47 = vld [vmem:[%s5792_s1 + $0x820] ss:$8 sps:$4 sm:$0xff]  }
  0xd5   : > { %2708 = vmatprep.subr.bf16.mxu0 %v4479_v49  ;;  %v4569_v49 = vld [vmem:[%s5792_s1 + $0x834] ss:$8 sps:$4 sm:$0xff]  }
  0xd6   : > { %1103 = vmatmul.mubr.bf16.gmra.mrb[8].mxu1 %v5399_v50 }
  0xd7   : > { %2423 = vmatmul.mubr.bf16.gmra.mrb[8].mxu0 %v5213_v54  ;;  %1389 = vmatpush1.bf16.msra.mxu1 %v4474_v36  ;;  %v4572_v36 = vld [vmem:[%s5792_s1 + $0x844] ss:$8 sps:$4 sm:$0xff]  }
  0xd8   : > { %2709 = vmatpush1.bf16.msra.mxu0 %v4477_v45  ;;  %1390 = vmatprep.subr.bf16.mxu1 %v4482_v51  ;;  %v4570_v45 = vld [vmem:[%s5792_s1 + $0x840] ss:$8 sps:$4 sm:$0xff]   ;;  %v4576_v51 = vld [vmem:[%s4802_s12 + $0x64] ss:$8 sps:$4 sm:$0xff]  }
  0xd9   : > { %2710 = vmatprep.subr.bf16.mxu0 %v4485_v52  ;;  %1112 = vmatprep.mubr.bf16.mxu1 %v5408_v53  ;;  %v4578_v52 = vld [vmem:[%s4802_s12 + $0xa4] ss:$8 sps:$4 sm:$0xff]  }
  0xda   : > { %2432 = vmatprep.mubr.bf16.mxu0 %v5411_v55 }
  0xdb   : > { %1391 = vmatpush1.bf16.msra.mxu1 %v4480_v56  ;;  %v4584_v56 = vld [vmem:[%s5792_s1 + $0x864] ss:$8 sps:$4 sm:$0xff]  }
  0xdc   : > { %2711 = vmatpush1.bf16.msra.mxu0 %v4483_v57  ;;  %1392 = vmatprep.subr.bf16.mxu1 %v4488_v58  ;;  %v4580_v57 = vld [vmem:[%s4802_s12 + $0x60] ss:$8 sps:$4 sm:$0xff]  }
  0xdd   : > { %2712 = vmatprep.subr.bf16.mxu0 %v4491_v59  ;;  %v5606_v58 = vld [vmem:[%s4802_s12 + $0xa0] ss:$8 sps:$4 sm:$0xff]  }
  0xde   : > { %1113 = vmatmul.mubr.bf16.gmra.mrb[12].mxu1 %v5430_v60  ;;  %v4582_v59 = vld [vmem:[%s5792_s1 + $0x860] ss:$8 sps:$4 sm:$0xff]  }
  0xdf   : > { %2433 = vmatmul.mubr.bf16.gmra.mrb[12].mxu0 %v5433_v61  ;;  %1393 = vmatpush1.bf16.msra.mxu1 %v4486_v62  ;;  %v4585_v62 = vld [vmem:[%s5792_s1 + $0x870] ss:$8 sps:$4 sm:$0xff]  }
  0xe0   : > { %2713 = vmatpush1.bf16.msra.mxu0 %v4489_v63  ;;  %1394 = vmatprep.subr.bf16.mxu1 %v4494_v17  ;;  %v4590_v63 = vld [vmem:[%s5792_s1 + $0x884] ss:$8 sps:$4 sm:$0xff]   ;;  %v4588_v17 = vld [vmem:[%s5792_s1 + $0x880] ss:$8 sps:$4 sm:$0xff]  }
  0xe1   : > { %2714 = vmatprep.subr.bf16.mxu0 %v4497_v33  ;;  %1412 = vmatprep.mubr.bf16.mxu1 %v4557_v0  ;;  %v4593_v33 = vld [vmem:[%s5792_s1 + $0x894] ss:$8 sps:$4 sm:$0xff]   ;;  %v4591_v0 = vld [vmem:[%s5792_s1 + $0x890] ss:$8 sps:$4 sm:$0xff]  }
  0xe2   : > { %2732 = vmatprep.mubr.bf16.mxu0 %v5001_v42  ;;  %v4509_v42 = vld [vmem:[%s5792_s1 + $0x794] ss:$8 sps:$4 sm:$0xff]  }
  0xe3   : > { %1395 = vmatpush1.bf16.msra.mxu1 %v4492_v1  ;;  %v4594_v1 = vld [vmem:[%s5792_s1 + $0x8a0] ss:$8 sps:$4 sm:$0xff]  }
  0xe4   : > { %2715 = vmatpush1.bf16.msra.mxu0 %v4495_v2  ;;  %1396 = vmatprep.subr.bf16.mxu1 %v4500_v3  ;;  %v4599_v2 = vld [vmem:[%s5792_s1 + $0x8b4] ss:$8 sps:$4 sm:$0xff]   ;;  %v4597_v3 = vld [vmem:[%s5792_s1 + $0x8b0] ss:$8 sps:$4 sm:$0xff]  }
  0xe5   : > { %2716 = vmatprep.subr.bf16.mxu0 %v4503_v5  ;;  %v4602_v5 = vld [vmem:[%s5792_s1 + $0x8c4] ss:$8 sps:$4 sm:$0xff]  }
  0xe7   : > { %1397 = vmatpush1.bf16.msra.mxu1 %v4498_v6  ;;  %v4600_v6 = vld [vmem:[%s5792_s1 + $0x8c0] ss:$8 sps:$4 sm:$0xff]  }
  0xe8   : > { %2717 = vmatpush1.bf16.msra.mxu0 %v4501_v7  ;;  %1398 = vmatprep.subr.bf16.mxu1 %v4506_v8  ;;  %v4605_v7 = vld [vmem:[%s5792_s1 + $0x8d4] ss:$8 sps:$4 sm:$0xff]   ;;  %v4603_v8 = vld [vmem:[%s5792_s1 + $0x8d0] ss:$8 sps:$4 sm:$0xff]  }
  0xe9   : > { %2718 = vmatprep.subr.bf16.mxu0 %v4509_v42  ;;  %v4608_v42 = vld [vmem:[%s5792_s1 + $0x8e4] ss:$8 sps:$4 sm:$0xff]  }
  0xeb   : > { %1399 = vmatpush1.bf16.msra.mxu1 %v4504_v9  ;;  %v4606_v9 = vld [vmem:[%s5792_s1 + $0x8e0] ss:$8 sps:$4 sm:$0xff]  }
  0xec   : > { %2719 = vmatpush1.bf16.msra.mxu0 %v4507_v10  ;;  %1400 = vmatprep.subr.bf16.mxu1 %v4512_v11  ;;  %v4611_v10 = vld [vmem:[%s5792_s1 + $0x8f4] ss:$8 sps:$4 sm:$0xff]   ;;  %v4609_v11 = vld [vmem:[%s5792_s1 + $0x8f0] ss:$8 sps:$4 sm:$0xff]  }
  0xed   : > { %2720 = vmatprep.subr.bf16.mxu0 %v4515_v12  ;;  %v4612_v12 = vld [vmem:[%s4802_s12 + $0xb4] ss:$8 sps:$4 sm:$0xff]  }
  0xef   : > { %1401 = vmatpush1.bf16.msra.mxu1 %v4510_v13  ;;  %v4614_v13 = vld [vmem:[%s4802_s12 + $0xb0] ss:$8 sps:$4 sm:$0xff]   ;;  %s3956_s12 = sshll.u32 %s5797_s16, 6 }
  0xf0   : > { %2721 = vmatpush1.bf16.msra.mxu0 %v4513_v14  ;;  %1402 = vmatprep.subr.bf16.mxu1 %v4518_v15  ;;  %s212_s20 = scalar_lea.vmem %s5794_s3, %s3956_s12  ;;  %s5746_s25 = scalar_lea.vmem %s5795_s4, %s3956_s12 }
  0xf1   : > { %2722 = vmatprep.subr.bf16.mxu0 %v4521_v16 }
  0xf3   : > { %1403 = vmatpush1.bf16.msra.mxu1 %v4516_v18 }
  0xf4   : > { %2723 = vmatpush1.bf16.msra.mxu0 %v4519_v19  ;;  %1404 = vmatprep.subr.bf16.mxu1 %v4527_v20 }
  0xf5   : > { %2724 = vmatprep.subr.bf16.mxu0 %v4530_v21 }
  0xf7   : > { %1405 = vmatpush1.bf16.msra.mxu1 %v4525_v22 }
  0xf8   : > { %2725 = vmatpush1.bf16.msra.mxu0 %v4528_v23  ;;  %1406 = vmatprep.subr.bf16.mxu1 %v4533_v26 }
  0xf9   : > { %2726 = vmatprep.subr.bf16.mxu0 %v4536_v27 }
  0xfb   : > { %1407 = vmatpush1.bf16.msra.mxu1 %v4531_v28 }
  0xfc   : > { %2727 = vmatpush1.bf16.msra.mxu0 %v4534_v30  ;;  %1408 = vmatprep.subr.bf16.mxu1 %v4544_v25 }
  0xfd   : > { %2728 = vmatprep.subr.bf16.mxu0 %v4548_v31 }
  0xff   : > { %1409 = vmatpush1.bf16.msra.mxu1 %v4542_v32 }
 0x100   : > { %2729 = vmatpush1.bf16.msra.mxu0 %v4546_v34  ;;  %1410 = vmatprep.subr.bf16.mxu1 %v4551_v48 }
 0x101   : > { %2730 = vmatprep.subr.bf16.mxu0 %v4554_v35 }
 0x103   : > { %1411 = vmatpush1.bf16.msra.mxu1 %v4549_v38 }
 0x104   : > { %2731 = vmatpush1.bf16.msra.mxu0 %v4552_v39  ;;  %3966 = vmatprep.subr.bf16.mxu1 %v4560_v24 }
 0x105   : > { %3030 = vmatprep.subr.bf16.mxu0 %v4560_v24 }
 0x106   : > { %1413 = vmatmul.mubr.bf16.vlgmr.msra.gmra.mrb[0].mxu1 %v4555_v37 }
 0x107   : > { %2733 = vmatmul.mubr.bf16.vlgmr.msra.gmra.mrb[0].mxu0 %v4615_v29  ;;  %3982 = vmatpush1.bf16.msra.mxu1 %v4558_v40 }
 0x108   : > { %3031 = vmatpush1.bf16.msra.mxu0 %v4558_v40  ;;  %3967 = vmatprep.subr.bf16.mxu1 %v4563_v4 }
 0x109   : > { %3032 = vmatprep.subr.bf16.mxu0 %v4563_v4  ;;  %1422 = vmatprep.mubr.bf16.mxu1 %v5374_v41  ;;  %v4567_v41 = vld [vmem:[%s5792_s1 + $0x830] ss:$8 sps:$4 sm:$0xff]  }
 0x10a   : > { %2742 = vmatprep.mubr.bf16.mxu0 %v5188_v46 }
 0x10b   : > { %3983 = vmatpush1.bf16.msra.mxu1 %v4561_v43 }
 0x10c   : > { %3033 = vmatpush1.bf16.msra.mxu0 %v4561_v43  ;;  %3968 = vmatprep.subr.bf16.mxu1 %v4566_v44 }
 0x10d   : > { %3034 = vmatprep.subr.bf16.mxu0 %v4566_v44 }
 0x10e   : > { %1423 = vmatmul.mubr.bf16.gmra.mrb[4].mxu1 %v5399_v50  ;;  %v4575_v50 = vld [vmem:[%s5792_s1 + $0x854] ss:$8 sps:$4 sm:$0xff]  }
 0x10f   : > { %2743 = vmatmul.mubr.bf16.gmra.mrb[4].mxu0 %v5213_v54  ;;  %3984 = vmatpush1.bf16.msra.mxu1 %v4564_v47 }
 0x110   : > { %3035 = vmatpush1.bf16.msra.mxu0 %v4564_v47  ;;  %3969 = vmatprep.subr.bf16.mxu1 %v4569_v49 }
 0x111   : > { %3036 = vmatprep.subr.bf16.mxu0 %v4569_v49  ;;  %1432 = vmatprep.mubr.bf16.mxu1 %v5408_v53  ;;  %v4573_v53 = vld [vmem:[%s5792_s1 + $0x850] ss:$8 sps:$4 sm:$0xff]   ;;  %v3121_v49 = vlaneseq }
 0x112   : > { %2752 = vmatprep.mubr.bf16.mxu0 %v5411_v55 }
 0x113   : > { %3985 = vmatpush1.bf16.msra.mxu1 %v4567_v41 }
 0x114   : > { %3037 = vmatpush1.bf16.msra.mxu0 %v4567_v41  ;;  %3970 = vmatprep.subr.bf16.mxu1 %v4572_v36  ;;  %v3122_v41 = vshrl.u32 %v3121_v49, 7 }
 0x115   : > { %3038 = vmatprep.subr.bf16.mxu0 %v4572_v36 }
 0x116   : > { %1433 = vmatmul.mubr.bf16.gmra.mrb[8].mxu1 %v5430_v60  ;;  %v4587_v60 = vld [vmem:[%s5792_s1 + $0x874] ss:$8 sps:$4 sm:$0xff]   ;;  %v3123_v36 = vsub.s32 0, %v3122_v41 }
 0x117   : > { %2753 = vmatmul.mubr.bf16.gmra.mrb[8].mxu0 %v5433_v61  ;;  %3986 = vmatpush1.bf16.msra.mxu1 %v4570_v45 }
 0x118   : > { %3039 = vmatpush1.bf16.msra.mxu0 %v4570_v45  ;;  %3971 = vmatprep.subr.bf16.mxu1 %v4575_v50  ;;  %v3127_v45 = vsub.s32 1, %v3122_v41 }
 0x119   : > { %3040 = vmatprep.subr.bf16.mxu0 %v4575_v50  ;;  %1442 = vmatprep.mubr.bf16.mxu1 %v4576_v51  ;;  %v3119_v50 = vld [vmem:[%s5793_s2] sm:$0x3] }
 0x11a   : > { %2762 = vmatprep.mubr.bf16.mxu0 %v4578_v52  ;;  %v3147_v51 = vld [vmem:[%s212_s20] sm:$0xff] }
 0x11b   : > { %3987 = vmatpush1.bf16.msra.mxu1 %v4573_v53 }
 0x11c   : > { %3041 = vmatpush1.bf16.msra.mxu0 %v4573_v53  ;;  %3972 = vmatprep.subr.bf16.mxu1 %v4584_v56  ;;  %v3148_v53 = vld [vmem:[%s212_s20 + $0x8] sm:$0xff] }
 0x11d   : > { %3042 = vmatprep.subr.bf16.mxu0 %v4584_v56  ;;  %v3152_v56 = vld [vmem:[%s212_s20 + $0x28] sm:$0xff] }
 0x11e   : > { %1443 = vmatmul.mubr.bf16.gmra.mrb[12].mxu1 %v4580_v57  ;;  %v5708_v57 = vrot.slane %v3119_v50, %v3123_v36 }
 0x11f   : > { %2763 = vmatmul.mubr.bf16.gmra.mrb[12].mxu0 %v5606_v58  ;;  %3988 = vmatpush1.bf16.msra.mxu1 %v4582_v59 }
 0x120   : > { %3043 = vmatpush1.bf16.msra.mxu0 %v4582_v59  ;;  %3973 = vmatprep.subr.bf16.mxu1 %v4587_v60  ;;  %v5712_v59 = vld [vmem:[%s212_s20 + $0x10] sm:$0xff] }
 0x121   : > { %3044 = vmatprep.subr.bf16.mxu0 %v4587_v60  ;;  %3062 = vmatprep.mubr.bf16.mxu0 %v5188_v46  ;;  %v4596_v46 = vld [vmem:[%s5792_s1 + $0x8a4] ss:$8 sps:$4 sm:$0xff]   ;;  %v5714_v60 = vld [vmem:[%s212_s20 + $0x30] sm:$0xff] }
 0x122   : > { %3082 = vmatprep.mubr.bf16.mxu1 %v4578_v52  ;;  %v3151_v52 = vld [vmem:[%s212_s20 + $0x20] sm:$0xff] }
 0x123   : > { %3989 = vmatpush1.bf16.msra.mxu1 %v4585_v62 }
 0x124   : > { %3045 = vmatpush1.bf16.msra.mxu0 %v4585_v62  ;;  %3974 = vmatprep.subr.bf16.mxu1 %v4590_v63  ;;  %v3155_v62 = vunpack.c.l.bf16 %v3147_v51 }
 0x125   : > { %3046 = vmatprep.subr.bf16.mxu0 %v4590_v63  ;;  %v3163_v63 = vunpack.c.l.bf16 %v3151_v52 }
 0x127   : > { %3990 = vmatpush1.bf16.msra.mxu1 %v4588_v17 }
 0x128   : > { %3047 = vmatpush1.bf16.msra.mxu0 %v4588_v17  ;;  %3975 = vmatprep.subr.bf16.mxu1 %v4593_v33  ;;  %v3156_v17 = vunpack.c.h.bf16 %v3147_v51 }
 0x129   : > { %3048 = vmatprep.subr.bf16.mxu0 %v4593_v33  ;;  %v3164_v33 = vunpack.c.h.bf16 %v3151_v52 }
 0x12b   : > { %3991 = vmatpush1.bf16.msra.mxu1 %v4591_v0 }
 0x12c   : > { %3049 = vmatpush1.bf16.msra.mxu0 %v4591_v0  ;;  %3976 = vmatprep.subr.bf16.mxu1 %v4596_v46  ;;  %v5716_v0 = vld [vmem:[%s212_s20 + $0x18] sm:$0xff] }
 0x12d   : > { %3050 = vmatprep.subr.bf16.mxu0 %v4596_v46  ;;  %v5718_v46 = vld [vmem:[%s212_s20 + $0x38] sm:$0xff] }
 0x12f   : > { %3992 = vmatpush1.bf16.msra.mxu1 %v4594_v1 }
 0x130   : > { %3051 = vmatpush1.bf16.msra.mxu0 %v4594_v1  ;;  %3977 = vmatprep.subr.bf16.mxu1 %v4599_v2  ;;  %v3157_v1 = vunpack.c.l.bf16 %v3148_v53 }
 0x131   : > { %3052 = vmatprep.subr.bf16.mxu0 %v4599_v2  ;;  %v3165_v2 = vunpack.c.l.bf16 %v3152_v56 }
 0x133   : > { %3993 = vmatpush1.bf16.msra.mxu1 %v4597_v3 }
 0x134   : > { %3053 = vmatpush1.bf16.msra.mxu0 %v4597_v3  ;;  %3978 = vmatprep.subr.bf16.mxu1 %v4602_v5  ;;  %v3158_v3 = vunpack.c.h.bf16 %v3148_v53 }
 0x135   : > { %3054 = vmatprep.subr.bf16.mxu0 %v4602_v5  ;;  %v3166_v5 = vunpack.c.h.bf16 %v3152_v56 }
 0x137   : > { %3994 = vmatpush1.bf16.msra.mxu1 %v4600_v6 }
 0x138   : > { %3055 = vmatpush1.bf16.msra.mxu0 %v4600_v6  ;;  %3979 = vmatprep.subr.bf16.mxu1 %v4605_v7 }
 0x139   : > { %3056 = vmatprep.subr.bf16.mxu0 %v4605_v7 }
 0x13b   : > { %3995 = vmatpush1.bf16.msra.mxu1 %v4603_v8 }
 0x13c   : > { %3057 = vmatpush1.bf16.msra.mxu0 %v4603_v8  ;;  %3980 = vmatprep.subr.bf16.mxu1 %v4608_v42  ;;  %v3159_v8 = vunpack.c.l.bf16 %v5712_v59 }
 0x13d   : > { %3058 = vmatprep.subr.bf16.mxu0 %v4608_v42  ;;  %v3167_v42 = vunpack.c.l.bf16 %v5714_v60 }
 0x13f   : > { %3996 = vmatpush1.bf16.msra.mxu1 %v4606_v9 }
 0x140   : > { %3059 = vmatpush1.bf16.msra.mxu0 %v4606_v9  ;;  %3981 = vmatprep.subr.bf16.mxu1 %v4611_v10  ;;  %v3160_v9 = vunpack.c.h.bf16 %v5712_v59 }
 0x141   : > { %3060 = vmatprep.subr.bf16.mxu0 %v4611_v10  ;;  %v3168_v10 = vunpack.c.h.bf16 %v5714_v60 }
 0x143   : > { %3997 = vmatpush1.bf16.msra.mxu1 %v4609_v11 }
 0x144   : > { %3061 = vmatpush1.bf16.msra.mxu0 %v4609_v11 }
 0x146   : > { %3083 = vmatmul.mubr.bf16.vlgmr.msra.gmra.mrb[16].mxu1 %v5606_v58  ;;  %v5710_v58 = vrot.slane %v3119_v50, %v3127_v45 }
 0x147   : > { %3063 = vmatmul.mubr.bf16.vlgmr.msra.gmra.mrb[0].mxu0 %v5213_v54  ;;  %3092 = vmatprep.mubr.bf16.mxu1 %v4612_v12 }
 0x148   : > { %3072 = vmatprep.mubr.bf16.mxu0 %v5411_v55 }
 0x14e   : > { %3093 = vmatmul.mubr.bf16.gmra.mrb[20].mxu1 %v4614_v13 }
 0x14f   : > { %3073 = vmatmul.mubr.bf16.gmra.mrb[4].mxu0 %v5433_v61 }
 0x1d9   : > { %v5673_v14 = vpop.f32.mrb[0].mxu1 }
 0x1da   : > { %v5675_v15 = vpop.f32.mrb[1].mxu1 }
 0x1db   : > { %v5677_v16 = vpop.f32.mrb[2].mxu1 }
 0x1dc   : > { %v5679_v18 = vpop.f32.mrb[3].mxu1 }
 0x1e1   : > { %v5681_v19 = vpop.f32.mrb[4].mxu1 }
 0x1e2   : > { %v5683_v54 = vpop.f32.mrb[5].mxu1 }
 0x1e3   : > { %v5685_v20 = vpop.f32.mrb[6].mxu1 }
 0x1e4   : > { %v5687_v55 = vpop.f32.mrb[7].mxu1 }
 0x1e9   : > { %v1434_v21 = vpop.f32.mrb[8].mxu1 }
 0x1ea   : > { %v2754_v22 = vpop.f32.mrb[8].mxu0  ;;  %v1436_v23 = vpop.f32.mrb[9].mxu1 }
 0x1eb   : > { %v4006_v61 = vadd.f32 %v2754_v22, %v1434_v21  ;;  %v2756_v26 = vpop.f32.mrb[9].mxu0  ;;  %v1438_v28 = vpop.f32.mrb[10].mxu1  ;;  %v3161_v22 = vunpack.c.l.bf16 %v5716_v0 }
 0x1ec   : > { %v4008_v27 = vadd.f32 %v2756_v26, %v1436_v23  ;;  %v2758_v30 = vpop.f32.mrb[10].mxu0  ;;  %v1440_v31 = vpop.f32.mrb[11].mxu1  ;;  %v3169_v23 = vunpack.c.l.bf16 %v5718_v46 }
 0x1ed   : > { %v4010_v25 = vadd.f32 %v2758_v30, %v1438_v28  ;;  %v2760_v32 = vpop.f32.mrb[11].mxu0 }
 0x1ee   : > { %v5689_v34 = vadd.f32 %v2760_v32, %v1440_v31  ;;  %v3162_v32 = vunpack.c.h.bf16 %v5716_v0 }
 0x1f1   : > { %v1444_v48 = vpop.f32.mrb[12].mxu1 }
 0x1f2   : > { %v2764_v35 = vpop.f32.mrb[12].mxu0  ;;  %v1446_v39 = vpop.f32.mrb[13].mxu1 }
 0x1f3   : > { %v5691_v38 = vadd.f32 %v2764_v35, %v1444_v48  ;;  %v2766_v24 = vpop.f32.mrb[13].mxu0  ;;  %v1448_v40 = vpop.f32.mrb[14].mxu1  ;;  %v3170_v48 = vunpack.c.h.bf16 %v5718_v46 }
 0x1f4   : > { %v5693_v37 = vadd.f32 %v2766_v24, %v1446_v39  ;;  %v2768_v4 = vpop.f32.mrb[14].mxu0  ;;  %v1450_v43 = vpop.f32.mrb[15].mxu1 }
 0x1f5   : > { %v5695_v29 = vadd.f32 %v2768_v4, %v1448_v40  ;;  %v2770_v44 = vpop.f32.mrb[15].mxu0 }
 0x1f6   : > { %v5697_v47 = vadd.f32 %v2770_v44, %v1450_v43 }
 0x219   : > { %v3084_v7 = vpop.f32.mrb[16].mxu1 }
 0x21a   : > { %v3064_v6 = vpop.f32.mrb[0].mxu0  ;;  %v4007_v12 = vadd.f32 %v4006_v61, %v3084_v7  ;;  %v3086_v21 = vpop.f32.mrb[17].mxu1 }
 0x21b   : > { %v3998_v11 = vadd.f32 %v3064_v6, %v5673_v14  ;;  %v3066_v13 = vpop.f32.mrb[1].mxu0  ;;  %v4009_v28 = vadd.f32 %v4008_v27, %v3086_v21  ;;  %v3088_v31 = vpop.f32.mrb[18].mxu1 }
 0x21c   : > { %v3999_v26 = vadd.f32 %v3066_v13, %v5675_v15  ;;  %v3068_v30 = vpop.f32.mrb[2].mxu0  ;;  %v3139_v14 = vadd.f32 %v4007_v12, %v5708_v57  ;;  %v4011_v39 = vadd.f32 %v4010_v25, %v3088_v31  ;;  %v3090_v40 = vpop.f32.mrb[19].mxu1 }
 0x21d   : > { %v3131_v35 = vadd.f32 %v3998_v11, %v5708_v57  ;;  %v4000_v61 = vadd.f32 %v3068_v30, %v5677_v16  ;;  %v3070_v24 = vpop.f32.mrb[3].mxu0  ;;  %v3140_v15 = vadd.f32 %v4009_v28, %v5710_v58  ;;  %v4013_v43 = vadd.f32 %v5689_v34, %v3090_v40 }
 0x21e   : > { %v3132_v4 = vadd.f32 %v3999_v26, %v5710_v58  ;;  %v4001_v27 = vadd.f32 %v3070_v24, %v5679_v18  ;;  %v3179_v49 = vadd.f32 %v3163_v63, %v3139_v14  ;;  %v3141_v36 = vadd.f32 %v4011_v39, %v5708_v57 }
 0x21f   : > { %v3171_v44 = vadd.f32 %v3155_v62, %v3131_v35  ;;  %v3133_v41 = vadd.f32 %v4000_v61, %v5708_v57  ;;  %v3180_v16 = vadd.f32 %v3164_v33, %v3140_v15  ;;  %v3142_v50 = vadd.f32 %v4013_v43, %v5710_v58 }
 0x220   : > { %v3172_v45 = vadd.f32 %v3156_v17, %v3132_v4  ;;  %v3134_v25 = vadd.f32 %v4001_v27, %v5710_v58  ;;  %v3195_v52 = vmax.f32 %v3179_v49, 0.0  ;;  %v3181_v56 = vadd.f32 %v3165_v2, %v3141_v36 }
 0x221   : > { %v3187_v51 = vmax.f32 %v3171_v44, 0.0  ;;  %v3173_v53 = vadd.f32 %v3157_v1, %v3133_v41  ;;  %v3196_v6 = vmax.f32 %v3180_v16, 0.0  ;;  %v3182_v62 = vadd.f32 %v3166_v5, %v3142_v50  ;;  %v3094_v7 = vpop.f32.mrb[20].mxu1 }
 0x222   : > { %v3188_v18 = vmax.f32 %v3172_v45, 0.0  ;;  %v3174_v34 = vadd.f32 %v3158_v3, %v3134_v25  ;;  %v3074_v63 = vpop.f32.mrb[4].mxu0  ;;  %v3197_v33 = vmax.f32 %v3181_v56, 0.0  ;;  %v4015_v1 = vadd.f32 %v5691_v38, %v3094_v7  ;;  %v3096_v12 = vpop.f32.mrb[21].mxu1 }
 0x223   : > { %v3189_v17 = vmax.f32 %v3173_v53, 0.0  ;;  %v4002_v11 = vadd.f32 %v3074_v63, %v5681_v19  ;;  %v3076_v2 = vpop.f32.mrb[5].mxu0  ;;  %v3962_v5 = vpack.c.bf16 %v3196_v6, %v3195_v52  ;;  %v3198_v21 = vmax.f32 %v3182_v62, 0.0  ;;  %v3098_v28 = vpop.f32.mrb[22].mxu1 }
 0x224   : > { %v3958_v3 = vpack.c.bf16 %v3188_v18, %v3187_v51  ;;  %v3190_v13 = vmax.f32 %v3174_v34, 0.0  ;;  %v3078_v26 = vpop.f32.mrb[6].mxu0  ;;  %v3143_v31 = vadd.f32 %v4015_v1, %v5708_v57  ;;  %v4003_v19 = vadd.f32 %v3076_v2, %v5683_v54  ;;  %v3100_v14 = vpop.f32.mrb[23].mxu1 }
 0x225   : > { %v3135_v30 = vadd.f32 %v4002_v11, %v5708_v57  ;;  %v4017_v35 = vadd.f32 %v5693_v37, %v3096_v12  ;;  %v3080_v38 = vpop.f32.mrb[7].mxu0  ;;  %3255 = vst [vmem:[%s5746_s25 + $0x20] sm:$0xff] %v3962_v5  ;;  %v3963_v39 = vpack.c.bf16 %v3198_v21, %v3197_v33  ;;  %v4004_v24 = vadd.f32 %v3078_v26, %v5685_v20 }
 0x226   : > { %3251 = vst [vmem:[%s5746_s25] sm:$0xff] %v3958_v3  ;;  %v3959_v61 = vpack.c.bf16 %v3190_v13, %v3189_v17  ;;  %v4019_v40 = vadd.f32 %v5695_v29, %v3098_v28  ;;  %v3183_v15 = vadd.f32 %v3167_v42, %v3143_v31  ;;  %v3136_v54 = vadd.f32 %v4003_v19, %v5710_v58 }
 0x227   : > { %v3175_v4 = vadd.f32 %v3159_v8, %v3135_v30  ;;  %v3144_v37 = vadd.f32 %v4017_v35, %v5710_v58  ;;  %3256 = vst [vmem:[%s5746_s25 + $0x28] sm:$0xff] %v3963_v39  ;;  %v3137_v27 = vadd.f32 %v4004_v24, %v5708_v57  ;;  %v4005_v20 = vadd.f32 %v3080_v38, %v5687_v55 }
 0x228   : > { %3252 = vst [vmem:[%s5746_s25 + $0x8] sm:$0xff] %v3959_v61  ;;  %v3145_v43 = vadd.f32 %v4019_v40, %v5708_v57  ;;  %v4021_v29 = vadd.f32 %v5697_v47, %v3100_v14  ;;  %v3199_v49 = vmax.f32 %v3183_v15, 0.0  ;;  %v3176_v8 = vadd.f32 %v3160_v9, %v3136_v54 }
 0x229   : > { %v3191_v44 = vmax.f32 %v3175_v4, 0.0  ;;  %v3184_v42 = vadd.f32 %v3168_v10, %v3144_v37  ;;  %v3177_v41 = vadd.f32 %v3161_v22, %v3137_v27  ;;  %v3138_v55 = vadd.f32 %v4005_v20, %v5710_v58 }
 0x22a   : > { %v3185_v57 = vadd.f32 %v3169_v23, %v3145_v43  ;;  %v3146_v47 = vadd.f32 %v4021_v29, %v5710_v58  ;;  %v3192_v36 = vmax.f32 %v3176_v8, 0.0 }
 0x22b   : > { %v3200_v59 = vmax.f32 %v3184_v42, 0.0  ;;  %v3193_v9 = vmax.f32 %v3177_v41, 0.0  ;;  %v3178_v60 = vadd.f32 %v3162_v32, %v3138_v55 }
 0x22c   : > { %v3201_v45 = vmax.f32 %v3185_v57, 0.0  ;;  %v3186_v10 = vadd.f32 %v3170_v48, %v3146_v47  ;;  %v3960_v22 = vpack.c.bf16 %v3192_v36, %v3191_v44 }
 0x22d   : > { %v3964_v16 = vpack.c.bf16 %v3200_v59, %v3199_v49  ;;  %v3194_v25 = vmax.f32 %v3178_v60, 0.0 }
 0x22e   : > { %v3202_v23 = vmax.f32 %v3186_v10, 0.0  ;;  %3253 = vst [vmem:[%s5746_s25 + $0x10] sm:$0xff] %v3960_v22 }
 0x22f   : > { %3257 = vst [vmem:[%s5746_s25 + $0x30] sm:$0xff] %v3964_v16  ;;  %v3961_v50 = vpack.c.bf16 %v3194_v25, %v3193_v9 }
 0x230   : > { %v3965_v51 = vpack.c.bf16 %v3202_v23, %v3201_v45 }
 0x231   : > { %3254 = vst [vmem:[%s5746_s25 + $0x18] sm:$0xff] %v3961_v50 }
 0x232   : > { %3258 = vst [vmem:[%s5746_s25 + $0x38] sm:$0xff] %v3965_v51 }
 0x233 PF: > { %s14_s15 = sadd.s32 1, %s4622_s15  }
 0x234   : > { %p11_p4 = scmp.ge.s32.totalorder %s14_s15, 4  }
 0x236   :  { %13 = sbr.rel (!%p11_p4) target bundleno = 1 (0x1), region = 77 }

</bundles_post_ra>
